<compile_context>
chip_gen: v7x
topology: tpu7x:2x2x1
jax: 0.10.0
libtpu: 0.0.40
codegen_flags: <defaults>
</compile_context>

<pallas_src>
import numpy as np
import jax
import jax.numpy as jnp
from jax.experimental import pallas as pl
from jax.experimental.pallas import tpu as pltpu

IMAGENET_MEAN = (0.485, 0.456, 0.406)
IMAGENET_STD = (0.229, 0.224, 0.225)
NUM_CLASSES = 20
OUT_SIZE = 473           # F.interpolate(..., (473, 473), 'bilinear', align_corners=True)
_VMEM_LIMIT = 32 * 1024 * 1024   # safe on v5e/v6e/v7x (<= physical, >= defaults we need)


def _round_up(v, m):
    return ((v + m - 1) // m) * m


# ---------------------------------------------------------------------------
# Direct conv kernel (k x k, SAME pad, stride 1 or 2), channel-major output.
# Input is spatially padded + phase-decomposed in XLA (single pass, 1x data):
#   xP[p, n, ci, a*Wq + b] = xpad[ci, n, a*s + di, b*s + dj],  p = di*s + dj
# Inside the kernel each tap (i, j) is a contiguous window of length Ho*Wq in
# the flattened phase plane, so no in-kernel reshapes / strided loads are
# needed; garbage guard columns (Wq > Wo) are sliced off in XLA afterwards.
# ---------------------------------------------------------------------------
def conv2d_direct(x, w, b, *, stride=1, relu=False, nchw_input=False, pad_values=None):
    Cout, Cin, kh, kw = w.shape
    assert kh == kw
    k, s, pad = kh, stride, kh // 2
    if nchw_input:
        N, Cin2, H, W = x.shape
    else:
        Cin2, N, H, W = x.shape
    assert Cin2 == Cin

    Ho = (H + 2 * pad - k) // s + 1
    Wo = (W + 2 * pad - k) // s + 1
    maxq = (k - 1) // s
    Hq, Wq = Ho + maxq + 1, Wo + maxq          # +1 row guards the flat over-read
    Hp, Wp = Hq * s, Wq * s
    L = Ho * Wq                                # flat window length per sample
    Lp = _round_up(L, 128)                     # lane-aligned per-sample output stride

    pw = ((pad, Hp - H - pad), (pad, Wp - W - pad))
    if nchw_input:
        # NCHW -> channel-major + per-channel constant border in one pad per channel
        pv = pad_values if pad_values is not None else [0.0] * Cin
        xp = jnp.stack(
            [jnp.pad(x[:, c], ((0, 0),) + pw, constant_values=pv[c]) for c in range(Cin)],
            axis=0)                                            # (Cin, N, Hp, Wp)
    else:
        xp = jnp.pad(x, ((0, 0), (0, 0)) + pw)                 # zero pad, channel-major

    # phase decomposition (one XLA transpose pass; identity-ish for s == 1)
    xP = (xp.reshape(Cin, N, Hq, s, Wq, s)
            .transpose(3, 5, 1, 0, 2, 4)
            .reshape(s * s, N, Cin, Hq * Wq))

    w_taps = w.transpose(2, 3, 0, 1).reshape(k * k, Cout, Cin)
    bias = b.reshape(Cout, 1)

    taps = []
    for i in range(k):
        for j in range(k):
            taps.append(((i % s) * s + (j % s), (i // s) * Wq + (j // s)))

    def kernel(w_ref, x_ref, b_ref, o_ref):
        acc = jnp.zeros((Cout, L), jnp.float32)
        for t, (p_idx, start) in enumerate(taps):
            win = x_ref[p_idx, 0, :, start:start + L]          # (Cin, L) contiguous
            acc = acc + jnp.dot(w_ref[t], win, preferred_element_type=jnp.float32)
        acc = acc + b_ref[...]
        if relu:
            acc = jnp.maximum(acc, 0.0)
        o_ref[:, :L] = acc                                     # tail [L:Lp) unused

    out = pl.pallas_call(
        kernel,
        out_shape=jax.ShapeDtypeStruct((Cout, N * Lp), jnp.float32),
        grid=(N,),
        in_specs=[pl.BlockSpec((k * k, Cout, Cin), lambda n: (0, 0, 0)),
                  pl.BlockSpec((s * s, 1, Cin, Hq * Wq), lambda n: (0, n, 0, 0)),
                  pl.BlockSpec((Cout, 1), lambda n: (0, 0))],
        out_specs=pl.BlockSpec((Cout, Lp), lambda n: (0, n)),
        compiler_params=pltpu.CompilerParams(
            dimension_semantics=("parallel",),
            vmem_limit_bytes=_VMEM_LIMIT),
    )(w_taps, xP, bias)

    # drop per-sample padding and width guard columns -> clean channel-major output
    out = out.reshape(Cout, N, Lp)[:, :, :L].reshape(Cout, N, Ho, Wq)[..., :Wo]
    # TODO(synk): for the real ResNet-101 channel counts add Cout/row tiling axes and
    #   re-budget VMEM for v7x (64 MiB physical); plane-per-sample blocks suffice here.
    return out


# ---------------------------------------------------------------------------
# 1x1 conv as transposed matmul:  out(Cout, M) = W(Cout, K) @ At(K, M)
#   + bias [+ residual] [+ ReLU] fused in the epilogue.  M (= N*H*W) in lanes,
#   tiled with TM = 2048; K / Cout are NOT padded (blocks cover full extents).
# ---------------------------------------------------------------------------
def _make_mm_kernel(relu, has_residual):
    def kernel(*refs):
        if has_residual:
            w_ref, a_ref, b_ref, r_ref, o_ref = refs
        else:
            w_ref, a_ref, b_ref, o_ref = refs
        acc = jnp.dot(w_ref[...], a_ref[...], preferred_element_type=jnp.float32)
        acc = acc + b_ref[...]
        if has_residual:
            acc = acc + r_ref[...]
        if relu:
            acc = jnp.maximum(acc, 0.0)
        o_ref[...] = acc
    return kernel


def pallas_matmul_1x1(wm, at, bias, *, relu=False, residual=None, tm=2048):
    Cout, K = wm.shape
    K2, M = at.shape
    assert K2 == K
    TM = _round_up(M, 128) if M <= tm else tm
    Mp = _round_up(M, TM)
    ap = jnp.pad(at, ((0, 0), (0, Mp - M))) if Mp != M else at
    bp = bias.reshape(Cout, 1)

    args = [wm, ap, bp]
    in_specs = [pl.BlockSpec((Cout, K), lambda i: (0, 0)),
                pl.BlockSpec((K, TM), lambda i: (0, i)),
                pl.BlockSpec((Cout, 1), lambda i: (0, 0))]
    if residual is not None:
        rp = jnp.pad(residual, ((0, 0), (0, Mp - M))) if Mp != M else residual
        args.append(rp)
        in_specs.append(pl.BlockSpec((Cout, TM), lambda i: (0, i)))

    out = pl.pallas_call(
        _make_mm_kernel(relu, residual is not None),
        out_shape=jax.ShapeDtypeStruct((Cout, Mp), jnp.float32),
        grid=(Mp // TM,),
        in_specs=in_specs,
        out_specs=pl.BlockSpec((Cout, TM), lambda i: (0, i)),
        compiler_params=pltpu.CompilerParams(
            dimension_semantics=("parallel",),
            vmem_limit_bytes=_VMEM_LIMIT),
    )(*args)
    return out[:, :M]


# ---------------------------------------------------------------------------
# Bilinear resize to (473, 473), align_corners=True.  Separable:
#   out = Wh @ img @ Ww.  Height matmul FIRST so both per-plane matmuls have
#   >= 256 output rows (full MXU occupancy).  Input is channel-major
#   (C, N, H, W); the out_spec index_map writes NCHW directly (the single
#   layout change of the whole pipeline).
# ---------------------------------------------------------------------------
def _interp_matrix(in_size, out_size):
    m = np.zeros((out_size, in_size), np.float32)
    if out_size == 1:
        src = np.zeros((out_size,), np.float64)
    else:
        src = np.arange(out_size, dtype=np.float64) * (in_size - 1) / (out_size - 1)
    i0 = np.clip(np.floor(src).astype(np.int64), 0, in_size - 1)
    i1 = np.clip(i0 + 1, 0, in_size - 1)
    w1 = (src - i0).astype(np.float32)
    w0 = 1.0 - w1
    rows = np.arange(out_size)
    np.add.at(m, (rows, i0), w0)
    np.add.at(m, (rows, i1), w1)
    return jnp.asarray(m)


def pallas_bilinear_resize_cm_to_nchw(x_cm, out_h, out_w, tc_max=5):
    C, N, H, W = x_cm.shape
    # tc = largest divisor of C (<= tc_max): keeps the 2-D grid even for megacore
    tc = max(d for d in range(1, min(tc_max, C) + 1) if C % d == 0)
    wh = _interp_matrix(H, out_h)        # (out_h, H)
    wwT = _interp_matrix(W, out_w).T     # (W, out_w)

    def kernel(x_ref, wh_ref, ww_ref, o_ref):
        for p in range(tc):
            t = jnp.dot(wh_ref[...], x_ref[p, 0], preferred_element_type=jnp.float32)
            o_ref[0, p] = jnp.dot(t, ww_ref[...], preferred_element_type=jnp.float32)

    return pl.pallas_call(
        kernel,
        out_shape=jax.ShapeDtypeStruct((N, C, out_h, out_w), jnp.float32),
        grid=(C // tc, N),
        in_specs=[pl.BlockSpec((tc, 1, H, W), lambda ci, n: (ci, n, 0, 0)),
                  pl.BlockSpec((out_h, H), lambda ci, n: (0, 0)),
                  pl.BlockSpec((W, out_w), lambda ci, n: (0, 0))],
        out_specs=pl.BlockSpec((1, tc, out_h, out_w), lambda ci, n: (n, ci, 0, 0)),
        compiler_params=pltpu.CompilerParams(
            dimension_semantics=("parallel", "parallel"),
            vmem_limit_bytes=_VMEM_LIMIT),
    )(x_cm, wh, wwT)


# ---------------------------------------------------------------------------
# Fold  (x/255 - mean)/std  into conv1:  w1' = w1/(255*std_c),
#   b1' = b1 - sum_{c,i,j} w1[:,c,i,j]*mean_c/std_c.
# Per-channel border constant 255*mean_c keeps border taps exactly equal to
# the normalize-then-zero-pad pipeline.
# ---------------------------------------------------------------------------
def _fold_normalize_into_conv1(w1, b1):
    std = jnp.asarray(IMAGENET_STD, jnp.float32)
    mean = jnp.asarray(IMAGENET_MEAN, jnp.float32)
    w1f = w1 * (1.0 / (255.0 * std))[None, :, None, None]
    b1f = b1 - jnp.sum(w1 * (mean / std)[None, :, None, None], axis=(1, 2, 3))
    pad_vals = [255.0 * mu for mu in IMAGENET_MEAN]   # python constants
    return w1f, b1f, pad_vals


# ---------------------------------------------------------------------------
# Stand-in parsing model (outputs[0][1] is the fusion logits, NUM_CLASSES maps)
# TODO(synk): the full ResNet-101/CE2P backbone (ResNet(Bottleneck,[3,4,23,3])) is not
#   defined in the provided module; a reduced-depth stand-in with the same output
#   contract (outputs[0][1] -> (N, 20, H/4, W/4)) is used, all convs in Pallas.
# ---------------------------------------------------------------------------
def init_params(key):
    def w(k, shape, scale=0.05):
        return scale * jax.random.normal(k, shape, jnp.float32)
    ks = jax.random.split(key, 7)
    return {
        "conv1_w": w(ks[0], (16, 3, 3, 3)),   "conv1_b": jnp.zeros((16,), jnp.float32),
        "conv2_w": w(ks[1], (32, 16, 3, 3)),  "conv2_b": jnp.zeros((32,), jnp.float32),
        "b_w1":    w(ks[2], (16, 32, 1, 1)),  "b_b1":    jnp.zeros((16,), jnp.float32),
        "b_w2":    w(ks[3], (16, 16, 3, 3)),  "b_b2":    jnp.zeros((16,), jnp.float32),
        "b_w3":    w(ks[4], (32, 16, 1, 1)),  "b_b3":    jnp.zeros((32,), jnp.float32),
        "head_w":  w(ks[5], (NUM_CLASSES, 32, 1, 1)),
        "head_b":  jnp.zeros((NUM_CLASSES,), jnp.float32),
        "edge_w":  w(ks[6], (2, 32, 1, 1)),   "edge_b":  jnp.zeros((2,), jnp.float32),
    }


def parsing_model(x_raw, p):
    # conv1 with folded x/255 + Normalize(mean, std); raw-image NCHW input
    w1f, b1f, pad_vals = _fold_normalize_into_conv1(p["conv1_w"], p["conv1_b"])
    h1 = conv2d_direct(x_raw, w1f, b1f, stride=2, relu=True,
                       nchw_input=True, pad_values=pad_vals)         # (16, N, H/2, W/2)
    h2 = conv2d_direct(h1, p["conv2_w"], p["conv2_b"],
                       stride=2, relu=True)                          # (32, N, H/4, W/4)
    C2, N, H2, W2 = h2.shape
    M2 = N * H2 * W2
    h2_flat = h2.reshape(C2, M2)                                     # channel-major At

    # bottleneck: 1x1 -> 3x3 -> 1x1, residual add + ReLU fused into the last matmul
    r = pallas_matmul_1x1(p["b_w1"].reshape(16, 32), h2_flat, p["b_b1"], relu=True)
    r = conv2d_direct(r.reshape(16, N, H2, W2), p["b_w2"], p["b_b2"], relu=True)
    h3 = pallas_matmul_1x1(p["b_w3"].reshape(32, 16), r.reshape(16, M2), p["b_b3"],
                           relu=True, residual=h2_flat)              # (32, M2)

    # head (20ch) + edge (2ch) fused into one matmul over the shared activation
    hw = jnp.concatenate([p["head_w"], p["edge_w"]], axis=0).reshape(NUM_CLASSES + 2, 32)
    hb = jnp.concatenate([p["head_b"], p["edge_b"]], axis=0)
    he = pallas_matmul_1x1(hw, h3, hb)                               # (22, M2)
    fusion = he[:NUM_CLASSES].reshape(NUM_CLASSES, N, H2, W2)        # channel-major
    edge = he[NUM_CLASSES:].reshape(2, N, H2, W2)
    aux = fusion
    return [[aux, fusion], [edge]]


# ---------------------------------------------------------------------------
# ParsingWrapper.forward
# ---------------------------------------------------------------------------
@jax.jit
def parsing_wrapper_forward(x, params):
    outputs = parsing_model(x, params)              # x/255 + Normalize folded into conv1
    fusion_result = outputs[0][1]                   # channel-major (20, N, H/4, W/4)
    # resize emits NCHW directly via its out_spec index_map (single layout change)
    return pallas_bilinear_resize_cm_to_nchw(fusion_result, OUT_SIZE, OUT_SIZE)


if __name__ == "__main__":
    key = jax.random.PRNGKey(0)
    k_img, k_params = jax.random.split(key)
    # small RGB image batch, pixel values in [0, 255] as the wrapper expects
    x = jax.random.uniform(k_img, (2, 3, 16, 16), jnp.float32, 0.0, 255.0)
    params = init_params(k_params)
    out = parsing_wrapper_forward(x, params)
    jax.block_until_ready(out)
    assert out.shape == (2, NUM_CLASSES, OUT_SIZE, OUT_SIZE) and out.dtype == jnp.float32
    print("KERNEL_OK")
</pallas_src>

<mosaic_0001>
module attributes {stable_mosaic.version = 11 : i64} {
  func.func @kernel(%arg0: i32, %arg1: memref<9x16x3xf32, #tpu.memory_space<vmem>>, %arg2: memref<4x1x3x90xf32, #tpu.memory_space<vmem>>, %arg3: memref<16x1xf32, #tpu.memory_space<vmem>>, %arg4: memref<16x128xf32, #tpu.memory_space<vmem>>) attributes {dimension_semantics = [#tpu.dimension_semantics<parallel>], iteration_bounds = array<i64: 2>, scalar_prefetch = 0 : i64, scratch_operands = 0 : i64, tpu.core_type = #tpu.core_type<tc>, window_params = [{pipeline_mode = #tpu.pipeline_mode<synchronous>, transform_indices = @transform_0, window_bounds = array<i64: 9, 16, 3>}, {transform_indices = @transform_1, window_bounds = array<i64: 4, 1, 3, 90>}, {pipeline_mode = #tpu.pipeline_mode<synchronous>, transform_indices = @transform_2, window_bounds = array<i64: 16, 1>}, {transform_indices = @transform_3, window_bounds = array<i64: 16, 128>}]} {
    %cst = arith.constant 0.000000e+00 : f32
    %0 = vector.broadcast %cst : f32 to vector<16x72xf32>
    %c0 = arith.constant 0 : index
    %c0_0 = arith.constant 0 : index
    %c0_1 = arith.constant 0 : index
    %c0_2 = arith.constant 0 : index
    %1 = vector.load %arg2[%c0, %c0_0, %c0_1, %c0_2] : memref<4x1x3x90xf32, #tpu.memory_space<vmem>>, vector<1x1x3x72xf32>
    %2 = vector.shape_cast %1 : vector<1x1x3x72xf32> to vector<3x72xf32>
    %c0_3 = arith.constant 0 : index
    %c0_4 = arith.constant 0 : index
    %c0_5 = arith.constant 0 : index
    %3 = vector.load %arg1[%c0_3, %c0_4, %c0_5] : memref<9x16x3xf32, #tpu.memory_space<vmem>>, vector<1x16x3xf32>
    %4 = vector.shape_cast %3 : vector<1x16x3xf32> to vector<16x3xf32>
    %cst_6 = arith.constant dense<0.000000e+00> : vector<16x72xf32>
    %5 = tpu.matmul %4, %2, %cst_6 {dimension_numbers = #tpu.dot_dimension_numbers<[1], [0], [0], [1], [0, 0, 1, 1], [], []>} : vector<16x3xf32>, vector<3x72xf32>, vector<16x72xf32> -> vector<16x72xf32>
    %6 = arith.addf %0, %5 : vector<16x72xf32>
    %c1 = arith.constant 1 : index
    %c0_7 = arith.constant 0 : index
    %c0_8 = arith.constant 0 : index
    %c0_9 = arith.constant 0 : index
    %7 = vector.load %arg2[%c1, %c0_7, %c0_8, %c0_9] : memref<4x1x3x90xf32, #tpu.memory_space<vmem>>, vector<1x1x3x72xf32>
    %8 = vector.shape_cast %7 : vector<1x1x3x72xf32> to vector<3x72xf32>
    %c1_10 = arith.constant 1 : index
    %c0_11 = arith.constant 0 : index
    %c0_12 = arith.constant 0 : index
    %9 = vector.load %arg1[%c1_10, %c0_11, %c0_12] : memref<9x16x3xf32, #tpu.memory_space<vmem>>, vector<1x16x3xf32>
    %10 = vector.shape_cast %9 : vector<1x16x3xf32> to vector<16x3xf32>
    %cst_13 = arith.constant dense<0.000000e+00> : vector<16x72xf32>
    %11 = tpu.matmul %10, %8, %cst_13 {dimension_numbers = #tpu.dot_dimension_numbers<[1], [0], [0], [1], [0, 0, 1, 1], [], []>} : vector<16x3xf32>, vector<3x72xf32>, vector<16x72xf32> -> vector<16x72xf32>
    %12 = arith.addf %6, %11 : vector<16x72xf32>
    %c0_14 = arith.constant 0 : index
    %c0_15 = arith.constant 0 : index
    %c0_16 = arith.constant 0 : index
    %c1_17 = arith.constant 1 : index
    %13 = vector.load %arg2[%c0_14, %c0_15, %c0_16, %c1_17] : memref<4x1x3x90xf32, #tpu.memory_space<vmem>>, vector<1x1x3x72xf32>
    %14 = vector.shape_cast %13 : vector<1x1x3x72xf32> to vector<3x72xf32>
    %c2 = arith.constant 2 : index
    %c0_18 = arith.constant 0 : index
    %c0_19 = arith.constant 0 : index
    %15 = vector.load %arg1[%c2, %c0_18, %c0_19] : memref<9x16x3xf32, #tpu.memory_space<vmem>>, vector<1x16x3xf32>
    %16 = vector.shape_cast %15 : vector<1x16x3xf32> to vector<16x3xf32>
    %cst_20 = arith.constant dense<0.000000e+00> : vector<16x72xf32>
    %17 = tpu.matmul %16, %14, %cst_20 {dimension_numbers = #tpu.dot_dimension_numbers<[1], [0], [0], [1], [0, 0, 1, 1], [], []>} : vector<16x3xf32>, vector<3x72xf32>, vector<16x72xf32> -> vector<16x72xf32>
    %18 = arith.addf %12, %17 : vector<16x72xf32>
    %c2_21 = arith.constant 2 : index
    %c0_22 = arith.constant 0 : index
    %c0_23 = arith.constant 0 : index
    %c0_24 = arith.constant 0 : index
    %19 = vector.load %arg2[%c2_21, %c0_22, %c0_23, %c0_24] : memref<4x1x3x90xf32, #tpu.memory_space<vmem>>, vector<1x1x3x72xf32>
    %20 = vector.shape_cast %19 : vector<1x1x3x72xf32> to vector<3x72xf32>
    %c3 = arith.constant 3 : index
    %c0_25 = arith.constant 0 : index
    %c0_26 = arith.constant 0 : index
    %21 = vector.load %arg1[%c3, %c0_25, %c0_26] : memref<9x16x3xf32, #tpu.memory_space<vmem>>, vector<1x16x3xf32>
    %22 = vector.shape_cast %21 : vector<1x16x3xf32> to vector<16x3xf32>
    %cst_27 = arith.constant dense<0.000000e+00> : vector<16x72xf32>
    %23 = tpu.matmul %22, %20, %cst_27 {dimension_numbers = #tpu.dot_dimension_numbers<[1], [0], [0], [1], [0, 0, 1, 1], [], []>} : vector<16x3xf32>, vector<3x72xf32>, vector<16x72xf32> -> vector<16x72xf32>
    %24 = arith.addf %18, %23 : vector<16x72xf32>
    %c3_28 = arith.constant 3 : index
    %c0_29 = arith.constant 0 : index
    %c0_30 = arith.constant 0 : index
    %c0_31 = arith.constant 0 : index
    %25 = vector.load %arg2[%c3_28, %c0_29, %c0_30, %c0_31] : memref<4x1x3x90xf32, #tpu.memory_space<vmem>>, vector<1x1x3x72xf32>
    %26 = vector.shape_cast %25 : vector<1x1x3x72xf32> to vector<3x72xf32>
    %c4 = arith.constant 4 : index
    %c0_32 = arith.constant 0 : index
    %c0_33 = arith.constant 0 : index
    %27 = vector.load %arg1[%c4, %c0_32, %c0_33] : memref<9x16x3xf32, #tpu.memory_space<vmem>>, vector<1x16x3xf32>
    %28 = vector.shape_cast %27 : vector<1x16x3xf32> to vector<16x3xf32>
    %cst_34 = arith.constant dense<0.000000e+00> : vector<16x72xf32>
    %29 = tpu.matmul %28, %26, %cst_34 {dimension_numbers = #tpu.dot_dimension_numbers<[1], [0], [0], [1], [0, 0, 1, 1], [], []>} : vector<16x3xf32>, vector<3x72xf32>, vector<16x72xf32> -> vector<16x72xf32>
    %30 = arith.addf %24, %29 : vector<16x72xf32>
    %c2_35 = arith.constant 2 : index
    %c0_36 = arith.constant 0 : index
    %c0_37 = arith.constant 0 : index
    %c1_38 = arith.constant 1 : index
    %31 = vector.load %arg2[%c2_35, %c0_36, %c0_37, %c1_38] : memref<4x1x3x90xf32, #tpu.memory_space<vmem>>, vector<1x1x3x72xf32>
    %32 = vector.shape_cast %31 : vector<1x1x3x72xf32> to vector<3x72xf32>
    %c5 = arith.constant 5 : index
    %c0_39 = arith.constant 0 : index
    %c0_40 = arith.constant 0 : index
    %33 = vector.load %arg1[%c5, %c0_39, %c0_40] : memref<9x16x3xf32, #tpu.memory_space<vmem>>, vector<1x16x3xf32>
    %34 = vector.shape_cast %33 : vector<1x16x3xf32> to vector<16x3xf32>
    %cst_41 = arith.constant dense<0.000000e+00> : vector<16x72xf32>
    %35 = tpu.matmul %34, %32, %cst_41 {dimension_numbers = #tpu.dot_dimension_numbers<[1], [0], [0], [1], [0, 0, 1, 1], [], []>} : vector<16x3xf32>, vector<3x72xf32>, vector<16x72xf32> -> vector<16x72xf32>
    %36 = arith.addf %30, %35 : vector<16x72xf32>
    %c0_42 = arith.constant 0 : index
    %c0_43 = arith.constant 0 : index
    %c0_44 = arith.constant 0 : index
    %c9 = arith.constant 9 : index
    %37 = vector.load %arg2[%c0_42, %c0_43, %c0_44, %c9] : memref<4x1x3x90xf32, #tpu.memory_space<vmem>>, vector<1x1x3x72xf32>
    %38 = vector.shape_cast %37 : vector<1x1x3x72xf32> to vector<3x72xf32>
    %c6 = arith.constant 6 : index
    %c0_45 = arith.constant 0 : index
    %c0_46 = arith.constant 0 : index
    %39 = vector.load %arg1[%c6, %c0_45, %c0_46] : memref<9x16x3xf32, #tpu.memory_space<vmem>>, vector<1x16x3xf32>
    %40 = vector.shape_cast %39 : vector<1x16x3xf32> to vector<16x3xf32>
    %cst_47 = arith.constant dense<0.000000e+00> : vector<16x72xf32>
    %41 = tpu.matmul %40, %38, %cst_47 {dimension_numbers = #tpu.dot_dimension_numbers<[1], [0], [0], [1], [0, 0, 1, 1], [], []>} : vector<16x3xf32>, vector<3x72xf32>, vector<16x72xf32> -> vector<16x72xf32>
    %42 = arith.addf %36, %41 : vector<16x72xf32>
    %c1_48 = arith.constant 1 : index
    %c0_49 = arith.constant 0 : index
    %c0_50 = arith.constant 0 : index
    %c9_51 = arith.constant 9 : index
    %43 = vector.load %arg2[%c1_48, %c0_49, %c0_50, %c9_51] : memref<4x1x3x90xf32, #tpu.memory_space<vmem>>, vector<1x1x3x72xf32>
    %44 = vector.shape_cast %43 : vector<1x1x3x72xf32> to vector<3x72xf32>
    %c7 = arith.constant 7 : index
    %c0_52 = arith.constant 0 : index
    %c0_53 = arith.constant 0 : index
    %45 = vector.load %arg1[%c7, %c0_52, %c0_53] : memref<9x16x3xf32, #tpu.memory_space<vmem>>, vector<1x16x3xf32>
    %46 = vector.shape_cast %45 : vector<1x16x3xf32> to vector<16x3xf32>
    %cst_54 = arith.constant dense<0.000000e+00> : vector<16x72xf32>
    %47 = tpu.matmul %46, %44, %cst_54 {dimension_numbers = #tpu.dot_dimension_numbers<[1], [0], [0], [1], [0, 0, 1, 1], [], []>} : vector<16x3xf32>, vector<3x72xf32>, vector<16x72xf32> -> vector<16x72xf32>
    %48 = arith.addf %42, %47 : vector<16x72xf32>
    %c0_55 = arith.constant 0 : index
    %c0_56 = arith.constant 0 : index
    %c0_57 = arith.constant 0 : index
    %c10 = arith.constant 10 : index
    %49 = vector.load %arg2[%c0_55, %c0_56, %c0_57, %c10] : memref<4x1x3x90xf32, #tpu.memory_space<vmem>>, vector<1x1x3x72xf32>
    %50 = vector.shape_cast %49 : vector<1x1x3x72xf32> to vector<3x72xf32>
    %c8 = arith.constant 8 : index
    %c0_58 = arith.constant 0 : index
    %c0_59 = arith.constant 0 : index
    %51 = vector.load %arg1[%c8, %c0_58, %c0_59] : memref<9x16x3xf32, #tpu.memory_space<vmem>>, vector<1x16x3xf32>
    %52 = vector.shape_cast %51 : vector<1x16x3xf32> to vector<16x3xf32>
    %cst_60 = arith.constant dense<0.000000e+00> : vector<16x72xf32>
    %53 = tpu.matmul %52, %50, %cst_60 {dimension_numbers = #tpu.dot_dimension_numbers<[1], [0], [0], [1], [0, 0, 1, 1], [], []>} : vector<16x3xf32>, vector<3x72xf32>, vector<16x72xf32> -> vector<16x72xf32>
    %54 = arith.addf %48, %53 : vector<16x72xf32>
    %c0_61 = arith.constant 0 : index
    %c0_62 = arith.constant 0 : index
    %55 = vector.load %arg3[%c0_61, %c0_62] : memref<16x1xf32, #tpu.memory_space<vmem>>, vector<16x1xf32>
    %56 = vector.broadcast %55 : vector<16x1xf32> to vector<16x72xf32>
    %57 = arith.addf %54, %56 : vector<16x72xf32>
    %cst_63 = arith.constant 0.000000e+00 : f32
    %58 = vector.broadcast %cst_63 : f32 to vector<16x72xf32>
    %59 = arith.maximumf %57, %58 : vector<16x72xf32>
    %c0_64 = arith.constant 0 : index
    %c0_65 = arith.constant 0 : index
    %60 = vector.load %arg4[%c0_64, %c0_65] : memref<16x128xf32, #tpu.memory_space<vmem>>, vector<16x72xf32>
    tpu.vector_store %arg4[%c0_64, %c0_65], %59 {strides = array<i32>} : memref<16x128xf32, #tpu.memory_space<vmem>>, vector<16x72xf32>,
    return
  }
  func.func @transform_0(%arg0: i32) -> (i32, i32, i32) {
    %c0_i32 = arith.constant 0 : i32
    %c0_i32_0 = arith.constant 0 : i32
    %c0_i32_1 = arith.constant 0 : i32
    %c0_i32_2 = arith.constant 0 : i32
    return %c0_i32, %c0_i32_0, %c0_i32_1 : i32, i32, i32
  }
  func.func @transform_1(%arg0: i32) -> (i32, i32, i32, i32) {
    %c0_i32 = arith.constant 0 : i32
    %c0_i32_0 = arith.constant 0 : i32
    %c0_i32_1 = arith.constant 0 : i32
    %c0_i32_2 = arith.constant 0 : i32
    return %c0_i32, %arg0, %c0_i32_0, %c0_i32_1 : i32, i32, i32, i32
  }
  func.func @transform_2(%arg0: i32) -> (i32, i32) {
    %c0_i32 = arith.constant 0 : i32
    %c0_i32_0 = arith.constant 0 : i32
    %c0_i32_1 = arith.constant 0 : i32
    return %c0_i32, %c0_i32_0 : i32, i32
  }
  func.func @transform_3(%arg0: i32) -> (i32, i32) {
    %c0_i32 = arith.constant 0 : i32
    %c0_i32_0 = arith.constant 0 : i32
    return %c0_i32, %arg0 : i32, i32
  }
}

module attributes {stable_mosaic.version = 11 : i64} {
  func.func @kernel(%arg0: i32, %arg1: memref<9x32x16xf32, #tpu.memory_space<vmem>>, %arg2: memref<4x1x16x30xf32, #tpu.memory_space<vmem>>, %arg3: memref<32x1xf32, #tpu.memory_space<vmem>>, %arg4: memref<32x128xf32, #tpu.memory_space<vmem>>) attributes {dimension_semantics = [#tpu.dimension_semantics<parallel>], iteration_bounds = array<i64: 2>, scalar_prefetch = 0 : i64, scratch_operands = 0 : i64, tpu.core_type = #tpu.core_type<tc>, window_params = [{pipeline_mode = #tpu.pipeline_mode<synchronous>, transform_indices = @transform_0, window_bounds = array<i64: 9, 32, 16>}, {transform_indices = @transform_1, window_bounds = array<i64: 4, 1, 16, 30>}, {pipeline_mode = #tpu.pipeline_mode<synchronous>, transform_indices = @transform_2, window_bounds = array<i64: 32, 1>}, {transform_indices = @transform_3, window_bounds = array<i64: 32, 128>}]} {
    %cst = arith.constant 0.000000e+00 : f32
    %0 = vector.broadcast %cst : f32 to vector<32x20xf32>
    %c0 = arith.constant 0 : index
    %c0_0 = arith.constant 0 : index
    %c0_1 = arith.constant 0 : index
    %c0_2 = arith.constant 0 : index
    %1 = vector.load %arg2[%c0, %c0_0, %c0_1, %c0_2] : memref<4x1x16x30xf32, #tpu.memory_space<vmem>>, vector<1x1x16x20xf32>
    %2 = vector.shape_cast %1 : vector<1x1x16x20xf32> to vector<16x20xf32>
    %c0_3 = arith.constant 0 : index
    %c0_4 = arith.constant 0 : index
    %c0_5 = arith.constant 0 : index
    %3 = vector.load %arg1[%c0_3, %c0_4, %c0_5] : memref<9x32x16xf32, #tpu.memory_space<vmem>>, vector<1x32x16xf32>
    %4 = vector.shape_cast %3 : vector<1x32x16xf32> to vector<32x16xf32>
    %cst_6 = arith.constant dense<0.000000e+00> : vector<32x20xf32>
    %5 = tpu.matmul %4, %2, %cst_6 {dimension_numbers = #tpu.dot_dimension_numbers<[1], [0], [0], [1], [0, 0, 1, 1], [], []>} : vector<32x16xf32>, vector<16x20xf32>, vector<32x20xf32> -> vector<32x20xf32>
    %6 = arith.addf %0, %5 : vector<32x20xf32>
    %c1 = arith.constant 1 : index
    %c0_7 = arith.constant 0 : index
    %c0_8 = arith.constant 0 : index
    %c0_9 = arith.constant 0 : index
    %7 = vector.load %arg2[%c1, %c0_7, %c0_8, %c0_9] : memref<4x1x16x30xf32, #tpu.memory_space<vmem>>, vector<1x1x16x20xf32>
    %8 = vector.shape_cast %7 : vector<1x1x16x20xf32> to vector<16x20xf32>
    %c1_10 = arith.constant 1 : index
    %c0_11 = arith.constant 0 : index
    %c0_12 = arith.constant 0 : index
    %9 = vector.load %arg1[%c1_10, %c0_11, %c0_12] : memref<9x32x16xf32, #tpu.memory_space<vmem>>, vector<1x32x16xf32>
    %10 = vector.shape_cast %9 : vector<1x32x16xf32> to vector<32x16xf32>
    %cst_13 = arith.constant dense<0.000000e+00> : vector<32x20xf32>
    %11 = tpu.matmul %10, %8, %cst_13 {dimension_numbers = #tpu.dot_dimension_numbers<[1], [0], [0], [1], [0, 0, 1, 1], [], []>} : vector<32x16xf32>, vector<16x20xf32>, vector<32x20xf32> -> vector<32x20xf32>
    %12 = arith.addf %6, %11 : vector<32x20xf32>
    %c0_14 = arith.constant 0 : index
    %c0_15 = arith.constant 0 : index
    %c0_16 = arith.constant 0 : index
    %c1_17 = arith.constant 1 : index
    %13 = vector.load %arg2[%c0_14, %c0_15, %c0_16, %c1_17] : memref<4x1x16x30xf32, #tpu.memory_space<vmem>>, vector<1x1x16x20xf32>
    %14 = vector.shape_cast %13 : vector<1x1x16x20xf32> to vector<16x20xf32>
    %c2 = arith.constant 2 : index
    %c0_18 = arith.constant 0 : index
    %c0_19 = arith.constant 0 : index
    %15 = vector.load %arg1[%c2, %c0_18, %c0_19] : memref<9x32x16xf32, #tpu.memory_space<vmem>>, vector<1x32x16xf32>
    %16 = vector.shape_cast %15 : vector<1x32x16xf32> to vector<32x16xf32>
    %cst_20 = arith.constant dense<0.000000e+00> : vector<32x20xf32>
    %17 = tpu.matmul %16, %14, %cst_20 {dimension_numbers = #tpu.dot_dimension_numbers<[1], [0], [0], [1], [0, 0, 1, 1], [], []>} : vector<32x16xf32>, vector<16x20xf32>, vector<32x20xf32> -> vector<32x20xf32>
    %18 = arith.addf %12, %17 : vector<32x20xf32>
    %c2_21 = arith.constant 2 : index
    %c0_22 = arith.constant 0 : index
    %c0_23 = arith.constant 0 : index
    %c0_24 = arith.constant 0 : index
    %19 = vector.load %arg2[%c2_21, %c0_22, %c0_23, %c0_24] : memref<4x1x16x30xf32, #tpu.memory_space<vmem>>, vector<1x1x16x20xf32>
    %20 = vector.shape_cast %19 : vector<1x1x16x20xf32> to vector<16x20xf32>
    %c3 = arith.constant 3 : index
    %c0_25 = arith.constant 0 : index
    %c0_26 = arith.constant 0 : index
    %21 = vector.load %arg1[%c3, %c0_25, %c0_26] : memref<9x32x16xf32, #tpu.memory_space<vmem>>, vector<1x32x16xf32>
    %22 = vector.shape_cast %21 : vector<1x32x16xf32> to vector<32x16xf32>
    %cst_27 = arith.constant dense<0.000000e+00> : vector<32x20xf32>
    %23 = tpu.matmul %22, %20, %cst_27 {dimension_numbers = #tpu.dot_dimension_numbers<[1], [0], [0], [1], [0, 0, 1, 1], [], []>} : vector<32x16xf32>, vector<16x20xf32>, vector<32x20xf32> -> vector<32x20xf32>
    %24 = arith.addf %18, %23 : vector<32x20xf32>
    %c3_28 = arith.constant 3 : index
    %c0_29 = arith.constant 0 : index
    %c0_30 = arith.constant 0 : index
    %c0_31 = arith.constant 0 : index
    %25 = vector.load %arg2[%c3_28, %c0_29, %c0_30, %c0_31] : memref<4x1x16x30xf32, #tpu.memory_space<vmem>>, vector<1x1x16x20xf32>
    %26 = vector.shape_cast %25 : vector<1x1x16x20xf32> to vector<16x20xf32>
    %c4 = arith.constant 4 : index
    %c0_32 = arith.constant 0 : index
    %c0_33 = arith.constant 0 : index
    %27 = vector.load %arg1[%c4, %c0_32, %c0_33] : memref<9x32x16xf32, #tpu.memory_space<vmem>>, vector<1x32x16xf32>
    %28 = vector.shape_cast %27 : vector<1x32x16xf32> to vector<32x16xf32>
    %cst_34 = arith.constant dense<0.000000e+00> : vector<32x20xf32>
    %29 = tpu.matmul %28, %26, %cst_34 {dimension_numbers = #tpu.dot_dimension_numbers<[1], [0], [0], [1], [0, 0, 1, 1], [], []>} : vector<32x16xf32>, vector<16x20xf32>, vector<32x20xf32> -> vector<32x20xf32>
    %30 = arith.addf %24, %29 : vector<32x20xf32>
    %c2_35 = arith.constant 2 : index
    %c0_36 = arith.constant 0 : index
    %c0_37 = arith.constant 0 : index
    %c1_38 = arith.constant 1 : index
    %31 = vector.load %arg2[%c2_35, %c0_36, %c0_37, %c1_38] : memref<4x1x16x30xf32, #tpu.memory_space<vmem>>, vector<1x1x16x20xf32>
    %32 = vector.shape_cast %31 : vector<1x1x16x20xf32> to vector<16x20xf32>
    %c5 = arith.constant 5 : index
    %c0_39 = arith.constant 0 : index
    %c0_40 = arith.constant 0 : index
    %33 = vector.load %arg1[%c5, %c0_39, %c0_40] : memref<9x32x16xf32, #tpu.memory_space<vmem>>, vector<1x32x16xf32>
    %34 = vector.shape_cast %33 : vector<1x32x16xf32> to vector<32x16xf32>
    %cst_41 = arith.constant dense<0.000000e+00> : vector<32x20xf32>
    %35 = tpu.matmul %34, %32, %cst_41 {dimension_numbers = #tpu.dot_dimension_numbers<[1], [0], [0], [1], [0, 0, 1, 1], [], []>} : vector<32x16xf32>, vector<16x20xf32>, vector<32x20xf32> -> vector<32x20xf32>
    %36 = arith.addf %30, %35 : vector<32x20xf32>
    %c0_42 = arith.constant 0 : index
    %c0_43 = arith.constant 0 : index
    %c0_44 = arith.constant 0 : index
    %c5_45 = arith.constant 5 : index
    %37 = vector.load %arg2[%c0_42, %c0_43, %c0_44, %c5_45] : memref<4x1x16x30xf32, #tpu.memory_space<vmem>>, vector<1x1x16x20xf32>
    %38 = vector.shape_cast %37 : vector<1x1x16x20xf32> to vector<16x20xf32>
    %c6 = arith.constant 6 : index
    %c0_46 = arith.constant 0 : index
    %c0_47 = arith.constant 0 : index
    %39 = vector.load %arg1[%c6, %c0_46, %c0_47] : memref<9x32x16xf32, #tpu.memory_space<vmem>>, vector<1x32x16xf32>
    %40 = vector.shape_cast %39 : vector<1x32x16xf32> to vector<32x16xf32>
    %cst_48 = arith.constant dense<0.000000e+00> : vector<32x20xf32>
    %41 = tpu.matmul %40, %38, %cst_48 {dimension_numbers = #tpu.dot_dimension_numbers<[1], [0], [0], [1], [0, 0, 1, 1], [], []>} : vector<32x16xf32>, vector<16x20xf32>, vector<32x20xf32> -> vector<32x20xf32>
    %42 = arith.addf %36, %41 : vector<32x20xf32>
    %c1_49 = arith.constant 1 : index
    %c0_50 = arith.constant 0 : index
    %c0_51 = arith.constant 0 : index
    %c5_52 = arith.constant 5 : index
    %43 = vector.load %arg2[%c1_49, %c0_50, %c0_51, %c5_52] : memref<4x1x16x30xf32, #tpu.memory_space<vmem>>, vector<1x1x16x20xf32>
    %44 = vector.shape_cast %43 : vector<1x1x16x20xf32> to vector<16x20xf32>
    %c7 = arith.constant 7 : index
    %c0_53 = arith.constant 0 : index
    %c0_54 = arith.constant 0 : index
    %45 = vector.load %arg1[%c7, %c0_53, %c0_54] : memref<9x32x16xf32, #tpu.memory_space<vmem>>, vector<1x32x16xf32>
    %46 = vector.shape_cast %45 : vector<1x32x16xf32> to vector<32x16xf32>
    %cst_55 = arith.constant dense<0.000000e+00> : vector<32x20xf32>
    %47 = tpu.matmul %46, %44, %cst_55 {dimension_numbers = #tpu.dot_dimension_numbers<[1], [0], [0], [1], [0, 0, 1, 1], [], []>} : vector<32x16xf32>, vector<16x20xf32>, vector<32x20xf32> -> vector<32x20xf32>
    %48 = arith.addf %42, %47 : vector<32x20xf32>
    %c0_56 = arith.constant 0 : index
    %c0_57 = arith.constant 0 : index
    %c0_58 = arith.constant 0 : index
    %c6_59 = arith.constant 6 : index
    %49 = vector.load %arg2[%c0_56, %c0_57, %c0_58, %c6_59] : memref<4x1x16x30xf32, #tpu.memory_space<vmem>>, vector<1x1x16x20xf32>
    %50 = vector.shape_cast %49 : vector<1x1x16x20xf32> to vector<16x20xf32>
    %c8 = arith.constant 8 : index
    %c0_60 = arith.constant 0 : index
    %c0_61 = arith.constant 0 : index
    %51 = vector.load %arg1[%c8, %c0_60, %c0_61] : memref<9x32x16xf32, #tpu.memory_space<vmem>>, vector<1x32x16xf32>
    %52 = vector.shape_cast %51 : vector<1x32x16xf32> to vector<32x16xf32>
    %cst_62 = arith.constant dense<0.000000e+00> : vector<32x20xf32>
    %53 = tpu.matmul %52, %50, %cst_62 {dimension_numbers = #tpu.dot_dimension_numbers<[1], [0], [0], [1], [0, 0, 1, 1], [], []>} : vector<32x16xf32>, vector<16x20xf32>, vector<32x20xf32> -> vector<32x20xf32>
    %54 = arith.addf %48, %53 : vector<32x20xf32>
    %c0_63 = arith.constant 0 : index
    %c0_64 = arith.constant 0 : index
    %55 = vector.load %arg3[%c0_63, %c0_64] : memref<32x1xf32, #tpu.memory_space<vmem>>, vector<32x1xf32>
    %56 = vector.broadcast %55 : vector<32x1xf32> to vector<32x20xf32>
    %57 = arith.addf %54, %56 : vector<32x20xf32>
    %cst_65 = arith.constant 0.000000e+00 : f32
    %58 = vector.broadcast %cst_65 : f32 to vector<32x20xf32>
    %59 = arith.maximumf %57, %58 : vector<32x20xf32>
    %c0_66 = arith.constant 0 : index
    %c0_67 = arith.constant 0 : index
    %60 = vector.load %arg4[%c0_66, %c0_67] : memref<32x128xf32, #tpu.memory_space<vmem>>, vector<32x20xf32>
    tpu.vector_store %arg4[%c0_66, %c0_67], %59 {strides = array<i32>} : memref<32x128xf32, #tpu.memory_space<vmem>>, vector<32x20xf32>,
    return
  }
  func.func @transform_0(%arg0: i32) -> (i32, i32, i32) {
    %c0_i32 = arith.constant 0 : i32
    %c0_i32_0 = arith.constant 0 : i32
    %c0_i32_1 = arith.constant 0 : i32
    %c0_i32_2 = arith.constant 0 : i32
    return %c0_i32, %c0_i32_0, %c0_i32_1 : i32, i32, i32
  }
  func.func @transform_1(%arg0: i32) -> (i32, i32, i32, i32) {
    %c0_i32 = arith.constant 0 : i32
    %c0_i32_0 = arith.constant 0 : i32
    %c0_i32_1 = arith.constant 0 : i32
    %c0_i32_2 = arith.constant 0 : i32
    return %c0_i32, %arg0, %c0_i32_0, %c0_i32_1 : i32, i32, i32, i32
  }
  func.func @transform_2(%arg0: i32) -> (i32, i32) {
    %c0_i32 = arith.constant 0 : i32
    %c0_i32_0 = arith.constant 0 : i32
    %c0_i32_1 = arith.constant 0 : i32
    return %c0_i32, %c0_i32_0 : i32, i32
  }
  func.func @transform_3(%arg0: i32) -> (i32, i32) {
    %c0_i32 = arith.constant 0 : i32
    %c0_i32_0 = arith.constant 0 : i32
    return %c0_i32, %arg0 : i32, i32
  }
}

module attributes {stable_mosaic.version = 11 : i64} {
  func.func @kernel(%arg0: i32, %arg1: memref<16x32xf32, #tpu.memory_space<vmem>>, %arg2: memref<32x128xf32, #tpu.memory_space<vmem>>, %arg3: memref<16x1xf32, #tpu.memory_space<vmem>>, %arg4: memref<16x128xf32, #tpu.memory_space<vmem>>) attributes {dimension_semantics = [#tpu.dimension_semantics<parallel>], iteration_bounds = array<i64: 1>, scalar_prefetch = 0 : i64, scratch_operands = 0 : i64, tpu.core_type = #tpu.core_type<tc>, window_params = [{pipeline_mode = #tpu.pipeline_mode<synchronous>, transform_indices = @transform_0, window_bounds = array<i64: 16, 32>}, {transform_indices = @transform_1, window_bounds = array<i64: 32, 128>}, {pipeline_mode = #tpu.pipeline_mode<synchronous>, transform_indices = @transform_2, window_bounds = array<i64: 16, 1>}, {transform_indices = @transform_3, window_bounds = array<i64: 16, 128>}]} {
    %c0 = arith.constant 0 : index
    %c0_0 = arith.constant 0 : index
    %0 = vector.load %arg1[%c0, %c0_0] : memref<16x32xf32, #tpu.memory_space<vmem>>, vector<16x32xf32>
    %c0_1 = arith.constant 0 : index
    %c0_2 = arith.constant 0 : index
    %1 = vector.load %arg2[%c0_1, %c0_2] : memref<32x128xf32, #tpu.memory_space<vmem>>, vector<32x128xf32>
    %cst = arith.constant dense<0.000000e+00> : vector<16x128xf32>
    %2 = tpu.matmul %0, %1, %cst {dimension_numbers = #tpu.dot_dimension_numbers<[1], [0], [0], [1], [0, 0, 1, 1], [], []>} : vector<16x32xf32>, vector<32x128xf32>, vector<16x128xf32> -> vector<16x128xf32>
    %c0_3 = arith.constant 0 : index
    %c0_4 = arith.constant 0 : index
    %3 = vector.load %arg3[%c0_3, %c0_4] : memref<16x1xf32, #tpu.memory_space<vmem>>, vector<16x1xf32>
    %4 = vector.broadcast %3 : vector<16x1xf32> to vector<16x128xf32>
    %5 = arith.addf %2, %4 : vector<16x128xf32>
    %cst_5 = arith.constant 0.000000e+00 : f32
    %6 = vector.broadcast %cst_5 : f32 to vector<16x128xf32>
    %7 = arith.maximumf %5, %6 : vector<16x128xf32>
    %c0_6 = arith.constant 0 : index
    %c0_7 = arith.constant 0 : index
    %8 = vector.load %arg4[%c0_6, %c0_7] : memref<16x128xf32, #tpu.memory_space<vmem>>, vector<16x128xf32>
    tpu.vector_store %arg4[%c0_6, %c0_7], %7 {strides = array<i32>} : memref<16x128xf32, #tpu.memory_space<vmem>>, vector<16x128xf32>,
    return
  }
  func.func @transform_0(%arg0: i32) -> (i32, i32) {
    %c0_i32 = arith.constant 0 : i32
    %c0_i32_0 = arith.constant 0 : i32
    %c0_i32_1 = arith.constant 0 : i32
    return %c0_i32, %c0_i32_0 : i32, i32
  }
  func.func @transform_1(%arg0: i32) -> (i32, i32) {
    %c0_i32 = arith.constant 0 : i32
    %c0_i32_0 = arith.constant 0 : i32
    return %c0_i32, %arg0 : i32, i32
  }
  func.func @transform_2(%arg0: i32) -> (i32, i32) {
    %c0_i32 = arith.constant 0 : i32
    %c0_i32_0 = arith.constant 0 : i32
    %c0_i32_1 = arith.constant 0 : i32
    return %c0_i32, %c0_i32_0 : i32, i32
  }
  func.func @transform_3(%arg0: i32) -> (i32, i32) {
    %c0_i32 = arith.constant 0 : i32
    %c0_i32_0 = arith.constant 0 : i32
    return %c0_i32, %arg0 : i32, i32
  }
}

module attributes {stable_mosaic.version = 11 : i64} {
  func.func @kernel(%arg0: i32, %arg1: memref<9x16x16xf32, #tpu.memory_space<vmem>>, %arg2: memref<1x1x16x42xf32, #tpu.memory_space<vmem>>, %arg3: memref<16x1xf32, #tpu.memory_space<vmem>>, %arg4: memref<16x128xf32, #tpu.memory_space<vmem>>) attributes {dimension_semantics = [#tpu.dimension_semantics<parallel>], iteration_bounds = array<i64: 2>, scalar_prefetch = 0 : i64, scratch_operands = 0 : i64, tpu.core_type = #tpu.core_type<tc>, window_params = [{pipeline_mode = #tpu.pipeline_mode<synchronous>, transform_indices = @transform_0, window_bounds = array<i64: 9, 16, 16>}, {transform_indices = @transform_1, window_bounds = array<i64: 1, 1, 16, 42>}, {pipeline_mode = #tpu.pipeline_mode<synchronous>, transform_indices = @transform_2, window_bounds = array<i64: 16, 1>}, {transform_indices = @transform_3, window_bounds = array<i64: 16, 128>}]} {
    %cst = arith.constant 0.000000e+00 : f32
    %0 = vector.broadcast %cst : f32 to vector<16x24xf32>
    %c0 = arith.constant 0 : index
    %c0_0 = arith.constant 0 : index
    %c0_1 = arith.constant 0 : index
    %c0_2 = arith.constant 0 : index
    %1 = vector.load %arg2[%c0, %c0_0, %c0_1, %c0_2] : memref<1x1x16x42xf32, #tpu.memory_space<vmem>>, vector<1x1x16x24xf32>
    %2 = vector.shape_cast %1 : vector<1x1x16x24xf32> to vector<16x24xf32>
    %c0_3 = arith.constant 0 : index
    %c0_4 = arith.constant 0 : index
    %c0_5 = arith.constant 0 : index
    %3 = vector.load %arg1[%c0_3, %c0_4, %c0_5] : memref<9x16x16xf32, #tpu.memory_space<vmem>>, vector<1x16x16xf32>
    %4 = vector.shape_cast %3 : vector<1x16x16xf32> to vector<16x16xf32>
    %cst_6 = arith.constant dense<0.000000e+00> : vector<16x24xf32>
    %5 = tpu.matmul %4, %2, %cst_6 {dimension_numbers = #tpu.dot_dimension_numbers<[1], [0], [0], [1], [0, 0, 1, 1], [], []>} : vector<16x16xf32>, vector<16x24xf32>, vector<16x24xf32> -> vector<16x24xf32>
    %6 = arith.addf %0, %5 : vector<16x24xf32>
    %c0_7 = arith.constant 0 : index
    %c0_8 = arith.constant 0 : index
    %c0_9 = arith.constant 0 : index
    %c1 = arith.constant 1 : index
    %7 = vector.load %arg2[%c0_7, %c0_8, %c0_9, %c1] : memref<1x1x16x42xf32, #tpu.memory_space<vmem>>, vector<1x1x16x24xf32>
    %8 = vector.shape_cast %7 : vector<1x1x16x24xf32> to vector<16x24xf32>
    %c1_10 = arith.constant 1 : index
    %c0_11 = arith.constant 0 : index
    %c0_12 = arith.constant 0 : index
    %9 = vector.load %arg1[%c1_10, %c0_11, %c0_12] : memref<9x16x16xf32, #tpu.memory_space<vmem>>, vector<1x16x16xf32>
    %10 = vector.shape_cast %9 : vector<1x16x16xf32> to vector<16x16xf32>
    %cst_13 = arith.constant dense<0.000000e+00> : vector<16x24xf32>
    %11 = tpu.matmul %10, %8, %cst_13 {dimension_numbers = #tpu.dot_dimension_numbers<[1], [0], [0], [1], [0, 0, 1, 1], [], []>} : vector<16x16xf32>, vector<16x24xf32>, vector<16x24xf32> -> vector<16x24xf32>
    %12 = arith.addf %6, %11 : vector<16x24xf32>
    %c0_14 = arith.constant 0 : index
    %c0_15 = arith.constant 0 : index
    %c0_16 = arith.constant 0 : index
    %c2 = arith.constant 2 : index
    %13 = vector.load %arg2[%c0_14, %c0_15, %c0_16, %c2] : memref<1x1x16x42xf32, #tpu.memory_space<vmem>>, vector<1x1x16x24xf32>
    %14 = vector.shape_cast %13 : vector<1x1x16x24xf32> to vector<16x24xf32>
    %c2_17 = arith.constant 2 : index
    %c0_18 = arith.constant 0 : index
    %c0_19 = arith.constant 0 : index
    %15 = vector.load %arg1[%c2_17, %c0_18, %c0_19] : memref<9x16x16xf32, #tpu.memory_space<vmem>>, vector<1x16x16xf32>
    %16 = vector.shape_cast %15 : vector<1x16x16xf32> to vector<16x16xf32>
    %cst_20 = arith.constant dense<0.000000e+00> : vector<16x24xf32>
    %17 = tpu.matmul %16, %14, %cst_20 {dimension_numbers = #tpu.dot_dimension_numbers<[1], [0], [0], [1], [0, 0, 1, 1], [], []>} : vector<16x16xf32>, vector<16x24xf32>, vector<16x24xf32> -> vector<16x24xf32>
    %18 = arith.addf %12, %17 : vector<16x24xf32>
    %c0_21 = arith.constant 0 : index
    %c0_22 = arith.constant 0 : index
    %c0_23 = arith.constant 0 : index
    %c6 = arith.constant 6 : index
    %19 = vector.load %arg2[%c0_21, %c0_22, %c0_23, %c6] : memref<1x1x16x42xf32, #tpu.memory_space<vmem>>, vector<1x1x16x24xf32>
    %20 = vector.shape_cast %19 : vector<1x1x16x24xf32> to vector<16x24xf32>
    %c3 = arith.constant 3 : index
    %c0_24 = arith.constant 0 : index
    %c0_25 = arith.constant 0 : index
    %21 = vector.load %arg1[%c3, %c0_24, %c0_25] : memref<9x16x16xf32, #tpu.memory_space<vmem>>, vector<1x16x16xf32>
    %22 = vector.shape_cast %21 : vector<1x16x16xf32> to vector<16x16xf32>
    %cst_26 = arith.constant dense<0.000000e+00> : vector<16x24xf32>
    %23 = tpu.matmul %22, %20, %cst_26 {dimension_numbers = #tpu.dot_dimension_numbers<[1], [0], [0], [1], [0, 0, 1, 1], [], []>} : vector<16x16xf32>, vector<16x24xf32>, vector<16x24xf32> -> vector<16x24xf32>
    %24 = arith.addf %18, %23 : vector<16x24xf32>
    %c0_27 = arith.constant 0 : index
    %c0_28 = arith.constant 0 : index
    %c0_29 = arith.constant 0 : index
    %c7 = arith.constant 7 : index
    %25 = vector.load %arg2[%c0_27, %c0_28, %c0_29, %c7] : memref<1x1x16x42xf32, #tpu.memory_space<vmem>>, vector<1x1x16x24xf32>
    %26 = vector.shape_cast %25 : vector<1x1x16x24xf32> to vector<16x24xf32>
    %c4 = arith.constant 4 : index
    %c0_30 = arith.constant 0 : index
    %c0_31 = arith.constant 0 : index
    %27 = vector.load %arg1[%c4, %c0_30, %c0_31] : memref<9x16x16xf32, #tpu.memory_space<vmem>>, vector<1x16x16xf32>
    %28 = vector.shape_cast %27 : vector<1x16x16xf32> to vector<16x16xf32>
    %cst_32 = arith.constant dense<0.000000e+00> : vector<16x24xf32>
    %29 = tpu.matmul %28, %26, %cst_32 {dimension_numbers = #tpu.dot_dimension_numbers<[1], [0], [0], [1], [0, 0, 1, 1], [], []>} : vector<16x16xf32>, vector<16x24xf32>, vector<16x24xf32> -> vector<16x24xf32>
    %30 = arith.addf %24, %29 : vector<16x24xf32>
    %c0_33 = arith.constant 0 : index
    %c0_34 = arith.constant 0 : index
    %c0_35 = arith.constant 0 : index
    %c8 = arith.constant 8 : index
    %31 = vector.load %arg2[%c0_33, %c0_34, %c0_35, %c8] : memref<1x1x16x42xf32, #tpu.memory_space<vmem>>, vector<1x1x16x24xf32>
    %32 = vector.shape_cast %31 : vector<1x1x16x24xf32> to vector<16x24xf32>
    %c5 = arith.constant 5 : index
    %c0_36 = arith.constant 0 : index
    %c0_37 = arith.constant 0 : index
    %33 = vector.load %arg1[%c5, %c0_36, %c0_37] : memref<9x16x16xf32, #tpu.memory_space<vmem>>, vector<1x16x16xf32>
    %34 = vector.shape_cast %33 : vector<1x16x16xf32> to vector<16x16xf32>
    %cst_38 = arith.constant dense<0.000000e+00> : vector<16x24xf32>
    %35 = tpu.matmul %34, %32, %cst_38 {dimension_numbers = #tpu.dot_dimension_numbers<[1], [0], [0], [1], [0, 0, 1, 1], [], []>} : vector<16x16xf32>, vector<16x24xf32>, vector<16x24xf32> -> vector<16x24xf32>
    %36 = arith.addf %30, %35 : vector<16x24xf32>
    %c0_39 = arith.constant 0 : index
    %c0_40 = arith.constant 0 : index
    %c0_41 = arith.constant 0 : index
    %c12 = arith.constant 12 : index
    %37 = vector.load %arg2[%c0_39, %c0_40, %c0_41, %c12] : memref<1x1x16x42xf32, #tpu.memory_space<vmem>>, vector<1x1x16x24xf32>
    %38 = vector.shape_cast %37 : vector<1x1x16x24xf32> to vector<16x24xf32>
    %c6_42 = arith.constant 6 : index
    %c0_43 = arith.constant 0 : index
    %c0_44 = arith.constant 0 : index
    %39 = vector.load %arg1[%c6_42, %c0_43, %c0_44] : memref<9x16x16xf32, #tpu.memory_space<vmem>>, vector<1x16x16xf32>
    %40 = vector.shape_cast %39 : vector<1x16x16xf32> to vector<16x16xf32>
    %cst_45 = arith.constant dense<0.000000e+00> : vector<16x24xf32>
    %41 = tpu.matmul %40, %38, %cst_45 {dimension_numbers = #tpu.dot_dimension_numbers<[1], [0], [0], [1], [0, 0, 1, 1], [], []>} : vector<16x16xf32>, vector<16x24xf32>, vector<16x24xf32> -> vector<16x24xf32>
    %42 = arith.addf %36, %41 : vector<16x24xf32>
    %c0_46 = arith.constant 0 : index
    %c0_47 = arith.constant 0 : index
    %c0_48 = arith.constant 0 : index
    %c13 = arith.constant 13 : index
    %43 = vector.load %arg2[%c0_46, %c0_47, %c0_48, %c13] : memref<1x1x16x42xf32, #tpu.memory_space<vmem>>, vector<1x1x16x24xf32>
    %44 = vector.shape_cast %43 : vector<1x1x16x24xf32> to vector<16x24xf32>
    %c7_49 = arith.constant 7 : index
    %c0_50 = arith.constant 0 : index
    %c0_51 = arith.constant 0 : index
    %45 = vector.load %arg1[%c7_49, %c0_50, %c0_51] : memref<9x16x16xf32, #tpu.memory_space<vmem>>, vector<1x16x16xf32>
    %46 = vector.shape_cast %45 : vector<1x16x16xf32> to vector<16x16xf32>
    %cst_52 = arith.constant dense<0.000000e+00> : vector<16x24xf32>
    %47 = tpu.matmul %46, %44, %cst_52 {dimension_numbers = #tpu.dot_dimension_numbers<[1], [0], [0], [1], [0, 0, 1, 1], [], []>} : vector<16x16xf32>, vector<16x24xf32>, vector<16x24xf32> -> vector<16x24xf32>
    %48 = arith.addf %42, %47 : vector<16x24xf32>
    %c0_53 = arith.constant 0 : index
    %c0_54 = arith.constant 0 : index
    %c0_55 = arith.constant 0 : index
    %c14 = arith.constant 14 : index
    %49 = vector.load %arg2[%c0_53, %c0_54, %c0_55, %c14] : memref<1x1x16x42xf32, #tpu.memory_space<vmem>>, vector<1x1x16x24xf32>
    %50 = vector.shape_cast %49 : vector<1x1x16x24xf32> to vector<16x24xf32>
    %c8_56 = arith.constant 8 : index
    %c0_57 = arith.constant 0 : index
    %c0_58 = arith.constant 0 : index
    %51 = vector.load %arg1[%c8_56, %c0_57, %c0_58] : memref<9x16x16xf32, #tpu.memory_space<vmem>>, vector<1x16x16xf32>
    %52 = vector.shape_cast %51 : vector<1x16x16xf32> to vector<16x16xf32>
    %cst_59 = arith.constant dense<0.000000e+00> : vector<16x24xf32>
    %53 = tpu.matmul %52, %50, %cst_59 {dimension_numbers = #tpu.dot_dimension_numbers<[1], [0], [0], [1], [0, 0, 1, 1], [], []>} : vector<16x16xf32>, vector<16x24xf32>, vector<16x24xf32> -> vector<16x24xf32>
    %54 = arith.addf %48, %53 : vector<16x24xf32>
    %c0_60 = arith.constant 0 : index
    %c0_61 = arith.constant 0 : index
    %55 = vector.load %arg3[%c0_60, %c0_61] : memref<16x1xf32, #tpu.memory_space<vmem>>, vector<16x1xf32>
    %56 = vector.broadcast %55 : vector<16x1xf32> to vector<16x24xf32>
    %57 = arith.addf %54, %56 : vector<16x24xf32>
    %cst_62 = arith.constant 0.000000e+00 : f32
    %58 = vector.broadcast %cst_62 : f32 to vector<16x24xf32>
    %59 = arith.maximumf %57, %58 : vector<16x24xf32>
    %c0_63 = arith.constant 0 : index
    %c0_64 = arith.constant 0 : index
    %60 = vector.load %arg4[%c0_63, %c0_64] : memref<16x128xf32, #tpu.memory_space<vmem>>, vector<16x24xf32>
    tpu.vector_store %arg4[%c0_63, %c0_64], %59 {strides = array<i32>} : memref<16x128xf32, #tpu.memory_space<vmem>>, vector<16x24xf32>,
    return
  }
  func.func @transform_0(%arg0: i32) -> (i32, i32, i32) {
    %c0_i32 = arith.constant 0 : i32
    %c0_i32_0 = arith.constant 0 : i32
    %c0_i32_1 = arith.constant 0 : i32
    %c0_i32_2 = arith.constant 0 : i32
    return %c0_i32, %c0_i32_0, %c0_i32_1 : i32, i32, i32
  }
  func.func @transform_1(%arg0: i32) -> (i32, i32, i32, i32) {
    %c0_i32 = arith.constant 0 : i32
    %c0_i32_0 = arith.constant 0 : i32
    %c0_i32_1 = arith.constant 0 : i32
    %c0_i32_2 = arith.constant 0 : i32
    return %c0_i32, %arg0, %c0_i32_0, %c0_i32_1 : i32, i32, i32, i32
  }
  func.func @transform_2(%arg0: i32) -> (i32, i32) {
    %c0_i32 = arith.constant 0 : i32
    %c0_i32_0 = arith.constant 0 : i32
    %c0_i32_1 = arith.constant 0 : i32
    return %c0_i32, %c0_i32_0 : i32, i32
  }
  func.func @transform_3(%arg0: i32) -> (i32, i32) {
    %c0_i32 = arith.constant 0 : i32
    %c0_i32_0 = arith.constant 0 : i32
    return %c0_i32, %arg0 : i32, i32
  }
}

module attributes {stable_mosaic.version = 11 : i64} {
  func.func @kernel(%arg0: i32, %arg1: memref<32x16xf32, #tpu.memory_space<vmem>>, %arg2: memref<16x128xf32, #tpu.memory_space<vmem>>, %arg3: memref<32x1xf32, #tpu.memory_space<vmem>>, %arg4: memref<32x128xf32, #tpu.memory_space<vmem>>, %arg5: memref<32x128xf32, #tpu.memory_space<vmem>>) attributes {dimension_semantics = [#tpu.dimension_semantics<parallel>], iteration_bounds = array<i64: 1>, scalar_prefetch = 0 : i64, scratch_operands = 0 : i64, tpu.core_type = #tpu.core_type<tc>, window_params = [{pipeline_mode = #tpu.pipeline_mode<synchronous>, transform_indices = @transform_0, window_bounds = array<i64: 32, 16>}, {transform_indices = @transform_1, window_bounds = array<i64: 16, 128>}, {pipeline_mode = #tpu.pipeline_mode<synchronous>, transform_indices = @transform_2, window_bounds = array<i64: 32, 1>}, {transform_indices = @transform_3, window_bounds = array<i64: 32, 128>}, {transform_indices = @transform_4, window_bounds = array<i64: 32, 128>}]} {
    %c0 = arith.constant 0 : index
    %c0_0 = arith.constant 0 : index
    %0 = vector.load %arg1[%c0, %c0_0] : memref<32x16xf32, #tpu.memory_space<vmem>>, vector<32x16xf32>
    %c0_1 = arith.constant 0 : index
    %c0_2 = arith.constant 0 : index
    %1 = vector.load %arg2[%c0_1, %c0_2] : memref<16x128xf32, #tpu.memory_space<vmem>>, vector<16x128xf32>
    %cst = arith.constant dense<0.000000e+00> : vector<32x128xf32>
    %2 = tpu.matmul %0, %1, %cst {dimension_numbers = #tpu.dot_dimension_numbers<[1], [0], [0], [1], [0, 0, 1, 1], [], []>} : vector<32x16xf32>, vector<16x128xf32>, vector<32x128xf32> -> vector<32x128xf32>
    %c0_3 = arith.constant 0 : index
    %c0_4 = arith.constant 0 : index
    %3 = vector.load %arg3[%c0_3, %c0_4] : memref<32x1xf32, #tpu.memory_space<vmem>>, vector<32x1xf32>
    %4 = vector.broadcast %3 : vector<32x1xf32> to vector<32x128xf32>
    %5 = arith.addf %2, %4 : vector<32x128xf32>
    %c0_5 = arith.constant 0 : index
    %c0_6 = arith.constant 0 : index
    %6 = vector.load %arg4[%c0_5, %c0_6] : memref<32x128xf32, #tpu.memory_space<vmem>>, vector<32x128xf32>
    %7 = arith.addf %5, %6 : vector<32x128xf32>
    %cst_7 = arith.constant 0.000000e+00 : f32
    %8 = vector.broadcast %cst_7 : f32 to vector<32x128xf32>
    %9 = arith.maximumf %7, %8 : vector<32x128xf32>
    %c0_8 = arith.constant 0 : index
    %c0_9 = arith.constant 0 : index
    %10 = vector.load %arg5[%c0_8, %c0_9] : memref<32x128xf32, #tpu.memory_space<vmem>>, vector<32x128xf32>
    tpu.vector_store %arg5[%c0_8, %c0_9], %9 {strides = array<i32>} : memref<32x128xf32, #tpu.memory_space<vmem>>, vector<32x128xf32>,
    return
  }
  func.func @transform_0(%arg0: i32) -> (i32, i32) {
    %c0_i32 = arith.constant 0 : i32
    %c0_i32_0 = arith.constant 0 : i32
    %c0_i32_1 = arith.constant 0 : i32
    return %c0_i32, %c0_i32_0 : i32, i32
  }
  func.func @transform_1(%arg0: i32) -> (i32, i32) {
    %c0_i32 = arith.constant 0 : i32
    %c0_i32_0 = arith.constant 0 : i32
    return %c0_i32, %arg0 : i32, i32
  }
  func.func @transform_2(%arg0: i32) -> (i32, i32) {
    %c0_i32 = arith.constant 0 : i32
    %c0_i32_0 = arith.constant 0 : i32
    %c0_i32_1 = arith.constant 0 : i32
    return %c0_i32, %c0_i32_0 : i32, i32
  }
  func.func @transform_3(%arg0: i32) -> (i32, i32) {
    %c0_i32 = arith.constant 0 : i32
    %c0_i32_0 = arith.constant 0 : i32
    return %c0_i32, %arg0 : i32, i32
  }
  func.func @transform_4(%arg0: i32) -> (i32, i32) {
    %c0_i32 = arith.constant 0 : i32
    %c0_i32_0 = arith.constant 0 : i32
    return %c0_i32, %arg0 : i32, i32
  }
}

module attributes {stable_mosaic.version = 11 : i64} {
  func.func @kernel(%arg0: i32, %arg1: memref<22x32xf32, #tpu.memory_space<vmem>>, %arg2: memref<32x128xf32, #tpu.memory_space<vmem>>, %arg3: memref<22x1xf32, #tpu.memory_space<vmem>>, %arg4: memref<22x128xf32, #tpu.memory_space<vmem>>) attributes {dimension_semantics = [#tpu.dimension_semantics<parallel>], iteration_bounds = array<i64: 1>, scalar_prefetch = 0 : i64, scratch_operands = 0 : i64, tpu.core_type = #tpu.core_type<tc>, window_params = [{pipeline_mode = #tpu.pipeline_mode<synchronous>, transform_indices = @transform_0, window_bounds = array<i64: 22, 32>}, {transform_indices = @transform_1, window_bounds = array<i64: 32, 128>}, {pipeline_mode = #tpu.pipeline_mode<synchronous>, transform_indices = @transform_2, window_bounds = array<i64: 22, 1>}, {transform_indices = @transform_3, window_bounds = array<i64: 22, 128>}]} {
    %c0 = arith.constant 0 : index
    %c0_0 = arith.constant 0 : index
    %0 = vector.load %arg1[%c0, %c0_0] : memref<22x32xf32, #tpu.memory_space<vmem>>, vector<22x32xf32>
    %c0_1 = arith.constant 0 : index
    %c0_2 = arith.constant 0 : index
    %1 = vector.load %arg2[%c0_1, %c0_2] : memref<32x128xf32, #tpu.memory_space<vmem>>, vector<32x128xf32>
    %cst = arith.constant dense<0.000000e+00> : vector<22x128xf32>
    %2 = tpu.matmul %0, %1, %cst {dimension_numbers = #tpu.dot_dimension_numbers<[1], [0], [0], [1], [0, 0, 1, 1], [], []>} : vector<22x32xf32>, vector<32x128xf32>, vector<22x128xf32> -> vector<22x128xf32>
    %c0_3 = arith.constant 0 : index
    %c0_4 = arith.constant 0 : index
    %3 = vector.load %arg3[%c0_3, %c0_4] : memref<22x1xf32, #tpu.memory_space<vmem>>, vector<22x1xf32>
    %4 = vector.broadcast %3 : vector<22x1xf32> to vector<22x128xf32>
    %5 = arith.addf %2, %4 : vector<22x128xf32>
    %c0_5 = arith.constant 0 : index
    %c0_6 = arith.constant 0 : index
    %6 = vector.load %arg4[%c0_5, %c0_6] : memref<22x128xf32, #tpu.memory_space<vmem>>, vector<22x128xf32>
    tpu.vector_store %arg4[%c0_5, %c0_6], %5 {strides = array<i32>} : memref<22x128xf32, #tpu.memory_space<vmem>>, vector<22x128xf32>,
    return
  }
  func.func @transform_0(%arg0: i32) -> (i32, i32) {
    %c0_i32 = arith.constant 0 : i32
    %c0_i32_0 = arith.constant 0 : i32
    %c0_i32_1 = arith.constant 0 : i32
    return %c0_i32, %c0_i32_0 : i32, i32
  }
  func.func @transform_1(%arg0: i32) -> (i32, i32) {
    %c0_i32 = arith.constant 0 : i32
    %c0_i32_0 = arith.constant 0 : i32
    return %c0_i32, %arg0 : i32, i32
  }
  func.func @transform_2(%arg0: i32) -> (i32, i32) {
    %c0_i32 = arith.constant 0 : i32
    %c0_i32_0 = arith.constant 0 : i32
    %c0_i32_1 = arith.constant 0 : i32
    return %c0_i32, %c0_i32_0 : i32, i32
  }
  func.func @transform_3(%arg0: i32) -> (i32, i32) {
    %c0_i32 = arith.constant 0 : i32
    %c0_i32_0 = arith.constant 0 : i32
    return %c0_i32, %arg0 : i32, i32
  }
}

module attributes {stable_mosaic.version = 11 : i64} {
  func.func @kernel(%arg0: i32, %arg1: i32, %arg2: memref<5x1x4x4xf32, #tpu.memory_space<vmem>>, %arg3: memref<473x4xf32, #tpu.memory_space<vmem>>, %arg4: memref<4x473xf32, #tpu.memory_space<vmem>>, %arg5: memref<1x5x473x473xf32, #tpu.memory_space<vmem>>) attributes {dimension_semantics = [#tpu.dimension_semantics<parallel>, #tpu.dimension_semantics<parallel>], iteration_bounds = array<i64: 4, 2>, scalar_prefetch = 0 : i64, scratch_operands = 0 : i64, tpu.core_type = #tpu.core_type<tc>, window_params = [{transform_indices = @transform_0, window_bounds = array<i64: 5, 1, 4, 4>}, {pipeline_mode = #tpu.pipeline_mode<synchronous>, transform_indices = @transform_1, window_bounds = array<i64: 473, 4>}, {pipeline_mode = #tpu.pipeline_mode<synchronous>, transform_indices = @transform_2, window_bounds = array<i64: 4, 473>}, {transform_indices = @transform_3, window_bounds = array<i64: 1, 5, 473, 473>}]} {
    %c0 = arith.constant 0 : index
    %c0_0 = arith.constant 0 : index
    %0 = vector.load %arg3[%c0, %c0_0] : memref<473x4xf32, #tpu.memory_space<vmem>>, vector<473x4xf32>
    %c0_1 = arith.constant 0 : index
    %c0_2 = arith.constant 0 : index
    %c0_3 = arith.constant 0 : index
    %c0_4 = arith.constant 0 : index
    %1 = vector.load %arg2[%c0_1, %c0_2, %c0_3, %c0_4] : memref<5x1x4x4xf32, #tpu.memory_space<vmem>>, vector<1x1x4x4xf32>
    %2 = vector.shape_cast %1 : vector<1x1x4x4xf32> to vector<4x4xf32>
    %cst = arith.constant dense<0.000000e+00> : vector<473x4xf32>
    %3 = tpu.matmul %0, %2, %cst {dimension_numbers = #tpu.dot_dimension_numbers<[1], [0], [0], [1], [0, 0, 1, 1], [], []>} : vector<473x4xf32>, vector<4x4xf32>, vector<473x4xf32> -> vector<473x4xf32>
    %c0_5 = arith.constant 0 : index
    %c0_6 = arith.constant 0 : index
    %4 = vector.load %arg4[%c0_5, %c0_6] : memref<4x473xf32, #tpu.memory_space<vmem>>, vector<4x473xf32>
    %cst_7 = arith.constant dense<0.000000e+00> : vector<473x473xf32>
    %5 = tpu.matmul %3, %4, %cst_7 {dimension_numbers = #tpu.dot_dimension_numbers<[1], [0], [0], [1], [0, 0, 1, 1], [], []>} : vector<473x4xf32>, vector<4x473xf32>, vector<473x473xf32> -> vector<473x473xf32>
    %c0_8 = arith.constant 0 : index
    %c0_9 = arith.constant 0 : index
    %c0_10 = arith.constant 0 : index
    %c0_11 = arith.constant 0 : index
    %6 = vector.load %arg5[%c0_8, %c0_9, %c0_10, %c0_11] : memref<1x5x473x473xf32, #tpu.memory_space<vmem>>, vector<1x1x473x473xf32>
    %7 = vector.shape_cast %6 : vector<1x1x473x473xf32> to vector<473x473xf32>
    %8 = vector.shape_cast %5 : vector<473x473xf32> to vector<1x1x473x473xf32>
    tpu.vector_store %arg5[%c0_8, %c0_9, %c0_10, %c0_11], %8 {strides = array<i32>} : memref<1x5x473x473xf32, #tpu.memory_space<vmem>>, vector<1x1x473x473xf32>,
    %c0_12 = arith.constant 0 : index
    %c0_13 = arith.constant 0 : index
    %9 = vector.load %arg3[%c0_12, %c0_13] : memref<473x4xf32, #tpu.memory_space<vmem>>, vector<473x4xf32>
    %c1 = arith.constant 1 : index
    %c0_14 = arith.constant 0 : index
    %c0_15 = arith.constant 0 : index
    %c0_16 = arith.constant 0 : index
    %10 = vector.load %arg2[%c1, %c0_14, %c0_15, %c0_16] : memref<5x1x4x4xf32, #tpu.memory_space<vmem>>, vector<1x1x4x4xf32>
    %11 = vector.shape_cast %10 : vector<1x1x4x4xf32> to vector<4x4xf32>
    %cst_17 = arith.constant dense<0.000000e+00> : vector<473x4xf32>
    %12 = tpu.matmul %9, %11, %cst_17 {dimension_numbers = #tpu.dot_dimension_numbers<[1], [0], [0], [1], [0, 0, 1, 1], [], []>} : vector<473x4xf32>, vector<4x4xf32>, vector<473x4xf32> -> vector<473x4xf32>
    %c0_18 = arith.constant 0 : index
    %c0_19 = arith.constant 0 : index
    %13 = vector.load %arg4[%c0_18, %c0_19] : memref<4x473xf32, #tpu.memory_space<vmem>>, vector<4x473xf32>
    %cst_20 = arith.constant dense<0.000000e+00> : vector<473x473xf32>
    %14 = tpu.matmul %12, %13, %cst_20 {dimension_numbers = #tpu.dot_dimension_numbers<[1], [0], [0], [1], [0, 0, 1, 1], [], []>} : vector<473x4xf32>, vector<4x473xf32>, vector<473x473xf32> -> vector<473x473xf32>
    %c0_21 = arith.constant 0 : index
    %c1_22 = arith.constant 1 : index
    %c0_23 = arith.constant 0 : index
    %c0_24 = arith.constant 0 : index
    %15 = vector.load %arg5[%c0_21, %c1_22, %c0_23, %c0_24] : memref<1x5x473x473xf32, #tpu.memory_space<vmem>>, vector<1x1x473x473xf32>
    %16 = vector.shape_cast %15 : vector<1x1x473x473xf32> to vector<473x473xf32>
    %17 = vector.shape_cast %14 : vector<473x473xf32> to vector<1x1x473x473xf32>
    tpu.vector_store %arg5[%c0_21, %c1_22, %c0_23, %c0_24], %17 {strides = array<i32>} : memref<1x5x473x473xf32, #tpu.memory_space<vmem>>, vector<1x1x473x473xf32>,
    %c0_25 = arith.constant 0 : index
    %c0_26 = arith.constant 0 : index
    %18 = vector.load %arg3[%c0_25, %c0_26] : memref<473x4xf32, #tpu.memory_space<vmem>>, vector<473x4xf32>
    %c2 = arith.constant 2 : index
    %c0_27 = arith.constant 0 : index
    %c0_28 = arith.constant 0 : index
    %c0_29 = arith.constant 0 : index
    %19 = vector.load %arg2[%c2, %c0_27, %c0_28, %c0_29] : memref<5x1x4x4xf32, #tpu.memory_space<vmem>>, vector<1x1x4x4xf32>
    %20 = vector.shape_cast %19 : vector<1x1x4x4xf32> to vector<4x4xf32>
    %cst_30 = arith.constant dense<0.000000e+00> : vector<473x4xf32>
    %21 = tpu.matmul %18, %20, %cst_30 {dimension_numbers = #tpu.dot_dimension_numbers<[1], [0], [0], [1], [0, 0, 1, 1], [], []>} : vector<473x4xf32>, vector<4x4xf32>, vector<473x4xf32> -> vector<473x4xf32>
    %c0_31 = arith.constant 0 : index
    %c0_32 = arith.constant 0 : index
    %22 = vector.load %arg4[%c0_31, %c0_32] : memref<4x473xf32, #tpu.memory_space<vmem>>, vector<4x473xf32>
    %cst_33 = arith.constant dense<0.000000e+00> : vector<473x473xf32>
    %23 = tpu.matmul %21, %22, %cst_33 {dimension_numbers = #tpu.dot_dimension_numbers<[1], [0], [0], [1], [0, 0, 1, 1], [], []>} : vector<473x4xf32>, vector<4x473xf32>, vector<473x473xf32> -> vector<473x473xf32>
    %c0_34 = arith.constant 0 : index
    %c2_35 = arith.constant 2 : index
    %c0_36 = arith.constant 0 : index
    %c0_37 = arith.constant 0 : index
    %24 = vector.load %arg5[%c0_34, %c2_35, %c0_36, %c0_37] : memref<1x5x473x473xf32, #tpu.memory_space<vmem>>, vector<1x1x473x473xf32>
    %25 = vector.shape_cast %24 : vector<1x1x473x473xf32> to vector<473x473xf32>
    %26 = vector.shape_cast %23 : vector<473x473xf32> to vector<1x1x473x473xf32>
    tpu.vector_store %arg5[%c0_34, %c2_35, %c0_36, %c0_37], %26 {strides = array<i32>} : memref<1x5x473x473xf32, #tpu.memory_space<vmem>>, vector<1x1x473x473xf32>,
    %c0_38 = arith.constant 0 : index
    %c0_39 = arith.constant 0 : index
    %27 = vector.load %arg3[%c0_38, %c0_39] : memref<473x4xf32, #tpu.memory_space<vmem>>, vector<473x4xf32>
    %c3 = arith.constant 3 : index
    %c0_40 = arith.constant 0 : index
    %c0_41 = arith.constant 0 : index
    %c0_42 = arith.constant 0 : index
    %28 = vector.load %arg2[%c3, %c0_40, %c0_41, %c0_42] : memref<5x1x4x4xf32, #tpu.memory_space<vmem>>, vector<1x1x4x4xf32>
    %29 = vector.shape_cast %28 : vector<1x1x4x4xf32> to vector<4x4xf32>
    %cst_43 = arith.constant dense<0.000000e+00> : vector<473x4xf32>
    %30 = tpu.matmul %27, %29, %cst_43 {dimension_numbers = #tpu.dot_dimension_numbers<[1], [0], [0], [1], [0, 0, 1, 1], [], []>} : vector<473x4xf32>, vector<4x4xf32>, vector<473x4xf32> -> vector<473x4xf32>
    %c0_44 = arith.constant 0 : index
    %c0_45 = arith.constant 0 : index
    %31 = vector.load %arg4[%c0_44, %c0_45] : memref<4x473xf32, #tpu.memory_space<vmem>>, vector<4x473xf32>
    %cst_46 = arith.constant dense<0.000000e+00> : vector<473x473xf32>
    %32 = tpu.matmul %30, %31, %cst_46 {dimension_numbers = #tpu.dot_dimension_numbers<[1], [0], [0], [1], [0, 0, 1, 1], [], []>} : vector<473x4xf32>, vector<4x473xf32>, vector<473x473xf32> -> vector<473x473xf32>
    %c0_47 = arith.constant 0 : index
    %c3_48 = arith.constant 3 : index
    %c0_49 = arith.constant 0 : index
    %c0_50 = arith.constant 0 : index
    %33 = vector.load %arg5[%c0_47, %c3_48, %c0_49, %c0_50] : memref<1x5x473x473xf32, #tpu.memory_space<vmem>>, vector<1x1x473x473xf32>
    %34 = vector.shape_cast %33 : vector<1x1x473x473xf32> to vector<473x473xf32>
    %35 = vector.shape_cast %32 : vector<473x473xf32> to vector<1x1x473x473xf32>
    tpu.vector_store %arg5[%c0_47, %c3_48, %c0_49, %c0_50], %35 {strides = array<i32>} : memref<1x5x473x473xf32, #tpu.memory_space<vmem>>, vector<1x1x473x473xf32>,
    %c0_51 = arith.constant 0 : index
    %c0_52 = arith.constant 0 : index
    %36 = vector.load %arg3[%c0_51, %c0_52] : memref<473x4xf32, #tpu.memory_space<vmem>>, vector<473x4xf32>
    %c4 = arith.constant 4 : index
    %c0_53 = arith.constant 0 : index
    %c0_54 = arith.constant 0 : index
    %c0_55 = arith.constant 0 : index
    %37 = vector.load %arg2[%c4, %c0_53, %c0_54, %c0_55] : memref<5x1x4x4xf32, #tpu.memory_space<vmem>>, vector<1x1x4x4xf32>
    %38 = vector.shape_cast %37 : vector<1x1x4x4xf32> to vector<4x4xf32>
    %cst_56 = arith.constant dense<0.000000e+00> : vector<473x4xf32>
    %39 = tpu.matmul %36, %38, %cst_56 {dimension_numbers = #tpu.dot_dimension_numbers<[1], [0], [0], [1], [0, 0, 1, 1], [], []>} : vector<473x4xf32>, vector<4x4xf32>, vector<473x4xf32> -> vector<473x4xf32>
    %c0_57 = arith.constant 0 : index
    %c0_58 = arith.constant 0 : index
    %40 = vector.load %arg4[%c0_57, %c0_58] : memref<4x473xf32, #tpu.memory_space<vmem>>, vector<4x473xf32>
    %cst_59 = arith.constant dense<0.000000e+00> : vector<473x473xf32>
    %41 = tpu.matmul %39, %40, %cst_59 {dimension_numbers = #tpu.dot_dimension_numbers<[1], [0], [0], [1], [0, 0, 1, 1], [], []>} : vector<473x4xf32>, vector<4x473xf32>, vector<473x473xf32> -> vector<473x473xf32>
    %c0_60 = arith.constant 0 : index
    %c4_61 = arith.constant 4 : index
    %c0_62 = arith.constant 0 : index
    %c0_63 = arith.constant 0 : index
    %42 = vector.load %arg5[%c0_60, %c4_61, %c0_62, %c0_63] : memref<1x5x473x473xf32, #tpu.memory_space<vmem>>, vector<1x1x473x473xf32>
    %43 = vector.shape_cast %42 : vector<1x1x473x473xf32> to vector<473x473xf32>
    %44 = vector.shape_cast %41 : vector<473x473xf32> to vector<1x1x473x473xf32>
    tpu.vector_store %arg5[%c0_60, %c4_61, %c0_62, %c0_63], %44 {strides = array<i32>} : memref<1x5x473x473xf32, #tpu.memory_space<vmem>>, vector<1x1x473x473xf32>,
    return
  }
  func.func @transform_0(%arg0: i32, %arg1: i32) -> (i32, i32, i32, i32) {
    %c0_i32 = arith.constant 0 : i32
    %c0_i32_0 = arith.constant 0 : i32
    %c0_i32_1 = arith.constant 0 : i32
    return %arg0, %arg1, %c0_i32, %c0_i32_0 : i32, i32, i32, i32
  }
  func.func @transform_1(%arg0: i32, %arg1: i32) -> (i32, i32) {
    %c0_i32 = arith.constant 0 : i32
    %c0_i32_0 = arith.constant 0 : i32
    %c0_i32_1 = arith.constant 0 : i32
    return %c0_i32, %c0_i32_0 : i32, i32
  }
  func.func @transform_2(%arg0: i32, %arg1: i32) -> (i32, i32) {
    %c0_i32 = arith.constant 0 : i32
    %c0_i32_0 = arith.constant 0 : i32
    %c0_i32_1 = arith.constant 0 : i32
    return %c0_i32, %c0_i32_0 : i32, i32
  }
  func.func @transform_3(%arg0: i32, %arg1: i32) -> (i32, i32, i32, i32) {
    %c0_i32 = arith.constant 0 : i32
    %c0_i32_0 = arith.constant 0 : i32
    %c0_i32_1 = arith.constant 0 : i32
    return %arg1, %arg0, %c0_i32, %c0_i32_0 : i32, i32, i32, i32
  }
}

</mosaic_0001>

<bundles_post_ra>
// kernel: parsing_wrapper_forward.7
= control target key start
LH: loop header
LB: loop body
LE: loop exit
PB: predicated region body
PF: predicated region fallthrough
CT: control target
= control target key end

     0   :  { %s1373_s12 = smov 0   ;;  %s1375_s13 = smov 0   ;;  %s1533_s0 = inlined_call_operand.vmem [shape: f32[9,16,3], index: 0, kind: input, shape index: {}]   ;;  %s1534_s1 = inlined_call_operand.vmem [shape: f32[4,2,3,90], index: 1, kind: input, shape index: {}]   ;;  %s1535_s2 = inlined_call_operand.vmem [shape: f32[16,1], index: 2, kind: input, shape index: {}]   ;;  %s1536_s3 = inlined_call_operand.vmem [shape: f32[16,256], index: 3, kind: output, shape index: {}]  }
   0x1   :  { %s1377_s14 = smov 0  }
   0x2 LB: > { %s1148_s15 = sadd.s32 4294967295, %s1347_s14   ;;  %s1390_s16 = sadd.s32 1, %s1347_s14   ;;  %s1347_s14 = sphi %s1377_s14, %s1540_s14   ;;  %s1343_s13 = sphi %s1375_s13, %s1539_s13   ;;  %s1339_s12 = sphi %s1373_s12, %s1538_s12  }
   0x3   : > { %s38_s17 = ssub.s32 %s1347_s14, %s1390_s16  ;;  %s41_s18 = sadd.s32 1, %s1343_s13 }
   0x4   : > { %p39_p0 = scmp.eq.s32.totalorder %s38_s17, 0  ;;  %p48_p1 = scmp.ne.s32.totalorder %s1343_s13, %s1339_s12 }
   0x5   : > { %p49_p2 = scmp.eq.s32.totalorder %s1347_s14, 0  ;;  %p99_p3 = scmp.eq.s32.totalorder %s1148_s15, 1 }
   0x6   : > { %s1401_s19 = scalar_select %p39_p0, %s1343_s13, %s41_s18  }
   0x7   : > { %p50_p4 = por %p49_p2, %p48_p1  ;;  %p1403_p5 = por %p99_p3, %p48_p1 }
   0x8   : > { %p1151_p6 = scmp.ge.s32.totalorder %s1347_s14, 2 }
   0xa   : > { %127 = sbr.rel (%p1151_p6) target bundleno = 24 (0x18), region = 24 }
  0x11   : > { %130 = sbr.rel (!%p50_p4) target bundleno = 24 (0x18), region = 28  ;;  %s132_s21 = sand.u32 (%p50_p4), 1, %s1343_s13  }
  0x12   : > { %s1153_s22 = sshll.u32 (%p50_p4), %s1347_s14, 2  ;;  %s1152_s23 = sshll.u32 (%p50_p4), %s132_s21, 4 }
  0x13   : > { %s136_s26 = scalar_lea.vmem (%p50_p4), %s1534_s1, %s1153_s22  ;;  %s134_s27 = scalar_lea.vmem (%p50_p4), [#allocation2], %s1152_s23 }
  0x14   : > { %v152_v0 = vld [vmem:[%s136_s26] sm:$0xf] (%p50_p4)  ;;  %v154_v1 = vld [vmem:[%s136_s26 + $0x8] sm:$0xf] (%p50_p4)  ;;  %v156_v2 = vld [vmem:[%s136_s26 + $0x10] sm:$0xf] (%p50_p4) }
  0x15   : > { %153 = vst [vmem:[%s134_s27] sm:$0xf] (%p50_p4), %v152_v0  ;;  %155 = vst [vmem:[%s134_s27 + $0x4] sm:$0xf] (%p50_p4), %v154_v1  ;;  %v158_v3 = vld [vmem:[%s136_s26 + $0x18] sm:$0xf] (%p50_p4) }
  0x16   : > { %157 = vst [vmem:[%s134_s27 + $0x8] sm:$0xf] (%p50_p4), %v156_v2  ;;  %159 = vst [vmem:[%s134_s27 + $0xc] sm:$0xf] (%p50_p4), %v158_v3 }
  0x18 PF: > { %p1154_p7 = scmp.ge.s32.totalorder %s1347_s14, 1  ;;  %p189_p8 = scmp.lt.s32.totalorder %s1347_s14, 3 }
  0x1a   : > { %p190_p9 = pnand %p1154_p7, %p189_p8 }
  0x1b   : > { %s196_s28 = sand.u32 (!%p190_p9), 1, %s1339_s12   ;;  %v1158_v4 = vld [vmem:[%s1533_s0 + $0x10] sm:$0xff] (!%p190_p9)  ;;  %vm226_vm0 = vcmask (!%p190_p9), 23552   ;;  %v1178_v5 = vld [vmem:[%s1533_s0 + $0x40] sm:$0xff] (!%p190_p9)  ;;  %vm233_vm1 = vcmask (!%p190_p9), 1042432   ;;  %v1159_v8 = vld [vmem:[%s1533_s0 + $0x18] sm:$0xff] (!%p190_p9) }
  0x1c   : > { %193 = sbr.rel (%p190_p9) target bundleno = 400 (0x190), region = 69  ;;  %s1419_s4 = sshll.u32 (!%p190_p9), %s196_s28, 4  ;;  %1236 = vmatprep.mubr.msk.f32.mxu1 (!%p190_p9), %vm226_vm0, %v1158_v4  ;;  %1256 = vmatprep.mubr.msk.f32.mxu0 (!%p190_p9), %vm226_vm0, %v1178_v5  ;;  %v219_v11 = vld [vmem:[%s1533_s0] sm:$0xff] (!%p190_p9)  ;;  %v1179_v12 = vld [vmem:[%s1533_s0 + $0x48] sm:$0xff] (!%p190_p9)  ;;  %v1183_v13 = vld [vmem:[%s1533_s0 + $0x50] sm:$0xff] (!%p190_p9)  ;;  %v1352_v18 = vmov (!%p190_p9), 0  }
  0x1d   : > { %s198_s7 = scalar_lea.vmem (!%p190_p9), [#allocation2], %s1419_s4  ;;  %s1349_s10 = smov (!%p190_p9), 127   ;;  %v220_v14 = vld [vmem:[%s1533_s0 + $0x8] sm:$0xff] (!%p190_p9)  ;;  %v1166_v15 = vld [vmem:[%s1533_s0 + $0x20] sm:$0xff] (!%p190_p9)  ;;  %1324 = vset.pattern.permute.xlu0 (!%p190_p9), %v1352_v18  ;;  %1323 = vset.pattern.permute.xlu1 (!%p190_p9), %v1352_v18  ;;  %v1184_v22 = vld [vmem:[%s1533_s0 + $0x58] sm:$0xff] (!%p190_p9)  ;;  %vm1044_vm2 = vcmask (!%p190_p9), 588800  }
  0x1e   : > { %v1171_v6 = vld [vmem:[%s198_s7 + $0x8] sm:$0x7] (!%p190_p9)  ;;  %v218_v7 = vld [vmem:[%s198_s7] sm:$0x7] (!%p190_p9)  ;;  %v1157_v9 = vld [vmem:[%s198_s7 + $0x4] sm:$0x7] (!%p190_p9) }
  0x1f   : > { %671 = vrot.lane.b32.xlu0 (!%p190_p9), %v1171_v6, %s1349_s10  ;;  %399 = vrot.lane.b32.xlu1 (!%p190_p9), %v218_v7, %s1349_s10  ;;  %v1177_v10 = vld [vmem:[%s198_s7 + $0xc] sm:$0x7] (!%p190_p9)  ;;  %s1350_s21 = smov (!%p190_p9), 119   ;;  %s1351_s24 = smov (!%p190_p9), 118   ;;  %v1028_v17 = vld [vmem:[%s1535_s2] sm:$0xff] (!%p190_p9) }
  0x20   : > { %1234 = vmatprep.subr.msk.mxu1 (!%p190_p9), %vm233_vm1, %v1157_v9  ;;  %1254 = vmatprep.subr.msk.mxu0 (!%p190_p9), %vm233_vm1, %v1177_v10  ;;  %v1029_v16 = vld [vmem:[%s1535_s2 + $0x8] sm:$0xff] (!%p190_p9)  ;;  %v1172_v23 = vld [vmem:[%s1533_s0 + $0x30] sm:$0xff] (!%p190_p9)  ;;  %v1188_v24 = vld [vmem:[%s1533_s0 + $0x60] sm:$0xff] (!%p190_p9)  ;;  %s217_s7 = scalar_lea.vmem (!%p190_p9), [#allocation3], %s1419_s4 }
  0x21   : > { %1235 = vmatpush3.msk.msra.mxu1 (!%p190_p9), %vm233_vm1, %v1157_v9  ;;  %1255 = vmatpush3.msk.msra.mxu0 (!%p190_p9), %vm233_vm1, %v1177_v10  ;;  %v1167_v21 = vld [vmem:[%s1533_s0 + $0x28] sm:$0xff] (!%p190_p9)  ;;  %v1173_v27 = vld [vmem:[%s1533_s0 + $0x38] sm:$0xff] (!%p190_p9)  ;;  %v1193_v29 = vld [vmem:[%s1533_s0 + $0x70] sm:$0xff] (!%p190_p9) }
  0x22   : > { %1237 = vmatmul.mubr.msk.f32.vlgmr.msra.gmra.mrb[0].mxu1 (!%p190_p9), %vm226_vm0, %v1159_v8  ;;  %1239 = vmatprep.subr.msk.mxu1 (!%p190_p9), %vm233_vm1, %v218_v7  ;;  %v1189_v28 = vld [vmem:[%s1533_s0 + $0x68] sm:$0xff] (!%p190_p9)  ;;  %v1194_v31 = vld [vmem:[%s1533_s0 + $0x78] sm:$0xff] (!%p190_p9)  ;;  %v1198_v32 = vld [vmem:[%s1533_s0 + $0x80] sm:$0xff] (!%p190_p9) }
  0x23   : > { %761 = vrot.lane.b32.xlu0 %v218_v7, %s1350_s21  ;;  %851 = vrot.lane.b32.xlu1 %v1157_v9, %s1350_s21  ;;  %v1199_v33 = vld [vmem:[%s1533_s0 + $0x88] sm:$0xff]  ;;  %s1204_s8 = sshll.u32 (%p1403_p5), %s1148_s15, 3 }
  0x24   : > { %1240 = vmatpush3.msk.msra.mxu1 %vm233_vm1, %v218_v7  ;;  %1241 = vmatprep.mubr.msk.f32.mxu1 %vm226_vm0, %v219_v11  ;;  %s1055_s11 = scalar_lea.vmem (%p1403_p5), %s1536_s3, %s1204_s8 }
  0x25   : > { %1257 = vmatmul.mubr.msk.f32.vlgmr.msra.gmra.mrb[0].mxu0 %vm226_vm0, %v1179_v12 }
  0x26   : > { %1261 = vmatprep.mubr.msk.f32.mxu0 %vm226_vm0, %v1183_v13 }
  0x27   : > { %941 = vrot.lane.b32.xlu0 %v218_v7, %s1351_s24  ;;  %1032 = vperm.xlu1 %1323, %v1028_v17  }
  0x2a   : > { %1242 = vmatmul.mubr.msk.f32.vlgmr.msra.gmra.mrb[0].mxu1 %vm226_vm0, %v220_v14 }
  0x2b   : > { %1246 = vmatprep.mubr.msk.f32.mxu1 %vm226_vm0, %v1166_v15  ;;  %1037 = vperm.xlu0 %1324, %v1029_v16  }
  0x91   : > { %v672_v19 = vpop.permute.xlu0 %671  ;;  %v400_v20 = vpop.permute.xlu1 %399 }
  0x92   : > { %1244 = vmatprep.subr.msk.mxu1 %vm233_vm1, %v400_v20  ;;  %1259 = vmatprep.subr.msk.mxu0 %vm233_vm1, %v672_v19 }
  0x93   : > { %1245 = vmatpush3.msk.msra.mxu1 %vm233_vm1, %v400_v20  ;;  %1260 = vmatpush3.msk.msra.mxu0 %vm233_vm1, %v672_v19 }
  0x94   : > { %1247 = vmatmul.mubr.msk.f32.vlgmr.msra.gmra.mrb[0].mxu1 %vm226_vm0, %v1167_v21  ;;  %1262 = vmatmul.mubr.msk.f32.vlgmr.msra.gmra.mrb[0].mxu0 %vm226_vm0, %v1184_v22 }
  0x95   : > { %v762_v25 = vpop.permute.xlu0 %761  ;;  %1249 = vmatprep.subr.msk.mxu1 %vm233_vm1, %v1171_v6  ;;  %1251 = vmatprep.mubr.msk.f32.mxu1 %vm226_vm0, %v1172_v23  ;;  %v852_v26 = vpop.permute.xlu1 %851 }
  0x96   : > { %1264 = vmatprep.subr.msk.mxu0 %vm233_vm1, %v762_v25  ;;  %1250 = vmatpush3.msk.msra.mxu1 %vm233_vm1, %v1171_v6 }
  0x97   : > { %1265 = vmatpush3.msk.msra.mxu0 %vm233_vm1, %v762_v25  ;;  %1266 = vmatprep.mubr.msk.f32.mxu0 %vm226_vm0, %v1188_v24 }
  0x98   : > { %1269 = vmatprep.subr.msk.mxu0 %vm233_vm1, %v852_v26 }
  0x99   : > { %v942_v30 = vpop.permute.xlu0 %941 }
  0x9c   : > { %1252 = vmatmul.mubr.msk.f32.vlgmr.msra.gmra.mrb[0].mxu1 %vm226_vm0, %v1173_v27  ;;  %1267 = vmatmul.mubr.msk.f32.vlgmr.msra.gmra.mrb[0].mxu0 %vm226_vm0, %v1189_v28 }
  0x9d   : > { %1270 = vmatpush3.msk.msra.mxu0 %vm233_vm1, %v852_v26  ;;  %1271 = vmatprep.mubr.msk.f32.mxu0 %vm226_vm0, %v1193_v29 }
  0x9e   : > { %1274 = vmatprep.subr.msk.mxu0 %vm233_vm1, %v942_v30 }
  0xa4   : > { %1272 = vmatmul.mubr.msk.f32.vlgmr.msra.gmra.mrb[0].mxu0 %vm226_vm0, %v1194_v31 }
  0xa5   : > { %1275 = vmatpush3.msk.msra.mxu0 %vm233_vm1, %v942_v30  ;;  %1276 = vmatprep.mubr.msk.f32.mxu0 %vm226_vm0, %v1198_v32 }
  0xa6   : > { %v1033_v40 = vpop.permute.xlu1 %1032 }
  0xaa   : > { %v1038_v37 = vpop.permute.xlu0 %1037 }
  0xac   : > { %1277 = vmatmul.mubr.msk.f32.vlgmr.msra.gmra.mrb[0].mxu0 %vm226_vm0, %v1199_v33 }
 0x16f   : > { %v1253_v34 = vpop.f32.mrb[0].mxu1 }
 0x170   : > { %v566_v35 = vpop.f32.mrb[1].mxu1 }
 0x17f   : > { %v1278_v36 = vpop.f32.mrb[0].mxu0 }
 0x180   : > { %v1279_v38 = vadd.f32 %v1278_v36, %v1253_v34  ;;  %v1017_v39 = vpop.f32.mrb[1].mxu0 }
 0x181   : > { %v1280_v41 = vadd.f32 %v1017_v39, %v566_v35  ;;  %1053 = sbr.rel (!%p1403_p5) target bundleno = 400 (0x190), region = 77 }
 0x182   : > { %v1041_v42 = vadd.f32 %v1279_v38, %v1038_v37 }
 0x183   : > { %v1040_v43 = vadd.f32 %v1280_v41, %v1033_v40 }
 0x184   : > { %v1043_v44 = vmax.f32 %v1041_v42, 0.0 }
 0x185   : > { %v1042_v45 = vmax.f32 %v1040_v43, 0.0 }
 0x186   : > { %1046 = vst.msk [vmem:[%s217_s7 + $0x8] sm:$0xff] %vm1044_vm2, %v1043_v44 }
 0x187   : > { %1045 = vst.msk [vmem:[%s217_s7] sm:$0xff] %vm1044_vm2, %v1042_v45 }
 0x18d   : > { %v1087_v47 = vld [vmem:[%s217_s7 + $0x8] sm:$0xff] }
 0x18e   : > { %v1085_v46 = vld [vmem:[%s217_s7] sm:$0xff]  ;;  %1088 = vst [vmem:[%s1055_s11 + $0x10] sm:$0xff] %v1087_v47 }
 0x18f   : > { %1086 = vst [vmem:[%s1055_s11] sm:$0xff] %v1085_v46 }
 0x190 PF: > { %p10_p10 = scmp.ge.s32.totalorder %s1390_s16, 4   ;;  %s1538_s12 = smov %s1343_s13 }
 0x191   : > { %s1539_s13 = smov %s1401_s19  ;;  %s1540_s14 = smov %s1390_s16 }
 0x192   :  { %12 = sbr.rel (!%p10_p10) target bundleno = 2 (0x2), region = 157 }

// kernel: parsing_wrapper_forward.9
= control target key start
LH: loop header
LB: loop body
LE: loop exit
PB: predicated region body
PF: predicated region fallthrough
CT: control target
= control target key end

     0   :  { %8 = vsyncpa [#allocation3], 0  ;;  %s193_s12 = smov [#allocation2]   ;;  %s255_s0 = inlined_call_operand.hbm [shape: f32[16,32], index: 0, kind: input, shape index: {}]   ;;  %s256_s1 = inlined_call_operand.vmem [shape: f32[32,128], index: 1, kind: input, shape index: {}]   ;;  %s257_s2 = inlined_call_operand.vmem [shape: f32[16,1], index: 2, kind: input, shape index: {}]   ;;  %s258_s3 = inlined_call_operand.vmem [shape: f32[16,128], index: 3, kind: output, shape index: {}]  }
   0x1   :  { %s14_s13 = sshll.u32 %s193_s12, 4  ;;  %s169_s16 = scalar_lea.hbm %s255_s0, 256  ;;  %s15_s13 = int_to_ptr.vmem [resolvable:$true] %s14_s13 }
   0x2   :  { %p170_p0 = scmp.ne.s32.totalorder %s255_s0, %s169_s16  ;;  %p173_p1 = scmp.lt.u32.totalorder %s169_s16, %s255_s0 }
   0x4   :  { %p175_p2 = pnand %p173_p1, %p170_p0 }
   0x6   :  { %178 = shalt.err (!%p175_p2)
}
   0x7   :  { %s179_s21 = scalar_lea.vmem %s15_s13, 256  ;;  %p184_p4 = scmp.lt.s32.totalorder %s15_s13, %s15_s13 }
   0x8   :  { %p180_p3 = scmp.ne.s32.totalorder %s15_s13, %s179_s21  ;;  %p185_p5 = scmp.lt.s32.totalorder %s179_s21, %s179_s21 }
   0xa   :  { %p186_p6 = por %p185_p5, %p184_p4 }
   0xc   :  { %p187_p7 = pnand %p186_p6, %p180_p3 }
   0xe   :  { %190 = shalt.err (!%p187_p7)
}
   0xf   :  { %s194_s22 = smov 128   ;;  %s195_s23 = smov 8  }
  0x10   :  { %20 = dma.hbm_to_vmem [thread:$0]  %s255_s0, 256, %s15_s13, [#allocation3], %s194_s22, %s194_s22, %s195_s23  }
  0x11   :  { %191 = dma.done.wait [#allocation3], 256  }
  0x12   :  { %192 = vsyncadd [#allocation3], 4294967040  ;;  %v196_v0 = vmov 0   ;;  %vm46_vm0 = vcmask 261120   ;;  %v30_v1 = vld [vmem:[%s256_s1] sm:$0xff]  ;;  %v31_v2 = vld [vmem:[%s256_s1 + $0x8] sm:$0xff] }
  0x13   :  { %168 = vset.pattern.permute.xlu0 %v196_v0  ;;  %v32_v3 = vld [vmem:[%s256_s1 + $0x10] sm:$0xff]  ;;  %v156_v4 = vpack.c.bf16 %v31_v2, %v30_v1  ;;  %v33_v5 = vld [vmem:[%s256_s1 + $0x18] sm:$0xff]  ;;  %v28_v6 = vld [vmem:[#allocation2] sm:$0xff] }
  0x14   :  { %v160_v7 = vpack.c.bf16 %v33_v5, %v32_v3  ;;  %153 = vmatprep.mubr.msk.f32.mxu0 %vm46_vm0, %v28_v6  ;;  %v34_v8 = vld [vmem:[%s257_s2] sm:$0xff]  ;;  %v35_v9 = vld [vmem:[%s257_s2 + $0x8] sm:$0xff] }
  0x15   :  { %157 = vmatprep.subr.bf16.mxu0 %v156_v4  ;;  %38 = vperm.xlu0 %168, %v34_v8   ;;  %v29_v10 = vld [vmem:[#allocation2 + $0x8] sm:$0xff] }
  0x16   :  { %159 = vmatpush3.bf16.msra.mxu0 %v156_v4 }
  0x17   :  { %161 = vmatprep.subr.bf16.mxu0 %v160_v7 }
  0x19   :  { %43 = vperm.xlu0 %168, %v35_v9  }
  0x1a   :  { %163 = vmatpush3.bf16.msra.mxu0 %v160_v7 }
  0x1d   :  { %154 = vmatmul.mubr.msk.f32.vlgmr.msra.gmra.mrb[0].mxu0 %vm46_vm0, %v29_v10 }
  0x94   :  { %v39_v11 = vpop.permute.xlu0 %38 }
  0x98   :  { %v44_v12 = vpop.permute.xlu0 %43 }
  0xf0   :  { %v155_v13 = vpop.f32.mrb[0].mxu0 }
  0xf1   :  { %v125_v14 = vadd.f32 %v155_v13, %v44_v12  ;;  %v119_v15 = vpop.f32.mrb[1].mxu0 }
  0xf2   :  { %v120_v16 = vadd.f32 %v119_v15, %v39_v11 }
  0xf3   :  { %v129_v17 = vmax.f32 %v125_v14, 0.0 }
  0xf4   :  { %v128_v18 = vmax.f32 %v120_v16, 0.0 }
  0xf5   :  { %131 = vst [vmem:[%s258_s3 + $0x8] sm:$0xff] %v129_v17 }
  0xf6   :  { %130 = vst [vmem:[%s258_s3] sm:$0xff] %v128_v18 }
  0xf7   :  { %136 = vsyncpa [#allocation3], 1 }

// kernel: parsing_wrapper_forward.8
= control target key start
LH: loop header
LB: loop body
LE: loop exit
PB: predicated region body
PF: predicated region fallthrough
CT: control target
= control target key end

     0   :  { %s1773_s12 = smov 0   ;;  %s1775_s13 = smov 0   ;;  %s2007_s0 = inlined_call_operand.vmem [shape: f32[9,32,16], index: 0, kind: input, shape index: {}]   ;;  %s2008_s1 = inlined_call_operand.vmem [shape: f32[4,2,16,30], index: 1, kind: input, shape index: {}]   ;;  %s2009_s2 = inlined_call_operand.vmem [shape: f32[32,1], index: 2, kind: input, shape index: {}]   ;;  %s2010_s3 = inlined_call_operand.vmem [shape: f32[32,256], index: 3, kind: output, shape index: {}]  }
   0x1   :  { %s1777_s14 = smov 0  }
   0x2 LB: > { %s1367_s15 = sadd.s32 4294967295, %s1747_s14   ;;  %s1790_s16 = sadd.s32 1, %s1747_s14   ;;  %s1747_s14 = sphi %s1777_s14, %s2014_s14   ;;  %s1743_s13 = sphi %s1775_s13, %s2013_s13   ;;  %s1739_s12 = sphi %s1773_s12, %s2012_s12  }
   0x3   : > { %s38_s17 = ssub.s32 %s1747_s14, %s1790_s16  ;;  %s41_s18 = sadd.s32 1, %s1743_s13 }
   0x4   : > { %p39_p0 = scmp.eq.s32.totalorder %s38_s17, 0  ;;  %p48_p1 = scmp.ne.s32.totalorder %s1743_s13, %s1739_s12 }
   0x5   : > { %p49_p2 = scmp.eq.s32.totalorder %s1747_s14, 0  ;;  %p99_p3 = scmp.eq.s32.totalorder %s1367_s15, 1 }
   0x6   : > { %s1801_s19 = scalar_select %p39_p0, %s1743_s13, %s41_s18  }
   0x7   : > { %p50_p4 = por %p49_p2, %p48_p1  ;;  %p1803_p5 = por %p99_p3, %p48_p1 }
   0x8   : > { %p1370_p6 = scmp.ge.s32.totalorder %s1747_s14, 2 }
   0xa   : > { %127 = sbr.rel (%p1370_p6) target bundleno = 25 (0x19), region = 24 }
  0x11   : > { %130 = sbr.rel (!%p50_p4) target bundleno = 25 (0x19), region = 28  ;;  %s132_s21 = sand.u32 (%p50_p4), 1, %s1743_s13  }
  0x12   : > { %s1455_s22 = sshll.u32 (%p50_p4), %s1747_s14, 4  ;;  %s1371_s23 = sshll.u32 (%p50_p4), %s132_s21, 6 }
  0x13   : > { %s137_s26 = scalar_lea.vmem (%p50_p4), %s2008_s1, %s1455_s22  ;;  %s134_s27 = scalar_lea.vmem (%p50_p4), [#allocation2], %s1371_s23 }
  0x14   : > { %v179_v0 = vld [vmem:[%s137_s26] sm:$0xff] (%p50_p4)  ;;  %v181_v1 = vld [vmem:[%s137_s26 + $0x8] sm:$0xff] (%p50_p4) }
  0x15   : > { %v183_v2 = vld [vmem:[%s137_s26 + $0x20] sm:$0xff] (%p50_p4)  ;;  %180 = vst [vmem:[%s134_s27] sm:$0xff] (%p50_p4), %v179_v0  ;;  %182 = vst [vmem:[%s134_s27 + $0x8] sm:$0xff] (%p50_p4), %v181_v1  ;;  %v185_v3 = vld [vmem:[%s137_s26 + $0x28] sm:$0xff] (%p50_p4) }
  0x16   : > { %184 = vst [vmem:[%s134_s27 + $0x10] sm:$0xff] (%p50_p4), %v183_v2  ;;  %v187_v4 = vld [vmem:[%s137_s26 + $0x40] sm:$0xff] (%p50_p4)  ;;  %v189_v5 = vld [vmem:[%s137_s26 + $0x48] sm:$0xff] (%p50_p4)  ;;  %186 = vst [vmem:[%s134_s27 + $0x18] sm:$0xff] (%p50_p4), %v185_v3 }
  0x17   : > { %188 = vst [vmem:[%s134_s27 + $0x20] sm:$0xff] (%p50_p4), %v187_v4  ;;  %190 = vst [vmem:[%s134_s27 + $0x28] sm:$0xff] (%p50_p4), %v189_v5  ;;  %v191_v6 = vld [vmem:[%s137_s26 + $0x60] sm:$0xff] (%p50_p4)  ;;  %v193_v7 = vld [vmem:[%s137_s26 + $0x68] sm:$0xff] (%p50_p4) }
  0x18   : > { %192 = vst [vmem:[%s134_s27 + $0x30] sm:$0xff] %v191_v6  ;;  %194 = vst [vmem:[%s134_s27 + $0x38] sm:$0xff] %v193_v7 }
  0x19 PF: > { %p1374_p7 = scmp.ge.s32.totalorder %s1747_s14, 1  ;;  %p199_p8 = scmp.lt.s32.totalorder %s1747_s14, 3 }
  0x1b   : > { %p200_p9 = pnand %p1374_p7, %p199_p8 }
  0x1c   : > { %s206_s28 = sand.u32 (!%p200_p9), 1, %s1739_s12   ;;  %v1379_v8 = vld [vmem:[%s2007_s0 + $0x20] sm:$0xff] (!%p200_p9)  ;;  %vm242_vm0 = vcmask (!%p200_p9), 130048   ;;  %s1749_s8 = smov (!%p200_p9), 127   ;;  %v1380_v25 = vld [vmem:[%s2007_s0 + $0x28] sm:$0xff] (!%p200_p9)  ;;  %v1381_v27 = vld [vmem:[%s2007_s0 + $0x30] sm:$0xff] (!%p200_p9) }
  0x1d   : > { %203 = sbr.rel (%p200_p9) target bundleno = 413 (0x19d), region = 66  ;;  %v1411_v9 = vld [vmem:[%s2007_s0 + $0x80] sm:$0xff] (!%p200_p9)  ;;  %s1375_s6 = sshll.u32 (!%p200_p9), %s206_s28, 6  ;;  %1514 = vmatprep.mubr.msk.f32.mxu1 (!%p200_p9), %vm242_vm0, %v1379_v8  ;;  %v1412_v26 = vld [vmem:[%s2007_s0 + $0x88] sm:$0xff] (!%p200_p9)  ;;  %v1382_v29 = vld [vmem:[%s2007_s0 + $0x38] sm:$0xff] (!%p200_p9)  ;;  %v1752_v37 = vmov (!%p200_p9), 0  }
  0x1e   : > { %1554 = vmatprep.mubr.msk.f32.mxu0 (!%p200_p9), %vm242_vm0, %v1411_v9  ;;  %s208_s7 = scalar_lea.vmem (!%p200_p9), [#allocation2], %s1375_s6  ;;  %s1750_s9 = smov (!%p200_p9), 123   ;;  %v1419_v28 = vld [vmem:[%s2007_s0 + $0xa0] sm:$0xff] (!%p200_p9)  ;;  %v231_v31 = vld [vmem:[%s2007_s0 + $0x8] sm:$0xff] (!%p200_p9)  ;;  %v232_v32 = vld [vmem:[%s2007_s0 + $0x10] sm:$0xff] (!%p200_p9)  ;;  %1723 = vset.pattern.permute.xlu1 (!%p200_p9), %v1752_v37  ;;  %vm1253_vm1 = vcmask (!%p200_p9), 162816  }
  0x1f   : > { %v1399_v10 = vld [vmem:[%s208_s7 + $0x20] sm:$0xff] (!%p200_p9)  ;;  %v1400_v11 = vld [vmem:[%s208_s7 + $0x28] sm:$0xff] (!%p200_p9)  ;;  %v1377_v16 = vld [vmem:[%s208_s7 + $0x10] sm:$0xff] (!%p200_p9)  ;;  %s1751_s27 = smov (!%p200_p9), 122   ;;  %1724 = vset.pattern.permute.xlu0 (!%p200_p9), %v1752_v37  ;;  %s1376_s11 = sshll.u32 (!%p200_p9), %s206_s28, 5 }
  0x20   : > { %v228_v12 = vld [vmem:[%s208_s7] sm:$0xff] (!%p200_p9)  ;;  %v1698_v13 = vpack.i.bf16 (!%p200_p9), %v1400_v11, %v1399_v10  ;;  %v1826_v14 = vpack.c.bf16 (!%p200_p9), %v1400_v11, %v1399_v10  ;;  %v229_v15 = vld [vmem:[%s208_s7 + $0x8] sm:$0xff] (!%p200_p9)  ;;  %v1378_v17 = vld [vmem:[%s208_s7 + $0x18] sm:$0xff] (!%p200_p9)  ;;  %s227_s17 = scalar_lea.vmem (!%p200_p9), [#allocation3], %s1376_s11 }
  0x21   : > { %v1708_v18 = vpack.i.bf16 (!%p200_p9), %v229_v15, %v228_v12  ;;  %v1409_v19 = vld [vmem:[%s208_s7 + $0x30] sm:$0xff] (!%p200_p9)  ;;  %v1410_v20 = vld [vmem:[%s208_s7 + $0x38] sm:$0xff] (!%p200_p9)  ;;  %v1600_v21 = vpack.c.bf16 (!%p200_p9), %v1378_v17, %v1377_v16  ;;  %v1604_v23 = vpack.c.bf16 (!%p200_p9), %v229_v15, %v228_v12  ;;  %v1713_v24 = vpack.i.bf16 (!%p200_p9), %v1378_v17, %v1377_v16  ;;  %v230_v30 = vld [vmem:[%s2007_s0] sm:$0xff] (!%p200_p9) }
  0x22   : > { %1699 = vrot.lane.b32.xlu0 (!%p200_p9), %v1698_v13, %s1749_s8  ;;  %v1828_v22 = vpack.c.bf16 (!%p200_p9), %v1410_v20, %v1409_v19  ;;  %v233_v33 = vld [vmem:[%s2007_s0 + $0x18] sm:$0xff] (!%p200_p9)  ;;  %v1391_v34 = vld [vmem:[%s2007_s0 + $0x40] sm:$0xff] (!%p200_p9)  ;;  %v1222_v36 = vld [vmem:[%s2009_s2 + $0x8] sm:$0xff] (!%p200_p9) }
  0x23   : > { %1709 = vrot.lane.b32.xlu1 (!%p200_p9), %v1708_v18, %s1750_s9  ;;  %1601 = vmatprep.subr.bf16.mxu1 (!%p200_p9), %v1600_v21  ;;  %v1221_v35 = vld [vmem:[%s2009_s2] sm:$0xff] (!%p200_p9)  ;;  %v1223_v38 = vld [vmem:[%s2009_s2 + $0x10] sm:$0xff] (!%p200_p9)  ;;  %v1224_v39 = vld [vmem:[%s2009_s2 + $0x18] sm:$0xff] (!%p200_p9) }
  0x24   : > { %1617 = vmatprep.subr.bf16.mxu0 %v1828_v22  ;;  %1603 = vmatpush3.bf16.msra.mxu1 %v1600_v21  ;;  %v1420_v52 = vld [vmem:[%s2007_s0 + $0xa8] sm:$0xff]  ;;  %v1421_v56 = vld [vmem:[%s2007_s0 + $0xb0] sm:$0xff]  ;;  %v1422_v60 = vld [vmem:[%s2007_s0 + $0xb8] sm:$0xff]  ;;  %s1452_s12 = sshll.u32 (%p1803_p5), %s1367_s15, 3 }
  0x25   : > { %1619 = vmatpush3.bf16.msra.mxu0 %v1828_v22  ;;  %1605 = vmatprep.subr.bf16.mxu1 %v1604_v23  ;;  %v1392_v59 = vld [vmem:[%s2007_s0 + $0x48] sm:$0xff]  ;;  %v1393_v61 = vld [vmem:[%s2007_s0 + $0x50] sm:$0xff]  ;;  %v1427_v62 = vld [vmem:[%s2007_s0 + $0xc0] sm:$0xff]  ;;  %s1266_s21 = scalar_lea.vmem (%p1803_p5), %s2010_s3, %s1452_s12 }
  0x26   : > { %1704 = vrot.lane.b32.xlu0 %v1708_v18, %s1749_s8  ;;  %v1394_v1 = vld [vmem:[%s2007_s0 + $0x58] sm:$0xff]  ;;  %v1428_v2 = vld [vmem:[%s2007_s0 + $0xc8] sm:$0xff]  ;;  %v1401_v3 = vld [vmem:[%s2007_s0 + $0x60] sm:$0xff] }
  0x27   : > { %1714 = vrot.lane.b32.xlu1 %v1713_v24, %s1750_s9  ;;  %1515 = vmatmul.mubr.msk.f32.vlgmr.msra.gmra.mrb[0].mxu1 %vm242_vm0, %v1380_v25  ;;  %v1429_v4 = vld [vmem:[%s2007_s0 + $0xd0] sm:$0xff]  ;;  %v1402_v6 = vld [vmem:[%s2007_s0 + $0x68] sm:$0xff]  ;;  %v1430_v7 = vld [vmem:[%s2007_s0 + $0xd8] sm:$0xff] }
  0x28   : > { %1555 = vmatmul.mubr.msk.f32.vlgmr.msra.gmra.mrb[0].mxu0 %vm242_vm0, %v1412_v26  ;;  %1517 = vmatprep.mubr.msk.f32.mxu1 %vm242_vm0, %v1381_v27  ;;  %v1403_v8 = vld [vmem:[%s2007_s0 + $0x70] sm:$0xff]  ;;  %v1435_v9 = vld [vmem:[%s2007_s0 + $0xe0] sm:$0xff]  ;;  %v1404_v10 = vld [vmem:[%s2007_s0 + $0x78] sm:$0xff] }
  0x29   : > { %1607 = vmatpush3.bf16.msra.mxu1 %v1604_v23  ;;  %1564 = vmatprep.mubr.msk.f32.mxu0 %vm242_vm0, %v1419_v28  ;;  %v1436_v11 = vld [vmem:[%s2007_s0 + $0xe8] sm:$0xff]  ;;  %v1437_v12 = vld [vmem:[%s2007_s0 + $0xf0] sm:$0xff]  ;;  %v1443_v15 = vld [vmem:[%s2007_s0 + $0x100] sm:$0xff] }
  0x2a   : > { %1719 = vrot.lane.b32.xlu0 %v1708_v18, %s1751_s27  ;;  %v1413_v13 = vld [vmem:[%s2007_s0 + $0x90] sm:$0xff]  ;;  %v1414_v16 = vld [vmem:[%s2007_s0 + $0x98] sm:$0xff]  ;;  %v1444_v17 = vld [vmem:[%s2007_s0 + $0x108] sm:$0xff] }
  0x2b   : > { %1518 = vmatmul.mubr.msk.f32.gmra.mrb[2].mxu1 %vm242_vm0, %v1382_v29  ;;  %1227 = vperm.xlu1 %1723, %v1221_v35   ;;  %v1445_v18 = vld [vmem:[%s2007_s0 + $0x110] sm:$0xff]  ;;  %v1446_v19 = vld [vmem:[%s2007_s0 + $0x118] sm:$0xff] }
  0x2c   : > { %1524 = vmatprep.mubr.msk.f32.mxu1 %vm242_vm0, %v230_v30 }
  0x2e   : > { %1232 = vperm.xlu0 %1724, %v1222_v36  }
  0x2f   : > { %1525 = vmatmul.mubr.msk.f32.vlgmr.msra.gmra.mrb[0].mxu1 %vm242_vm0, %v231_v31  ;;  %1237 = vperm.xlu1 %1723, %v1223_v38  }
  0x30   : > { %1527 = vmatprep.mubr.msk.f32.mxu1 %vm242_vm0, %v232_v32 }
  0x33   : > { %1528 = vmatmul.mubr.msk.f32.gmra.mrb[2].mxu1 %vm242_vm0, %v233_v33  ;;  %1242 = vperm.xlu1 %1723, %v1224_v39  }
  0x34   : > { %1534 = vmatprep.mubr.msk.f32.mxu1 %vm242_vm0, %v1391_v34 }
  0x94   : > { %v1700_v40 = vpop.permute.xlu0 %1699 }
  0x95   : > { %v1702_v41 = vunpack.i.h.bf16 %v1700_v40  ;;  %v1701_v42 = vunpack.i.l.bf16 %v1700_v40  ;;  %v1710_v43 = vpop.permute.xlu1 %1709 }
  0x96   : > { %v1712_v44 = vunpack.i.h.bf16 %v1710_v43  ;;  %v1711_v45 = vunpack.i.l.bf16 %v1710_v43 }
  0x97   : > { %v1620_v46 = vpack.c.bf16 %v1702_v41, %v1701_v42 }
  0x98   : > { %v1705_v47 = vpop.permute.xlu0 %1704  ;;  %v1624_v48 = vpack.c.bf16 %v1712_v44, %v1711_v45 }
  0x99   : > { %v1707_v49 = vunpack.i.h.bf16 %v1705_v47  ;;  %v1706_v50 = vunpack.i.l.bf16 %v1705_v47  ;;  %1621 = vmatprep.subr.bf16.mxu0 %v1620_v46  ;;  %v1715_v51 = vpop.permute.xlu1 %1714 }
  0x9a   : > { %1623 = vmatpush3.bf16.msra.mxu0 %v1620_v46  ;;  %v1717_v53 = vunpack.i.h.bf16 %v1715_v51  ;;  %v1716_v54 = vunpack.i.l.bf16 %v1715_v51 }
  0x9b   : > { %v1608_v55 = vpack.c.bf16 %v1707_v49, %v1706_v50  ;;  %1625 = vmatprep.subr.bf16.mxu0 %v1624_v48 }
  0x9c   : > { %v1628_v57 = vpack.c.bf16 %v1717_v53, %v1716_v54  ;;  %v1720_v58 = vpop.permute.xlu0 %1719 }
  0x9d   : > { %1609 = vmatprep.subr.bf16.mxu1 %v1608_v55  ;;  %1565 = vmatmul.mubr.msk.f32.vlgmr.msra.gmra.mrb[0].mxu0 %vm242_vm0, %v1420_v52  ;;  %v1722_v63 = vunpack.i.h.bf16 %v1720_v58  ;;  %v1721_v0 = vunpack.i.l.bf16 %v1720_v58 }
  0x9e   : > { %1611 = vmatpush3.bf16.msra.mxu1 %v1608_v55  ;;  %1567 = vmatprep.mubr.msk.f32.mxu0 %vm242_vm0, %v1421_v56 }
  0x9f   : > { %1627 = vmatpush3.bf16.msra.mxu0 %v1624_v48  ;;  %1613 = vmatprep.subr.bf16.mxu1 %v1826_v14  ;;  %v1632_v5 = vpack.c.bf16 %v1722_v63, %v1721_v0 }
  0xa0   : > { %1629 = vmatprep.subr.bf16.mxu0 %v1628_v57 }
  0xa1   : > { %1535 = vmatmul.mubr.msk.f32.vlgmr.msra.gmra.mrb[0].mxu1 %vm242_vm0, %v1392_v59  ;;  %1568 = vmatmul.mubr.msk.f32.gmra.mrb[2].mxu0 %vm242_vm0, %v1422_v60 }
  0xa2   : > { %1537 = vmatprep.mubr.msk.f32.mxu1 %vm242_vm0, %v1393_v61  ;;  %1574 = vmatprep.mubr.msk.f32.mxu0 %vm242_vm0, %v1427_v62 }
  0xa3   : > { %1615 = vmatpush3.bf16.msra.mxu1 %v1826_v14  ;;  %v1438_v14 = vld [vmem:[%s2007_s0 + $0xf8] sm:$0xff] }
  0xa4   : > { %1636 = vmatprep.subr.bf16.mxu1 %v1828_v22 }
  0xa5   : > { %1538 = vmatmul.mubr.msk.f32.gmra.mrb[2].mxu1 %vm242_vm0, %v1394_v1  ;;  %1575 = vmatmul.mubr.msk.f32.vlgmr.msra.gmra.mrb[0].mxu0 %vm242_vm0, %v1428_v2 }
  0xa6   : > { %1544 = vmatprep.mubr.msk.f32.mxu1 %vm242_vm0, %v1401_v3  ;;  %1577 = vmatprep.mubr.msk.f32.mxu0 %vm242_vm0, %v1429_v4 }
  0xa7   : > { %1631 = vmatpush3.bf16.msra.mxu0 %v1628_v57 }
  0xa8   : > { %1633 = vmatprep.subr.bf16.mxu0 %v1632_v5 }
  0xa9   : > { %1545 = vmatmul.mubr.msk.f32.vlgmr.msra.gmra.mrb[0].mxu1 %vm242_vm0, %v1402_v6  ;;  %1578 = vmatmul.mubr.msk.f32.gmra.mrb[2].mxu0 %vm242_vm0, %v1430_v7 }
  0xaa   : > { %1547 = vmatprep.mubr.msk.f32.mxu1 %vm242_vm0, %v1403_v8  ;;  %1584 = vmatprep.mubr.msk.f32.mxu0 %vm242_vm0, %v1435_v9 }
  0xab   : > { %1637 = vmatpush3.bf16.msra.mxu1 %v1828_v22  ;;  %v1228_v22 = vpop.permute.xlu1 %1227 }
  0xad   : > { %1548 = vmatmul.mubr.msk.f32.gmra.mrb[2].mxu1 %vm242_vm0, %v1404_v10  ;;  %1585 = vmatmul.mubr.msk.f32.vlgmr.msra.gmra.mrb[0].mxu0 %vm242_vm0, %v1436_v11  ;;  %v1233_v24 = vpop.permute.xlu0 %1232 }
  0xae   : > { %1587 = vmatprep.mubr.msk.f32.mxu0 %vm242_vm0, %v1437_v12  ;;  %1635 = vmatpush3.bf16.msra.mxu0 %v1632_v5 }
  0xaf   : > { %1557 = vmatprep.mubr.msk.f32.mxu1 %vm242_vm0, %v1413_v13  ;;  %v1238_v23 = vpop.permute.xlu1 %1237 }
  0xb1   : > { %1588 = vmatmul.mubr.msk.f32.gmra.mrb[2].mxu0 %vm242_vm0, %v1438_v14 }
  0xb2   : > { %1594 = vmatprep.mubr.msk.f32.mxu0 %vm242_vm0, %v1443_v15 }
  0xb3   : > { %v1243_v38 = vpop.permute.xlu1 %1242 }
  0xb5   : > { %1558 = vmatmul.mubr.msk.f32.vlgmr.msra.gmra.mrb[2].mxu1 %vm242_vm0, %v1414_v16  ;;  %1595 = vmatmul.mubr.msk.f32.vlgmr.msra.gmra.mrb[0].mxu0 %vm242_vm0, %v1444_v17 }
  0xb6   : > { %1597 = vmatprep.mubr.msk.f32.mxu0 %vm242_vm0, %v1445_v18 }
  0xb9   : > { %1598 = vmatmul.mubr.msk.f32.gmra.mrb[2].mxu0 %vm242_vm0, %v1446_v19 }
 0x17c   : > { %v1546_v20 = vpop.f32.mrb[0].mxu1 }
 0x17d   : > { %v637_v21 = vpop.f32.mrb[1].mxu1 }
 0x188   : > { %v1559_v25 = vpop.f32.mrb[2].mxu1  ;;  %v1596_v26 = vpop.f32.mrb[0].mxu0 }
 0x189   : > { %v1638_v27 = vadd.f32 %v1596_v26, %v1546_v20  ;;  %v756_v28 = vpop.f32.mrb[3].mxu1  ;;  %v1198_v29 = vpop.f32.mrb[1].mxu0 }
 0x18a   : > { %v1639_v30 = vadd.f32 %v1198_v29, %v637_v21 }
 0x18b   : > { %v1246_v31 = vadd.f32 %v1638_v27, %v1233_v24 }
 0x18c   : > { %v1245_v32 = vadd.f32 %v1639_v30, %v1228_v22  ;;  %v1599_v33 = vpop.f32.mrb[2].mxu0 }
 0x18d   : > { %v1250_v34 = vmax.f32 %v1246_v31, 0.0  ;;  %v1640_v35 = vadd.f32 %v1599_v33, %v1559_v25  ;;  %v1208_v36 = vpop.f32.mrb[3].mxu0 }
 0x18e   : > { %v1249_v37 = vmax.f32 %v1245_v32, 0.0  ;;  %v1641_v39 = vadd.f32 %v1208_v36, %v756_v28  ;;  %1264 = sbr.rel (!%p1803_p5) target bundleno = 413 (0x19d), region = 74 }
 0x18f   : > { %1255 = vst.msk [vmem:[%s227_s17 + $0x8] sm:$0xff] %vm1253_vm1, %v1250_v34  ;;  %v1248_v40 = vadd.f32 %v1640_v35, %v1243_v38 }
 0x190   : > { %1254 = vst.msk [vmem:[%s227_s17] sm:$0xff] %vm1253_vm1, %v1249_v37  ;;  %v1247_v41 = vadd.f32 %v1641_v39, %v1238_v23 }
 0x191   : > { %v1252_v42 = vmax.f32 %v1248_v40, 0.0 }
 0x192   : > { %v1251_v43 = vmax.f32 %v1247_v41, 0.0 }
 0x193   : > { %1257 = vst.msk [vmem:[%s227_s17 + $0x18] sm:$0xff] %vm1253_vm1, %v1252_v42 }
 0x194   : > { %1256 = vst.msk [vmem:[%s227_s17 + $0x10] sm:$0xff] %vm1253_vm1, %v1251_v43 }
 0x196   : > { %v1302_v45 = vld [vmem:[%s227_s17 + $0x8] sm:$0xff] }
 0x197   : > { %v1300_v44 = vld [vmem:[%s227_s17] sm:$0xff]  ;;  %1303 = vst [vmem:[%s1266_s21 + $0x10] sm:$0xff] %v1302_v45 }
 0x198   : > { %1301 = vst [vmem:[%s1266_s21] sm:$0xff] %v1300_v44 }
 0x19a   : > { %v1306_v47 = vld [vmem:[%s227_s17 + $0x18] sm:$0xff] }
 0x19b   : > { %v1304_v46 = vld [vmem:[%s227_s17 + $0x10] sm:$0xff]  ;;  %1307 = vst [vmem:[%s1266_s21 + $0x30] sm:$0xff] %v1306_v47 }
 0x19c   : > { %1305 = vst [vmem:[%s1266_s21 + $0x20] sm:$0xff] %v1304_v46 }
 0x19d PF: > { %p10_p10 = scmp.ge.s32.totalorder %s1790_s16, 4   ;;  %s2012_s12 = smov %s1743_s13 }
 0x19e   : > { %s2013_s13 = smov %s1801_s19  ;;  %s2014_s14 = smov %s1790_s16 }
 0x19f   :  { %12 = sbr.rel (!%p10_p10) target bundleno = 2 (0x2), region = 154 }

// kernel: parsing_wrapper_forward.11
= control target key start
LH: loop header
LB: loop body
LE: loop exit
PB: predicated region body
PF: predicated region fallthrough
CT: control target
= control target key end

     0   :  { %vm47_vm0 = vcmask 130048   ;;  %v194_v3 = vmov 0   ;;  %s278_s1 = inlined_call_operand.vmem [shape: f32[16,128], index: 1, kind: input, shape index: {}]   ;;  %s279_s0 = inlined_call_operand.vmem [shape: f32[32,16], index: 0, kind: input, shape index: {}]   ;;  %s280_s2 = inlined_call_operand.vmem [shape: f32[32,1], index: 2, kind: input, shape index: {}]   ;;  %s281_s3 = inlined_call_operand.vmem [shape: f32[32,128], index: 3, kind: input, shape index: {}]   ;;  %s282_s4 = inlined_call_operand.vmem [shape: f32[32,128], index: 4, kind: output, shape index: {}]  }
   0x1   :  { %v21_v0 = vld [vmem:[%s278_s1] sm:$0xff]  ;;  %v22_v1 = vld [vmem:[%s278_s1 + $0x8] sm:$0xff]  ;;  %193 = vset.pattern.permute.xlu1 %v194_v3  ;;  %192 = vset.pattern.permute.xlu0 %v194_v3  ;;  %v19_v5 = vld [vmem:[%s279_s0 + $0x10] sm:$0xff] }
   0x2   :  { %v17_v2 = vld [vmem:[%s279_s0] sm:$0xff]  ;;  %v185_v4 = vpack.c.bf16 %v22_v1, %v21_v0  ;;  %182 = vmatprep.mubr.msk.f32.mxu1 %vm47_vm0, %v19_v5  ;;  %v25_v6 = vld [vmem:[%s280_s2 + $0x10] sm:$0xff]  ;;  %v18_v8 = vld [vmem:[%s279_s0 + $0x8] sm:$0xff] }
   0x3   :  { %179 = vmatprep.mubr.msk.f32.mxu0 %vm47_vm0, %v17_v2  ;;  %v23_v7 = vld [vmem:[%s280_s2] sm:$0xff]  ;;  %v20_v9 = vld [vmem:[%s279_s0 + $0x18] sm:$0xff]  ;;  %39 = vperm.xlu1 %193, %v25_v6   ;;  %v24_v11 = vld [vmem:[%s280_s2 + $0x8] sm:$0xff] }
   0x4   :  { %186 = vmatprep.subr.bf16.mxu0 %v185_v4  ;;  %189 = vmatprep.subr.bf16.mxu1 %v185_v4  ;;  %v26_v10 = vld [vmem:[%s280_s2 + $0x18] sm:$0xff]  ;;  %v146_v17 = vld [vmem:[%s281_s3 + $0x8] sm:$0xff]  ;;  %v145_v23 = vld [vmem:[%s281_s3] sm:$0xff] }
   0x5   :  { %188 = vmatpush3.bf16.msra.mxu0 %v185_v4  ;;  %190 = vmatpush3.bf16.msra.mxu1 %v185_v4  ;;  %v148_v19 = vld [vmem:[%s281_s3 + $0x18] sm:$0xff]  ;;  %v147_v25 = vld [vmem:[%s281_s3 + $0x10] sm:$0xff] }
   0x6   :  { %29 = vperm.xlu0 %192, %v23_v7  }
   0x7   :  { %44 = vperm.xlu1 %193, %v26_v10  }
   0x8   :  { %180 = vmatmul.mubr.msk.f32.vlgmr.msra.gmra.mrb[0].mxu0 %vm47_vm0, %v18_v8  ;;  %183 = vmatmul.mubr.msk.f32.vlgmr.msra.gmra.mrb[0].mxu1 %vm47_vm0, %v20_v9 }
   0xa   :  { %34 = vperm.xlu0 %192, %v24_v11  }
  0x82   :  { %v40_v12 = vpop.permute.xlu1 %39 }
  0x85   :  { %v30_v13 = vpop.permute.xlu0 %29 }
  0x86   :  { %v45_v14 = vpop.permute.xlu1 %44 }
  0x89   :  { %v35_v15 = vpop.permute.xlu0 %34 }
  0xdb   :  { %v181_v16 = vpop.f32.mrb[0].mxu0  ;;  %v184_v18 = vpop.f32.mrb[0].mxu1 }
  0xdc   :  { %v132_v20 = vadd.f32 %v181_v16, %v35_v15  ;;  %v142_v21 = vadd.f32 %v184_v18, %v45_v14  ;;  %v126_v22 = vpop.f32.mrb[1].mxu0  ;;  %v136_v24 = vpop.f32.mrb[1].mxu1 }
  0xdd   :  { %v127_v26 = vadd.f32 %v126_v22, %v30_v13  ;;  %v137_v27 = vadd.f32 %v136_v24, %v40_v12 }
  0xde   :  { %v150_v28 = vadd.f32 %v146_v17, %v132_v20  ;;  %v152_v29 = vadd.f32 %v148_v19, %v142_v21 }
  0xdf   :  { %v149_v30 = vadd.f32 %v145_v23, %v127_v26  ;;  %v151_v31 = vadd.f32 %v147_v25, %v137_v27 }
  0xe0   :  { %v154_v32 = vmax.f32 %v150_v28, 0.0  ;;  %v156_v33 = vmax.f32 %v152_v29, 0.0 }
  0xe1   :  { %v153_v34 = vmax.f32 %v149_v30, 0.0  ;;  %v155_v35 = vmax.f32 %v151_v31, 0.0 }
  0xe2   :  { %158 = vst [vmem:[%s282_s4 + $0x8] sm:$0xff] %v154_v32  ;;  %160 = vst [vmem:[%s282_s4 + $0x18] sm:$0xff] %v156_v33 }
  0xe3   :  { %157 = vst [vmem:[%s282_s4] sm:$0xff] %v153_v34  ;;  %159 = vst [vmem:[%s282_s4 + $0x10] sm:$0xff] %v155_v35 }

// kernel: parsing_wrapper_forward.10
= control target key start
LH: loop header
LB: loop body
LE: loop exit
PB: predicated region body
PF: predicated region fallthrough
CT: control target
= control target key end

     0   :  { %8 = vsyncpa [#allocation3], 0  ;;  %s1488_s12 = smov 0   ;;  %s1490_s13 = smov 0   ;;  %s1598_s0 = inlined_call_operand.hbm [shape: f32[9,16,16], index: 0, kind: input, shape index: {}]   ;;  %s1599_s1 = inlined_call_operand.vmem [shape: f32[1,2,16,42], index: 1, kind: input, shape index: {}]   ;;  %s1600_s2 = inlined_call_operand.vmem [shape: f32[16,1], index: 2, kind: input, shape index: {}]   ;;  %s1601_s3 = inlined_call_operand.vmem [shape: f32[16,256], index: 3, kind: output, shape index: {}]  }
   0x1   :  { %s1492_s14 = smov 0  }
   0x2 LB: > { %s1501_s15 = sadd.s32 4294967295, %s1454_s14   ;;  %s1503_s16 = sadd.s32 1, %s1454_s14   ;;  %s1454_s14 = sphi %s1492_s14, %s1613_s14   ;;  %s1450_s13 = sphi %s1490_s13, %s1612_s13   ;;  %s1446_s12 = sphi %s1488_s12, %s1611_s12  }
   0x3   : > { %s86_s17 = ssub.s32 %s1454_s14, %s1503_s16  ;;  %s89_s18 = sadd.s32 1, %s1450_s13 }
   0x4   : > { %p87_p0 = scmp.eq.s32.totalorder %s86_s17, 0  ;;  %p99_p1 = scmp.ne.s32.totalorder %s1450_s13, %s1446_s12 }
   0x5   : > { %p100_p2 = scmp.eq.s32.totalorder %s1501_s15, 1  ;;  %p1130_p3 = scmp.ge.s32.totalorder %s1454_s14, 1 }
   0x6   : > { %s1511_s19 = scalar_select %p87_p0, %s1450_s13, %s89_s18  }
   0x7   : > { %p1513_p4 = por %p100_p2, %p99_p1  ;;  %p113_p5 = scmp.lt.s32.totalorder %s1454_s14, 3 }
   0x8   : > { %p1602_p6 = scmp.eq.s32.totalorder %s1501_s15, 0  ;;  %s1456_s22 = smov [#allocation2]  }
   0x9   : > { %s1604_s20 = scalar_select %p1513_p4, 1, 0 }
   0xa   : > { %p1518_p7 = pnand %p1130_p3, %p113_p5  ;;  %s125_s23 = sshll.u32 %s1456_s22, 4  ;;  %s126_s23 = int_to_ptr.vmem [resolvable:$true] %s125_s23 }
   0xb   : > { %s1400_s27 = scalar_lea.hbm %s1598_s0, 2304 }
   0xc   : > { %s1605_s21 = scalar_select %p1518_p7, 1, 0 }
   0xd   : > { %p1316_p8 = pneg %p1518_p7  ;;  %p1401_p10 = scmp.ne.s32.totalorder %s1598_s0, %s1400_s27 }
   0xe   : > { %p1407_p0 = scmp.lt.u32.totalorder %s1400_s27, %s1598_s0 }
   0xf   : > { %p1526_p9 = pnand %p1602_p6, %p1316_p8 }
  0x11   : > { %p1402_p11 = pneg %p1526_p9 }
  0x13   : > { %p1403_p12 = pnand %p1402_p11, %p1401_p10 }
  0x15   : > { %p1404_p13 = pneg %p1403_p12 }
  0x17   : > { %p1409_p1 = pnand %p1407_p0, %p1404_p13 }
  0x19   : > { %1412 = shalt.err (!%p1409_p1)
}
  0x1a   : > { %s1413_s5 = scalar_lea.vmem %s126_s23, 2304  ;;  %p1421_p8 = scmp.lt.s32.totalorder %s126_s23, %s126_s23 }
  0x1b   : > { %p1414_p2 = scmp.ne.s32.totalorder %s126_s23, %s1413_s5  ;;  %p1422_p6 = scmp.lt.s32.totalorder %s1413_s5, %s1413_s5 }
  0x1d   : > { %p1416_p3 = pnand %p1414_p2, %p1402_p11  ;;  %p1423_p4 = por %p1422_p6, %p1421_p8 }
  0x1f   : > { %p1417_p5 = pneg %p1416_p3 }
  0x21   : > { %p1424_p7 = pnand %p1423_p4, %p1417_p5 }
  0x23   : > { %1427 = shalt.err (!%p1424_p7)
}
  0x24   : > { %s1457_s6 = smov 128   ;;  %s1458_s7 = smov 8  }
  0x25   : > { %1319 = dma.hbm_to_vmem [thread:$0]  (!%p1526_p9), %s1598_s0, 2304, %s126_s23, [#allocation3], %s1457_s6, %s1457_s6, %s1458_s7  }
  0x26   : > { %p1607_p10 = scmp.ne.s32.totalorder %s1605_s21, 0 }
  0x27   : > { %p1608_p12 = scmp.eq.s32.totalorder (!%p1607_p10), %s1501_s15, 0 }
  0x28   : > { %152 = sbr.rel (%p1607_p10) target bundleno = 440 (0x1b8), region = 32 }
  0x2f   : > { %1441 = dma.done.wait (%p1608_p12), [#allocation3], 2304   ;;  %p1609_p11 = pmov %p1608_p12 }
  0x30   : > { %p175_p4 = scmp.lt.s32.totalorder %s1501_s15, 1  ;;  %vm195_vm0 = vcmask 130048   ;;  %v543_v2 = vld [vmem:[#allocation2 + $0x40] sm:$0xff]  ;;  %v185_v4 = vld [vmem:[#allocation2 + $0x10] sm:$0xff]  ;;  %s1459_s21 = smov 121   ;;  %v1003_v6 = vld [vmem:[%s1600_s2 + $0x8] sm:$0xff] }
  0x31   : > { %1443 = vsyncadd (%p1609_p11), [#allocation3], 4294964992  ;;  %1229 = vmatprep.mubr.msk.f32.mxu0 %vm195_vm0, %v543_v2  ;;  %1201 = vmatprep.mubr.msk.f32.mxu1 %vm195_vm0, %v185_v4  ;;  %s1460_s22 = smov 120   ;;  %s1461_s23 = smov 127   ;;  %v1002_v7 = vld [vmem:[%s1600_s2] sm:$0xff]  ;;  %v1467_v8 = vmov 0  }
  0x32   : > { %s176_s10 = scalar_select %p175_p4, %s1501_s15, 1  ;;  %1399 = vset.pattern.permute.xlu1 %v1467_v8  ;;  %1398 = vset.pattern.permute.xlu0 %v1467_v8  ;;  %v544_v23 = vld [vmem:[#allocation2 + $0x48] sm:$0xff]  ;;  %v635_v26 = vld [vmem:[#allocation2 + $0x50] sm:$0xff]  ;;  %v186_v31 = vld [vmem:[#allocation2 + $0x18] sm:$0xff]  ;;  %vm1018_vm1 = vcmask 195584  }
  0x33   : > { %s1462_s24 = smov 116   ;;  %s1463_s25 = smov 115   ;;  %v182_v35 = vld [vmem:[#allocation2] sm:$0xff]  ;;  %v636_v37 = vld [vmem:[#allocation2 + $0x58] sm:$0xff]  ;;  %v183_v43 = vld [vmem:[#allocation2 + $0x8] sm:$0xff] }
  0x34   : > { %s1160_s11 = sshll.u32 %s176_s10, 4  ;;  %s1464_s26 = smov 126   ;;  %v727_v39 = vld [vmem:[#allocation2 + $0x60] sm:$0xff]  ;;  %v728_v48 = vld [vmem:[#allocation2 + $0x68] sm:$0xff]  ;;  %v819_v50 = vld [vmem:[#allocation2 + $0x70] sm:$0xff] }
  0x35   : > { %s179_s18 = scalar_lea.vmem %s1599_s1, %s1160_s11  ;;  %s1465_s27 = smov 114   ;;  %v359_v47 = vld [vmem:[#allocation2 + $0x20] sm:$0xff]  ;;  %v360_v51 = vld [vmem:[#allocation2 + $0x28] sm:$0xff]  ;;  %v451_v52 = vld [vmem:[#allocation2 + $0x30] sm:$0xff] }
  0x36   : > { %v180_v0 = vld [vmem:[%s179_s18] sm:$0xff]  ;;  %v181_v1 = vld [vmem:[%s179_s18 + $0x8] sm:$0xff]  ;;  %s1466_s28 = smov 122   ;;  %v820_v53 = vld [vmem:[#allocation2 + $0x78] sm:$0xff]  ;;  %s172_s6 = sand.u32 1, %s1446_s12  }
  0x37   : > { %v1358_v3 = vpack.i.bf16 %v181_v1, %v180_v0  ;;  %v1264_v5 = vpack.c.bf16 %v181_v1, %v180_v0  ;;  %v911_v54 = vld [vmem:[#allocation2 + $0x80] sm:$0xff]  ;;  %v452_v55 = vld [vmem:[#allocation2 + $0x38] sm:$0xff]  ;;  %v912_v56 = vld [vmem:[#allocation2 + $0x88] sm:$0xff]  ;;  %s1135_s7 = sshll.u32 %s172_s6, 4  ;;  %p1610_p6 = scmp.ne.s32.totalorder %s1604_s20, 0 }
  0x38   : > { %s174_s8 = scalar_lea.vmem [#allocation4], %s1135_s7  ;;  %s1157_s12 = sshll.u32 (%p1610_p6), %s1501_s15, 3 }
  0x39   : > { %1359 = vrot.lane.b32.xlu0 %v1358_v3, %s1459_s21  ;;  %1369 = vrot.lane.b32.xlu1 %v1358_v3, %s1460_s22  ;;  %s1029_s11 = scalar_lea.vmem (%p1610_p6), %s1601_s3, %s1157_s12 }
  0x3d   : > { %1364 = vrot.lane.b32.xlu0 %v1358_v3, %s1461_s23  ;;  %1374 = vrot.lane.b32.xlu1 %v1358_v3, %s1462_s24 }
  0x41   : > { %1384 = vrot.lane.b32.xlu1 %v1358_v3, %s1463_s25  ;;  %1379 = vrot.lane.b32.xlu0 %v1358_v3, %s1464_s26 }
  0x45   : > { %1394 = vrot.lane.b32.xlu1 %v1358_v3, %s1465_s27  ;;  %1389 = vrot.lane.b32.xlu0 %v1358_v3, %s1466_s28 }
  0x49   : > { %1011 = vperm.xlu1 %1399, %v1003_v6   ;;  %1006 = vperm.xlu0 %1398, %v1002_v7  }
  0xab   : > { %v1360_v9 = vpop.permute.xlu0 %1359  ;;  %v1370_v10 = vpop.permute.xlu1 %1369 }
  0xac   : > { %v1362_v11 = vunpack.i.h.bf16 %v1360_v9  ;;  %v1361_v12 = vunpack.i.l.bf16 %v1360_v9  ;;  %v1372_v13 = vunpack.i.h.bf16 %v1370_v10  ;;  %v1371_v14 = vunpack.i.l.bf16 %v1370_v10 }
  0xae   : > { %v1280_v15 = vpack.c.bf16 %v1372_v13, %v1371_v14  ;;  %v1276_v16 = vpack.c.bf16 %v1362_v11, %v1361_v12 }
  0xaf   : > { %v1365_v17 = vpop.permute.xlu0 %1364  ;;  %v1375_v18 = vpop.permute.xlu1 %1374 }
  0xb0   : > { %v1367_v19 = vunpack.i.h.bf16 %v1365_v17  ;;  %v1366_v20 = vunpack.i.l.bf16 %v1365_v17  ;;  %1277 = vmatprep.subr.bf16.mxu0 %v1276_v16  ;;  %v1377_v21 = vunpack.i.h.bf16 %v1375_v18  ;;  %v1376_v22 = vunpack.i.l.bf16 %v1375_v18 }
  0xb1   : > { %1279 = vmatpush3.bf16.msra.mxu0 %v1276_v16 }
  0xb2   : > { %v1260_v24 = vpack.c.bf16 %v1367_v19, %v1366_v20  ;;  %1281 = vmatprep.subr.bf16.mxu0 %v1280_v15  ;;  %v1284_v25 = vpack.c.bf16 %v1377_v21, %v1376_v22 }
  0xb3   : > { %v1385_v27 = vpop.permute.xlu1 %1384  ;;  %v1380_v28 = vpop.permute.xlu0 %1379 }
  0xb4   : > { %1261 = vmatprep.subr.bf16.mxu1 %v1260_v24  ;;  %1230 = vmatmul.mubr.msk.f32.vlgmr.msra.gmra.mrb[0].mxu0 %vm195_vm0, %v544_v23  ;;  %v1382_v29 = vunpack.i.h.bf16 %v1380_v28  ;;  %v1381_v30 = vunpack.i.l.bf16 %v1380_v28  ;;  %v1387_v32 = vunpack.i.h.bf16 %v1385_v27  ;;  %v1386_v33 = vunpack.i.l.bf16 %v1385_v27 }
  0xb5   : > { %1263 = vmatpush3.bf16.msra.mxu1 %v1260_v24  ;;  %1283 = vmatpush3.bf16.msra.mxu0 %v1280_v15 }
  0xb6   : > { %1236 = vmatprep.mubr.msk.f32.mxu0 %vm195_vm0, %v635_v26  ;;  %1285 = vmatprep.subr.bf16.mxu0 %v1284_v25  ;;  %v1268_v34 = vpack.c.bf16 %v1382_v29, %v1381_v30  ;;  %v1288_v38 = vpack.c.bf16 %v1387_v32, %v1386_v33 }
  0xb7   : > { %1265 = vmatprep.subr.bf16.mxu1 %v1264_v5  ;;  %v1390_v36 = vpop.permute.xlu0 %1389  ;;  %v1395_v42 = vpop.permute.xlu1 %1394 }
  0xb8   : > { %1202 = vmatmul.mubr.msk.f32.vlgmr.msra.gmra.mrb[0].mxu1 %vm195_vm0, %v186_v31  ;;  %v1392_v40 = vunpack.i.h.bf16 %v1390_v36  ;;  %v1391_v41 = vunpack.i.l.bf16 %v1390_v36  ;;  %v1397_v44 = vunpack.i.h.bf16 %v1395_v42  ;;  %v1396_v45 = vunpack.i.l.bf16 %v1395_v42 }
  0xb9   : > { %1267 = vmatpush3.bf16.msra.mxu1 %v1264_v5  ;;  %1208 = vmatprep.mubr.msk.f32.mxu1 %vm195_vm0, %v182_v35 }
  0xba   : > { %1269 = vmatprep.subr.bf16.mxu1 %v1268_v34  ;;  %v1272_v46 = vpack.c.bf16 %v1392_v40, %v1391_v41  ;;  %v1292_v49 = vpack.c.bf16 %v1397_v44, %v1396_v45 }
  0xbc   : > { %1237 = vmatmul.mubr.msk.f32.vlgmr.msra.gmra.mrb[0].mxu0 %vm195_vm0, %v636_v37 }
  0xbd   : > { %1287 = vmatpush3.bf16.msra.mxu0 %v1284_v25  ;;  %1243 = vmatprep.mubr.msk.f32.mxu0 %vm195_vm0, %v727_v39 }
  0xbe   : > { %1289 = vmatprep.subr.bf16.mxu0 %v1288_v38 }
  0xc0   : > { %1209 = vmatmul.mubr.msk.f32.vlgmr.msra.gmra.mrb[0].mxu1 %vm195_vm0, %v183_v43 }
  0xc1   : > { %1271 = vmatpush3.bf16.msra.mxu1 %v1268_v34  ;;  %1215 = vmatprep.mubr.msk.f32.mxu1 %vm195_vm0, %v359_v47 }
  0xc2   : > { %1273 = vmatprep.subr.bf16.mxu1 %v1272_v46 }
  0xc4   : > { %1244 = vmatmul.mubr.msk.f32.vlgmr.msra.gmra.mrb[0].mxu0 %vm195_vm0, %v728_v48 }
  0xc5   : > { %1291 = vmatpush3.bf16.msra.mxu0 %v1288_v38  ;;  %1250 = vmatprep.mubr.msk.f32.mxu0 %vm195_vm0, %v819_v50 }
  0xc6   : > { %1293 = vmatprep.subr.bf16.mxu0 %v1292_v49 }
  0xc8   : > { %1216 = vmatmul.mubr.msk.f32.vlgmr.msra.gmra.mrb[0].mxu1 %vm195_vm0, %v360_v51  ;;  %v1012_v60 = vpop.permute.xlu1 %1011  ;;  %v1007_v63 = vpop.permute.xlu0 %1006 }
  0xc9   : > { %1275 = vmatpush3.bf16.msra.mxu1 %v1272_v46  ;;  %1222 = vmatprep.mubr.msk.f32.mxu1 %vm195_vm0, %v451_v52 }
  0xcc   : > { %1251 = vmatmul.mubr.msk.f32.vlgmr.msra.gmra.mrb[0].mxu0 %vm195_vm0, %v820_v53 }
  0xcd   : > { %1295 = vmatpush3.bf16.msra.mxu0 %v1292_v49  ;;  %1257 = vmatprep.mubr.msk.f32.mxu0 %vm195_vm0, %v911_v54 }
  0xd0   : > { %1223 = vmatmul.mubr.msk.f32.vlgmr.msra.gmra.mrb[0].mxu1 %vm195_vm0, %v452_v55 }
  0xd4   : > { %1258 = vmatmul.mubr.msk.f32.vlgmr.msra.gmra.mrb[0].mxu0 %vm195_vm0, %v912_v56 }
 0x1a3   : > { %v1224_v57 = vpop.f32.mrb[0].mxu1 }
 0x1a4   : > { %v531_v58 = vpop.f32.mrb[1].mxu1 }
 0x1a7   : > { %v1259_v59 = vpop.f32.mrb[0].mxu0 }
 0x1a8   : > { %v1296_v61 = vadd.f32 %v1259_v59, %v1224_v57  ;;  %v991_v62 = vpop.f32.mrb[1].mxu0 }
 0x1a9   : > { %v1297_v0 = vadd.f32 %v991_v62, %v531_v58  ;;  %1027 = sbr.rel (!%p1610_p6) target bundleno = 440 (0x1b8), region = 40 }
 0x1aa   : > { %v1015_v1 = vadd.f32 %v1296_v61, %v1012_v60 }
 0x1ab   : > { %v1014_v2 = vadd.f32 %v1297_v0, %v1007_v63 }
 0x1ac   : > { %v1017_v3 = vmax.f32 %v1015_v1, 0.0 }
 0x1ad   : > { %v1016_v4 = vmax.f32 %v1014_v2, 0.0 }
 0x1ae   : > { %1020 = vst.msk [vmem:[%s174_s8 + $0x8] sm:$0xff] %vm1018_vm1, %v1017_v3 }
 0x1af   : > { %1019 = vst.msk [vmem:[%s174_s8] sm:$0xff] %vm1018_vm1, %v1016_v4 }
 0x1b5   : > { %v1061_v6 = vld [vmem:[%s174_s8 + $0x8] sm:$0xff] }
 0x1b6   : > { %v1059_v5 = vld [vmem:[%s174_s8] sm:$0xff]  ;;  %1062 = vst [vmem:[%s1029_s11 + $0x10] sm:$0xff] %v1061_v6 }
 0x1b7   : > { %1060 = vst [vmem:[%s1029_s11] sm:$0xff] %v1059_v5 }
 0x1b8 PF: > { %p11_p7 = scmp.ge.s32.totalorder %s1503_s16, 4   ;;  %s1611_s12 = smov %s1450_s13 }
 0x1b9   : > { %s1612_s13 = smov %s1511_s19  ;;  %s1613_s14 = smov %s1503_s16 }
 0x1ba   :  { %13 = sbr.rel (!%p11_p7) target bundleno = 2 (0x2), region = 113 }
 0x1c1   :  { %1078 = vsyncpa [#allocation3], 1 }
 0x1c2   :  { %1080 = vsyncpa [#allocation3 + $0x1], 1 }

// kernel: parsing_wrapper_forward.12
= control target key start
LH: loop header
LB: loop body
LE: loop exit
PB: predicated region body
PF: predicated region fallthrough
CT: control target
= control target key end

     0   :  { %v179_v0 = vmov 0.0|0.0   ;;  %vm180_vm0 = vmmov 0   ;;  %v181_v6 = vmov 0.0   ;;  %v182_v7 = vmov 0   ;;  %s245_s1 = inlined_call_operand.vmem [shape: f32[32,128], index: 1, kind: input, shape index: {}]   ;;  %s246_s2 = inlined_call_operand.vmem [shape: f32[22,1], index: 2, kind: input, shape index: {}]   ;;  %s247_s0 = inlined_call_operand.vmem [shape: f32[22,32], index: 0, kind: input, shape index: {}]   ;;  %s248_s3 = inlined_call_operand.vmem [shape: f32[22,128], index: 3, kind: output, shape index: {}]  }
   0x1   :  { %163 = vmatprep.subr.bf16.mxu0 %v179_v0  ;;  %169 = vmatprep.subr.bf16.mxu1 %v179_v0  ;;  %v17_v1 = vld [vmem:[%s245_s1] sm:$0xff]  ;;  %v18_v2 = vld [vmem:[%s245_s1 + $0x8] sm:$0xff]  ;;  %v19_v3 = vld [vmem:[%s245_s1 + $0x10] sm:$0xff]  ;;  %vm39_vm1 = vcmask 261120  }
   0x2   :  { %v164_v4 = vpack.c.bf16 %v18_v2, %v17_v1  ;;  %v20_v5 = vld [vmem:[%s245_s1 + $0x18] sm:$0xff]  ;;  %154 = vmatprep.mubr.msk.f32.mxu0 %vm180_vm0, %v181_v6  ;;  %157 = vmatprep.mubr.msk.f32.mxu1 %vm180_vm0, %v181_v6  ;;  %v21_v8 = vld [vmem:[%s246_s2] sm:$0xff]  ;;  %v23_v10 = vld [vmem:[%s246_s2 + $0x10] sm:$0x3f] }
   0x3   :  { %177 = vset.pattern.permute.xlu0 %v182_v7  ;;  %178 = vset.pattern.permute.xlu1 %v182_v7  ;;  %v167_v9 = vpack.c.bf16 %v20_v5, %v19_v3  ;;  %v22_v11 = vld [vmem:[%s246_s2 + $0x8] sm:$0xff]  ;;  %v14_v12 = vld [vmem:[%s247_s0] sm:$0xff]  ;;  %v16_v14 = vld [vmem:[%s247_s0 + $0x10] sm:$0x3f] }
   0x4   :  { %165 = vmatpush3.bf16.msra.mxu0 %v164_v4  ;;  %171 = vmatpush3.bf16.msra.mxu1 %v164_v4  ;;  %v15_v13 = vld [vmem:[%s247_s0 + $0x8] sm:$0xff] }
   0x5   :  { %166 = vmatprep.subr.bf16.mxu0 %v179_v0  ;;  %170 = vmatprep.subr.bf16.mxu1 %v179_v0 }
   0x6   :  { %26 = vperm.xlu0 %177, %v21_v8   ;;  %36 = vperm.xlu1 %178, %v23_v10  }
   0x8   :  { %168 = vmatpush3.bf16.msra.mxu0 %v167_v9  ;;  %172 = vmatpush3.bf16.msra.mxu1 %v167_v9 }
   0xa   :  { %31 = vperm.xlu0 %177, %v22_v11  }
   0xb   :  { %155 = vmatmul.mubr.msk.f32.vlgmr.msra.gmra.mrb[0].mxu0 %vm39_vm1, %v14_v12  ;;  %158 = vmatmul.mubr.msk.f32.vlgmr.msra.gmra.mrb[0].mxu1 %vm39_vm1, %v15_v13 }
   0xc   :  { %160 = vmatprep.mubr.msk.f32.mxu1 %vm180_vm0, %v181_v6 }
   0xf   :  { %161 = vmatmul.mubr.msk.f32.gmra.mrb[2].mxu1 %vm39_vm1, %v16_v14 }
  0x85   :  { %v27_v15 = vpop.permute.xlu0 %26  ;;  %v37_v23 = vpop.permute.xlu1 %36 }
  0x89   :  { %v32_v16 = vpop.permute.xlu0 %31 }
  0xde   :  { %v115_v17 = vpop.f32.mrb[0].mxu0  ;;  %v120_v18 = vpop.f32.mrb[0].mxu1 }
  0xdf   :  { %v116_v19 = vadd.f32 %v115_v17, %v27_v15  ;;  %v121_v20 = vadd.f32 %v120_v18, %v32_v16  ;;  %v159_v21 = vpop.f32.mrb[1].mxu1  ;;  %v156_v22 = vpop.f32.mrb[1].mxu0 }
  0xe1   :  { %129 = vst [vmem:[%s248_s3] sm:$0xff] %v116_v19  ;;  %130 = vst [vmem:[%s248_s3 + $0x8] sm:$0xff] %v121_v20 }
  0xe2   :  { %v125_v24 = vpop.f32.mrb[2].mxu1 }
  0xe3   :  { %v126_v25 = vadd.f32 %v125_v24, %v37_v23  ;;  %v162_v26 = vpop.f32.mrb[3].mxu1 }
  0xe5   :  { %131 = vst [vmem:[%s248_s3 + $0x10] sm:$0x3f] %v126_v25 }

// kernel: parsing_wrapper_forward.13
= control target key start
LH: loop header
LB: loop body
LE: loop exit
PB: predicated region body
PF: predicated region fallthrough
CT: control target
= control target key end

     0   :  { %8 = vsyncpa [#allocation4], 0  ;;  %s16950_s0 = inlined_call_operand.vmem [shape: f32[20,2,4,4], index: 0, kind: input, shape index: {}]   ;;  %s16951_s1 = inlined_call_operand.hbm [shape: f32[473,4], index: 1, kind: input, shape index: {}]   ;;  %s16952_s2 = inlined_call_operand.hbm [shape: f32[4,473], index: 2, kind: input, shape index: {}]   ;;  %s16953_s3 = inlined_call_operand.hbm [shape: f32[2,20,473,473], index: 3, kind: output, shape index: {}]  }
   0x1   :  { %9 = vsyncpa [#allocation7], 0 }
   0x2   :  { %10 = vsyncpa [#allocation5], 0 }
   0x3   :  { %12 = vsyncpa [#allocation5 + $0x1], 0  ;;  %s12846_s12 = smov 0   ;;  %s12848_s13 = smov 0  }
   0x4   :  { %s12850_s14 = smov 0   ;;  %s12852_s15 = smov 0  }
   0x5   :  { %s12854_s16 = smov 0   ;;  %s12856_s17 = smov 0  }
   0x6   :  { %s12858_s18 = smov 0   ;;  %s12860_s19 = smov 0  }
   0x7 LB: > { %s9875_s20 = sadd.s32 4294967295, %s12816_s19   ;;  %s9876_s21 = sadd.s32 4294967294, %s12816_s19   ;;  %s12816_s19 = sphi %s12860_s19, %s18_s19   ;;  %s12812_s18 = sphi %s12858_s18, %s16983_s18   ;;  %s12808_s17 = sphi %s12856_s17, %s16982_s17   ;;  %s12804_s16 = sphi %s12854_s16, %s16981_s16   ;;  %s12800_s15 = sphi %s12852_s15, %s16980_s15   ;;  %s12796_s14 = sphi %s12850_s14, %s16979_s14   ;;  %s12792_s13 = sphi %s12848_s13, %s16978_s13   ;;  %s12788_s12 = sphi %s12846_s12, %s16977_s12  }
   0x8   : > { %s27_s22 = sadd.s32 1, %s12808_s17  ;;  %s30_s23 = sadd.s32 1, %s12812_s18 }
   0x9   : > { %p28_p0 = scmp.ge.s32.totalorder %s27_s22, 2  ;;  %s39_s24 = sadd.s32 1, %s12796_s14 }
   0xa   : > { %p46_p1 = scmp.ne.s32.totalorder %s12796_s14, %s12792_s13  ;;  %p47_p2 = scmp.eq.s32.totalorder %s12816_s19, 0 }
   0xb   : > { %s16985_s22 = smov (%p28_p0, %s27_s22), 0  ;;  %s16987_s23 = smov (!%p28_p0, %s30_s23), %s12812_s18 }
   0xc   : > { %16960 = sst [smem:[#allocation12_spill]] %s16985_s22  ;;  %s35_s25 = ssub.s32 %s12808_s17, %s16985_s22 }
   0xd   : > { %p12899_p3 = por %p47_p2, %p46_p1  ;;  %p32_p4 = scmp.ge.s32.totalorder %s16987_s23, 4 }
   0xe   : > { %p120_p5 = scmp.eq.s32.totalorder %s9875_s20, 7  ;;  %p125_p6 = scmp.ne.s32.totalorder %s12792_s13, %s12788_s12 }
   0xf   : > { %s16961_s26 = scalar_select %p12899_p3, 1, 0 }
  0x10   : > { %p126_p7 = scmp.eq.s32.totalorder %s9876_s21, 7  ;;  %s16989_s23 = smov (%p32_p4, %s16987_s23), 0 }
  0x11   : > { %16962 = sst [smem:[#allocation13_spill]] %s16989_s23  ;;  %p12907_p8 = por %p120_p5, %p46_p1 }
  0x12   : > { %p12911_p9 = por %p126_p7, %p125_p6  ;;  %s34_s29 = ssub.s32 %s12812_s18, %s16989_s23 }
  0x13   : > { %s16963_s27 = scalar_select %p12907_p8, 1, 0 }
  0x14   : > { %s16964_s28 = scalar_select %p12911_p9, 1, 0 }
  0x15   : > { %p9877_p10 = scmp.ge.s32.totalorder %s12816_s19, 1  ;;  %s36_s30 = sor.u32 %s35_s25, %s34_s29 }
  0x16   : > { %p133_p11 = scmp.lt.s32.totalorder %s12816_s19, 9  ;;  %p37_p12 = scmp.eq.s32.totalorder %s36_s30, 0 }
  0x17   : > { %p12923_p0 = scmp.eq.s32.totalorder %s9875_s20, 0  ;;  %s12818_s7 = smov [#allocation3]  }
  0x18   : > { %p12919_p13 = pnand %p9877_p10, %p133_p11  ;;  %s145_s8 = sshll.u32 %s12818_s7, 4  ;;  %s146_s8 = int_to_ptr.vmem [resolvable:$true] %s145_s8 }
  0x19   : > { %s16966_s5 = scalar_select %p12923_p0, 1, 0 }
  0x1a   : > { %s16965_s4 = scalar_select %p12919_p13, 1, 0 }
  0x1b   : > { %s12928_s6 = scalar_select %p37_p12, %s12796_s14, %s39_s24  }
  0x1c   : > { %p12561_p1 = pneg %p12919_p13  ;;  %s12819_s10 = smov [#allocation6]  }
  0x1d   : > { %16967 = sst [smem:[#allocation14_spill]] %s12928_s6  ;;  %s159_s11 = sshll.u32 %s12819_s10, 4  ;;  %s160_s11 = int_to_ptr.vmem [resolvable:$true] %s159_s11 }
  0x1e   : > { %p12934_p2 = pnand %p12923_p0, %p12561_p1  ;;  %s12658_s25 = scalar_lea.hbm %s16951_s1, 7680 }
  0x1f   : > { %p12659_p4 = scmp.ne.s32.totalorder %s16951_s1, %s12658_s25  ;;  %p12665_p10 = scmp.lt.u32.totalorder %s12658_s25, %s16951_s1 }
  0x20   : > { %p12660_p5 = pneg %p12934_p2 }
  0x22   : > { %p12661_p6 = pnand %p12660_p5, %p12659_p4 }
  0x24   : > { %p12662_p7 = pneg %p12661_p6 }
  0x26   : > { %p12667_p11 = pnand %p12665_p10, %p12662_p7 }
  0x28   : > { %12670 = shalt.err (!%p12667_p11)
}
  0x29   : > { %s12671_s10 = scalar_lea.vmem %s146_s8, 7680  ;;  %p12679_p8 = scmp.lt.s32.totalorder %s146_s8, %s146_s8 }
  0x2a   : > { %p12672_p12 = scmp.ne.s32.totalorder %s146_s8, %s12671_s10  ;;  %p12680_p0 = scmp.lt.s32.totalorder %s12671_s10, %s12671_s10 }
  0x2c   : > { %p12674_p1 = pnand %p12672_p12, %p12660_p5  ;;  %p12681_p13 = por %p12680_p0, %p12679_p8 }
  0x2e   : > { %p12675_p9 = pneg %p12674_p1 }
  0x30   : > { %p12682_p3 = pnand %p12681_p13, %p12675_p9 }
  0x32   : > { %12685 = shalt.err (!%p12682_p3)
}
  0x33   : > { %s12820_s20 = smov 128   ;;  %s12821_s21 = smov 8  }
  0x34   : > { %12564 = dma.hbm_to_vmem [thread:$0]  (!%p12934_p2), %s16951_s1, 7680, %s146_s8, [#allocation4], %s12820_s20, %s12820_s20, %s12821_s21  }
  0x35   : > { %s12686_s7 = scalar_lea.hbm %s16952_s2, 256 }
  0x36   : > { %p12687_p8 = scmp.ne.s32.totalorder %s16952_s2, %s12686_s7  ;;  %p12693_p13 = scmp.lt.u32.totalorder %s12686_s7, %s16952_s2 }
  0x38   : > { %p12689_p3 = pnand %p12687_p8, %p12660_p5 }
  0x3a   : > { %p12690_p9 = pneg %p12689_p3 }
  0x3c   : > { %p12695_p0 = pnand %p12693_p13, %p12690_p9 }
  0x3e   : > { %12698 = shalt.err (!%p12695_p0)
}
  0x3f   : > { %s12699_s8 = scalar_lea.vmem %s160_s11, 256  ;;  %p12707_p10 = scmp.lt.s32.totalorder %s160_s11, %s160_s11 }
  0x40   : > { %p12700_p4 = scmp.ne.s32.totalorder %s160_s11, %s12699_s8  ;;  %p12708_p11 = scmp.lt.s32.totalorder %s12699_s8, %s12699_s8 }
  0x42   : > { %p12702_p6 = pnand %p12700_p4, %p12660_p5  ;;  %p12709_p12 = por %p12708_p11, %p12707_p10 }
  0x44   : > { %p12703_p7 = pneg %p12702_p6 }
  0x46   : > { %p12710_p1 = pnand %p12709_p12, %p12703_p7 }
  0x48   : > { %12713 = shalt.err (!%p12710_p1)
}
  0x49   : > { %12567 = dma.hbm_to_vmem [thread:$0]  (!%p12934_p2), %s16952_s2, 256, %s160_s11, [#allocation7]  }
  0x4a   : > { %p9880_p8 = scmp.ge.s32.totalorder %s12816_s19, 8 }
  0x4b   : > { %p16969_p3 = scmp.ne.s32.totalorder (!%p9880_p8), %s16961_s26, 0 }
  0x4c   : > { %166 = sbr.rel (%p9880_p8) target bundleno = 93 (0x5d), region = 24 }
  0x53   : > { %169 = sbr.rel (!%p16969_p3) target bundleno = 93 (0x5d), region = 28  ;;  %s171_s6 = sand.u32 (%p16969_p3), 1, %s12796_s14  }
  0x54   : > { %s11778_s20 = smul.u32 (%p16969_p3), 10, %s12812_s18 }
  0x55   : > { %s12546_s21 = smul.u32 (%p16969_p3), 20, %s171_s6 }
  0x56   : > { %s176_s25 = sadd.s32 (%p16969_p3), %s12808_s17, %s11778_s20 }
  0x57   : > { %s9882_s24 = sshll.u32 (%p16969_p3), %s176_s25, 2  ;;  %s173_s11 = scalar_lea.vmem (%p16969_p3), [#allocation2], %s12546_s21 }
  0x58   : > { %s178_s30 = scalar_lea.vmem (%p16969_p3), %s16950_s0, %s9882_s24 }
  0x59   : > { %v194_v0 = vld [vmem:[%s178_s30] sm:$0xf] (%p16969_p3)  ;;  %v196_v1 = vld [vmem:[%s178_s30 + $0x8] sm:$0xf] (%p16969_p3)  ;;  %v198_v2 = vld [vmem:[%s178_s30 + $0x10] sm:$0xf] (%p16969_p3) }
  0x5a   : > { %195 = vst [vmem:[%s173_s11] sm:$0xf] %v194_v0  ;;  %197 = vst [vmem:[%s173_s11 + $0x4] sm:$0xf] %v196_v1  ;;  %v200_v3 = vld [vmem:[%s178_s30 + $0x18] sm:$0xf] }
  0x5b   : > { %199 = vst [vmem:[%s173_s11 + $0x8] sm:$0xf] %v198_v2  ;;  %v202_v4 = vld [vmem:[%s178_s30 + $0x20] sm:$0xf]  ;;  %201 = vst [vmem:[%s173_s11 + $0xc] sm:$0xf] %v200_v3 }
  0x5c   : > { %203 = vst [vmem:[%s173_s11 + $0x10] sm:$0xf] %v202_v4 }
  0x5d PF: > { %p16970_p2 = scmp.ne.s32.totalorder %s16965_s4, 0 }
  0x5e   : > { %s12992_s26 = sand.u32 (!%p16970_p2), 1, %s12792_s13   ;;  %p16971_p5 = scmp.ne.s32.totalorder (!%p16970_p2), %s16966_s5, 0 }
  0x5f   : > { %239 = sbr.rel (%p16970_p2) target bundleno = 2597 (0xa25), region = 69 }
  0x60   : > { %s12547_s7 = smul.u32 (!%p16970_p2), 20, %s12992_s26 }
  0x62   : > { %s12995_s10 = scalar_lea.vmem (!%p16970_p2), [#allocation2], %s12547_s7 }
  0x66   : > { %12775 = dma.done.wait (%p16971_p5), [#allocation4], 7680  }
  0x67   : > { %12777 = vsyncadd (%p16971_p5), [#allocation4], 4294959616 }
  0x68   : > { %12779 = dma.done.wait (%p16971_p5), [#allocation7], 256  }
  0x69   : > { %12781 = vsyncadd (%p16971_p5), [#allocation7], 4294967040  ;;  %vm517_vm0 = vcmask 1043456   ;;  %vm336_vm1 = vcmask 31744   ;;  %v335_v5 = vld [vmem:[%s12995_s10] sm:$0xf] }
  0x6a   : > { %v13006_v6 = vld [vmem:[#allocation3] sm:$0xff]  ;;  %v13008_v7 = vld [vmem:[#allocation3 + $0x8] sm:$0xff]  ;;  %12084 = vmatprep.subr.msk.mxu0 %vm517_vm0, %v335_v5  ;;  %v277_v8 = vld [vmem:[#allocation3 + $0x10] sm:$0xff]  ;;  %12544 = vmatprep.subr.msk.mxu1 %vm517_vm0, %v335_v5  ;;  %s12548_s4 = smul.u32 9600, %s12992_s26  ;;  %vm1933_vm2 = vcmask 728064   ;;  %vm2170_vm3 = vcmask 720896  }
  0x6b   : > { %12086 = vmatprep.mubr.msk.f32.mxu0 %vm336_vm1, %v13006_v6  ;;  %12085 = vmatpush3.msk.msra.mxu0 %vm517_vm0, %v335_v5  ;;  %v278_v9 = vld [vmem:[#allocation3 + $0x18] sm:$0xff]  ;;  %v279_v10 = vld [vmem:[#allocation3 + $0x20] sm:$0xff]  ;;  %v280_v11 = vld [vmem:[#allocation3 + $0x28] sm:$0xff]  ;;  %s12576_s8 = smul.u32 1200, %s12804_s16  ;;  %s9753_s25 = scalar_lea.sflag [#allocation5], %s12992_s26 }
  0x6c   : > { %12087 = vmatmul.mubr.msk.f32.vlgmr.msra.gmra.mrb[0].mxu0 %vm336_vm1, %v13008_v7  ;;  %12545 = vmatpush3.msk.msra.mxu1 %vm517_vm0, %v335_v5  ;;  %v281_v12 = vld [vmem:[#allocation3 + $0x30] sm:$0xff]  ;;  %v306_v14 = vld [vmem:[#allocation3 + $0xf8] sm:$0xff]  ;;  %v307_v15 = vld [vmem:[#allocation3 + $0x100] sm:$0xff]  ;;  %s13464_s5 = scalar_lea.vmem [#allocation8], %s12548_s4  ;;  %s12550_s22 = smul.u32 4800, %s12800_s15 }
  0x6d   : > { %12089 = vmatprep.mubr.msk.f32.mxu0 %vm336_vm1, %v277_v8  ;;  %v305_v13 = vld [vmem:[#allocation3 + $0xf0] sm:$0xff]  ;;  %v282_v16 = vld [vmem:[#allocation3 + $0x38] sm:$0xff]  ;;  %v283_v17 = vld [vmem:[#allocation3 + $0x40] sm:$0xff]  ;;  %v12822_v8 = vmov 0.0   ;;  %s9769_s23 = sshll.u32 %s13464_s5, 4  ;;  %p16972_p13 = scmp.ne.s32.totalorder %s16963_s27, 0  ;;  %s16891_s23 = int_to_ptr.vmem [resolvable:$true] %s9769_s23 }
  0x6e   : > { %12131 = vmatprep.mubr.msk.f32.mxu1 %vm336_vm1, %v305_v13  ;;  %v308_v18 = vld [vmem:[#allocation3 + $0x108] sm:$0xff]  ;;  %v13026_v19 = vld [vmem:[#allocation6] sm:$0xff]  ;;  %v309_v20 = vld [vmem:[#allocation3 + $0x110] sm:$0xff]  ;;  %s9766_s16 = sadd.s32 %s12576_s8, %s12550_s22  ;;  %s12714_s24 = scalar_lea.vmem %s16891_s23, 153600 }
  0x6f   : > { %12132 = vmatmul.mubr.msk.f32.vlgmr.msra.gmra.mrb[0].mxu1 %vm336_vm1, %v306_v14  ;;  %v13030_v21 = vcombine.high %v13026_v19, %v13026_v19  ;;  %v284_v22 = vld [vmem:[#allocation3 + $0x48] sm:$0xff]  ;;  %v285_v23 = vld [vmem:[#allocation3 + $0x50] sm:$0xff]  ;;  %v310_v24 = vld [vmem:[#allocation3 + $0x118] sm:$0xff]  ;;  %s11775_s15 = sshll.u32 %s9766_s16, 7  ;;  %p12715_p9 = scmp.ne.s32.totalorder %s16891_s23, %s12714_s24 }
  0x70   : > { %12090 = vmatmul.mubr.msk.f32.gmra.mrb[2].mxu0 %vm336_vm1, %v278_v9  ;;  %12134 = vmatprep.mubr.msk.f32.mxu1 %vm336_vm1, %v307_v15  ;;  %v311_v25 = vld [vmem:[#allocation3 + $0x120] sm:$0xff]  ;;  %v286_v26 = vld [vmem:[#allocation3 + $0x58] sm:$0xff]  ;;  %v312_v28 = vld [vmem:[#allocation3 + $0x128] sm:$0xff]  ;;  %s16889_s21 = scalar_lea.hbm %s16953_s3, %s11775_s15  ;;  %s12823_s29 = smov [#allocation8]  }
  0x71   : > { %12092 = vmatprep.mubr.msk.f32.mxu0 %vm336_vm1, %v279_v10  ;;  %9947 = vmatprep.subr.msk.mxu1 %vm517_vm0, %v13030_v21  ;;  %v287_v27 = vld [vmem:[#allocation3 + $0x60] sm:$0xff]  ;;  %v313_v29 = vld [vmem:[#allocation3 + $0x130] sm:$0xff]  ;;  %v288_v30 = vld [vmem:[#allocation3 + $0x68] sm:$0xff]  ;;  %p12716_p0 = pnand %p12715_p9, %p16972_p13  ;;  %s12718_s9 = sshll.u32 %s12823_s29, 4  ;;  %s12719_s9 = int_to_ptr.vmem [resolvable:$false] %s12718_s9 }
  0x72   : > { %9948 = vmatpush1.msk.msra.mxu1 %vm517_vm0, %v13026_v19  ;;  %v289_v31 = vld [vmem:[#allocation3 + $0x70] sm:$0xff]  ;;  %v314_v32 = vld [vmem:[#allocation3 + $0x138] sm:$0xff]  ;;  %v315_v33 = vld [vmem:[#allocation3 + $0x140] sm:$0xff]  ;;  %s12720_s30 = scalar_lea.vmem %s12719_s9, 307200  ;;  %p12721_p6 = scmp.lt.s32.totalorder %s16891_s23, %s12719_s9 }
  0x73   : > { %12135 = vmatmul.mubr.msk.f32.gmra.mrb[2].mxu1 %vm336_vm1, %v308_v18  ;;  %v290_v34 = vld [vmem:[#allocation3 + $0x78] sm:$0xff]  ;;  %v291_v35 = vld [vmem:[#allocation3 + $0x80] sm:$0xff]  ;;  %v316_v36 = vld [vmem:[#allocation3 + $0x148] sm:$0xff]  ;;  %p12717_p4 = pneg %p12716_p0  ;;  %p12722_p7 = scmp.lt.s32.totalorder %s12720_s30, %s12714_s24 }
  0x74   : > { %12093 = vmatmul.mubr.msk.f32.gmra.mrb[4].mxu0 %vm336_vm1, %v280_v11  ;;  %12137 = vmatprep.mubr.msk.f32.mxu1 %vm336_vm1, %v309_v20  ;;  %v317_v37 = vld [vmem:[#allocation3 + $0x150] sm:$0xff]  ;;  %v292_v38 = vld [vmem:[#allocation3 + $0x88] sm:$0xff]  ;;  %v318_v40 = vld [vmem:[#allocation3 + $0x158] sm:$0xff] }
  0x75   : > { %12095 = vmatprep.mubr.msk.f32.mxu0 %vm336_vm1, %v281_v12  ;;  %v293_v39 = vld [vmem:[#allocation3 + $0x90] sm:$0xff]  ;;  %v319_v41 = vld [vmem:[#allocation3 + $0x160] sm:$0xff]  ;;  %v294_v42 = vld [vmem:[#allocation3 + $0x98] sm:$0xff]  ;;  %p12723_p10 = por %p12722_p7, %p12721_p6 }
  0x76   : > { %v295_v43 = vld [vmem:[#allocation3 + $0xa0] sm:$0xff]  ;;  %v320_v44 = vld [vmem:[#allocation3 + $0x168] sm:$0xff]  ;;  %v321_v45 = vld [vmem:[#allocation3 + $0x170] sm:$0xff] }
  0x77   : > { %12138 = vmatmul.mubr.msk.f32.gmra.mrb[4].mxu1 %vm336_vm1, %v310_v24  ;;  %v296_v46 = vld [vmem:[#allocation3 + $0xa8] sm:$0xff]  ;;  %v297_v47 = vld [vmem:[#allocation3 + $0xb0] sm:$0xff]  ;;  %v322_v48 = vld [vmem:[#allocation3 + $0x178] sm:$0xff]  ;;  %p12724_p11 = pnand %p12723_p10, %p12717_p4 }
  0x78   : > { %12096 = vmatmul.mubr.msk.f32.gmra.mrb[6].mxu0 %vm336_vm1, %v282_v16  ;;  %12140 = vmatprep.mubr.msk.f32.mxu1 %vm336_vm1, %v311_v25  ;;  %v323_v49 = vld [vmem:[#allocation3 + $0x180] sm:$0xff]  ;;  %v298_v50 = vld [vmem:[#allocation3 + $0xb8] sm:$0xff]  ;;  %v324_v52 = vld [vmem:[#allocation3 + $0x188] sm:$0xff] }
  0x79   : > { %12098 = vmatprep.mubr.msk.f32.mxu0 %vm336_vm1, %v283_v17  ;;  %v299_v51 = vld [vmem:[#allocation3 + $0xc0] sm:$0xff]  ;;  %v325_v53 = vld [vmem:[#allocation3 + $0x190] sm:$0xff]  ;;  %v300_v54 = vld [vmem:[#allocation3 + $0xc8] sm:$0xff] }
  0x7a   : > { %v301_v55 = vld [vmem:[#allocation3 + $0xd0] sm:$0xff]  ;;  %v326_v56 = vld [vmem:[#allocation3 + $0x198] sm:$0xff]  ;;  %v327_v57 = vld [vmem:[#allocation3 + $0x1a0] sm:$0xff] }
  0x7b   : > { %12141 = vmatmul.mubr.msk.f32.gmra.mrb[6].mxu1 %vm336_vm1, %v312_v28  ;;  %v302_v58 = vld [vmem:[#allocation3 + $0xd8] sm:$0xff]  ;;  %v303_v59 = vld [vmem:[#allocation3 + $0xe0] sm:$0xff]  ;;  %v328_v60 = vld [vmem:[#allocation3 + $0x1a8] sm:$0xff] }
  0x7c   : > { %12099 = vmatmul.mubr.msk.f32.gmra.mrb[8].mxu0 %vm336_vm1, %v284_v22  ;;  %12143 = vmatprep.mubr.msk.f32.mxu1 %vm336_vm1, %v313_v29  ;;  %v329_v61 = vld [vmem:[#allocation3 + $0x1b0] sm:$0xff]  ;;  %v304_v62 = vld [vmem:[#allocation3 + $0xe8] sm:$0xff]  ;;  %v330_v63 = vld [vmem:[#allocation3 + $0x1b8] sm:$0xff] }
  0x7d   : > { %12101 = vmatprep.mubr.msk.f32.mxu0 %vm336_vm1, %v285_v23  ;;  %v331_v0 = vld [vmem:[#allocation3 + $0x1c0] sm:$0xff]  ;;  %v332_v1 = vld [vmem:[#allocation3 + $0x1c8] sm:$0xff]  ;;  %v333_v2 = vld [vmem:[#allocation3 + $0x1d0] sm:$0xff] }
  0x7e   : > { %v334_v3 = vld [vmem:[#allocation3 + $0x1d8] sm:$0x1]  ;;  %v887_v4 = vld [vmem:[#allocation6 + $0x8] sm:$0xff]  ;;  %v10071_v9 = vld [vmem:[%s12995_s10 + $0x4] sm:$0xf] }
  0x7f   : > { %12144 = vmatmul.mubr.msk.f32.gmra.mrb[8].mxu1 %vm336_vm1, %v314_v32  ;;  %v891_v5 = vcombine.high %v887_v4, %v887_v4  ;;  %12176 = vmatprep.subr.msk.mxu1 %vm517_vm0, %v10071_v9 }
  0x80   : > { %12102 = vmatmul.mubr.msk.f32.gmra.mrb[10].mxu0 %vm336_vm1, %v286_v26  ;;  %12146 = vmatprep.mubr.msk.f32.mxu1 %vm336_vm1, %v315_v33 }
  0x81   : > { %12104 = vmatprep.mubr.msk.f32.mxu0 %vm336_vm1, %v287_v27  ;;  %10009 = vmatprep.subr.msk.mxu0 %vm517_vm0, %v891_v5 }
  0x82   : > { %10010 = vmatpush1.msk.msra.mxu0 %vm517_vm0, %v887_v4 }
  0x83   : > { %12147 = vmatmul.mubr.msk.f32.gmra.mrb[10].mxu1 %vm336_vm1, %v316_v36  ;;  %10133 = vmatprep.subr.msk.mxu0 %vm517_vm0, %v13030_v21 }
  0x84   : > { %12105 = vmatmul.mubr.msk.f32.gmra.mrb[12].mxu0 %vm336_vm1, %v288_v30  ;;  %12149 = vmatprep.mubr.msk.f32.mxu1 %vm336_vm1, %v317_v37 }
  0x85   : > { %12107 = vmatprep.mubr.msk.f32.mxu0 %vm336_vm1, %v289_v31 }
  0x87   : > { %12150 = vmatmul.mubr.msk.f32.gmra.mrb[12].mxu1 %vm336_vm1, %v318_v40 }
  0x88   : > { %12108 = vmatmul.mubr.msk.f32.gmra.mrb[14].mxu0 %vm336_vm1, %v290_v34  ;;  %12152 = vmatprep.mubr.msk.f32.mxu1 %vm336_vm1, %v319_v41 }
  0x89   : > { %12110 = vmatprep.mubr.msk.f32.mxu0 %vm336_vm1, %v291_v35 }
  0x8b   : > { %12153 = vmatmul.mubr.msk.f32.gmra.mrb[14].mxu1 %vm336_vm1, %v320_v44 }
  0x8c   : > { %12111 = vmatmul.mubr.msk.f32.gmra.mrb[16].mxu0 %vm336_vm1, %v292_v38  ;;  %12155 = vmatprep.mubr.msk.f32.mxu1 %vm336_vm1, %v321_v45 }
  0x8d   : > { %12113 = vmatprep.mubr.msk.f32.mxu0 %vm336_vm1, %v293_v39 }
  0x8f   : > { %12156 = vmatmul.mubr.msk.f32.gmra.mrb[16].mxu1 %vm336_vm1, %v322_v48 }
  0x90   : > { %12114 = vmatmul.mubr.msk.f32.gmra.mrb[18].mxu0 %vm336_vm1, %v294_v42  ;;  %12158 = vmatprep.mubr.msk.f32.mxu1 %vm336_vm1, %v323_v49 }
  0x91   : > { %12116 = vmatprep.mubr.msk.f32.mxu0 %vm336_vm1, %v295_v43 }
  0x93   : > { %12159 = vmatmul.mubr.msk.f32.gmra.mrb[18].mxu1 %vm336_vm1, %v324_v52 }
  0x94   : > { %12117 = vmatmul.mubr.msk.f32.gmra.mrb[20].mxu0 %vm336_vm1, %v296_v46  ;;  %12161 = vmatprep.mubr.msk.f32.mxu1 %vm336_vm1, %v325_v53 }
  0x95   : > { %12119 = vmatprep.mubr.msk.f32.mxu0 %vm336_vm1, %v297_v47 }
  0x97   : > { %12162 = vmatmul.mubr.msk.f32.gmra.mrb[20].mxu1 %vm336_vm1, %v326_v56 }
  0x98   : > { %12120 = vmatmul.mubr.msk.f32.gmra.mrb[22].mxu0 %vm336_vm1, %v298_v50  ;;  %12164 = vmatprep.mubr.msk.f32.mxu1 %vm336_vm1, %v327_v57 }
  0x99   : > { %12122 = vmatprep.mubr.msk.f32.mxu0 %vm336_vm1, %v299_v51 }
  0x9b   : > { %12165 = vmatmul.mubr.msk.f32.gmra.mrb[22].mxu1 %vm336_vm1, %v328_v60 }
  0x9c   : > { %12123 = vmatmul.mubr.msk.f32.gmra.mrb[24].mxu0 %vm336_vm1, %v300_v54  ;;  %12167 = vmatprep.mubr.msk.f32.mxu1 %vm336_vm1, %v329_v61 }
  0x9d   : > { %12125 = vmatprep.mubr.msk.f32.mxu0 %vm336_vm1, %v301_v55 }
  0x9f   : > { %12168 = vmatmul.mubr.msk.f32.gmra.mrb[24].mxu1 %vm336_vm1, %v330_v63 }
  0xa0   : > { %12126 = vmatmul.mubr.msk.f32.gmra.mrb[26].mxu0 %vm336_vm1, %v302_v58  ;;  %12170 = vmatprep.mubr.msk.f32.mxu1 %vm336_vm1, %v331_v0 }
  0xa1   : > { %12128 = vmatprep.mubr.msk.f32.mxu0 %vm336_vm1, %v303_v59 }
  0xa3   : > { %12171 = vmatmul.mubr.msk.f32.gmra.mrb[26].mxu1 %vm336_vm1, %v332_v1 }
  0xa4   : > { %12129 = vmatmul.mubr.msk.f32.gmra.mrb[28].mxu0 %vm336_vm1, %v304_v62  ;;  %12173 = vmatprep.mubr.msk.f32.mxu1 %vm336_vm1, %v333_v2 }
  0xa5   : > { %1569 = vmatprep.mubr.f32.mxu0 %v12822_v8 }
  0xa7   : > { %12174 = vmatmul.mubr.msk.f32.gmra.mrb[28].mxu1 %vm336_vm1, %v334_v3 }
  0xa8   : > { %1144 = vmatprep.mubr.f32.mxu1 %v12822_v8 }
 0x13f   : > { %v12088_v10 = vpop.f32.mrb[0].mxu0 }
 0x140   : > { %v587_v11 = vpop.f32.mrb[1].mxu0 }
 0x141   : > { %9949 = vmatmul.mubr.msk.f32.vlgmr.msra.gmra.mrb[30].mxu1 %vm336_vm1, %v587_v11  ;;  %10011 = vmatmul.mubr.msk.f32.vlgmr.msra.gmra.mrb[30].mxu0 %vm336_vm1, %v587_v11 }
 0x142   : > { %12177 = vmatpush3.msk.msra.mxu1 %vm517_vm0, %v10071_v9  ;;  %1150 = vmatprep.mubr.f32.mxu1 %v12822_v8  ;;  %v13105_v16 = vpop.f32.mrb[0].mxu1 }
 0x143   : > { %1575 = vmatprep.mubr.f32.mxu0 %v12822_v8  ;;  %v12091_v12 = vpop.f32.mrb[2].mxu0  ;;  %10134 = vmatpush1.msk.msra.mxu0 %vm517_vm0, %v13026_v19  ;;  %v13109_v17 = vpop.f32.mrb[1].mxu1 }
 0x144   : > { %v597_v13 = vpop.f32.mrb[3].mxu0 }
 0x145   : > { %9950 = vmatmul.mubr.msk.f32.gmra.mrb[32].mxu1 %vm336_vm1, %v12088_v10  ;;  %10012 = vmatmul.mubr.msk.f32.gmra.mrb[32].mxu0 %vm336_vm1, %v12088_v10 }
 0x146   : > { %1156 = vmatprep.mubr.f32.mxu1 %v12822_v8  ;;  %1581 = vmatprep.mubr.f32.mxu0 %v12822_v8  ;;  %v13113_v20 = vpop.f32.mrb[2].mxu1 }
 0x147   : > { %v12094_v14 = vpop.f32.mrb[4].mxu0  ;;  %v13117_v21 = vpop.f32.mrb[3].mxu1 }
 0x148   : > { %v607_v15 = vpop.f32.mrb[5].mxu0 }
 0x149   : > { %9951 = vmatmul.mubr.msk.f32.gmra.mrb[34].mxu1 %vm336_vm1, %v597_v13  ;;  %10013 = vmatmul.mubr.msk.f32.gmra.mrb[34].mxu0 %vm336_vm1, %v597_v13 }
 0x14a   : > { %1162 = vmatprep.mubr.f32.mxu1 %v12822_v8  ;;  %1587 = vmatprep.mubr.f32.mxu0 %v12822_v8  ;;  %v13121_v24 = vpop.f32.mrb[4].mxu1 }
 0x14b   : > { %v12097_v18 = vpop.f32.mrb[6].mxu0  ;;  %v13125_v25 = vpop.f32.mrb[5].mxu1 }
 0x14c   : > { %v617_v19 = vpop.f32.mrb[7].mxu0 }
 0x14d   : > { %9952 = vmatmul.mubr.msk.f32.gmra.mrb[36].mxu1 %vm336_vm1, %v12091_v12  ;;  %10014 = vmatmul.mubr.msk.f32.gmra.mrb[36].mxu0 %vm336_vm1, %v12091_v12 }
 0x14e   : > { %1168 = vmatprep.mubr.f32.mxu1 %v12822_v8  ;;  %1593 = vmatprep.mubr.f32.mxu0 %v12822_v8  ;;  %v13129_v28 = vpop.f32.mrb[6].mxu1 }
 0x14f   : > { %v12100_v22 = vpop.f32.mrb[8].mxu0  ;;  %v13133_v29 = vpop.f32.mrb[7].mxu1 }
 0x150   : > { %v627_v23 = vpop.f32.mrb[9].mxu0 }
 0x151   : > { %9953 = vmatmul.mubr.msk.f32.gmra.mrb[38].mxu1 %vm336_vm1, %v607_v15  ;;  %10015 = vmatmul.mubr.msk.f32.gmra.mrb[38].mxu0 %vm336_vm1, %v607_v15 }
 0x152   : > { %1174 = vmatprep.mubr.f32.mxu1 %v12822_v8  ;;  %1599 = vmatprep.mubr.f32.mxu0 %v12822_v8  ;;  %v13137_v32 = vpop.f32.mrb[8].mxu1 }
 0x153   : > { %v12103_v26 = vpop.f32.mrb[10].mxu0  ;;  %v13141_v33 = vpop.f32.mrb[9].mxu1 }
 0x154   : > { %v637_v27 = vpop.f32.mrb[11].mxu0 }
 0x155   : > { %9954 = vmatmul.mubr.msk.f32.gmra.mrb[40].mxu1 %vm336_vm1, %v12094_v14  ;;  %10016 = vmatmul.mubr.msk.f32.gmra.mrb[40].mxu0 %vm336_vm1, %v12094_v14 }
 0x156   : > { %1180 = vmatprep.mubr.f32.mxu1 %v12822_v8  ;;  %1605 = vmatprep.mubr.f32.mxu0 %v12822_v8  ;;  %v13147_v36 = vpop.f32.mrb[10].mxu1 }
 0x157   : > { %v12106_v30 = vpop.f32.mrb[12].mxu0  ;;  %v13151_v37 = vpop.f32.mrb[11].mxu1 }
 0x158   : > { %v647_v31 = vpop.f32.mrb[13].mxu0 }
 0x159   : > { %9955 = vmatmul.mubr.msk.f32.gmra.mrb[42].mxu1 %vm336_vm1, %v617_v19  ;;  %10017 = vmatmul.mubr.msk.f32.gmra.mrb[42].mxu0 %vm336_vm1, %v617_v19 }
 0x15a   : > { %1186 = vmatprep.mubr.f32.mxu1 %v12822_v8  ;;  %1611 = vmatprep.mubr.f32.mxu0 %v12822_v8  ;;  %v13163_v42 = vpop.f32.mrb[12].mxu1 }
 0x15b   : > { %v12109_v34 = vpop.f32.mrb[14].mxu0  ;;  %v13167_v43 = vpop.f32.mrb[13].mxu1 }
 0x15c   : > { %v657_v35 = vpop.f32.mrb[15].mxu0 }
 0x15d   : > { %9956 = vmatmul.mubr.msk.f32.gmra.mrb[44].mxu1 %vm336_vm1, %v12097_v18  ;;  %10018 = vmatmul.mubr.msk.f32.gmra.mrb[44].mxu0 %vm336_vm1, %v12097_v18 }
 0x15e   : > { %1192 = vmatprep.mubr.f32.mxu1 %v12822_v8  ;;  %1617 = vmatprep.mubr.f32.mxu0 %v12822_v8  ;;  %v13183_v48 = vpop.f32.mrb[14].mxu1 }
 0x15f   : > { %v13153_v38 = vpop.f32.mrb[16].mxu0  ;;  %v13187_v49 = vpop.f32.mrb[15].mxu1 }
 0x160   : > { %v667_v39 = vpop.f32.mrb[17].mxu0 }
 0x161   : > { %9957 = vmatmul.mubr.msk.f32.gmra.mrb[46].mxu1 %vm336_vm1, %v627_v23  ;;  %10019 = vmatmul.mubr.msk.f32.gmra.mrb[46].mxu0 %vm336_vm1, %v627_v23 }
 0x162   : > { %1198 = vmatprep.mubr.f32.mxu1 %v12822_v8  ;;  %1623 = vmatprep.mubr.f32.mxu0 %v12822_v8  ;;  %v13203_v54 = vpop.f32.mrb[16].mxu1 }
 0x163   : > { %v13159_v40 = vpop.f32.mrb[18].mxu0  ;;  %v13207_v55 = vpop.f32.mrb[17].mxu1 }
 0x164   : > { %v677_v41 = vpop.f32.mrb[19].mxu0 }
 0x165   : > { %9958 = vmatmul.mubr.msk.f32.gmra.mrb[48].mxu1 %vm336_vm1, %v12100_v22  ;;  %10020 = vmatmul.mubr.msk.f32.gmra.mrb[48].mxu0 %vm336_vm1, %v12100_v22 }
 0x166   : > { %1204 = vmatprep.mubr.f32.mxu1 %v12822_v8  ;;  %1629 = vmatprep.mubr.f32.mxu0 %v12822_v8  ;;  %v13215_v58 = vpop.f32.mrb[18].mxu1 }
 0x167   : > { %v13169_v44 = vpop.f32.mrb[20].mxu0  ;;  %v13219_v59 = vpop.f32.mrb[19].mxu1 }
 0x168   : > { %v13171_v45 = vpop.f32.mrb[21].mxu0 }
 0x169   : > { %9959 = vmatmul.mubr.msk.f32.gmra.mrb[50].mxu1 %vm336_vm1, %v637_v27  ;;  %10021 = vmatmul.mubr.msk.f32.gmra.mrb[50].mxu0 %vm336_vm1, %v637_v27 }
 0x16a   : > { %1210 = vmatprep.mubr.f32.mxu1 %v12822_v8  ;;  %1635 = vmatprep.mubr.f32.mxu0 %v12822_v8  ;;  %v13223_v60 = vpop.f32.mrb[20].mxu1 }
 0x16b   : > { %v13177_v46 = vpop.f32.mrb[22].mxu0  ;;  %v13227_v61 = vpop.f32.mrb[21].mxu1 }
 0x16c   : > { %v13179_v47 = vpop.f32.mrb[23].mxu0 }
 0x16d   : > { %9960 = vmatmul.mubr.msk.f32.gmra.mrb[52].mxu1 %vm336_vm1, %v12103_v26  ;;  %10022 = vmatmul.mubr.msk.f32.gmra.mrb[52].mxu0 %vm336_vm1, %v12103_v26 }
 0x16e   : > { %1216 = vmatprep.mubr.f32.mxu1 %v12822_v8  ;;  %1641 = vmatprep.mubr.f32.mxu0 %v12822_v8  ;;  %v13231_v62 = vpop.f32.mrb[22].mxu1 }
 0x16f   : > { %v13189_v50 = vpop.f32.mrb[24].mxu0  ;;  %v13235_v63 = vpop.f32.mrb[23].mxu1 }
 0x170   : > { %v13191_v51 = vpop.f32.mrb[25].mxu0 }
 0x171   : > { %9961 = vmatmul.mubr.msk.f32.gmra.mrb[54].mxu1 %vm336_vm1, %v647_v31  ;;  %10023 = vmatmul.mubr.msk.f32.gmra.mrb[54].mxu0 %vm336_vm1, %v647_v31 }
 0x172   : > { %1222 = vmatprep.mubr.f32.mxu1 %v12822_v8  ;;  %1647 = vmatprep.mubr.f32.mxu0 %v12822_v8  ;;  %v13241_v0 = vpop.f32.mrb[24].mxu1 }
 0x173   : > { %v13197_v52 = vpop.f32.mrb[26].mxu0  ;;  %v13245_v1 = vpop.f32.mrb[25].mxu1 }
 0x174   : > { %v13199_v53 = vpop.f32.mrb[27].mxu0 }
 0x175   : > { %9962 = vmatmul.mubr.msk.f32.gmra.mrb[56].mxu1 %vm336_vm1, %v12106_v30  ;;  %10024 = vmatmul.mubr.msk.f32.gmra.mrb[56].mxu0 %vm336_vm1, %v12106_v30 }
 0x176   : > { %1228 = vmatprep.mubr.f32.mxu1 %v12822_v8  ;;  %1653 = vmatprep.mubr.f32.mxu0 %v12822_v8  ;;  %v13249_v2 = vpop.f32.mrb[26].mxu1 }
 0x177   : > { %v13209_v56 = vpop.f32.mrb[28].mxu0  ;;  %v13253_v3 = vpop.f32.mrb[27].mxu1 }
 0x178   : > { %v13211_v57 = vpop.f32.mrb[29].mxu0 }
 0x179   : > { %9963 = vmatmul.mubr.msk.f32.gmra.mrb[58].mxu1 %vm336_vm1, %v657_v35  ;;  %10025 = vmatmul.mubr.msk.f32.gmra.mrb[58].mxu0 %vm336_vm1, %v657_v35 }
 0x17a   : > { %1234 = vmatprep.mubr.f32.mxu1 %v12822_v8  ;;  %1659 = vmatprep.mubr.f32.mxu0 %v12822_v8  ;;  %v13259_v4 = vpop.f32.mrb[28].mxu1 }
 0x17b   : > { %v13263_v5 = vpop.f32.mrb[29].mxu1 }
 0x17d   : > { %9964 = vmatmul.mubr.msk.f32.gmra.mrb[60].mxu1 %vm336_vm1, %v12109_v34  ;;  %10026 = vmatmul.mubr.msk.f32.gmra.mrb[60].mxu0 %vm336_vm1, %v12109_v34 }
 0x17e   : > { %1240 = vmatprep.mubr.f32.mxu1 %v12822_v8  ;;  %1665 = vmatprep.mubr.f32.mxu0 %v12822_v8 }
 0x181   : > { %9965 = vmatmul.mubr.msk.f32.gmra.mrb[62].mxu1 %vm336_vm1, %v667_v39  ;;  %10027 = vmatmul.mubr.msk.f32.gmra.mrb[62].mxu0 %vm336_vm1, %v667_v39 }
 0x182   : > { %1246 = vmatprep.mubr.f32.mxu1 %v12822_v8  ;;  %1671 = vmatprep.mubr.f32.mxu0 %v12822_v8 }
 0x185   : > { %9966 = vmatmul.mubr.msk.f32.gmra.mrb[64].mxu1 %vm336_vm1, %v13153_v38  ;;  %10028 = vmatmul.mubr.msk.f32.gmra.mrb[64].mxu0 %vm336_vm1, %v13153_v38 }
 0x186   : > { %1252 = vmatprep.mubr.f32.mxu1 %v12822_v8  ;;  %1677 = vmatprep.mubr.f32.mxu0 %v12822_v8 }
 0x189   : > { %9967 = vmatmul.mubr.msk.f32.gmra.mrb[66].mxu1 %vm336_vm1, %v677_v41  ;;  %10029 = vmatmul.mubr.msk.f32.gmra.mrb[66].mxu0 %vm336_vm1, %v677_v41 }
 0x18a   : > { %1258 = vmatprep.mubr.f32.mxu1 %v12822_v8  ;;  %1683 = vmatprep.mubr.f32.mxu0 %v12822_v8 }
 0x18d   : > { %9968 = vmatmul.mubr.msk.f32.gmra.mrb[68].mxu1 %vm336_vm1, %v13159_v40  ;;  %10030 = vmatmul.mubr.msk.f32.gmra.mrb[68].mxu0 %vm336_vm1, %v13159_v40 }
 0x18e   : > { %1264 = vmatprep.mubr.f32.mxu1 %v12822_v8  ;;  %1689 = vmatprep.mubr.f32.mxu0 %v12822_v8 }
 0x191   : > { %9969 = vmatmul.mubr.msk.f32.gmra.mrb[70].mxu1 %vm336_vm1, %v13171_v45  ;;  %10031 = vmatmul.mubr.msk.f32.gmra.mrb[70].mxu0 %vm336_vm1, %v13171_v45 }
 0x192   : > { %1270 = vmatprep.mubr.f32.mxu1 %v12822_v8  ;;  %1695 = vmatprep.mubr.f32.mxu0 %v12822_v8 }
 0x195   : > { %9970 = vmatmul.mubr.msk.f32.gmra.mrb[72].mxu1 %vm336_vm1, %v13169_v44  ;;  %10032 = vmatmul.mubr.msk.f32.gmra.mrb[72].mxu0 %vm336_vm1, %v13169_v44 }
 0x196   : > { %1276 = vmatprep.mubr.f32.mxu1 %v12822_v8  ;;  %1701 = vmatprep.mubr.f32.mxu0 %v12822_v8 }
 0x199   : > { %9971 = vmatmul.mubr.msk.f32.gmra.mrb[74].mxu1 %vm336_vm1, %v13179_v47  ;;  %10033 = vmatmul.mubr.msk.f32.gmra.mrb[74].mxu0 %vm336_vm1, %v13179_v47  ;;  %v2178_v47 = vld [vmem:[#allocation3 + $0x30] sm:$0xff] }
 0x19a   : > { %1282 = vmatprep.mubr.f32.mxu1 %v12822_v8  ;;  %1707 = vmatprep.mubr.f32.mxu0 %v12822_v8 }
 0x19d   : > { %9972 = vmatmul.mubr.msk.f32.gmra.mrb[76].mxu1 %vm336_vm1, %v13177_v46  ;;  %10034 = vmatmul.mubr.msk.f32.gmra.mrb[76].mxu0 %vm336_vm1, %v13177_v46 }
 0x19e   : > { %1288 = vmatprep.mubr.f32.mxu1 %v12822_v8  ;;  %1713 = vmatprep.mubr.f32.mxu0 %v12822_v8 }
 0x1a1   : > { %9973 = vmatmul.mubr.msk.f32.gmra.mrb[78].mxu1 %vm336_vm1, %v13191_v51  ;;  %10035 = vmatmul.mubr.msk.f32.gmra.mrb[78].mxu0 %vm336_vm1, %v13191_v51 }
 0x1a2   : > { %1294 = vmatprep.mubr.f32.mxu1 %v12822_v8  ;;  %1719 = vmatprep.mubr.f32.mxu0 %v12822_v8 }
 0x1a5   : > { %9974 = vmatmul.mubr.msk.f32.gmra.mrb[80].mxu1 %vm336_vm1, %v13189_v50  ;;  %10036 = vmatmul.mubr.msk.f32.gmra.mrb[80].mxu0 %vm336_vm1, %v13189_v50 }
 0x1a6   : > { %1300 = vmatprep.mubr.f32.mxu1 %v12822_v8  ;;  %1725 = vmatprep.mubr.f32.mxu0 %v12822_v8 }
 0x1a9   : > { %9975 = vmatmul.mubr.msk.f32.gmra.mrb[82].mxu1 %vm336_vm1, %v13199_v53  ;;  %10037 = vmatmul.mubr.msk.f32.gmra.mrb[82].mxu0 %vm336_vm1, %v13199_v53  ;;  %v2180_v53 = vld [vmem:[#allocation3 + $0x40] sm:$0xff] }
 0x1aa   : > { %1306 = vmatprep.mubr.f32.mxu1 %v12822_v8  ;;  %1731 = vmatprep.mubr.f32.mxu0 %v12822_v8 }
 0x1ad   : > { %9976 = vmatmul.mubr.msk.f32.gmra.mrb[84].mxu1 %vm336_vm1, %v13197_v52  ;;  %10038 = vmatmul.mubr.msk.f32.gmra.mrb[84].mxu0 %vm336_vm1, %v13197_v52  ;;  %v2179_v52 = vld [vmem:[#allocation3 + $0x38] sm:$0xff] }
 0x1ae   : > { %1312 = vmatprep.mubr.f32.mxu1 %v12822_v8  ;;  %1737 = vmatprep.mubr.f32.mxu0 %v12822_v8 }
 0x1b1   : > { %9977 = vmatmul.mubr.msk.f32.gmra.mrb[86].mxu1 %vm336_vm1, %v13211_v57  ;;  %10039 = vmatmul.mubr.msk.f32.gmra.mrb[86].mxu0 %vm336_vm1, %v13211_v57 }
 0x1b2   : > { %1318 = vmatprep.mubr.f32.mxu1 %v12822_v8  ;;  %1743 = vmatprep.mubr.f32.mxu0 %v12822_v8 }
 0x1b5   : > { %9978 = vmatmul.mubr.msk.f32.gmra.mrb[88].mxu1 %vm336_vm1, %v13209_v56  ;;  %10040 = vmatmul.mubr.msk.f32.gmra.mrb[88].mxu0 %vm336_vm1, %v13209_v56 }
 0x1b6   : > { %1324 = vmatprep.mubr.f32.mxu1 %v12822_v8  ;;  %1749 = vmatprep.mubr.f32.mxu0 %v12822_v8 }
 0x1b9   : > { %9979 = vmatmul.mubr.msk.f32.gmra.mrb[90].mxu1 %vm336_vm1, %v13109_v17  ;;  %10041 = vmatmul.mubr.msk.f32.gmra.mrb[90].mxu0 %vm336_vm1, %v13109_v17 }
 0x1ba   : > { %1330 = vmatprep.mubr.f32.mxu1 %v12822_v8  ;;  %1755 = vmatprep.mubr.f32.mxu0 %v12822_v8 }
 0x1bd   : > { %9980 = vmatmul.mubr.msk.f32.gmra.mrb[92].mxu1 %vm336_vm1, %v13105_v16  ;;  %10042 = vmatmul.mubr.msk.f32.gmra.mrb[92].mxu0 %vm336_vm1, %v13105_v16 }
 0x1be   : > { %1336 = vmatprep.mubr.f32.mxu1 %v12822_v8  ;;  %1761 = vmatprep.mubr.f32.mxu0 %v12822_v8 }
 0x1c1   : > { %9981 = vmatmul.mubr.msk.f32.gmra.mrb[94].mxu1 %vm336_vm1, %v13117_v21  ;;  %10043 = vmatmul.mubr.msk.f32.gmra.mrb[94].mxu0 %vm336_vm1, %v13117_v21 }
 0x1c2   : > { %1342 = vmatprep.mubr.f32.mxu1 %v12822_v8  ;;  %1767 = vmatprep.mubr.f32.mxu0 %v12822_v8 }
 0x1c5   : > { %9982 = vmatmul.mubr.msk.f32.gmra.mrb[96].mxu1 %vm336_vm1, %v13113_v20  ;;  %10044 = vmatmul.mubr.msk.f32.gmra.mrb[96].mxu0 %vm336_vm1, %v13113_v20 }
 0x1c6   : > { %1348 = vmatprep.mubr.f32.mxu1 %v12822_v8  ;;  %1773 = vmatprep.mubr.f32.mxu0 %v12822_v8 }
 0x1c9   : > { %9983 = vmatmul.mubr.msk.f32.gmra.mrb[98].mxu1 %vm336_vm1, %v13125_v25  ;;  %10045 = vmatmul.mubr.msk.f32.gmra.mrb[98].mxu0 %vm336_vm1, %v13125_v25 }
 0x1ca   : > { %1354 = vmatprep.mubr.f32.mxu1 %v12822_v8  ;;  %1779 = vmatprep.mubr.f32.mxu0 %v12822_v8 }
 0x1cd   : > { %9984 = vmatmul.mubr.msk.f32.gmra.mrb[100].mxu1 %vm336_vm1, %v13121_v24  ;;  %10046 = vmatmul.mubr.msk.f32.gmra.mrb[100].mxu0 %vm336_vm1, %v13121_v24 }
 0x1ce   : > { %1360 = vmatprep.mubr.f32.mxu1 %v12822_v8  ;;  %1785 = vmatprep.mubr.f32.mxu0 %v12822_v8 }
 0x1d1   : > { %9985 = vmatmul.mubr.msk.f32.gmra.mrb[102].mxu1 %vm336_vm1, %v13133_v29  ;;  %10047 = vmatmul.mubr.msk.f32.gmra.mrb[102].mxu0 %vm336_vm1, %v13133_v29 }
 0x1d2   : > { %1366 = vmatprep.mubr.f32.mxu1 %v12822_v8  ;;  %1791 = vmatprep.mubr.f32.mxu0 %v12822_v8 }
 0x1d5   : > { %9986 = vmatmul.mubr.msk.f32.gmra.mrb[104].mxu1 %vm336_vm1, %v13129_v28  ;;  %10048 = vmatmul.mubr.msk.f32.gmra.mrb[104].mxu0 %vm336_vm1, %v13129_v28 }
 0x1d6   : > { %1372 = vmatprep.mubr.f32.mxu1 %v12822_v8  ;;  %1797 = vmatprep.mubr.f32.mxu0 %v12822_v8 }
 0x1d9   : > { %9987 = vmatmul.mubr.msk.f32.gmra.mrb[106].mxu1 %vm336_vm1, %v13141_v33  ;;  %10049 = vmatmul.mubr.msk.f32.gmra.mrb[106].mxu0 %vm336_vm1, %v13141_v33 }
 0x1da   : > { %1378 = vmatprep.mubr.f32.mxu1 %v12822_v8  ;;  %1803 = vmatprep.mubr.f32.mxu0 %v12822_v8 }
 0x1dd   : > { %9988 = vmatmul.mubr.msk.f32.gmra.mrb[108].mxu1 %vm336_vm1, %v13137_v32  ;;  %10050 = vmatmul.mubr.msk.f32.gmra.mrb[108].mxu0 %vm336_vm1, %v13137_v32 }
 0x1de   : > { %1384 = vmatprep.mubr.f32.mxu1 %v12822_v8  ;;  %1809 = vmatprep.mubr.f32.mxu0 %v12822_v8 }
 0x1e1   : > { %9989 = vmatmul.mubr.msk.f32.gmra.mrb[110].mxu1 %vm336_vm1, %v13151_v37  ;;  %10051 = vmatmul.mubr.msk.f32.gmra.mrb[110].mxu0 %vm336_vm1, %v13151_v37  ;;  %v2174_v37 = vld [vmem:[#allocation3 + $0x10] sm:$0xff] }
 0x1e2   : > { %1390 = vmatprep.mubr.f32.mxu1 %v12822_v8  ;;  %1815 = vmatprep.mubr.f32.mxu0 %v12822_v8 }
 0x1e5   : > { %9990 = vmatmul.mubr.msk.f32.gmra.mrb[112].mxu1 %vm336_vm1, %v13147_v36  ;;  %10052 = vmatmul.mubr.msk.f32.gmra.mrb[112].mxu0 %vm336_vm1, %v13147_v36 }
 0x1e6   : > { %1396 = vmatprep.mubr.f32.mxu1 %v12822_v8  ;;  %1821 = vmatprep.mubr.f32.mxu0 %v12822_v8 }
 0x1e9   : > { %9991 = vmatmul.mubr.msk.f32.gmra.mrb[114].mxu1 %vm336_vm1, %v13167_v43  ;;  %10053 = vmatmul.mubr.msk.f32.gmra.mrb[114].mxu0 %vm336_vm1, %v13167_v43 }
 0x1ea   : > { %1402 = vmatprep.mubr.f32.mxu1 %v12822_v8  ;;  %1827 = vmatprep.mubr.f32.mxu0 %v12822_v8 }
 0x1ed   : > { %9992 = vmatmul.mubr.msk.f32.gmra.mrb[116].mxu1 %vm336_vm1, %v13163_v42  ;;  %10054 = vmatmul.mubr.msk.f32.gmra.mrb[116].mxu0 %vm336_vm1, %v13163_v42  ;;  %v2176_v42 = vld [vmem:[#allocation3 + $0x20] sm:$0xff] }
 0x1ee   : > { %1408 = vmatprep.mubr.f32.mxu1 %v12822_v8  ;;  %1833 = vmatprep.mubr.f32.mxu0 %v12822_v8 }
 0x1f1   : > { %9993 = vmatmul.mubr.msk.f32.gmra.mrb[118].mxu1 %vm336_vm1, %v13187_v49  ;;  %10055 = vmatmul.mubr.msk.f32.gmra.mrb[118].mxu0 %vm336_vm1, %v13187_v49 }
 0x1f2   : > { %1414 = vmatprep.mubr.f32.mxu1 %v12822_v8  ;;  %1839 = vmatprep.mubr.f32.mxu0 %v12822_v8 }
 0x1f5   : > { %9994 = vmatmul.mubr.msk.f32.gmra.mrb[120].mxu1 %vm336_vm1, %v13183_v48  ;;  %10056 = vmatmul.mubr.msk.f32.gmra.mrb[120].mxu0 %vm336_vm1, %v13183_v48 }
 0x1f6   : > { %1420 = vmatprep.mubr.f32.mxu1 %v12822_v8  ;;  %1845 = vmatprep.mubr.f32.mxu0 %v12822_v8 }
 0x1f9   : > { %9995 = vmatmul.mubr.msk.f32.gmra.mrb[122].mxu1 %vm336_vm1, %v13207_v55  ;;  %10057 = vmatmul.mubr.msk.f32.gmra.mrb[122].mxu0 %vm336_vm1, %v13207_v55 }
 0x1fa   : > { %1426 = vmatprep.mubr.f32.mxu1 %v12822_v8  ;;  %1851 = vmatprep.mubr.f32.mxu0 %v12822_v8 }
 0x1fd   : > { %9996 = vmatmul.mubr.msk.f32.gmra.mrb[124].mxu1 %vm336_vm1, %v13203_v54  ;;  %10058 = vmatmul.mubr.msk.f32.gmra.mrb[124].mxu0 %vm336_vm1, %v13203_v54 }
 0x1fe   : > { %1432 = vmatprep.mubr.f32.mxu1 %v12822_v8  ;;  %1857 = vmatprep.mubr.f32.mxu0 %v12822_v8 }
 0x201   : > { %9997 = vmatmul.mubr.msk.f32.gmra.mrb[126].mxu1 %vm336_vm1, %v13219_v59  ;;  %10059 = vmatmul.mubr.msk.f32.gmra.mrb[126].mxu0 %vm336_vm1, %v13219_v59  ;;  %v2182_v59 = vld [vmem:[#allocation3 + $0x50] sm:$0xff] }
 0x202   : > { %1438 = vmatprep.mubr.f32.mxu1 %v12822_v8  ;;  %1863 = vmatprep.mubr.f32.mxu0 %v12822_v8 }
 0x205   : > { %9998 = vmatmul.mubr.msk.f32.gmra.mrb[128].mxu1 %vm336_vm1, %v13215_v58  ;;  %10060 = vmatmul.mubr.msk.f32.gmra.mrb[128].mxu0 %vm336_vm1, %v13215_v58  ;;  %v2181_v58 = vld [vmem:[#allocation3 + $0x48] sm:$0xff] }
 0x206   : > { %1444 = vmatprep.mubr.f32.mxu1 %v12822_v8  ;;  %1869 = vmatprep.mubr.f32.mxu0 %v12822_v8 }
 0x209   : > { %9999 = vmatmul.mubr.msk.f32.gmra.mrb[130].mxu1 %vm336_vm1, %v13227_v61  ;;  %10061 = vmatmul.mubr.msk.f32.gmra.mrb[130].mxu0 %vm336_vm1, %v13227_v61 }
 0x20a   : > { %1450 = vmatprep.mubr.f32.mxu1 %v12822_v8  ;;  %1875 = vmatprep.mubr.f32.mxu0 %v12822_v8 }
 0x20d   : > { %10000 = vmatmul.mubr.msk.f32.gmra.mrb[132].mxu1 %vm336_vm1, %v13223_v60  ;;  %10062 = vmatmul.mubr.msk.f32.gmra.mrb[132].mxu0 %vm336_vm1, %v13223_v60 }
 0x20e   : > { %1456 = vmatprep.mubr.f32.mxu1 %v12822_v8  ;;  %1881 = vmatprep.mubr.f32.mxu0 %v12822_v8 }
 0x211   : > { %10001 = vmatmul.mubr.msk.f32.gmra.mrb[134].mxu1 %vm336_vm1, %v13235_v63  ;;  %10063 = vmatmul.mubr.msk.f32.gmra.mrb[134].mxu0 %vm336_vm1, %v13235_v63 }
 0x212   : > { %1462 = vmatprep.mubr.f32.mxu1 %v12822_v8  ;;  %1887 = vmatprep.mubr.f32.mxu0 %v12822_v8 }
 0x214   : > { %v1146_v9 = vpop.f32.mrb[30].mxu1  ;;  %v1571_v10 = vpop.f32.mrb[30].mxu0 }
 0x215   : > { %1930 = vst [vmem:[%s13464_s5] sm:$0xff] %v1146_v9  ;;  %1932 = vst [vmem:[%s13464_s5 + $0x10] sm:$0xff] %v1571_v10  ;;  %v1148_v11 = vpop.f32.mrb[31].mxu1  ;;  %10002 = vmatmul.mubr.msk.f32.gmra.mrb[136].mxu1 %vm336_vm1, %v13231_v62  ;;  %v1573_v12 = vpop.f32.mrb[31].mxu0  ;;  %10064 = vmatmul.mubr.msk.f32.gmra.mrb[136].mxu0 %vm336_vm1, %v13231_v62  ;;  %v2185_v9 = vld [vmem:[#allocation3 + $0x68] sm:$0xff]  ;;  %v2186_v10 = vld [vmem:[#allocation3 + $0x70] sm:$0xff] }
 0x216   : > { %1931 = vst [vmem:[%s13464_s5 + $0x8] sm:$0xff] %v1148_v11  ;;  %1934 = vst.msk [vmem:[%s13464_s5 + $0x18] sm:$0xff] %vm1933_vm2, %v1573_v12  ;;  %1468 = vmatprep.mubr.f32.mxu1 %v12822_v8  ;;  %1893 = vmatprep.mubr.f32.mxu0 %v12822_v8 }
 0x218   : > { %v1152_v13 = vpop.f32.mrb[32].mxu1  ;;  %v1577_v14 = vpop.f32.mrb[32].mxu0 }
 0x219   : > { %1935 = vst [vmem:[%s13464_s5 + $0x20] sm:$0xff] %v1152_v13  ;;  %1937 = vst [vmem:[%s13464_s5 + $0x30] sm:$0xff] %v1577_v14  ;;  %v1154_v15 = vpop.f32.mrb[33].mxu1  ;;  %10003 = vmatmul.mubr.msk.f32.gmra.mrb[138].mxu1 %vm336_vm1, %v13245_v1  ;;  %v1579_v16 = vpop.f32.mrb[33].mxu0  ;;  %10065 = vmatmul.mubr.msk.f32.gmra.mrb[138].mxu0 %vm336_vm1, %v13245_v1  ;;  %v2184_v1 = vld [vmem:[#allocation3 + $0x60] sm:$0xff] }
 0x21a   : > { %1936 = vst [vmem:[%s13464_s5 + $0x28] sm:$0xff] %v1154_v15  ;;  %1938 = vst.msk [vmem:[%s13464_s5 + $0x38] sm:$0xff] %vm1933_vm2, %v1579_v16  ;;  %1474 = vmatprep.mubr.f32.mxu1 %v12822_v8  ;;  %1899 = vmatprep.mubr.f32.mxu0 %v12822_v8  ;;  %v2187_v15 = vld [vmem:[#allocation3 + $0x78] sm:$0xff]  ;;  %v2188_v16 = vld [vmem:[#allocation3 + $0x80] sm:$0xff] }
 0x21c   : > { %v1158_v17 = vpop.f32.mrb[34].mxu1  ;;  %v1583_v18 = vpop.f32.mrb[34].mxu0 }
 0x21d   : > { %1939 = vst [vmem:[%s13464_s5 + $0x40] sm:$0xff] %v1158_v17  ;;  %1941 = vst [vmem:[%s13464_s5 + $0x50] sm:$0xff] %v1583_v18  ;;  %v1160_v19 = vpop.f32.mrb[35].mxu1  ;;  %10004 = vmatmul.mubr.msk.f32.gmra.mrb[140].mxu1 %vm336_vm1, %v13241_v0  ;;  %v1585_v20 = vpop.f32.mrb[35].mxu0  ;;  %10066 = vmatmul.mubr.msk.f32.gmra.mrb[140].mxu0 %vm336_vm1, %v13241_v0  ;;  %v2183_v0 = vld [vmem:[#allocation3 + $0x58] sm:$0xff] }
 0x21e   : > { %1940 = vst [vmem:[%s13464_s5 + $0x48] sm:$0xff] %v1160_v19  ;;  %1942 = vst.msk [vmem:[%s13464_s5 + $0x58] sm:$0xff] %vm1933_vm2, %v1585_v20  ;;  %1480 = vmatprep.mubr.f32.mxu1 %v12822_v8  ;;  %1905 = vmatprep.mubr.f32.mxu0 %v12822_v8 }
 0x220   : > { %v1164_v21 = vpop.f32.mrb[36].mxu1  ;;  %v1589_v22 = vpop.f32.mrb[36].mxu0 }
 0x221   : > { %1943 = vst [vmem:[%s13464_s5 + $0x60] sm:$0xff] %v1164_v21  ;;  %1945 = vst [vmem:[%s13464_s5 + $0x70] sm:$0xff] %v1589_v22  ;;  %v1166_v23 = vpop.f32.mrb[37].mxu1  ;;  %10005 = vmatmul.mubr.msk.f32.gmra.mrb[142].mxu1 %vm336_vm1, %v13253_v3  ;;  %v1591_v24 = vpop.f32.mrb[37].mxu0  ;;  %10067 = vmatmul.mubr.msk.f32.gmra.mrb[142].mxu0 %vm336_vm1, %v13253_v3  ;;  %v2189_v21 = vld [vmem:[#allocation3 + $0x88] sm:$0xff]  ;;  %v2190_v22 = vld [vmem:[#allocation3 + $0x90] sm:$0xff] }
 0x222   : > { %1944 = vst [vmem:[%s13464_s5 + $0x68] sm:$0xff] %v1166_v23  ;;  %1946 = vst.msk [vmem:[%s13464_s5 + $0x78] sm:$0xff] %vm1933_vm2, %v1591_v24  ;;  %1486 = vmatprep.mubr.f32.mxu1 %v12822_v8  ;;  %1911 = vmatprep.mubr.f32.mxu0 %v12822_v8 }
 0x224   : > { %v1170_v25 = vpop.f32.mrb[38].mxu1  ;;  %v1595_v26 = vpop.f32.mrb[38].mxu0 }
 0x225   : > { %1947 = vst [vmem:[%s13464_s5 + $0x80] sm:$0xff] %v1170_v25  ;;  %1949 = vst [vmem:[%s13464_s5 + $0x90] sm:$0xff] %v1595_v26  ;;  %v1172_v27 = vpop.f32.mrb[39].mxu1  ;;  %10006 = vmatmul.mubr.msk.f32.gmra.mrb[144].mxu1 %vm336_vm1, %v13249_v2  ;;  %v1597_v28 = vpop.f32.mrb[39].mxu0  ;;  %10068 = vmatmul.mubr.msk.f32.gmra.mrb[144].mxu0 %vm336_vm1, %v13249_v2 }
 0x226   : > { %1948 = vst [vmem:[%s13464_s5 + $0x88] sm:$0xff] %v1172_v27  ;;  %1950 = vst.msk [vmem:[%s13464_s5 + $0x98] sm:$0xff] %vm1933_vm2, %v1597_v28  ;;  %1492 = vmatprep.mubr.f32.mxu1 %v12822_v8  ;;  %1917 = vmatprep.mubr.f32.mxu0 %v12822_v8  ;;  %v2191_v27 = vld [vmem:[#allocation3 + $0x98] sm:$0xff]  ;;  %v2192_v28 = vld [vmem:[#allocation3 + $0xa0] sm:$0xff] }
 0x228   : > { %v1176_v29 = vpop.f32.mrb[40].mxu1  ;;  %v1601_v30 = vpop.f32.mrb[40].mxu0 }
 0x229   : > { %1951 = vst [vmem:[%s13464_s5 + $0xa0] sm:$0xff] %v1176_v29  ;;  %1953 = vst [vmem:[%s13464_s5 + $0xb0] sm:$0xff] %v1601_v30  ;;  %v1178_v31 = vpop.f32.mrb[41].mxu1  ;;  %10007 = vmatmul.mubr.msk.f32.gmra.mrb[146].mxu1 %vm336_vm1, %v13263_v5  ;;  %v1603_v32 = vpop.f32.mrb[41].mxu0  ;;  %10069 = vmatmul.mubr.msk.f32.gmra.mrb[146].mxu0 %vm336_vm1, %v13263_v5 }
 0x22a   : > { %1952 = vst [vmem:[%s13464_s5 + $0xa8] sm:$0xff] %v1178_v31  ;;  %1954 = vst.msk [vmem:[%s13464_s5 + $0xb8] sm:$0xff] %vm1933_vm2, %v1603_v32  ;;  %1498 = vmatprep.mubr.f32.mxu1 %v12822_v8  ;;  %1923 = vmatprep.mubr.f32.mxu0 %v12822_v8 }
 0x22c   : > { %v1182_v33 = vpop.f32.mrb[42].mxu1  ;;  %v1607_v34 = vpop.f32.mrb[42].mxu0 }
 0x22d   : > { %1955 = vst [vmem:[%s13464_s5 + $0xc0] sm:$0xff] %v1182_v33  ;;  %1957 = vst [vmem:[%s13464_s5 + $0xd0] sm:$0xff] %v1607_v34  ;;  %v1184_v35 = vpop.f32.mrb[43].mxu1  ;;  %10008 = vmatmul.mubr.msk.f32.gmra.mrb[148].mxu1 %vm336_vm1, %v13259_v4  ;;  %v1609_v36 = vpop.f32.mrb[43].mxu0  ;;  %10070 = vmatmul.mubr.msk.f32.gmra.mrb[148].mxu0 %vm336_vm1, %v13259_v4  ;;  %v2193_v33 = vld [vmem:[#allocation3 + $0xa8] sm:$0xff]  ;;  %v2194_v34 = vld [vmem:[#allocation3 + $0xb0] sm:$0xff] }
 0x22e   : > { %1956 = vst [vmem:[%s13464_s5 + $0xc8] sm:$0xff] %v1184_v35  ;;  %1958 = vst.msk [vmem:[%s13464_s5 + $0xd8] sm:$0xff] %vm1933_vm2, %v1609_v36  ;;  %12178 = vmatprep.mubr.msk.f32.mxu1 %vm336_vm1, %v13006_v6  ;;  %3040 = vmatprep.mubr.f32.mxu0 %v12822_v8  ;;  %v2175_v6 = vld [vmem:[#allocation3 + $0x18] sm:$0xff] }
 0x230   : > { %v1188_v38 = vpop.f32.mrb[44].mxu1  ;;  %v1613_v39 = vpop.f32.mrb[44].mxu0 }
 0x231   : > { %1959 = vst [vmem:[%s13464_s5 + $0xe0] sm:$0xff] %v1188_v38  ;;  %1961 = vst [vmem:[%s13464_s5 + $0xf0] sm:$0xff] %v1613_v39  ;;  %v1190_v40 = vpop.f32.mrb[45].mxu1  ;;  %v1615_v41 = vpop.f32.mrb[45].mxu0  ;;  %12179 = vmatmul.mubr.msk.f32.vlgmr.msra.gmra.mrb[150].mxu1 %vm336_vm1, %v13008_v7  ;;  %v2177_v7 = vld [vmem:[#allocation3 + $0x28] sm:$0xff]  ;;  %v2195_v39 = vld [vmem:[#allocation3 + $0xb8] sm:$0xff] }
 0x232   : > { %1960 = vst [vmem:[%s13464_s5 + $0xe8] sm:$0xff] %v1190_v40  ;;  %1962 = vst.msk [vmem:[%s13464_s5 + $0xf8] sm:$0xff] %vm1933_vm2, %v1615_v41  ;;  %12181 = vmatprep.mubr.msk.f32.mxu1 %vm336_vm1, %v2174_v37  ;;  %v2196_v40 = vld [vmem:[#allocation3 + $0xc0] sm:$0xff] }
 0x234   : > { %v1194_v43 = vpop.f32.mrb[46].mxu1  ;;  %v1619_v44 = vpop.f32.mrb[46].mxu0 }
 0x235   : > { %1963 = vst [vmem:[%s13464_s5 + $0x100] sm:$0xff] %v1194_v43  ;;  %1965 = vst [vmem:[%s13464_s5 + $0x110] sm:$0xff] %v1619_v44  ;;  %v1196_v45 = vpop.f32.mrb[47].mxu1  ;;  %v1621_v46 = vpop.f32.mrb[47].mxu0  ;;  %12182 = vmatmul.mubr.msk.f32.gmra.mrb[152].mxu1 %vm336_vm1, %v2175_v6  ;;  %v2197_v44 = vld [vmem:[#allocation3 + $0xc8] sm:$0xff] }
 0x236   : > { %1964 = vst [vmem:[%s13464_s5 + $0x108] sm:$0xff] %v1196_v45  ;;  %1966 = vst.msk [vmem:[%s13464_s5 + $0x118] sm:$0xff] %vm1933_vm2, %v1621_v46  ;;  %12184 = vmatprep.mubr.msk.f32.mxu1 %vm336_vm1, %v2176_v42  ;;  %v2198_v45 = vld [vmem:[#allocation3 + $0xd0] sm:$0xff] }
 0x238   : > { %v1200_v48 = vpop.f32.mrb[48].mxu1  ;;  %v1625_v49 = vpop.f32.mrb[48].mxu0 }
 0x239   : > { %1967 = vst [vmem:[%s13464_s5 + $0x120] sm:$0xff] %v1200_v48  ;;  %1969 = vst [vmem:[%s13464_s5 + $0x130] sm:$0xff] %v1625_v49  ;;  %v1202_v50 = vpop.f32.mrb[49].mxu1  ;;  %v1627_v51 = vpop.f32.mrb[49].mxu0  ;;  %12185 = vmatmul.mubr.msk.f32.gmra.mrb[154].mxu1 %vm336_vm1, %v2177_v7  ;;  %v2199_v49 = vld [vmem:[#allocation3 + $0xd8] sm:$0xff] }
 0x23a   : > { %1968 = vst [vmem:[%s13464_s5 + $0x128] sm:$0xff] %v1202_v50  ;;  %1970 = vst.msk [vmem:[%s13464_s5 + $0x138] sm:$0xff] %vm1933_vm2, %v1627_v51  ;;  %12187 = vmatprep.mubr.msk.f32.mxu1 %vm336_vm1, %v2178_v47  ;;  %v2200_v50 = vld [vmem:[#allocation3 + $0xe0] sm:$0xff] }
 0x23c   : > { %v1206_v54 = vpop.f32.mrb[50].mxu1  ;;  %v1631_v55 = vpop.f32.mrb[50].mxu0 }
 0x23d   : > { %1971 = vst [vmem:[%s13464_s5 + $0x140] sm:$0xff] %v1206_v54  ;;  %1973 = vst [vmem:[%s13464_s5 + $0x150] sm:$0xff] %v1631_v55  ;;  %v1208_v56 = vpop.f32.mrb[51].mxu1  ;;  %v1633_v57 = vpop.f32.mrb[51].mxu0  ;;  %12188 = vmatmul.mubr.msk.f32.gmra.mrb[156].mxu1 %vm336_vm1, %v2179_v52  ;;  %v2201_v55 = vld [vmem:[#allocation3 + $0xe8] sm:$0xff] }
 0x23e   : > { %1972 = vst [vmem:[%s13464_s5 + $0x148] sm:$0xff] %v1208_v56  ;;  %1974 = vst.msk [vmem:[%s13464_s5 + $0x158] sm:$0xff] %vm1933_vm2, %v1633_v57  ;;  %12190 = vmatprep.mubr.msk.f32.mxu1 %vm336_vm1, %v2180_v53  ;;  %v2202_v56 = vld [vmem:[#allocation3 + $0xf0] sm:$0xff] }
 0x240   : > { %v1212_v60 = vpop.f32.mrb[52].mxu1  ;;  %v1637_v61 = vpop.f32.mrb[52].mxu0 }
 0x241   : > { %1975 = vst [vmem:[%s13464_s5 + $0x160] sm:$0xff] %v1212_v60  ;;  %1977 = vst [vmem:[%s13464_s5 + $0x170] sm:$0xff] %v1637_v61  ;;  %v1214_v62 = vpop.f32.mrb[53].mxu1  ;;  %v1639_v63 = vpop.f32.mrb[53].mxu0  ;;  %12191 = vmatmul.mubr.msk.f32.gmra.mrb[158].mxu1 %vm336_vm1, %v2181_v58  ;;  %v2203_v61 = vld [vmem:[#allocation3 + $0xf8] sm:$0xff] }
 0x242   : > { %1976 = vst [vmem:[%s13464_s5 + $0x168] sm:$0xff] %v1214_v62  ;;  %1978 = vst.msk [vmem:[%s13464_s5 + $0x178] sm:$0xff] %vm1933_vm2, %v1639_v63  ;;  %12193 = vmatprep.mubr.msk.f32.mxu1 %vm336_vm1, %v2182_v59  ;;  %v2204_v62 = vld [vmem:[#allocation3 + $0x100] sm:$0xff] }
 0x244   : > { %v1218_v2 = vpop.f32.mrb[54].mxu1  ;;  %v1643_v3 = vpop.f32.mrb[54].mxu0 }
 0x245   : > { %1979 = vst [vmem:[%s13464_s5 + $0x180] sm:$0xff] %v1218_v2  ;;  %1981 = vst [vmem:[%s13464_s5 + $0x190] sm:$0xff] %v1643_v3  ;;  %v1220_v4 = vpop.f32.mrb[55].mxu1  ;;  %v1645_v5 = vpop.f32.mrb[55].mxu0  ;;  %12194 = vmatmul.mubr.msk.f32.gmra.mrb[160].mxu1 %vm336_vm1, %v2183_v0  ;;  %v2205_v3 = vld [vmem:[#allocation3 + $0x108] sm:$0xff] }
 0x246   : > { %1980 = vst [vmem:[%s13464_s5 + $0x188] sm:$0xff] %v1220_v4  ;;  %1982 = vst.msk [vmem:[%s13464_s5 + $0x198] sm:$0xff] %vm1933_vm2, %v1645_v5  ;;  %12196 = vmatprep.mubr.msk.f32.mxu1 %vm336_vm1, %v2184_v1  ;;  %v2206_v4 = vld [vmem:[#allocation3 + $0x110] sm:$0xff] }
 0x248   : > { %v1224_v11 = vpop.f32.mrb[56].mxu1  ;;  %v1649_v12 = vpop.f32.mrb[56].mxu0 }
 0x249   : > { %1983 = vst [vmem:[%s13464_s5 + $0x1a0] sm:$0xff] %v1224_v11  ;;  %1985 = vst [vmem:[%s13464_s5 + $0x1b0] sm:$0xff] %v1649_v12  ;;  %v1226_v13 = vpop.f32.mrb[57].mxu1  ;;  %v1651_v14 = vpop.f32.mrb[57].mxu0  ;;  %12197 = vmatmul.mubr.msk.f32.gmra.mrb[162].mxu1 %vm336_vm1, %v2185_v9  ;;  %v2207_v12 = vld [vmem:[#allocation3 + $0x118] sm:$0xff] }
 0x24a   : > { %1984 = vst [vmem:[%s13464_s5 + $0x1a8] sm:$0xff] %v1226_v13  ;;  %1986 = vst.msk [vmem:[%s13464_s5 + $0x1b8] sm:$0xff] %vm1933_vm2, %v1651_v14  ;;  %12199 = vmatprep.mubr.msk.f32.mxu1 %vm336_vm1, %v2186_v10  ;;  %v2208_v13 = vld [vmem:[#allocation3 + $0x120] sm:$0xff] }
 0x24c   : > { %v1230_v17 = vpop.f32.mrb[58].mxu1  ;;  %v1655_v18 = vpop.f32.mrb[58].mxu0 }
 0x24d   : > { %1987 = vst [vmem:[%s13464_s5 + $0x1c0] sm:$0xff] %v1230_v17  ;;  %1989 = vst [vmem:[%s13464_s5 + $0x1d0] sm:$0xff] %v1655_v18  ;;  %v1232_v19 = vpop.f32.mrb[59].mxu1  ;;  %v1657_v20 = vpop.f32.mrb[59].mxu0  ;;  %12200 = vmatmul.mubr.msk.f32.gmra.mrb[164].mxu1 %vm336_vm1, %v2187_v15  ;;  %v2209_v18 = vld [vmem:[#allocation3 + $0x128] sm:$0xff] }
 0x24e   : > { %1988 = vst [vmem:[%s13464_s5 + $0x1c8] sm:$0xff] %v1232_v19  ;;  %1990 = vst.msk [vmem:[%s13464_s5 + $0x1d8] sm:$0xff] %vm1933_vm2, %v1657_v20  ;;  %12202 = vmatprep.mubr.msk.f32.mxu1 %vm336_vm1, %v2188_v16  ;;  %v2210_v19 = vld [vmem:[#allocation3 + $0x130] sm:$0xff] }
 0x250   : > { %v1236_v23 = vpop.f32.mrb[60].mxu1  ;;  %v1661_v24 = vpop.f32.mrb[60].mxu0 }
 0x251   : > { %1991 = vst [vmem:[%s13464_s5 + $0x1e0] sm:$0xff] %v1236_v23  ;;  %1993 = vst [vmem:[%s13464_s5 + $0x1f0] sm:$0xff] %v1661_v24  ;;  %v1238_v25 = vpop.f32.mrb[61].mxu1  ;;  %v1663_v26 = vpop.f32.mrb[61].mxu0  ;;  %12203 = vmatmul.mubr.msk.f32.gmra.mrb[166].mxu1 %vm336_vm1, %v2189_v21  ;;  %v2211_v24 = vld [vmem:[#allocation3 + $0x138] sm:$0xff] }
 0x252   : > { %1992 = vst [vmem:[%s13464_s5 + $0x1e8] sm:$0xff] %v1238_v25  ;;  %1994 = vst.msk [vmem:[%s13464_s5 + $0x1f8] sm:$0xff] %vm1933_vm2, %v1663_v26  ;;  %12205 = vmatprep.mubr.msk.f32.mxu1 %vm336_vm1, %v2190_v22  ;;  %v2212_v25 = vld [vmem:[#allocation3 + $0x140] sm:$0xff] }
 0x254   : > { %v1242_v29 = vpop.f32.mrb[62].mxu1  ;;  %v1667_v30 = vpop.f32.mrb[62].mxu0 }
 0x255   : > { %1995 = vst [vmem:[%s13464_s5 + $0x200] sm:$0xff] %v1242_v29  ;;  %1997 = vst [vmem:[%s13464_s5 + $0x210] sm:$0xff] %v1667_v30  ;;  %v1244_v31 = vpop.f32.mrb[63].mxu1  ;;  %v1669_v32 = vpop.f32.mrb[63].mxu0  ;;  %12206 = vmatmul.mubr.msk.f32.gmra.mrb[168].mxu1 %vm336_vm1, %v2191_v27  ;;  %v2213_v30 = vld [vmem:[#allocation3 + $0x148] sm:$0xff] }
 0x256   : > { %1996 = vst [vmem:[%s13464_s5 + $0x208] sm:$0xff] %v1244_v31  ;;  %1998 = vst.msk [vmem:[%s13464_s5 + $0x218] sm:$0xff] %vm1933_vm2, %v1669_v32  ;;  %12208 = vmatprep.mubr.msk.f32.mxu1 %vm336_vm1, %v2192_v28  ;;  %v2214_v31 = vld [vmem:[#allocation3 + $0x150] sm:$0xff] }
 0x258   : > { %v1248_v35 = vpop.f32.mrb[64].mxu1  ;;  %v1673_v36 = vpop.f32.mrb[64].mxu0 }
 0x259   : > { %1999 = vst [vmem:[%s13464_s5 + $0x220] sm:$0xff] %v1248_v35  ;;  %2001 = vst [vmem:[%s13464_s5 + $0x230] sm:$0xff] %v1673_v36  ;;  %v1250_v37 = vpop.f32.mrb[65].mxu1  ;;  %v1675_v38 = vpop.f32.mrb[65].mxu0  ;;  %12209 = vmatmul.mubr.msk.f32.gmra.mrb[170].mxu1 %vm336_vm1, %v2193_v33  ;;  %v2783_v36 = vld [vmem:[#allocation6 + $0x8] sm:$0xff] }
 0x25a   : > { %2000 = vst [vmem:[%s13464_s5 + $0x228] sm:$0xff] %v1250_v37  ;;  %2002 = vst.msk [vmem:[%s13464_s5 + $0x238] sm:$0xff] %vm1933_vm2, %v1675_v38  ;;  %12211 = vmatprep.mubr.msk.f32.mxu1 %vm336_vm1, %v2194_v34  ;;  %v2215_v37 = vld [vmem:[#allocation3 + $0x158] sm:$0xff]  ;;  %v2787_v38 = vcombine.high %v2783_v36, %v2783_v36 }
 0x25c   : > { %v1254_v41 = vpop.f32.mrb[66].mxu1  ;;  %v1679_v6 = vpop.f32.mrb[66].mxu0  ;;  %10195 = vmatprep.subr.msk.mxu1 %vm517_vm0, %v2787_v38 }
 0x25d   : > { %2003 = vst [vmem:[%s13464_s5 + $0x240] sm:$0xff] %v1254_v41  ;;  %2005 = vst [vmem:[%s13464_s5 + $0x250] sm:$0xff] %v1679_v6  ;;  %v1256_v42 = vpop.f32.mrb[67].mxu1  ;;  %v1681_v43 = vpop.f32.mrb[67].mxu0  ;;  %12212 = vmatmul.mubr.msk.f32.gmra.mrb[172].mxu1 %vm336_vm1, %v2195_v39  ;;  %v2216_v39 = vld [vmem:[#allocation3 + $0x160] sm:$0xff] }
 0x25e   : > { %2004 = vst [vmem:[%s13464_s5 + $0x248] sm:$0xff] %v1256_v42  ;;  %2006 = vst.msk [vmem:[%s13464_s5 + $0x258] sm:$0xff] %vm1933_vm2, %v1681_v43  ;;  %12214 = vmatprep.mubr.msk.f32.mxu1 %vm336_vm1, %v2196_v40  ;;  %v13697_v43 = vld [vmem:[%s12995_s10 + $0x8] sm:$0xf]  ;;  %10196 = vmatpush1.msk.msra.mxu1 %vm517_vm0, %v2783_v36 }
 0x25f   : > { %12268 = vmatprep.subr.msk.mxu0 %vm517_vm0, %v13697_v43 }
 0x260   : > { %v1260_v46 = vpop.f32.mrb[68].mxu1  ;;  %v1685_v7 = vpop.f32.mrb[68].mxu0 }
 0x261   : > { %2007 = vst [vmem:[%s13464_s5 + $0x260] sm:$0xff] %v1260_v46  ;;  %2009 = vst [vmem:[%s13464_s5 + $0x270] sm:$0xff] %v1685_v7  ;;  %v1262_v47 = vpop.f32.mrb[69].mxu1  ;;  %v1687_v48 = vpop.f32.mrb[69].mxu0  ;;  %12215 = vmatmul.mubr.msk.f32.gmra.mrb[174].mxu1 %vm336_vm1, %v2197_v44  ;;  %v2217_v44 = vld [vmem:[#allocation3 + $0x168] sm:$0xff] }
 0x262   : > { %2008 = vst [vmem:[%s13464_s5 + $0x268] sm:$0xff] %v1262_v47  ;;  %2010 = vst.msk [vmem:[%s13464_s5 + $0x278] sm:$0xff] %vm1933_vm2, %v1687_v48  ;;  %12217 = vmatprep.mubr.msk.f32.mxu1 %vm336_vm1, %v2198_v45  ;;  %v2218_v45 = vld [vmem:[#allocation3 + $0x170] sm:$0xff] }
 0x264   : > { %v1266_v51 = vpop.f32.mrb[70].mxu1  ;;  %v1691_v52 = vpop.f32.mrb[70].mxu0 }
 0x265   : > { %2011 = vst [vmem:[%s13464_s5 + $0x280] sm:$0xff] %v1266_v51  ;;  %2013 = vst [vmem:[%s13464_s5 + $0x290] sm:$0xff] %v1691_v52  ;;  %v1268_v53 = vpop.f32.mrb[71].mxu1  ;;  %v1693_v54 = vpop.f32.mrb[71].mxu0  ;;  %12218 = vmatmul.mubr.msk.f32.gmra.mrb[176].mxu1 %vm336_vm1, %v2199_v49  ;;  %v2219_v49 = vld [vmem:[#allocation3 + $0x178] sm:$0xff] }
 0x266   : > { %2012 = vst [vmem:[%s13464_s5 + $0x288] sm:$0xff] %v1268_v53  ;;  %2014 = vst.msk [vmem:[%s13464_s5 + $0x298] sm:$0xff] %vm1933_vm2, %v1693_v54  ;;  %12220 = vmatprep.mubr.msk.f32.mxu1 %vm336_vm1, %v2200_v50  ;;  %v2220_v50 = vld [vmem:[#allocation3 + $0x180] sm:$0xff] }
 0x268   : > { %v1272_v57 = vpop.f32.mrb[72].mxu1  ;;  %v1697_v58 = vpop.f32.mrb[72].mxu0 }
 0x269   : > { %2015 = vst [vmem:[%s13464_s5 + $0x2a0] sm:$0xff] %v1272_v57  ;;  %2017 = vst [vmem:[%s13464_s5 + $0x2b0] sm:$0xff] %v1697_v58  ;;  %v1274_v59 = vpop.f32.mrb[73].mxu1  ;;  %v1699_v60 = vpop.f32.mrb[73].mxu0  ;;  %12221 = vmatmul.mubr.msk.f32.gmra.mrb[178].mxu1 %vm336_vm1, %v2201_v55  ;;  %v2221_v55 = vld [vmem:[#allocation3 + $0x188] sm:$0xff] }
 0x26a   : > { %2016 = vst [vmem:[%s13464_s5 + $0x2a8] sm:$0xff] %v1274_v59  ;;  %2018 = vst.msk [vmem:[%s13464_s5 + $0x2b8] sm:$0xff] %vm1933_vm2, %v1699_v60  ;;  %12223 = vmatprep.mubr.msk.f32.mxu1 %vm336_vm1, %v2202_v56  ;;  %v2222_v56 = vld [vmem:[#allocation3 + $0x190] sm:$0xff] }
 0x26c   : > { %v1278_v63 = vpop.f32.mrb[74].mxu1  ;;  %v1703_v0 = vpop.f32.mrb[74].mxu0 }
 0x26d   : > { %2019 = vst [vmem:[%s13464_s5 + $0x2c0] sm:$0xff] %v1278_v63  ;;  %2021 = vst [vmem:[%s13464_s5 + $0x2d0] sm:$0xff] %v1703_v0  ;;  %v1280_v1 = vpop.f32.mrb[75].mxu1  ;;  %v1705_v2 = vpop.f32.mrb[75].mxu0  ;;  %12224 = vmatmul.mubr.msk.f32.gmra.mrb[180].mxu1 %vm336_vm1, %v2203_v61  ;;  %v2223_v61 = vld [vmem:[#allocation3 + $0x198] sm:$0xff] }
 0x26e   : > { %2020 = vst [vmem:[%s13464_s5 + $0x2c8] sm:$0xff] %v1280_v1  ;;  %2022 = vst.msk [vmem:[%s13464_s5 + $0x2d8] sm:$0xff] %vm1933_vm2, %v1705_v2  ;;  %12226 = vmatprep.mubr.msk.f32.mxu1 %vm336_vm1, %v2204_v62  ;;  %v2224_v62 = vld [vmem:[#allocation3 + $0x1a0] sm:$0xff] }
 0x270   : > { %v1284_v5 = vpop.f32.mrb[76].mxu1  ;;  %v1709_v9 = vpop.f32.mrb[76].mxu0 }
 0x271   : > { %2023 = vst [vmem:[%s13464_s5 + $0x2e0] sm:$0xff] %v1284_v5  ;;  %2025 = vst [vmem:[%s13464_s5 + $0x2f0] sm:$0xff] %v1709_v9  ;;  %v1286_v10 = vpop.f32.mrb[77].mxu1  ;;  %v1711_v11 = vpop.f32.mrb[77].mxu0  ;;  %12227 = vmatmul.mubr.msk.f32.gmra.mrb[182].mxu1 %vm336_vm1, %v2205_v3  ;;  %v2225_v3 = vld [vmem:[#allocation3 + $0x1a8] sm:$0xff] }
 0x272   : > { %2024 = vst [vmem:[%s13464_s5 + $0x2e8] sm:$0xff] %v1286_v10  ;;  %2026 = vst.msk [vmem:[%s13464_s5 + $0x2f8] sm:$0xff] %vm1933_vm2, %v1711_v11  ;;  %12229 = vmatprep.mubr.msk.f32.mxu1 %vm336_vm1, %v2206_v4  ;;  %v2226_v4 = vld [vmem:[#allocation3 + $0x1b0] sm:$0xff] }
 0x274   : > { %v1290_v14 = vpop.f32.mrb[78].mxu1  ;;  %v1715_v15 = vpop.f32.mrb[78].mxu0 }
 0x275   : > { %2027 = vst [vmem:[%s13464_s5 + $0x300] sm:$0xff] %v1290_v14  ;;  %2029 = vst [vmem:[%s13464_s5 + $0x310] sm:$0xff] %v1715_v15  ;;  %v1292_v16 = vpop.f32.mrb[79].mxu1  ;;  %v1717_v17 = vpop.f32.mrb[79].mxu0  ;;  %12230 = vmatmul.mubr.msk.f32.gmra.mrb[184].mxu1 %vm336_vm1, %v2207_v12  ;;  %v2227_v12 = vld [vmem:[#allocation3 + $0x1b8] sm:$0xff] }
 0x276   : > { %2028 = vst [vmem:[%s13464_s5 + $0x308] sm:$0xff] %v1292_v16  ;;  %2030 = vst.msk [vmem:[%s13464_s5 + $0x318] sm:$0xff] %vm1933_vm2, %v1717_v17  ;;  %12232 = vmatprep.mubr.msk.f32.mxu1 %vm336_vm1, %v2208_v13  ;;  %v2228_v13 = vld [vmem:[#allocation3 + $0x1c0] sm:$0xff] }
 0x278   : > { %v1296_v20 = vpop.f32.mrb[80].mxu1  ;;  %v1721_v21 = vpop.f32.mrb[80].mxu0 }
 0x279   : > { %2031 = vst [vmem:[%s13464_s5 + $0x320] sm:$0xff] %v1296_v20  ;;  %2033 = vst [vmem:[%s13464_s5 + $0x330] sm:$0xff] %v1721_v21  ;;  %v1298_v22 = vpop.f32.mrb[81].mxu1  ;;  %v1723_v23 = vpop.f32.mrb[81].mxu0  ;;  %12233 = vmatmul.mubr.msk.f32.gmra.mrb[186].mxu1 %vm336_vm1, %v2209_v18  ;;  %v2229_v18 = vld [vmem:[#allocation3 + $0x1c8] sm:$0xff] }
 0x27a   : > { %2032 = vst [vmem:[%s13464_s5 + $0x328] sm:$0xff] %v1298_v22  ;;  %2034 = vst.msk [vmem:[%s13464_s5 + $0x338] sm:$0xff] %vm1933_vm2, %v1723_v23  ;;  %12235 = vmatprep.mubr.msk.f32.mxu1 %vm336_vm1, %v2210_v19  ;;  %v2230_v19 = vld [vmem:[#allocation3 + $0x1d0] sm:$0xff] }
 0x27c   : > { %v1302_v26 = vpop.f32.mrb[82].mxu1  ;;  %v1727_v27 = vpop.f32.mrb[82].mxu0 }
 0x27d   : > { %2035 = vst [vmem:[%s13464_s5 + $0x340] sm:$0xff] %v1302_v26  ;;  %2037 = vst [vmem:[%s13464_s5 + $0x350] sm:$0xff] %v1727_v27  ;;  %v1304_v28 = vpop.f32.mrb[83].mxu1  ;;  %v1729_v29 = vpop.f32.mrb[83].mxu0  ;;  %12236 = vmatmul.mubr.msk.f32.gmra.mrb[188].mxu1 %vm336_vm1, %v2211_v24  ;;  %v2231_v24 = vld [vmem:[#allocation3 + $0x1d8] sm:$0x1] }
 0x27e   : > { %2036 = vst [vmem:[%s13464_s5 + $0x348] sm:$0xff] %v1304_v28  ;;  %2038 = vst.msk [vmem:[%s13464_s5 + $0x358] sm:$0xff] %vm1933_vm2, %v1729_v29  ;;  %12238 = vmatprep.mubr.msk.f32.mxu1 %vm336_vm1, %v2212_v25 }
 0x280   : > { %v1308_v32 = vpop.f32.mrb[84].mxu1  ;;  %v1733_v33 = vpop.f32.mrb[84].mxu0 }
 0x281   : > { %2039 = vst [vmem:[%s13464_s5 + $0x360] sm:$0xff] %v1308_v32  ;;  %2041 = vst [vmem:[%s13464_s5 + $0x370] sm:$0xff] %v1733_v33  ;;  %v1310_v34 = vpop.f32.mrb[85].mxu1  ;;  %v1735_v35 = vpop.f32.mrb[85].mxu0  ;;  %12239 = vmatmul.mubr.msk.f32.gmra.mrb[190].mxu1 %vm336_vm1, %v2213_v30 }
 0x282   : > { %2040 = vst [vmem:[%s13464_s5 + $0x368] sm:$0xff] %v1310_v34  ;;  %2042 = vst.msk [vmem:[%s13464_s5 + $0x378] sm:$0xff] %vm1933_vm2, %v1735_v35  ;;  %12241 = vmatprep.mubr.msk.f32.mxu1 %vm336_vm1, %v2214_v31 }
 0x284   : > { %v1314_v40 = vpop.f32.mrb[86].mxu1  ;;  %v1739_v41 = vpop.f32.mrb[86].mxu0 }
 0x285   : > { %2043 = vst [vmem:[%s13464_s5 + $0x380] sm:$0xff] %v1314_v40  ;;  %2045 = vst [vmem:[%s13464_s5 + $0x390] sm:$0xff] %v1739_v41  ;;  %v1316_v6 = vpop.f32.mrb[87].mxu1  ;;  %v1741_v42 = vpop.f32.mrb[87].mxu0  ;;  %12242 = vmatmul.mubr.msk.f32.gmra.mrb[192].mxu1 %vm336_vm1, %v2215_v37 }
 0x286   : > { %2044 = vst [vmem:[%s13464_s5 + $0x388] sm:$0xff] %v1316_v6  ;;  %2046 = vst.msk [vmem:[%s13464_s5 + $0x398] sm:$0xff] %vm1933_vm2, %v1741_v42  ;;  %12244 = vmatprep.mubr.msk.f32.mxu1 %vm336_vm1, %v2216_v39 }
 0x288   : > { %v1320_v46 = vpop.f32.mrb[88].mxu1  ;;  %v1745_v7 = vpop.f32.mrb[88].mxu0 }
 0x289   : > { %2047 = vst [vmem:[%s13464_s5 + $0x3a0] sm:$0xff] %v1320_v46  ;;  %2049 = vst [vmem:[%s13464_s5 + $0x3b0] sm:$0xff] %v1745_v7  ;;  %v1322_v47 = vpop.f32.mrb[89].mxu1  ;;  %v1747_v48 = vpop.f32.mrb[89].mxu0  ;;  %12245 = vmatmul.mubr.msk.f32.gmra.mrb[194].mxu1 %vm336_vm1, %v2217_v44 }
 0x28a   : > { %2048 = vst [vmem:[%s13464_s5 + $0x3a8] sm:$0xff] %v1322_v47  ;;  %2050 = vst.msk [vmem:[%s13464_s5 + $0x3b8] sm:$0xff] %vm1933_vm2, %v1747_v48  ;;  %12247 = vmatprep.mubr.msk.f32.mxu1 %vm336_vm1, %v2218_v45 }
 0x28c   : > { %v1326_v51 = vpop.f32.mrb[90].mxu1  ;;  %v1751_v52 = vpop.f32.mrb[90].mxu0 }
 0x28d   : > { %2051 = vst [vmem:[%s13464_s5 + $0x3c0] sm:$0xff] %v1326_v51  ;;  %2053 = vst [vmem:[%s13464_s5 + $0x3d0] sm:$0xff] %v1751_v52  ;;  %v1328_v53 = vpop.f32.mrb[91].mxu1  ;;  %v1753_v54 = vpop.f32.mrb[91].mxu0  ;;  %12248 = vmatmul.mubr.msk.f32.gmra.mrb[196].mxu1 %vm336_vm1, %v2219_v49 }
 0x28e   : > { %2052 = vst [vmem:[%s13464_s5 + $0x3c8] sm:$0xff] %v1328_v53  ;;  %2054 = vst.msk [vmem:[%s13464_s5 + $0x3d8] sm:$0xff] %vm1933_vm2, %v1753_v54  ;;  %12250 = vmatprep.mubr.msk.f32.mxu1 %vm336_vm1, %v2220_v50 }
 0x290   : > { %v1332_v57 = vpop.f32.mrb[92].mxu1  ;;  %v1757_v58 = vpop.f32.mrb[92].mxu0 }
 0x291   : > { %2055 = vst [vmem:[%s13464_s5 + $0x3e0] sm:$0xff] %v1332_v57  ;;  %2057 = vst [vmem:[%s13464_s5 + $0x3f0] sm:$0xff] %v1757_v58  ;;  %v1334_v59 = vpop.f32.mrb[93].mxu1  ;;  %v1759_v60 = vpop.f32.mrb[93].mxu0  ;;  %12251 = vmatmul.mubr.msk.f32.gmra.mrb[198].mxu1 %vm336_vm1, %v2221_v55 }
 0x292   : > { %2056 = vst [vmem:[%s13464_s5 + $0x3e8] sm:$0xff] %v1334_v59  ;;  %2058 = vst.msk [vmem:[%s13464_s5 + $0x3f8] sm:$0xff] %vm1933_vm2, %v1759_v60  ;;  %12253 = vmatprep.mubr.msk.f32.mxu1 %vm336_vm1, %v2222_v56 }
 0x294   : > { %v1338_v63 = vpop.f32.mrb[94].mxu1  ;;  %v1763_v0 = vpop.f32.mrb[94].mxu0 }
 0x295   : > { %2059 = vst [vmem:[%s13464_s5 + $0x400] sm:$0xff] %v1338_v63  ;;  %2061 = vst [vmem:[%s13464_s5 + $0x410] sm:$0xff] %v1763_v0  ;;  %v1340_v1 = vpop.f32.mrb[95].mxu1  ;;  %v1765_v2 = vpop.f32.mrb[95].mxu0  ;;  %12254 = vmatmul.mubr.msk.f32.gmra.mrb[200].mxu1 %vm336_vm1, %v2223_v61 }
 0x296   : > { %2060 = vst [vmem:[%s13464_s5 + $0x408] sm:$0xff] %v1340_v1  ;;  %2062 = vst.msk [vmem:[%s13464_s5 + $0x418] sm:$0xff] %vm1933_vm2, %v1765_v2  ;;  %12256 = vmatprep.mubr.msk.f32.mxu1 %vm336_vm1, %v2224_v62 }
 0x298   : > { %v1344_v5 = vpop.f32.mrb[96].mxu1  ;;  %v1769_v9 = vpop.f32.mrb[96].mxu0 }
 0x299   : > { %2063 = vst [vmem:[%s13464_s5 + $0x420] sm:$0xff] %v1344_v5  ;;  %2065 = vst [vmem:[%s13464_s5 + $0x430] sm:$0xff] %v1769_v9  ;;  %v1346_v10 = vpop.f32.mrb[97].mxu1  ;;  %v1771_v11 = vpop.f32.mrb[97].mxu0  ;;  %12257 = vmatmul.mubr.msk.f32.gmra.mrb[202].mxu1 %vm336_vm1, %v2225_v3 }
 0x29a   : > { %2064 = vst [vmem:[%s13464_s5 + $0x428] sm:$0xff] %v1346_v10  ;;  %2066 = vst.msk [vmem:[%s13464_s5 + $0x438] sm:$0xff] %vm1933_vm2, %v1771_v11  ;;  %12259 = vmatprep.mubr.msk.f32.mxu1 %vm336_vm1, %v2226_v4 }
 0x29c   : > { %v1350_v14 = vpop.f32.mrb[98].mxu1  ;;  %v1775_v15 = vpop.f32.mrb[98].mxu0 }
 0x29d   : > { %2067 = vst [vmem:[%s13464_s5 + $0x440] sm:$0xff] %v1350_v14  ;;  %2069 = vst [vmem:[%s13464_s5 + $0x450] sm:$0xff] %v1775_v15  ;;  %v1352_v16 = vpop.f32.mrb[99].mxu1  ;;  %v1777_v17 = vpop.f32.mrb[99].mxu0  ;;  %12260 = vmatmul.mubr.msk.f32.gmra.mrb[204].mxu1 %vm336_vm1, %v2227_v12 }
 0x29e   : > { %2068 = vst [vmem:[%s13464_s5 + $0x448] sm:$0xff] %v1352_v16  ;;  %2070 = vst.msk [vmem:[%s13464_s5 + $0x458] sm:$0xff] %vm1933_vm2, %v1777_v17  ;;  %12262 = vmatprep.mubr.msk.f32.mxu1 %vm336_vm1, %v2228_v13 }
 0x2a0   : > { %v1356_v20 = vpop.f32.mrb[100].mxu1  ;;  %v1781_v21 = vpop.f32.mrb[100].mxu0 }
 0x2a1   : > { %2071 = vst [vmem:[%s13464_s5 + $0x460] sm:$0xff] %v1356_v20  ;;  %2073 = vst [vmem:[%s13464_s5 + $0x470] sm:$0xff] %v1781_v21  ;;  %v1358_v22 = vpop.f32.mrb[101].mxu1  ;;  %v1783_v23 = vpop.f32.mrb[101].mxu0  ;;  %12263 = vmatmul.mubr.msk.f32.gmra.mrb[206].mxu1 %vm336_vm1, %v2229_v18 }
 0x2a2   : > { %2072 = vst [vmem:[%s13464_s5 + $0x468] sm:$0xff] %v1358_v22  ;;  %2074 = vst.msk [vmem:[%s13464_s5 + $0x478] sm:$0xff] %vm1933_vm2, %v1783_v23  ;;  %12265 = vmatprep.mubr.msk.f32.mxu1 %vm336_vm1, %v2230_v19 }
 0x2a4   : > { %v1362_v25 = vpop.f32.mrb[102].mxu1  ;;  %v1787_v26 = vpop.f32.mrb[102].mxu0 }
 0x2a5   : > { %2075 = vst [vmem:[%s13464_s5 + $0x480] sm:$0xff] %v1362_v25  ;;  %2077 = vst [vmem:[%s13464_s5 + $0x490] sm:$0xff] %v1787_v26  ;;  %v1364_v27 = vpop.f32.mrb[103].mxu1  ;;  %v1789_v28 = vpop.f32.mrb[103].mxu0  ;;  %12266 = vmatmul.mubr.msk.f32.gmra.mrb[208].mxu1 %vm336_vm1, %v2231_v24 }
 0x2a6   : > { %2076 = vst [vmem:[%s13464_s5 + $0x488] sm:$0xff] %v1364_v27  ;;  %2078 = vst.msk [vmem:[%s13464_s5 + $0x498] sm:$0xff] %vm1933_vm2, %v1789_v28  ;;  %3465 = vmatprep.mubr.f32.mxu1 %v12822_v8 }
 0x2a8   : > { %v1368_v29 = vpop.f32.mrb[104].mxu1  ;;  %v1793_v30 = vpop.f32.mrb[104].mxu0 }
 0x2a9   : > { %2079 = vst [vmem:[%s13464_s5 + $0x4a0] sm:$0xff] %v1368_v29  ;;  %2081 = vst [vmem:[%s13464_s5 + $0x4b0] sm:$0xff] %v1793_v30  ;;  %v1370_v31 = vpop.f32.mrb[105].mxu1  ;;  %v1795_v32 = vpop.f32.mrb[105].mxu0 }
 0x2aa   : > { %2080 = vst [vmem:[%s13464_s5 + $0x4a8] sm:$0xff] %v1370_v31  ;;  %2082 = vst.msk [vmem:[%s13464_s5 + $0x4b8] sm:$0xff] %vm1933_vm2, %v1795_v32 }
 0x2ac   : > { %v1374_v33 = vpop.f32.mrb[106].mxu1  ;;  %v1799_v34 = vpop.f32.mrb[106].mxu0 }
 0x2ad   : > { %2083 = vst [vmem:[%s13464_s5 + $0x4c0] sm:$0xff] %v1374_v33  ;;  %2085 = vst [vmem:[%s13464_s5 + $0x4d0] sm:$0xff] %v1799_v34  ;;  %v1376_v35 = vpop.f32.mrb[107].mxu1  ;;  %v1801_v36 = vpop.f32.mrb[107].mxu0 }
 0x2ae   : > { %2084 = vst [vmem:[%s13464_s5 + $0x4c8] sm:$0xff] %v1376_v35  ;;  %2086 = vst.msk [vmem:[%s13464_s5 + $0x4d8] sm:$0xff] %vm1933_vm2, %v1801_v36 }
 0x2b0   : > { %v1380_v37 = vpop.f32.mrb[108].mxu1  ;;  %v1805_v38 = vpop.f32.mrb[108].mxu0 }
 0x2b1   : > { %2087 = vst [vmem:[%s13464_s5 + $0x4e0] sm:$0xff] %v1380_v37  ;;  %2089 = vst [vmem:[%s13464_s5 + $0x4f0] sm:$0xff] %v1805_v38  ;;  %v1382_v39 = vpop.f32.mrb[109].mxu1  ;;  %v1807_v40 = vpop.f32.mrb[109].mxu0 }
 0x2b2   : > { %2088 = vst [vmem:[%s13464_s5 + $0x4e8] sm:$0xff] %v1382_v39  ;;  %2090 = vst.msk [vmem:[%s13464_s5 + $0x4f8] sm:$0xff] %vm1933_vm2, %v1807_v40 }
 0x2b4   : > { %v1386_v41 = vpop.f32.mrb[110].mxu1  ;;  %v1811_v6 = vpop.f32.mrb[110].mxu0 }
 0x2b5   : > { %2091 = vst [vmem:[%s13464_s5 + $0x500] sm:$0xff] %v1386_v41  ;;  %2093 = vst [vmem:[%s13464_s5 + $0x510] sm:$0xff] %v1811_v6  ;;  %v1388_v42 = vpop.f32.mrb[111].mxu1  ;;  %v1813_v44 = vpop.f32.mrb[111].mxu0 }
 0x2b6   : > { %2092 = vst [vmem:[%s13464_s5 + $0x508] sm:$0xff] %v1388_v42  ;;  %2094 = vst.msk [vmem:[%s13464_s5 + $0x518] sm:$0xff] %vm1933_vm2, %v1813_v44 }
 0x2b8   : > { %v1392_v45 = vpop.f32.mrb[112].mxu1  ;;  %v1817_v46 = vpop.f32.mrb[112].mxu0 }
 0x2b9   : > { %2095 = vst [vmem:[%s13464_s5 + $0x520] sm:$0xff] %v1392_v45  ;;  %2097 = vst [vmem:[%s13464_s5 + $0x530] sm:$0xff] %v1817_v46  ;;  %v1394_v7 = vpop.f32.mrb[113].mxu1  ;;  %v1819_v47 = vpop.f32.mrb[113].mxu0 }
 0x2ba   : > { %2096 = vst [vmem:[%s13464_s5 + $0x528] sm:$0xff] %v1394_v7  ;;  %2098 = vst.msk [vmem:[%s13464_s5 + $0x538] sm:$0xff] %vm1933_vm2, %v1819_v47 }
 0x2bc   : > { %v1398_v48 = vpop.f32.mrb[114].mxu1  ;;  %v1823_v49 = vpop.f32.mrb[114].mxu0 }
 0x2bd   : > { %2099 = vst [vmem:[%s13464_s5 + $0x540] sm:$0xff] %v1398_v48  ;;  %2101 = vst [vmem:[%s13464_s5 + $0x550] sm:$0xff] %v1823_v49  ;;  %v1400_v50 = vpop.f32.mrb[115].mxu1  ;;  %v1825_v51 = vpop.f32.mrb[115].mxu0 }
 0x2be   : > { %2100 = vst [vmem:[%s13464_s5 + $0x548] sm:$0xff] %v1400_v50  ;;  %2102 = vst.msk [vmem:[%s13464_s5 + $0x558] sm:$0xff] %vm1933_vm2, %v1825_v51 }
 0x2c0   : > { %v1404_v52 = vpop.f32.mrb[116].mxu1  ;;  %v1829_v53 = vpop.f32.mrb[116].mxu0 }
 0x2c1   : > { %2103 = vst [vmem:[%s13464_s5 + $0x560] sm:$0xff] %v1404_v52  ;;  %2105 = vst [vmem:[%s13464_s5 + $0x570] sm:$0xff] %v1829_v53  ;;  %v1406_v54 = vpop.f32.mrb[117].mxu1  ;;  %v1831_v55 = vpop.f32.mrb[117].mxu0 }
 0x2c2   : > { %2104 = vst [vmem:[%s13464_s5 + $0x568] sm:$0xff] %v1406_v54  ;;  %2106 = vst.msk [vmem:[%s13464_s5 + $0x578] sm:$0xff] %vm1933_vm2, %v1831_v55 }
 0x2c4   : > { %v1410_v56 = vpop.f32.mrb[118].mxu1  ;;  %v1835_v57 = vpop.f32.mrb[118].mxu0 }
 0x2c5   : > { %2107 = vst [vmem:[%s13464_s5 + $0x580] sm:$0xff] %v1410_v56  ;;  %2109 = vst [vmem:[%s13464_s5 + $0x590] sm:$0xff] %v1835_v57  ;;  %v1412_v58 = vpop.f32.mrb[119].mxu1  ;;  %v1837_v59 = vpop.f32.mrb[119].mxu0 }
 0x2c6   : > { %2108 = vst [vmem:[%s13464_s5 + $0x588] sm:$0xff] %v1412_v58  ;;  %2110 = vst.msk [vmem:[%s13464_s5 + $0x598] sm:$0xff] %vm1933_vm2, %v1837_v59 }
 0x2c8   : > { %v1416_v60 = vpop.f32.mrb[120].mxu1  ;;  %v1841_v61 = vpop.f32.mrb[120].mxu0 }
 0x2c9   : > { %2111 = vst [vmem:[%s13464_s5 + $0x5a0] sm:$0xff] %v1416_v60  ;;  %2113 = vst [vmem:[%s13464_s5 + $0x5b0] sm:$0xff] %v1841_v61  ;;  %v1418_v62 = vpop.f32.mrb[121].mxu1  ;;  %v1843_v63 = vpop.f32.mrb[121].mxu0 }
 0x2ca   : > { %2112 = vst [vmem:[%s13464_s5 + $0x5a8] sm:$0xff] %v1418_v62  ;;  %2114 = vst.msk [vmem:[%s13464_s5 + $0x5b8] sm:$0xff] %vm1933_vm2, %v1843_v63 }
 0x2cc   : > { %v1422_v0 = vpop.f32.mrb[122].mxu1  ;;  %v1847_v1 = vpop.f32.mrb[122].mxu0 }
 0x2cd   : > { %2115 = vst [vmem:[%s13464_s5 + $0x5c0] sm:$0xff] %v1422_v0  ;;  %2117 = vst [vmem:[%s13464_s5 + $0x5d0] sm:$0xff] %v1847_v1  ;;  %v1424_v2 = vpop.f32.mrb[123].mxu1  ;;  %v1849_v3 = vpop.f32.mrb[123].mxu0 }
 0x2ce   : > { %2116 = vst [vmem:[%s13464_s5 + $0x5c8] sm:$0xff] %v1424_v2  ;;  %2118 = vst.msk [vmem:[%s13464_s5 + $0x5d8] sm:$0xff] %vm1933_vm2, %v1849_v3 }
 0x2d0   : > { %v1428_v4 = vpop.f32.mrb[124].mxu1  ;;  %v1853_v5 = vpop.f32.mrb[124].mxu0 }
 0x2d1   : > { %2119 = vst [vmem:[%s13464_s5 + $0x5e0] sm:$0xff] %v1428_v4  ;;  %2121 = vst [vmem:[%s13464_s5 + $0x5f0] sm:$0xff] %v1853_v5  ;;  %v1430_v9 = vpop.f32.mrb[125].mxu1  ;;  %v1855_v10 = vpop.f32.mrb[125].mxu0 }
 0x2d2   : > { %2120 = vst [vmem:[%s13464_s5 + $0x5e8] sm:$0xff] %v1430_v9  ;;  %2122 = vst.msk [vmem:[%s13464_s5 + $0x5f8] sm:$0xff] %vm1933_vm2, %v1855_v10 }
 0x2d4   : > { %v1434_v11 = vpop.f32.mrb[126].mxu1  ;;  %v1859_v12 = vpop.f32.mrb[126].mxu0 }
 0x2d5   : > { %2123 = vst [vmem:[%s13464_s5 + $0x600] sm:$0xff] %v1434_v11  ;;  %2125 = vst [vmem:[%s13464_s5 + $0x610] sm:$0xff] %v1859_v12  ;;  %v1436_v13 = vpop.f32.mrb[127].mxu1  ;;  %v1861_v14 = vpop.f32.mrb[127].mxu0 }
 0x2d6   : > { %2124 = vst [vmem:[%s13464_s5 + $0x608] sm:$0xff] %v1436_v13  ;;  %2126 = vst.msk [vmem:[%s13464_s5 + $0x618] sm:$0xff] %vm1933_vm2, %v1861_v14 }
 0x2d8   : > { %v1440_v15 = vpop.f32.mrb[128].mxu1  ;;  %v1865_v16 = vpop.f32.mrb[128].mxu0 }
 0x2d9   : > { %2127 = vst [vmem:[%s13464_s5 + $0x620] sm:$0xff] %v1440_v15  ;;  %2129 = vst [vmem:[%s13464_s5 + $0x630] sm:$0xff] %v1865_v16  ;;  %v1442_v17 = vpop.f32.mrb[129].mxu1  ;;  %v1867_v18 = vpop.f32.mrb[129].mxu0 }
 0x2da   : > { %2128 = vst [vmem:[%s13464_s5 + $0x628] sm:$0xff] %v1442_v17  ;;  %2130 = vst.msk [vmem:[%s13464_s5 + $0x638] sm:$0xff] %vm1933_vm2, %v1867_v18 }
 0x2dc   : > { %v1446_v19 = vpop.f32.mrb[130].mxu1  ;;  %v1871_v20 = vpop.f32.mrb[130].mxu0 }
 0x2dd   : > { %2131 = vst [vmem:[%s13464_s5 + $0x640] sm:$0xff] %v1446_v19  ;;  %2133 = vst [vmem:[%s13464_s5 + $0x650] sm:$0xff] %v1871_v20  ;;  %v1448_v21 = vpop.f32.mrb[131].mxu1  ;;  %v1873_v22 = vpop.f32.mrb[131].mxu0 }
 0x2de   : > { %2132 = vst [vmem:[%s13464_s5 + $0x648] sm:$0xff] %v1448_v21  ;;  %2134 = vst.msk [vmem:[%s13464_s5 + $0x658] sm:$0xff] %vm1933_vm2, %v1873_v22 }
 0x2e0   : > { %v1452_v23 = vpop.f32.mrb[132].mxu1  ;;  %v1877_v24 = vpop.f32.mrb[132].mxu0 }
 0x2e1   : > { %2135 = vst [vmem:[%s13464_s5 + $0x660] sm:$0xff] %v1452_v23  ;;  %2137 = vst [vmem:[%s13464_s5 + $0x670] sm:$0xff] %v1877_v24  ;;  %v1454_v25 = vpop.f32.mrb[133].mxu1  ;;  %v1879_v26 = vpop.f32.mrb[133].mxu0 }
 0x2e2   : > { %2136 = vst [vmem:[%s13464_s5 + $0x668] sm:$0xff] %v1454_v25  ;;  %2138 = vst.msk [vmem:[%s13464_s5 + $0x678] sm:$0xff] %vm1933_vm2, %v1879_v26 }
 0x2e4   : > { %v1458_v27 = vpop.f32.mrb[134].mxu1  ;;  %v1883_v28 = vpop.f32.mrb[134].mxu0 }
 0x2e5   : > { %2139 = vst [vmem:[%s13464_s5 + $0x680] sm:$0xff] %v1458_v27  ;;  %2141 = vst [vmem:[%s13464_s5 + $0x690] sm:$0xff] %v1883_v28  ;;  %v1460_v29 = vpop.f32.mrb[135].mxu1  ;;  %v1885_v30 = vpop.f32.mrb[135].mxu0 }
 0x2e6   : > { %2140 = vst [vmem:[%s13464_s5 + $0x688] sm:$0xff] %v1460_v29  ;;  %2142 = vst.msk [vmem:[%s13464_s5 + $0x698] sm:$0xff] %vm1933_vm2, %v1885_v30 }
 0x2e8   : > { %v1464_v31 = vpop.f32.mrb[136].mxu1  ;;  %v1889_v32 = vpop.f32.mrb[136].mxu0 }
 0x2e9   : > { %2143 = vst [vmem:[%s13464_s5 + $0x6a0] sm:$0xff] %v1464_v31  ;;  %2145 = vst [vmem:[%s13464_s5 + $0x6b0] sm:$0xff] %v1889_v32  ;;  %v1466_v33 = vpop.f32.mrb[137].mxu1  ;;  %v1891_v34 = vpop.f32.mrb[137].mxu0 }
 0x2ea   : > { %2144 = vst [vmem:[%s13464_s5 + $0x6a8] sm:$0xff] %v1466_v33  ;;  %2146 = vst.msk [vmem:[%s13464_s5 + $0x6b8] sm:$0xff] %vm1933_vm2, %v1891_v34 }
 0x2ec   : > { %v1470_v35 = vpop.f32.mrb[138].mxu1  ;;  %v1895_v36 = vpop.f32.mrb[138].mxu0 }
 0x2ed   : > { %2147 = vst [vmem:[%s13464_s5 + $0x6c0] sm:$0xff] %v1470_v35  ;;  %2149 = vst [vmem:[%s13464_s5 + $0x6d0] sm:$0xff] %v1895_v36  ;;  %v1472_v37 = vpop.f32.mrb[139].mxu1  ;;  %v1897_v38 = vpop.f32.mrb[139].mxu0 }
 0x2ee   : > { %2148 = vst [vmem:[%s13464_s5 + $0x6c8] sm:$0xff] %v1472_v37  ;;  %2150 = vst.msk [vmem:[%s13464_s5 + $0x6d8] sm:$0xff] %vm1933_vm2, %v1897_v38 }
 0x2f0   : > { %v1476_v39 = vpop.f32.mrb[140].mxu1  ;;  %v1901_v40 = vpop.f32.mrb[140].mxu0 }
 0x2f1   : > { %2151 = vst [vmem:[%s13464_s5 + $0x6e0] sm:$0xff] %v1476_v39  ;;  %2153 = vst [vmem:[%s13464_s5 + $0x6f0] sm:$0xff] %v1901_v40  ;;  %v1478_v41 = vpop.f32.mrb[141].mxu1  ;;  %v1903_v6 = vpop.f32.mrb[141].mxu0  ;;  %v4677_v40 = vld [vmem:[#allocation6] sm:$0xff] }
 0x2f2   : > { %2152 = vst [vmem:[%s13464_s5 + $0x6e8] sm:$0xff] %v1478_v41  ;;  %2154 = vst.msk [vmem:[%s13464_s5 + $0x6f8] sm:$0xff] %vm1933_vm2, %v1903_v6  ;;  %v4681_v6 = vcombine.high %v4677_v40, %v4677_v40 }
 0x2f4   : > { %v1482_v42 = vpop.f32.mrb[142].mxu1  ;;  %v1907_v44 = vpop.f32.mrb[142].mxu0  ;;  %10559 = vmatprep.subr.msk.mxu1 %vm517_vm0, %v4681_v6  ;;  %v4074_v6 = vld [vmem:[#allocation3 + $0x38] sm:$0xff] }
 0x2f5   : > { %2155 = vst [vmem:[%s13464_s5 + $0x700] sm:$0xff] %v1482_v42  ;;  %2157 = vst [vmem:[%s13464_s5 + $0x710] sm:$0xff] %v1907_v44  ;;  %v1484_v45 = vpop.f32.mrb[143].mxu1  ;;  %v1909_v46 = vpop.f32.mrb[143].mxu0 }
 0x2f6   : > { %2156 = vst [vmem:[%s13464_s5 + $0x708] sm:$0xff] %v1484_v45  ;;  %2158 = vst.msk [vmem:[%s13464_s5 + $0x718] sm:$0xff] %vm1933_vm2, %v1909_v46 }
 0x2f8   : > { %v1488_v7 = vpop.f32.mrb[144].mxu1  ;;  %v1913_v47 = vpop.f32.mrb[144].mxu0 }
 0x2f9   : > { %2159 = vst [vmem:[%s13464_s5 + $0x720] sm:$0xff] %v1488_v7  ;;  %2161 = vst [vmem:[%s13464_s5 + $0x730] sm:$0xff] %v1913_v47  ;;  %v1490_v48 = vpop.f32.mrb[145].mxu1  ;;  %v1915_v49 = vpop.f32.mrb[145].mxu0 }
 0x2fa   : > { %2160 = vst [vmem:[%s13464_s5 + $0x728] sm:$0xff] %v1490_v48  ;;  %2162 = vst.msk [vmem:[%s13464_s5 + $0x738] sm:$0xff] %vm1933_vm2, %v1915_v49 }
 0x2fc   : > { %v1494_v50 = vpop.f32.mrb[146].mxu1  ;;  %v1919_v51 = vpop.f32.mrb[146].mxu0 }
 0x2fd   : > { %2163 = vst [vmem:[%s13464_s5 + $0x740] sm:$0xff] %v1494_v50  ;;  %2165 = vst [vmem:[%s13464_s5 + $0x750] sm:$0xff] %v1919_v51  ;;  %v1496_v52 = vpop.f32.mrb[147].mxu1  ;;  %v1921_v53 = vpop.f32.mrb[147].mxu0 }
 0x2fe   : > { %2164 = vst [vmem:[%s13464_s5 + $0x748] sm:$0xff] %v1496_v52  ;;  %2166 = vst.msk [vmem:[%s13464_s5 + $0x758] sm:$0xff] %vm1933_vm2, %v1921_v53 }
 0x300   : > { %v1500_v54 = vpop.f32.mrb[148].mxu1  ;;  %v1925_v55 = vpop.f32.mrb[148].mxu0 }
 0x301   : > { %2167 = vst [vmem:[%s13464_s5 + $0x760] sm:$0x1] %v1500_v54  ;;  %2169 = vst [vmem:[%s13464_s5 + $0x770] sm:$0x1] %v1925_v55  ;;  %v1502_v56 = vpop.f32.mrb[149].mxu1  ;;  %v1927_v57 = vpop.f32.mrb[149].mxu0 }
 0x302   : > { %2168 = vst [vmem:[%s13464_s5 + $0x768] sm:$0x1] %v1502_v56  ;;  %2171 = vst.msk [vmem:[%s13464_s5 + $0x778] sm:$0x1] %vm2170_vm3, %v1927_v57 }
 0x304   : > { %v12180_v58 = vpop.f32.mrb[150].mxu1 }
 0x305   : > { %v2483_v59 = vpop.f32.mrb[151].mxu1 }
 0x306   : > { %10135 = vmatmul.mubr.msk.f32.vlgmr.msra.gmra.mrb[150].mxu0 %vm336_vm1, %v2483_v59  ;;  %10197 = vmatmul.mubr.msk.f32.vlgmr.msra.gmra.mrb[210].mxu1 %vm336_vm1, %v2483_v59 }
 0x307   : > { %12269 = vmatpush3.msk.msra.mxu0 %vm517_vm0, %v13697_v43  ;;  %3046 = vmatprep.mubr.f32.mxu0 %v12822_v8 }
 0x308   : > { %3471 = vmatprep.mubr.f32.mxu1 %v12822_v8  ;;  %v12183_v60 = vpop.f32.mrb[152].mxu1  ;;  %10560 = vmatpush1.msk.msra.mxu1 %vm517_vm0, %v4677_v40 }
 0x309   : > { %v2493_v61 = vpop.f32.mrb[153].mxu1 }
 0x30a   : > { %10136 = vmatmul.mubr.msk.f32.gmra.mrb[152].mxu0 %vm336_vm1, %v12180_v58  ;;  %10198 = vmatmul.mubr.msk.f32.gmra.mrb[212].mxu1 %vm336_vm1, %v12180_v58 }
 0x30b   : > { %3052 = vmatprep.mubr.f32.mxu0 %v12822_v8  ;;  %3477 = vmatprep.mubr.f32.mxu1 %v12822_v8 }
 0x30c   : > { %v12186_v62 = vpop.f32.mrb[154].mxu1 }
 0x30d   : > { %v2503_v63 = vpop.f32.mrb[155].mxu1 }
 0x30e   : > { %10137 = vmatmul.mubr.msk.f32.gmra.mrb[154].mxu0 %vm336_vm1, %v2493_v61  ;;  %10199 = vmatmul.mubr.msk.f32.gmra.mrb[214].mxu1 %vm336_vm1, %v2493_v61 }
 0x30f   : > { %3058 = vmatprep.mubr.f32.mxu0 %v12822_v8  ;;  %3483 = vmatprep.mubr.f32.mxu1 %v12822_v8 }
 0x310   : > { %v12189_v43 = vpop.f32.mrb[156].mxu1 }
 0x311   : > { %v2513_v0 = vpop.f32.mrb[157].mxu1 }
 0x312   : > { %10138 = vmatmul.mubr.msk.f32.gmra.mrb[156].mxu0 %vm336_vm1, %v12183_v60  ;;  %10200 = vmatmul.mubr.msk.f32.gmra.mrb[216].mxu1 %vm336_vm1, %v12183_v60 }
 0x313   : > { %3064 = vmatprep.mubr.f32.mxu0 %v12822_v8  ;;  %3489 = vmatprep.mubr.f32.mxu1 %v12822_v8 }
 0x314   : > { %v12192_v1 = vpop.f32.mrb[158].mxu1 }
 0x315   : > { %v2523_v2 = vpop.f32.mrb[159].mxu1 }
 0x316   : > { %10139 = vmatmul.mubr.msk.f32.gmra.mrb[158].mxu0 %vm336_vm1, %v2503_v63  ;;  %10201 = vmatmul.mubr.msk.f32.gmra.mrb[218].mxu1 %vm336_vm1, %v2503_v63 }
 0x317   : > { %3070 = vmatprep.mubr.f32.mxu0 %v12822_v8  ;;  %3495 = vmatprep.mubr.f32.mxu1 %v12822_v8 }
 0x318   : > { %v12195_v3 = vpop.f32.mrb[160].mxu1 }
 0x319   : > { %v2533_v4 = vpop.f32.mrb[161].mxu1 }
 0x31a   : > { %10140 = vmatmul.mubr.msk.f32.gmra.mrb[160].mxu0 %vm336_vm1, %v12186_v62  ;;  %10202 = vmatmul.mubr.msk.f32.gmra.mrb[220].mxu1 %vm336_vm1, %v12186_v62 }
 0x31b   : > { %3076 = vmatprep.mubr.f32.mxu0 %v12822_v8  ;;  %3501 = vmatprep.mubr.f32.mxu1 %v12822_v8 }
 0x31c   : > { %v12198_v5 = vpop.f32.mrb[162].mxu1 }
 0x31d   : > { %v2543_v9 = vpop.f32.mrb[163].mxu1 }
 0x31e   : > { %10141 = vmatmul.mubr.msk.f32.gmra.mrb[162].mxu0 %vm336_vm1, %v2513_v0  ;;  %10203 = vmatmul.mubr.msk.f32.gmra.mrb[222].mxu1 %vm336_vm1, %v2513_v0 }
 0x31f   : > { %3082 = vmatprep.mubr.f32.mxu0 %v12822_v8  ;;  %3507 = vmatprep.mubr.f32.mxu1 %v12822_v8 }
 0x320   : > { %v12201_v10 = vpop.f32.mrb[164].mxu1 }
 0x321   : > { %v2553_v11 = vpop.f32.mrb[165].mxu1 }
 0x322   : > { %10142 = vmatmul.mubr.msk.f32.gmra.mrb[164].mxu0 %vm336_vm1, %v12189_v43  ;;  %10204 = vmatmul.mubr.msk.f32.gmra.mrb[224].mxu1 %vm336_vm1, %v12189_v43 }
 0x323   : > { %3088 = vmatprep.mubr.f32.mxu0 %v12822_v8  ;;  %3513 = vmatprep.mubr.f32.mxu1 %v12822_v8 }
 0x324   : > { %v12204_v12 = vpop.f32.mrb[166].mxu1 }
 0x325   : > { %v2563_v13 = vpop.f32.mrb[167].mxu1 }
 0x326   : > { %10143 = vmatmul.mubr.msk.f32.gmra.mrb[166].mxu0 %vm336_vm1, %v2523_v2  ;;  %10205 = vmatmul.mubr.msk.f32.gmra.mrb[226].mxu1 %vm336_vm1, %v2523_v2 }
 0x327   : > { %3094 = vmatprep.mubr.f32.mxu0 %v12822_v8  ;;  %3519 = vmatprep.mubr.f32.mxu1 %v12822_v8 }
 0x328   : > { %v13915_v14 = vpop.f32.mrb[168].mxu1 }
 0x329   : > { %v2573_v15 = vpop.f32.mrb[169].mxu1 }
 0x32a   : > { %10144 = vmatmul.mubr.msk.f32.gmra.mrb[168].mxu0 %vm336_vm1, %v12192_v1  ;;  %10206 = vmatmul.mubr.msk.f32.gmra.mrb[228].mxu1 %vm336_vm1, %v12192_v1 }
 0x32b   : > { %3100 = vmatprep.mubr.f32.mxu0 %v12822_v8  ;;  %3525 = vmatprep.mubr.f32.mxu1 %v12822_v8 }
 0x32c   : > { %v13921_v16 = vpop.f32.mrb[170].mxu1 }
 0x32d   : > { %v2583_v17 = vpop.f32.mrb[171].mxu1 }
 0x32e   : > { %10145 = vmatmul.mubr.msk.f32.gmra.mrb[170].mxu0 %vm336_vm1, %v2533_v4  ;;  %10207 = vmatmul.mubr.msk.f32.gmra.mrb[230].mxu1 %vm336_vm1, %v2533_v4 }
 0x32f   : > { %3106 = vmatprep.mubr.f32.mxu0 %v12822_v8  ;;  %3531 = vmatprep.mubr.f32.mxu1 %v12822_v8 }
 0x330   : > { %v13927_v18 = vpop.f32.mrb[172].mxu1 }
 0x331   : > { %v13929_v19 = vpop.f32.mrb[173].mxu1 }
 0x332   : > { %10146 = vmatmul.mubr.msk.f32.gmra.mrb[172].mxu0 %vm336_vm1, %v12195_v3  ;;  %10208 = vmatmul.mubr.msk.f32.gmra.mrb[232].mxu1 %vm336_vm1, %v12195_v3 }
 0x333   : > { %3112 = vmatprep.mubr.f32.mxu0 %v12822_v8  ;;  %3537 = vmatprep.mubr.f32.mxu1 %v12822_v8 }
 0x334   : > { %v13935_v20 = vpop.f32.mrb[174].mxu1 }
 0x335   : > { %v13937_v21 = vpop.f32.mrb[175].mxu1 }
 0x336   : > { %10147 = vmatmul.mubr.msk.f32.gmra.mrb[174].mxu0 %vm336_vm1, %v2543_v9  ;;  %10209 = vmatmul.mubr.msk.f32.gmra.mrb[234].mxu1 %vm336_vm1, %v2543_v9 }
 0x337   : > { %3118 = vmatprep.mubr.f32.mxu0 %v12822_v8  ;;  %3543 = vmatprep.mubr.f32.mxu1 %v12822_v8 }
 0x338   : > { %v13943_v22 = vpop.f32.mrb[176].mxu1 }
 0x339   : > { %v13945_v23 = vpop.f32.mrb[177].mxu1 }
 0x33a   : > { %10148 = vmatmul.mubr.msk.f32.gmra.mrb[176].mxu0 %vm336_vm1, %v12198_v5  ;;  %10210 = vmatmul.mubr.msk.f32.gmra.mrb[236].mxu1 %vm336_vm1, %v12198_v5 }
 0x33b   : > { %3124 = vmatprep.mubr.f32.mxu0 %v12822_v8  ;;  %3549 = vmatprep.mubr.f32.mxu1 %v12822_v8 }
 0x33c   : > { %v13951_v24 = vpop.f32.mrb[178].mxu1 }
 0x33d   : > { %v13953_v25 = vpop.f32.mrb[179].mxu1 }
 0x33e   : > { %10149 = vmatmul.mubr.msk.f32.gmra.mrb[178].mxu0 %vm336_vm1, %v2553_v11  ;;  %10211 = vmatmul.mubr.msk.f32.gmra.mrb[238].mxu1 %vm336_vm1, %v2553_v11 }
 0x33f   : > { %3130 = vmatprep.mubr.f32.mxu0 %v12822_v8  ;;  %3555 = vmatprep.mubr.f32.mxu1 %v12822_v8 }
 0x340   : > { %v13959_v26 = vpop.f32.mrb[180].mxu1 }
 0x341   : > { %v13961_v27 = vpop.f32.mrb[181].mxu1 }
 0x342   : > { %10150 = vmatmul.mubr.msk.f32.gmra.mrb[180].mxu0 %vm336_vm1, %v12201_v10  ;;  %10212 = vmatmul.mubr.msk.f32.gmra.mrb[240].mxu1 %vm336_vm1, %v12201_v10 }
 0x343   : > { %3136 = vmatprep.mubr.f32.mxu0 %v12822_v8  ;;  %3561 = vmatprep.mubr.f32.mxu1 %v12822_v8 }
 0x344   : > { %v13967_v28 = vpop.f32.mrb[182].mxu1 }
 0x345   : > { %v13969_v29 = vpop.f32.mrb[183].mxu1 }
 0x346   : > { %10151 = vmatmul.mubr.msk.f32.gmra.mrb[182].mxu0 %vm336_vm1, %v2563_v13  ;;  %10213 = vmatmul.mubr.msk.f32.gmra.mrb[242].mxu1 %vm336_vm1, %v2563_v13 }
 0x347   : > { %3142 = vmatprep.mubr.f32.mxu0 %v12822_v8  ;;  %3567 = vmatprep.mubr.f32.mxu1 %v12822_v8 }
 0x348   : > { %v13975_v30 = vpop.f32.mrb[184].mxu1 }
 0x349   : > { %v13977_v31 = vpop.f32.mrb[185].mxu1 }
 0x34a   : > { %10152 = vmatmul.mubr.msk.f32.gmra.mrb[184].mxu0 %vm336_vm1, %v12204_v12  ;;  %10214 = vmatmul.mubr.msk.f32.gmra.mrb[244].mxu1 %vm336_vm1, %v12204_v12 }
 0x34b   : > { %3148 = vmatprep.mubr.f32.mxu0 %v12822_v8  ;;  %3573 = vmatprep.mubr.f32.mxu1 %v12822_v8 }
 0x34c   : > { %v13983_v32 = vpop.f32.mrb[186].mxu1 }
 0x34d   : > { %v13985_v33 = vpop.f32.mrb[187].mxu1 }
 0x34e   : > { %10153 = vmatmul.mubr.msk.f32.gmra.mrb[186].mxu0 %vm336_vm1, %v2573_v15  ;;  %10215 = vmatmul.mubr.msk.f32.gmra.mrb[246].mxu1 %vm336_vm1, %v2573_v15 }
 0x34f   : > { %3154 = vmatprep.mubr.f32.mxu0 %v12822_v8  ;;  %3579 = vmatprep.mubr.f32.mxu1 %v12822_v8 }
 0x350   : > { %v13991_v34 = vpop.f32.mrb[188].mxu1 }
 0x351   : > { %v13993_v35 = vpop.f32.mrb[189].mxu1 }
 0x352   : > { %10154 = vmatmul.mubr.msk.f32.gmra.mrb[188].mxu0 %vm336_vm1, %v13915_v14  ;;  %10216 = vmatmul.mubr.msk.f32.gmra.mrb[248].mxu1 %vm336_vm1, %v13915_v14 }
 0x353   : > { %3160 = vmatprep.mubr.f32.mxu0 %v12822_v8  ;;  %3585 = vmatprep.mubr.f32.mxu1 %v12822_v8 }
 0x354   : > { %v14001_v36 = vpop.f32.mrb[190].mxu1 }
 0x355   : > { %v14003_v37 = vpop.f32.mrb[191].mxu1 }
 0x356   : > { %10155 = vmatmul.mubr.msk.f32.gmra.mrb[190].mxu0 %vm336_vm1, %v2583_v17  ;;  %10217 = vmatmul.mubr.msk.f32.gmra.mrb[250].mxu1 %vm336_vm1, %v2583_v17 }
 0x357   : > { %3166 = vmatprep.mubr.f32.mxu0 %v12822_v8  ;;  %3591 = vmatprep.mubr.f32.mxu1 %v12822_v8 }
 0x358   : > { %v14009_v38 = vpop.f32.mrb[192].mxu1 }
 0x359   : > { %v14011_v39 = vpop.f32.mrb[193].mxu1 }
 0x35a   : > { %10156 = vmatmul.mubr.msk.f32.gmra.mrb[192].mxu0 %vm336_vm1, %v13921_v16  ;;  %10218 = vmatmul.mubr.msk.f32.gmra.mrb[252].mxu1 %vm336_vm1, %v13921_v16 }
 0x35b   : > { %3172 = vmatprep.mubr.f32.mxu0 %v12822_v8  ;;  %3597 = vmatprep.mubr.f32.mxu1 %v12822_v8 }
 0x35c   : > { %v14019_v41 = vpop.f32.mrb[194].mxu1 }
 0x35d   : > { %v14021_v42 = vpop.f32.mrb[195].mxu1 }
 0x35e   : > { %10157 = vmatmul.mubr.msk.f32.gmra.mrb[194].mxu0 %vm336_vm1, %v13929_v19  ;;  %10219 = vmatmul.mubr.msk.f32.gmra.mrb[254].mxu1 %vm336_vm1, %v13929_v19  ;;  %v4067_v19 = vld [vmem:[#allocation3] sm:$0xff] }
 0x35f   : > { %3178 = vmatprep.mubr.f32.mxu0 %v12822_v8  ;;  %3603 = vmatprep.mubr.f32.mxu1 %v12822_v8 }
 0x360   : > { %v14029_v44 = vpop.f32.mrb[196].mxu1 }
 0x361   : > { %v14032_v45 = vpop.f32.mrb[197].mxu1 }
 0x362   : > { %10158 = vmatmul.mubr.msk.f32.gmra.mrb[196].mxu0 %vm336_vm1, %v13927_v18  ;;  %10220 = vmatmul.mubr.msk.f32.gmra.mrb[0].mxu1 %vm336_vm1, %v13927_v18 }
 0x363   : > { %3184 = vmatprep.mubr.f32.mxu0 %v12822_v8  ;;  %3609 = vmatprep.mubr.f32.mxu1 %v12822_v8 }
 0x364   : > { %v14041_v46 = vpop.f32.mrb[198].mxu1 }
 0x365   : > { %v14043_v7 = vpop.f32.mrb[199].mxu1 }
 0x366   : > { %10159 = vmatmul.mubr.msk.f32.gmra.mrb[198].mxu0 %vm336_vm1, %v13937_v21  ;;  %10221 = vmatmul.mubr.msk.f32.gmra.mrb[2].mxu1 %vm336_vm1, %v13937_v21 }
 0x367   : > { %3190 = vmatprep.mubr.f32.mxu0 %v12822_v8  ;;  %3615 = vmatprep.mubr.f32.mxu1 %v12822_v8 }
 0x368   : > { %v14051_v47 = vpop.f32.mrb[200].mxu1 }
 0x369   : > { %v14053_v48 = vpop.f32.mrb[201].mxu1 }
 0x36a   : > { %10160 = vmatmul.mubr.msk.f32.gmra.mrb[200].mxu0 %vm336_vm1, %v13935_v20  ;;  %10222 = vmatmul.mubr.msk.f32.gmra.mrb[4].mxu1 %vm336_vm1, %v13935_v20 }
 0x36b   : > { %3196 = vmatprep.mubr.f32.mxu0 %v12822_v8  ;;  %3621 = vmatprep.mubr.f32.mxu1 %v12822_v8 }
 0x36c   : > { %v14061_v49 = vpop.f32.mrb[202].mxu1 }
 0x36d   : > { %v14063_v50 = vpop.f32.mrb[203].mxu1 }
 0x36e   : > { %10161 = vmatmul.mubr.msk.f32.gmra.mrb[202].mxu0 %vm336_vm1, %v13945_v23  ;;  %10223 = vmatmul.mubr.msk.f32.gmra.mrb[6].mxu1 %vm336_vm1, %v13945_v23 }
 0x36f   : > { %3202 = vmatprep.mubr.f32.mxu0 %v12822_v8  ;;  %3627 = vmatprep.mubr.f32.mxu1 %v12822_v8 }
 0x370   : > { %v14071_v51 = vpop.f32.mrb[204].mxu1 }
 0x371   : > { %v14073_v52 = vpop.f32.mrb[205].mxu1 }
 0x372   : > { %10162 = vmatmul.mubr.msk.f32.gmra.mrb[204].mxu0 %vm336_vm1, %v13943_v22  ;;  %10224 = vmatmul.mubr.msk.f32.gmra.mrb[8].mxu1 %vm336_vm1, %v13943_v22 }
 0x373   : > { %3208 = vmatprep.mubr.f32.mxu0 %v12822_v8  ;;  %3633 = vmatprep.mubr.f32.mxu1 %v12822_v8 }
 0x374   : > { %v14081_v53 = vpop.f32.mrb[206].mxu1 }
 0x375   : > { %v14083_v54 = vpop.f32.mrb[207].mxu1 }
 0x376   : > { %10163 = vmatmul.mubr.msk.f32.gmra.mrb[206].mxu0 %vm336_vm1, %v13953_v25  ;;  %10225 = vmatmul.mubr.msk.f32.gmra.mrb[10].mxu1 %vm336_vm1, %v13953_v25  ;;  %v4069_v25 = vld [vmem:[#allocation3 + $0x10] sm:$0xff] }
 0x377   : > { %3214 = vmatprep.mubr.f32.mxu0 %v12822_v8  ;;  %3639 = vmatprep.mubr.f32.mxu1 %v12822_v8 }
 0x378   : > { %v14091_v55 = vpop.f32.mrb[208].mxu1 }
 0x379   : > { %v14093_v56 = vpop.f32.mrb[209].mxu1 }
 0x37a   : > { %10164 = vmatmul.mubr.msk.f32.gmra.mrb[208].mxu0 %vm336_vm1, %v13951_v24  ;;  %10226 = vmatmul.mubr.msk.f32.gmra.mrb[12].mxu1 %vm336_vm1, %v13951_v24  ;;  %v4068_v24 = vld [vmem:[#allocation3 + $0x8] sm:$0xff] }
 0x37b   : > { %3220 = vmatprep.mubr.f32.mxu0 %v12822_v8  ;;  %3645 = vmatprep.mubr.f32.mxu1 %v12822_v8 }
 0x37e   : > { %10165 = vmatmul.mubr.msk.f32.gmra.mrb[210].mxu0 %vm336_vm1, %v13961_v27  ;;  %10227 = vmatmul.mubr.msk.f32.gmra.mrb[14].mxu1 %vm336_vm1, %v13961_v27 }
 0x37f   : > { %3226 = vmatprep.mubr.f32.mxu0 %v12822_v8  ;;  %3651 = vmatprep.mubr.f32.mxu1 %v12822_v8 }
 0x382   : > { %10166 = vmatmul.mubr.msk.f32.gmra.mrb[212].mxu0 %vm336_vm1, %v13959_v26  ;;  %10228 = vmatmul.mubr.msk.f32.gmra.mrb[16].mxu1 %vm336_vm1, %v13959_v26 }
 0x383   : > { %3232 = vmatprep.mubr.f32.mxu0 %v12822_v8  ;;  %3657 = vmatprep.mubr.f32.mxu1 %v12822_v8 }
 0x386   : > { %10167 = vmatmul.mubr.msk.f32.gmra.mrb[214].mxu0 %vm336_vm1, %v13969_v29  ;;  %10229 = vmatmul.mubr.msk.f32.gmra.mrb[18].mxu1 %vm336_vm1, %v13969_v29 }
 0x387   : > { %3238 = vmatprep.mubr.f32.mxu0 %v12822_v8  ;;  %3663 = vmatprep.mubr.f32.mxu1 %v12822_v8 }
 0x38a   : > { %10168 = vmatmul.mubr.msk.f32.gmra.mrb[216].mxu0 %vm336_vm1, %v13967_v28  ;;  %10230 = vmatmul.mubr.msk.f32.gmra.mrb[20].mxu1 %vm336_vm1, %v13967_v28 }
 0x38b   : > { %3244 = vmatprep.mubr.f32.mxu0 %v12822_v8  ;;  %3669 = vmatprep.mubr.f32.mxu1 %v12822_v8 }
 0x38e   : > { %10169 = vmatmul.mubr.msk.f32.gmra.mrb[218].mxu0 %vm336_vm1, %v13977_v31  ;;  %10231 = vmatmul.mubr.msk.f32.gmra.mrb[22].mxu1 %vm336_vm1, %v13977_v31  ;;  %v4071_v31 = vld [vmem:[#allocation3 + $0x20] sm:$0xff] }
 0x38f   : > { %3250 = vmatprep.mubr.f32.mxu0 %v12822_v8  ;;  %3675 = vmatprep.mubr.f32.mxu1 %v12822_v8 }
 0x392   : > { %10170 = vmatmul.mubr.msk.f32.gmra.mrb[220].mxu0 %vm336_vm1, %v13975_v30  ;;  %10232 = vmatmul.mubr.msk.f32.gmra.mrb[24].mxu1 %vm336_vm1, %v13975_v30  ;;  %v4070_v30 = vld [vmem:[#allocation3 + $0x18] sm:$0xff] }
 0x393   : > { %3256 = vmatprep.mubr.f32.mxu0 %v12822_v8  ;;  %3681 = vmatprep.mubr.f32.mxu1 %v12822_v8 }
 0x396   : > { %10171 = vmatmul.mubr.msk.f32.gmra.mrb[222].mxu0 %vm336_vm1, %v13985_v33  ;;  %10233 = vmatmul.mubr.msk.f32.gmra.mrb[26].mxu1 %vm336_vm1, %v13985_v33 }
 0x397   : > { %3262 = vmatprep.mubr.f32.mxu0 %v12822_v8  ;;  %3687 = vmatprep.mubr.f32.mxu1 %v12822_v8 }
 0x39a   : > { %10172 = vmatmul.mubr.msk.f32.gmra.mrb[224].mxu0 %vm336_vm1, %v13983_v32  ;;  %10234 = vmatmul.mubr.msk.f32.gmra.mrb[28].mxu1 %vm336_vm1, %v13983_v32 }
 0x39b   : > { %3268 = vmatprep.mubr.f32.mxu0 %v12822_v8  ;;  %3693 = vmatprep.mubr.f32.mxu1 %v12822_v8 }
 0x39e   : > { %10173 = vmatmul.mubr.msk.f32.gmra.mrb[226].mxu0 %vm336_vm1, %v13993_v35  ;;  %10235 = vmatmul.mubr.msk.f32.gmra.mrb[30].mxu1 %vm336_vm1, %v13993_v35 }
 0x39f   : > { %3274 = vmatprep.mubr.f32.mxu0 %v12822_v8  ;;  %3699 = vmatprep.mubr.f32.mxu1 %v12822_v8 }
 0x3a2   : > { %10174 = vmatmul.mubr.msk.f32.gmra.mrb[228].mxu0 %vm336_vm1, %v13991_v34  ;;  %10236 = vmatmul.mubr.msk.f32.gmra.mrb[32].mxu1 %vm336_vm1, %v13991_v34 }
 0x3a3   : > { %3280 = vmatprep.mubr.f32.mxu0 %v12822_v8  ;;  %3705 = vmatprep.mubr.f32.mxu1 %v12822_v8 }
 0x3a6   : > { %10175 = vmatmul.mubr.msk.f32.gmra.mrb[230].mxu0 %vm336_vm1, %v14003_v37  ;;  %10237 = vmatmul.mubr.msk.f32.gmra.mrb[34].mxu1 %vm336_vm1, %v14003_v37  ;;  %v4073_v37 = vld [vmem:[#allocation3 + $0x30] sm:$0xff] }
 0x3a7   : > { %3286 = vmatprep.mubr.f32.mxu0 %v12822_v8  ;;  %3711 = vmatprep.mubr.f32.mxu1 %v12822_v8 }
 0x3aa   : > { %10176 = vmatmul.mubr.msk.f32.gmra.mrb[232].mxu0 %vm336_vm1, %v14001_v36  ;;  %10238 = vmatmul.mubr.msk.f32.gmra.mrb[36].mxu1 %vm336_vm1, %v14001_v36  ;;  %v4072_v36 = vld [vmem:[#allocation3 + $0x28] sm:$0xff] }
 0x3ab   : > { %3292 = vmatprep.mubr.f32.mxu0 %v12822_v8  ;;  %3717 = vmatprep.mubr.f32.mxu1 %v12822_v8 }
 0x3ae   : > { %10177 = vmatmul.mubr.msk.f32.gmra.mrb[234].mxu0 %vm336_vm1, %v14011_v39  ;;  %10239 = vmatmul.mubr.msk.f32.gmra.mrb[38].mxu1 %vm336_vm1, %v14011_v39 }
 0x3af   : > { %3298 = vmatprep.mubr.f32.mxu0 %v12822_v8  ;;  %3723 = vmatprep.mubr.f32.mxu1 %v12822_v8 }
 0x3b2   : > { %10178 = vmatmul.mubr.msk.f32.gmra.mrb[236].mxu0 %vm336_vm1, %v14009_v38  ;;  %10240 = vmatmul.mubr.msk.f32.gmra.mrb[40].mxu1 %vm336_vm1, %v14009_v38 }
 0x3b3   : > { %3304 = vmatprep.mubr.f32.mxu0 %v12822_v8  ;;  %3729 = vmatprep.mubr.f32.mxu1 %v12822_v8 }
 0x3b6   : > { %10179 = vmatmul.mubr.msk.f32.gmra.mrb[238].mxu0 %vm336_vm1, %v14021_v42  ;;  %10241 = vmatmul.mubr.msk.f32.gmra.mrb[42].mxu1 %vm336_vm1, %v14021_v42  ;;  %v4075_v42 = vld [vmem:[#allocation3 + $0x40] sm:$0xff] }
 0x3b7   : > { %3310 = vmatprep.mubr.f32.mxu0 %v12822_v8  ;;  %3735 = vmatprep.mubr.f32.mxu1 %v12822_v8 }
 0x3ba   : > { %10180 = vmatmul.mubr.msk.f32.gmra.mrb[240].mxu0 %vm336_vm1, %v14019_v41  ;;  %10242 = vmatmul.mubr.msk.f32.gmra.mrb[44].mxu1 %vm336_vm1, %v14019_v41 }
 0x3bb   : > { %3316 = vmatprep.mubr.f32.mxu0 %v12822_v8  ;;  %3741 = vmatprep.mubr.f32.mxu1 %v12822_v8 }
 0x3be   : > { %10181 = vmatmul.mubr.msk.f32.gmra.mrb[242].mxu0 %vm336_vm1, %v14032_v45  ;;  %10243 = vmatmul.mubr.msk.f32.gmra.mrb[46].mxu1 %vm336_vm1, %v14032_v45 }
 0x3bf   : > { %3322 = vmatprep.mubr.f32.mxu0 %v12822_v8  ;;  %3747 = vmatprep.mubr.f32.mxu1 %v12822_v8 }
 0x3c2   : > { %10182 = vmatmul.mubr.msk.f32.gmra.mrb[244].mxu0 %vm336_vm1, %v14029_v44  ;;  %10244 = vmatmul.mubr.msk.f32.gmra.mrb[48].mxu1 %vm336_vm1, %v14029_v44 }
 0x3c3   : > { %3328 = vmatprep.mubr.f32.mxu0 %v12822_v8  ;;  %3753 = vmatprep.mubr.f32.mxu1 %v12822_v8 }
 0x3c6   : > { %10183 = vmatmul.mubr.msk.f32.gmra.mrb[246].mxu0 %vm336_vm1, %v14043_v7  ;;  %10245 = vmatmul.mubr.msk.f32.gmra.mrb[50].mxu1 %vm336_vm1, %v14043_v7 }
 0x3c7   : > { %3334 = vmatprep.mubr.f32.mxu0 %v12822_v8  ;;  %3759 = vmatprep.mubr.f32.mxu1 %v12822_v8 }
 0x3ca   : > { %10184 = vmatmul.mubr.msk.f32.gmra.mrb[248].mxu0 %vm336_vm1, %v14041_v46  ;;  %10246 = vmatmul.mubr.msk.f32.gmra.mrb[52].mxu1 %vm336_vm1, %v14041_v46 }
 0x3cb   : > { %3340 = vmatprep.mubr.f32.mxu0 %v12822_v8  ;;  %3765 = vmatprep.mubr.f32.mxu1 %v12822_v8 }
 0x3ce   : > { %10185 = vmatmul.mubr.msk.f32.gmra.mrb[250].mxu0 %vm336_vm1, %v14053_v48  ;;  %10247 = vmatmul.mubr.msk.f32.gmra.mrb[54].mxu1 %vm336_vm1, %v14053_v48  ;;  %v4077_v48 = vld [vmem:[#allocation3 + $0x50] sm:$0xff] }
 0x3cf   : > { %3346 = vmatprep.mubr.f32.mxu0 %v12822_v8  ;;  %3771 = vmatprep.mubr.f32.mxu1 %v12822_v8 }
 0x3d2   : > { %10186 = vmatmul.mubr.msk.f32.gmra.mrb[252].mxu0 %vm336_vm1, %v14051_v47  ;;  %10248 = vmatmul.mubr.msk.f32.gmra.mrb[56].mxu1 %vm336_vm1, %v14051_v47  ;;  %v4076_v47 = vld [vmem:[#allocation3 + $0x48] sm:$0xff] }
 0x3d3   : > { %3352 = vmatprep.mubr.f32.mxu0 %v12822_v8  ;;  %3777 = vmatprep.mubr.f32.mxu1 %v12822_v8 }
 0x3d6   : > { %10187 = vmatmul.mubr.msk.f32.gmra.mrb[254].mxu0 %vm336_vm1, %v14063_v50  ;;  %10249 = vmatmul.mubr.msk.f32.gmra.mrb[58].mxu1 %vm336_vm1, %v14063_v50 }
 0x3d7   : > { %3358 = vmatprep.mubr.f32.mxu0 %v12822_v8  ;;  %3783 = vmatprep.mubr.f32.mxu1 %v12822_v8 }
 0x3d9   : > { %v3042_v57 = vpop.f32.mrb[150].mxu0  ;;  %v3467_v58 = vpop.f32.mrb[210].mxu1 }
 0x3da   : > { %10257 = vst [vmem:[%s13464_s5 + $0x780] sm:$0xff] %v3042_v57  ;;  %10259 = vst [vmem:[%s13464_s5 + $0x790] sm:$0xff] %v3467_v58  ;;  %v3044_v59 = vpop.f32.mrb[151].mxu0  ;;  %10188 = vmatmul.mubr.msk.f32.gmra.mrb[0].mxu0 %vm336_vm1, %v14061_v49  ;;  %v3469_v60 = vpop.f32.mrb[211].mxu1  ;;  %10250 = vmatmul.mubr.msk.f32.gmra.mrb[60].mxu1 %vm336_vm1, %v14061_v49 }
 0x3db   : > { %10258 = vst [vmem:[%s13464_s5 + $0x788] sm:$0xff] %v3044_v59  ;;  %10260 = vst.msk [vmem:[%s13464_s5 + $0x798] sm:$0xff] %vm1933_vm2, %v3469_v60  ;;  %3364 = vmatprep.mubr.f32.mxu0 %v12822_v8  ;;  %3789 = vmatprep.mubr.f32.mxu1 %v12822_v8  ;;  %v4080_v59 = vld [vmem:[#allocation3 + $0x68] sm:$0xff]  ;;  %v4081_v60 = vld [vmem:[#allocation3 + $0x70] sm:$0xff] }
 0x3dd   : > { %v3048_v61 = vpop.f32.mrb[152].mxu0  ;;  %v3473_v62 = vpop.f32.mrb[212].mxu1 }
 0x3de   : > { %10261 = vst [vmem:[%s13464_s5 + $0x7a0] sm:$0xff] %v3048_v61  ;;  %10263 = vst [vmem:[%s13464_s5 + $0x7b0] sm:$0xff] %v3473_v62  ;;  %v3050_v63 = vpop.f32.mrb[153].mxu0  ;;  %10189 = vmatmul.mubr.msk.f32.gmra.mrb[2].mxu0 %vm336_vm1, %v14073_v52  ;;  %v3475_v43 = vpop.f32.mrb[213].mxu1  ;;  %10251 = vmatmul.mubr.msk.f32.gmra.mrb[62].mxu1 %vm336_vm1, %v14073_v52 }
 0x3df   : > { %10262 = vst [vmem:[%s13464_s5 + $0x7a8] sm:$0xff] %v3050_v63  ;;  %10264 = vst.msk [vmem:[%s13464_s5 + $0x7b8] sm:$0xff] %vm1933_vm2, %v3475_v43  ;;  %3370 = vmatprep.mubr.f32.mxu0 %v12822_v8  ;;  %3795 = vmatprep.mubr.f32.mxu1 %v12822_v8 }
 0x3e1   : > { %v3054_v0 = vpop.f32.mrb[154].mxu0  ;;  %v3479_v1 = vpop.f32.mrb[214].mxu1 }
 0x3e2   : > { %10265 = vst [vmem:[%s13464_s5 + $0x7c0] sm:$0xff] %v3054_v0  ;;  %10267 = vst [vmem:[%s13464_s5 + $0x7d0] sm:$0xff] %v3479_v1  ;;  %v3056_v2 = vpop.f32.mrb[155].mxu0  ;;  %10190 = vmatmul.mubr.msk.f32.gmra.mrb[4].mxu0 %vm336_vm1, %v14071_v51  ;;  %v3481_v3 = vpop.f32.mrb[215].mxu1  ;;  %10252 = vmatmul.mubr.msk.f32.gmra.mrb[64].mxu1 %vm336_vm1, %v14071_v51  ;;  %v4082_v0 = vld [vmem:[#allocation3 + $0x78] sm:$0xff]  ;;  %v4083_v1 = vld [vmem:[#allocation3 + $0x80] sm:$0xff] }
 0x3e3   : > { %10266 = vst [vmem:[%s13464_s5 + $0x7c8] sm:$0xff] %v3056_v2  ;;  %10268 = vst.msk [vmem:[%s13464_s5 + $0x7d8] sm:$0xff] %vm1933_vm2, %v3481_v3  ;;  %3376 = vmatprep.mubr.f32.mxu0 %v12822_v8  ;;  %3801 = vmatprep.mubr.f32.mxu1 %v12822_v8 }
 0x3e5   : > { %v3060_v4 = vpop.f32.mrb[156].mxu0  ;;  %v3485_v5 = vpop.f32.mrb[216].mxu1 }
 0x3e6   : > { %10269 = vst [vmem:[%s13464_s5 + $0x7e0] sm:$0xff] %v3060_v4  ;;  %10271 = vst [vmem:[%s13464_s5 + $0x7f0] sm:$0xff] %v3485_v5  ;;  %v3062_v9 = vpop.f32.mrb[157].mxu0  ;;  %10191 = vmatmul.mubr.msk.f32.gmra.mrb[6].mxu0 %vm336_vm1, %v14083_v54  ;;  %v3487_v10 = vpop.f32.mrb[217].mxu1  ;;  %10253 = vmatmul.mubr.msk.f32.gmra.mrb[66].mxu1 %vm336_vm1, %v14083_v54  ;;  %v4079_v54 = vld [vmem:[#allocation3 + $0x60] sm:$0xff] }
 0x3e7   : > { %10270 = vst [vmem:[%s13464_s5 + $0x7e8] sm:$0xff] %v3062_v9  ;;  %10272 = vst.msk [vmem:[%s13464_s5 + $0x7f8] sm:$0xff] %vm1933_vm2, %v3487_v10  ;;  %3382 = vmatprep.mubr.f32.mxu0 %v12822_v8  ;;  %3807 = vmatprep.mubr.f32.mxu1 %v12822_v8  ;;  %v4084_v9 = vld [vmem:[#allocation3 + $0x88] sm:$0xff]  ;;  %v4085_v10 = vld [vmem:[#allocation3 + $0x90] sm:$0xff] }
 0x3e9   : > { %v3066_v11 = vpop.f32.mrb[158].mxu0  ;;  %v3491_v12 = vpop.f32.mrb[218].mxu1 }
 0x3ea   : > { %10273 = vst [vmem:[%s13464_s5 + $0x800] sm:$0xff] %v3066_v11  ;;  %10275 = vst [vmem:[%s13464_s5 + $0x810] sm:$0xff] %v3491_v12  ;;  %v3068_v13 = vpop.f32.mrb[159].mxu0  ;;  %10192 = vmatmul.mubr.msk.f32.gmra.mrb[8].mxu0 %vm336_vm1, %v14081_v53  ;;  %v3493_v14 = vpop.f32.mrb[219].mxu1  ;;  %10254 = vmatmul.mubr.msk.f32.gmra.mrb[68].mxu1 %vm336_vm1, %v14081_v53  ;;  %v4078_v53 = vld [vmem:[#allocation3 + $0x58] sm:$0xff] }
 0x3eb   : > { %10274 = vst [vmem:[%s13464_s5 + $0x808] sm:$0xff] %v3068_v13  ;;  %10276 = vst.msk [vmem:[%s13464_s5 + $0x818] sm:$0xff] %vm1933_vm2, %v3493_v14  ;;  %3388 = vmatprep.mubr.f32.mxu0 %v12822_v8  ;;  %3813 = vmatprep.mubr.f32.mxu1 %v12822_v8 }
 0x3ed   : > { %v3072_v15 = vpop.f32.mrb[160].mxu0  ;;  %v3497_v16 = vpop.f32.mrb[220].mxu1 }
 0x3ee   : > { %10277 = vst [vmem:[%s13464_s5 + $0x820] sm:$0xff] %v3072_v15  ;;  %10279 = vst [vmem:[%s13464_s5 + $0x830] sm:$0xff] %v3497_v16  ;;  %v3074_v17 = vpop.f32.mrb[161].mxu0  ;;  %10193 = vmatmul.mubr.msk.f32.gmra.mrb[10].mxu0 %vm336_vm1, %v14093_v56  ;;  %v3499_v18 = vpop.f32.mrb[221].mxu1  ;;  %10255 = vmatmul.mubr.msk.f32.gmra.mrb[70].mxu1 %vm336_vm1, %v14093_v56  ;;  %v4086_v15 = vld [vmem:[#allocation3 + $0x98] sm:$0xff]  ;;  %v4087_v16 = vld [vmem:[#allocation3 + $0xa0] sm:$0xff] }
 0x3ef   : > { %10278 = vst [vmem:[%s13464_s5 + $0x828] sm:$0xff] %v3074_v17  ;;  %10280 = vst.msk [vmem:[%s13464_s5 + $0x838] sm:$0xff] %vm1933_vm2, %v3499_v18  ;;  %3394 = vmatprep.mubr.f32.mxu0 %v12822_v8  ;;  %3819 = vmatprep.mubr.f32.mxu1 %v12822_v8 }
 0x3f1   : > { %v3078_v20 = vpop.f32.mrb[162].mxu0  ;;  %v3503_v21 = vpop.f32.mrb[222].mxu1 }
 0x3f2   : > { %10281 = vst [vmem:[%s13464_s5 + $0x840] sm:$0xff] %v3078_v20  ;;  %10283 = vst [vmem:[%s13464_s5 + $0x850] sm:$0xff] %v3503_v21  ;;  %v3080_v22 = vpop.f32.mrb[163].mxu0  ;;  %10194 = vmatmul.mubr.msk.f32.gmra.mrb[12].mxu0 %vm336_vm1, %v14091_v55  ;;  %v3505_v23 = vpop.f32.mrb[223].mxu1  ;;  %10256 = vmatmul.mubr.msk.f32.gmra.mrb[72].mxu1 %vm336_vm1, %v14091_v55  ;;  %v4088_v21 = vld [vmem:[#allocation3 + $0xa8] sm:$0xff] }
 0x3f3   : > { %10282 = vst [vmem:[%s13464_s5 + $0x848] sm:$0xff] %v3080_v22  ;;  %10284 = vst.msk [vmem:[%s13464_s5 + $0x858] sm:$0xff] %vm1933_vm2, %v3505_v23  ;;  %12270 = vmatprep.mubr.msk.f32.mxu0 %vm336_vm1, %v4067_v19  ;;  %4935 = vmatprep.mubr.f32.mxu1 %v12822_v8  ;;  %v4089_v22 = vld [vmem:[#allocation3 + $0xb0] sm:$0xff] }
 0x3f5   : > { %v3084_v26 = vpop.f32.mrb[164].mxu0  ;;  %v3509_v27 = vpop.f32.mrb[224].mxu1 }
 0x3f6   : > { %10285 = vst [vmem:[%s13464_s5 + $0x860] sm:$0xff] %v3084_v26  ;;  %10287 = vst [vmem:[%s13464_s5 + $0x870] sm:$0xff] %v3509_v27  ;;  %v3086_v28 = vpop.f32.mrb[165].mxu0  ;;  %v3511_v29 = vpop.f32.mrb[225].mxu1  ;;  %12271 = vmatmul.mubr.msk.f32.vlgmr.msra.gmra.mrb[14].mxu0 %vm336_vm1, %v4068_v24  ;;  %v4090_v27 = vld [vmem:[#allocation3 + $0xb8] sm:$0xff] }
 0x3f7   : > { %10286 = vst [vmem:[%s13464_s5 + $0x868] sm:$0xff] %v3086_v28  ;;  %10288 = vst.msk [vmem:[%s13464_s5 + $0x878] sm:$0xff] %vm1933_vm2, %v3511_v29  ;;  %12273 = vmatprep.mubr.msk.f32.mxu0 %vm336_vm1, %v4069_v25  ;;  %v4091_v28 = vld [vmem:[#allocation3 + $0xc0] sm:$0xff] }
 0x3f9   : > { %v3090_v32 = vpop.f32.mrb[166].mxu0  ;;  %v3515_v33 = vpop.f32.mrb[226].mxu1 }
 0x3fa   : > { %10289 = vst [vmem:[%s13464_s5 + $0x880] sm:$0xff] %v3090_v32  ;;  %10291 = vst [vmem:[%s13464_s5 + $0x890] sm:$0xff] %v3515_v33  ;;  %v3092_v34 = vpop.f32.mrb[167].mxu0  ;;  %v3517_v35 = vpop.f32.mrb[227].mxu1  ;;  %12274 = vmatmul.mubr.msk.f32.gmra.mrb[16].mxu0 %vm336_vm1, %v4070_v30  ;;  %v4092_v33 = vld [vmem:[#allocation3 + $0xc8] sm:$0xff] }
 0x3fb   : > { %10290 = vst [vmem:[%s13464_s5 + $0x888] sm:$0xff] %v3092_v34  ;;  %10292 = vst.msk [vmem:[%s13464_s5 + $0x898] sm:$0xff] %vm1933_vm2, %v3517_v35  ;;  %12276 = vmatprep.mubr.msk.f32.mxu0 %vm336_vm1, %v4071_v31  ;;  %v4093_v34 = vld [vmem:[#allocation3 + $0xd0] sm:$0xff] }
 0x3fd   : > { %v3096_v38 = vpop.f32.mrb[168].mxu0  ;;  %v3521_v39 = vpop.f32.mrb[228].mxu1 }
 0x3fe   : > { %10293 = vst [vmem:[%s13464_s5 + $0x8a0] sm:$0xff] %v3096_v38  ;;  %10295 = vst [vmem:[%s13464_s5 + $0x8b0] sm:$0xff] %v3521_v39  ;;  %v3098_v40 = vpop.f32.mrb[169].mxu0  ;;  %v3523_v41 = vpop.f32.mrb[229].mxu1  ;;  %12277 = vmatmul.mubr.msk.f32.gmra.mrb[18].mxu0 %vm336_vm1, %v4072_v36  ;;  %v4094_v39 = vld [vmem:[#allocation3 + $0xd8] sm:$0xff] }
 0x3ff   : > { %10294 = vst [vmem:[%s13464_s5 + $0x8a8] sm:$0xff] %v3098_v40  ;;  %10296 = vst.msk [vmem:[%s13464_s5 + $0x8b8] sm:$0xff] %vm1933_vm2, %v3523_v41  ;;  %12279 = vmatprep.mubr.msk.f32.mxu0 %vm336_vm1, %v4073_v37  ;;  %v4095_v40 = vld [vmem:[#allocation3 + $0xe0] sm:$0xff] }
 0x401   : > { %v3102_v44 = vpop.f32.mrb[170].mxu0  ;;  %v3527_v45 = vpop.f32.mrb[230].mxu1 }
 0x402   : > { %10297 = vst [vmem:[%s13464_s5 + $0x8c0] sm:$0xff] %v3102_v44  ;;  %10299 = vst [vmem:[%s13464_s5 + $0x8d0] sm:$0xff] %v3527_v45  ;;  %v3104_v46 = vpop.f32.mrb[171].mxu0  ;;  %v3529_v7 = vpop.f32.mrb[231].mxu1  ;;  %12280 = vmatmul.mubr.msk.f32.gmra.mrb[20].mxu0 %vm336_vm1, %v4074_v6  ;;  %v4096_v45 = vld [vmem:[#allocation3 + $0xe8] sm:$0xff] }
 0x403   : > { %10298 = vst [vmem:[%s13464_s5 + $0x8c8] sm:$0xff] %v3104_v46  ;;  %10300 = vst.msk [vmem:[%s13464_s5 + $0x8d8] sm:$0xff] %vm1933_vm2, %v3529_v7  ;;  %12282 = vmatprep.mubr.msk.f32.mxu0 %vm336_vm1, %v4075_v42  ;;  %v4097_v46 = vld [vmem:[#allocation3 + $0xf0] sm:$0xff] }
 0x405   : > { %v3108_v49 = vpop.f32.mrb[172].mxu0  ;;  %v3533_v50 = vpop.f32.mrb[232].mxu1 }
 0x406   : > { %10301 = vst [vmem:[%s13464_s5 + $0x8e0] sm:$0xff] %v3108_v49  ;;  %10303 = vst [vmem:[%s13464_s5 + $0x8f0] sm:$0xff] %v3533_v50  ;;  %v3110_v51 = vpop.f32.mrb[173].mxu0  ;;  %v3535_v52 = vpop.f32.mrb[233].mxu1  ;;  %12283 = vmatmul.mubr.msk.f32.gmra.mrb[22].mxu0 %vm336_vm1, %v4076_v47  ;;  %v4098_v50 = vld [vmem:[#allocation3 + $0xf8] sm:$0xff] }
 0x407   : > { %10302 = vst [vmem:[%s13464_s5 + $0x8e8] sm:$0xff] %v3110_v51  ;;  %10304 = vst.msk [vmem:[%s13464_s5 + $0x8f8] sm:$0xff] %vm1933_vm2, %v3535_v52  ;;  %12285 = vmatprep.mubr.msk.f32.mxu0 %vm336_vm1, %v4077_v48  ;;  %v4099_v51 = vld [vmem:[#allocation3 + $0x100] sm:$0xff] }
 0x409   : > { %v3114_v55 = vpop.f32.mrb[174].mxu0  ;;  %v3539_v56 = vpop.f32.mrb[234].mxu1 }
 0x40a   : > { %10305 = vst [vmem:[%s13464_s5 + $0x900] sm:$0xff] %v3114_v55  ;;  %10307 = vst [vmem:[%s13464_s5 + $0x910] sm:$0xff] %v3539_v56  ;;  %v3116_v57 = vpop.f32.mrb[175].mxu0  ;;  %v3541_v58 = vpop.f32.mrb[235].mxu1  ;;  %12286 = vmatmul.mubr.msk.f32.gmra.mrb[24].mxu0 %vm336_vm1, %v4078_v53  ;;  %v4100_v56 = vld [vmem:[#allocation3 + $0x108] sm:$0xff] }
 0x40b   : > { %10306 = vst [vmem:[%s13464_s5 + $0x908] sm:$0xff] %v3116_v57  ;;  %10308 = vst.msk [vmem:[%s13464_s5 + $0x918] sm:$0xff] %vm1933_vm2, %v3541_v58  ;;  %12288 = vmatprep.mubr.msk.f32.mxu0 %vm336_vm1, %v4079_v54  ;;  %v4101_v57 = vld [vmem:[#allocation3 + $0x110] sm:$0xff] }
 0x40d   : > { %v3120_v61 = vpop.f32.mrb[176].mxu0  ;;  %v3545_v62 = vpop.f32.mrb[236].mxu1 }
 0x40e   : > { %10309 = vst [vmem:[%s13464_s5 + $0x920] sm:$0xff] %v3120_v61  ;;  %10311 = vst [vmem:[%s13464_s5 + $0x930] sm:$0xff] %v3545_v62  ;;  %v3122_v63 = vpop.f32.mrb[177].mxu0  ;;  %v3547_v43 = vpop.f32.mrb[237].mxu1  ;;  %12289 = vmatmul.mubr.msk.f32.gmra.mrb[26].mxu0 %vm336_vm1, %v4080_v59  ;;  %v4102_v62 = vld [vmem:[#allocation3 + $0x118] sm:$0xff] }
 0x40f   : > { %10310 = vst [vmem:[%s13464_s5 + $0x928] sm:$0xff] %v3122_v63  ;;  %10312 = vst.msk [vmem:[%s13464_s5 + $0x938] sm:$0xff] %vm1933_vm2, %v3547_v43  ;;  %12291 = vmatprep.mubr.msk.f32.mxu0 %vm336_vm1, %v4081_v60  ;;  %v4103_v63 = vld [vmem:[#allocation3 + $0x120] sm:$0xff] }
 0x411   : > { %v3126_v2 = vpop.f32.mrb[178].mxu0  ;;  %v3551_v3 = vpop.f32.mrb[238].mxu1 }
 0x412   : > { %10313 = vst [vmem:[%s13464_s5 + $0x940] sm:$0xff] %v3126_v2  ;;  %10315 = vst [vmem:[%s13464_s5 + $0x950] sm:$0xff] %v3551_v3  ;;  %v3128_v4 = vpop.f32.mrb[179].mxu0  ;;  %v3553_v5 = vpop.f32.mrb[239].mxu1  ;;  %12292 = vmatmul.mubr.msk.f32.gmra.mrb[28].mxu0 %vm336_vm1, %v4082_v0  ;;  %v4104_v3 = vld [vmem:[#allocation3 + $0x128] sm:$0xff] }
 0x413   : > { %10314 = vst [vmem:[%s13464_s5 + $0x948] sm:$0xff] %v3128_v4  ;;  %10316 = vst.msk [vmem:[%s13464_s5 + $0x958] sm:$0xff] %vm1933_vm2, %v3553_v5  ;;  %12294 = vmatprep.mubr.msk.f32.mxu0 %vm336_vm1, %v4083_v1  ;;  %v4105_v4 = vld [vmem:[#allocation3 + $0x130] sm:$0xff] }
 0x415   : > { %v3132_v11 = vpop.f32.mrb[180].mxu0  ;;  %v3557_v12 = vpop.f32.mrb[240].mxu1 }
 0x416   : > { %10317 = vst [vmem:[%s13464_s5 + $0x960] sm:$0xff] %v3132_v11  ;;  %10319 = vst [vmem:[%s13464_s5 + $0x970] sm:$0xff] %v3557_v12  ;;  %v3134_v13 = vpop.f32.mrb[181].mxu0  ;;  %v3559_v14 = vpop.f32.mrb[241].mxu1  ;;  %12295 = vmatmul.mubr.msk.f32.gmra.mrb[30].mxu0 %vm336_vm1, %v4084_v9  ;;  %v4106_v12 = vld [vmem:[#allocation3 + $0x138] sm:$0xff] }
 0x417   : > { %10318 = vst [vmem:[%s13464_s5 + $0x968] sm:$0xff] %v3134_v13  ;;  %10320 = vst.msk [vmem:[%s13464_s5 + $0x978] sm:$0xff] %vm1933_vm2, %v3559_v14  ;;  %12297 = vmatprep.mubr.msk.f32.mxu0 %vm336_vm1, %v4085_v10  ;;  %v4107_v13 = vld [vmem:[#allocation3 + $0x140] sm:$0xff] }
 0x419   : > { %v3138_v17 = vpop.f32.mrb[182].mxu0  ;;  %v3563_v18 = vpop.f32.mrb[242].mxu1 }
 0x41a   : > { %10321 = vst [vmem:[%s13464_s5 + $0x980] sm:$0xff] %v3138_v17  ;;  %10323 = vst [vmem:[%s13464_s5 + $0x990] sm:$0xff] %v3563_v18  ;;  %v3140_v19 = vpop.f32.mrb[183].mxu0  ;;  %v3565_v20 = vpop.f32.mrb[243].mxu1  ;;  %12298 = vmatmul.mubr.msk.f32.gmra.mrb[32].mxu0 %vm336_vm1, %v4086_v15  ;;  %v4108_v18 = vld [vmem:[#allocation3 + $0x148] sm:$0xff] }
 0x41b   : > { %10322 = vst [vmem:[%s13464_s5 + $0x988] sm:$0xff] %v3140_v19  ;;  %10324 = vst.msk [vmem:[%s13464_s5 + $0x998] sm:$0xff] %vm1933_vm2, %v3565_v20  ;;  %12300 = vmatprep.mubr.msk.f32.mxu0 %vm336_vm1, %v4087_v16  ;;  %v4109_v19 = vld [vmem:[#allocation3 + $0x150] sm:$0xff] }
 0x41d   : > { %v3144_v23 = vpop.f32.mrb[184].mxu0  ;;  %v3569_v24 = vpop.f32.mrb[244].mxu1 }
 0x41e   : > { %10325 = vst [vmem:[%s13464_s5 + $0x9a0] sm:$0xff] %v3144_v23  ;;  %10327 = vst [vmem:[%s13464_s5 + $0x9b0] sm:$0xff] %v3569_v24  ;;  %v3146_v25 = vpop.f32.mrb[185].mxu0  ;;  %v3571_v26 = vpop.f32.mrb[245].mxu1  ;;  %12301 = vmatmul.mubr.msk.f32.gmra.mrb[34].mxu0 %vm336_vm1, %v4088_v21  ;;  %v4678_v24 = vld [vmem:[#allocation6 + $0x8] sm:$0xff] }
 0x41f   : > { %10326 = vst [vmem:[%s13464_s5 + $0x9a8] sm:$0xff] %v3146_v25  ;;  %10328 = vst.msk [vmem:[%s13464_s5 + $0x9b8] sm:$0xff] %vm1933_vm2, %v3571_v26  ;;  %12303 = vmatprep.mubr.msk.f32.mxu0 %vm336_vm1, %v4089_v22  ;;  %v4110_v25 = vld [vmem:[#allocation3 + $0x158] sm:$0xff]  ;;  %v4682_v26 = vcombine.high %v4678_v24, %v4678_v24 }
 0x421   : > { %v3150_v29 = vpop.f32.mrb[186].mxu0  ;;  %v3575_v30 = vpop.f32.mrb[246].mxu1  ;;  %10621 = vmatprep.subr.msk.mxu0 %vm517_vm0, %v4682_v26 }
 0x422   : > { %10329 = vst [vmem:[%s13464_s5 + $0x9c0] sm:$0xff] %v3150_v29  ;;  %10331 = vst [vmem:[%s13464_s5 + $0x9d0] sm:$0xff] %v3575_v30  ;;  %v3152_v31 = vpop.f32.mrb[187].mxu0  ;;  %v3577_v32 = vpop.f32.mrb[247].mxu1  ;;  %12304 = vmatmul.mubr.msk.f32.gmra.mrb[36].mxu0 %vm336_vm1, %v4090_v27  ;;  %v4111_v27 = vld [vmem:[#allocation3 + $0x160] sm:$0xff] }
 0x423   : > { %10330 = vst [vmem:[%s13464_s5 + $0x9c8] sm:$0xff] %v3152_v31  ;;  %10332 = vst.msk [vmem:[%s13464_s5 + $0x9d8] sm:$0xff] %vm1933_vm2, %v3577_v32  ;;  %12306 = vmatprep.mubr.msk.f32.mxu0 %vm336_vm1, %v4091_v28  ;;  %v14468_v32 = vld [vmem:[%s12995_s10 + $0xc] sm:$0xf]  ;;  %10622 = vmatpush1.msk.msra.mxu0 %vm517_vm0, %v4678_v24 }
 0x424   : > { %12360 = vmatprep.subr.msk.mxu1 %vm517_vm0, %v14468_v32 }
 0x425   : > { %v3156_v35 = vpop.f32.mrb[188].mxu0  ;;  %v3581_v36 = vpop.f32.mrb[248].mxu1 }
 0x426   : > { %10333 = vst [vmem:[%s13464_s5 + $0x9e0] sm:$0xff] %v3156_v35  ;;  %10335 = vst [vmem:[%s13464_s5 + $0x9f0] sm:$0xff] %v3581_v36  ;;  %v3158_v37 = vpop.f32.mrb[189].mxu0  ;;  %v3583_v38 = vpop.f32.mrb[249].mxu1  ;;  %12307 = vmatmul.mubr.msk.f32.gmra.mrb[38].mxu0 %vm336_vm1, %v4092_v33  ;;  %v4112_v33 = vld [vmem:[#allocation3 + $0x168] sm:$0xff] }
 0x427   : > { %10334 = vst [vmem:[%s13464_s5 + $0x9e8] sm:$0xff] %v3158_v37  ;;  %10336 = vst.msk [vmem:[%s13464_s5 + $0x9f8] sm:$0xff] %vm1933_vm2, %v3583_v38  ;;  %12309 = vmatprep.mubr.msk.f32.mxu0 %vm336_vm1, %v4093_v34  ;;  %v4113_v34 = vld [vmem:[#allocation3 + $0x170] sm:$0xff] }
 0x429   : > { %v3162_v41 = vpop.f32.mrb[190].mxu0  ;;  %v3587_v6 = vpop.f32.mrb[250].mxu1 }
 0x42a   : > { %10337 = vst [vmem:[%s13464_s5 + $0xa00] sm:$0xff] %v3162_v41  ;;  %10339 = vst [vmem:[%s13464_s5 + $0xa10] sm:$0xff] %v3587_v6  ;;  %v3164_v42 = vpop.f32.mrb[191].mxu0  ;;  %v3589_v44 = vpop.f32.mrb[251].mxu1  ;;  %12310 = vmatmul.mubr.msk.f32.gmra.mrb[40].mxu0 %vm336_vm1, %v4094_v39  ;;  %v4114_v39 = vld [vmem:[#allocation3 + $0x178] sm:$0xff] }
 0x42b   : > { %10338 = vst [vmem:[%s13464_s5 + $0xa08] sm:$0xff] %v3164_v42  ;;  %10340 = vst.msk [vmem:[%s13464_s5 + $0xa18] sm:$0xff] %vm1933_vm2, %v3589_v44  ;;  %12312 = vmatprep.mubr.msk.f32.mxu0 %vm336_vm1, %v4095_v40  ;;  %v4115_v40 = vld [vmem:[#allocation3 + $0x180] sm:$0xff] }
 0x42d   : > { %v3168_v7 = vpop.f32.mrb[192].mxu0  ;;  %v3593_v47 = vpop.f32.mrb[252].mxu1 }
 0x42e   : > { %10341 = vst [vmem:[%s13464_s5 + $0xa20] sm:$0xff] %v3168_v7  ;;  %10343 = vst [vmem:[%s13464_s5 + $0xa30] sm:$0xff] %v3593_v47  ;;  %v3170_v48 = vpop.f32.mrb[193].mxu0  ;;  %v3595_v49 = vpop.f32.mrb[253].mxu1  ;;  %12313 = vmatmul.mubr.msk.f32.gmra.mrb[42].mxu0 %vm336_vm1, %v4096_v45  ;;  %v4116_v45 = vld [vmem:[#allocation3 + $0x188] sm:$0xff] }
 0x42f   : > { %10342 = vst [vmem:[%s13464_s5 + $0xa28] sm:$0xff] %v3170_v48  ;;  %10344 = vst.msk [vmem:[%s13464_s5 + $0xa38] sm:$0xff] %vm1933_vm2, %v3595_v49  ;;  %12315 = vmatprep.mubr.msk.f32.mxu0 %vm336_vm1, %v4097_v46  ;;  %v4117_v46 = vld [vmem:[#allocation3 + $0x190] sm:$0xff] }
 0x431   : > { %v3174_v52 = vpop.f32.mrb[194].mxu0  ;;  %v3599_v53 = vpop.f32.mrb[254].mxu1 }
 0x432   : > { %10345 = vst [vmem:[%s13464_s5 + $0xa40] sm:$0xff] %v3174_v52  ;;  %10347 = vst [vmem:[%s13464_s5 + $0xa50] sm:$0xff] %v3599_v53  ;;  %v3176_v54 = vpop.f32.mrb[195].mxu0  ;;  %v3601_v55 = vpop.f32.mrb[255].mxu1  ;;  %12316 = vmatmul.mubr.msk.f32.gmra.mrb[44].mxu0 %vm336_vm1, %v4098_v50  ;;  %v4118_v50 = vld [vmem:[#allocation3 + $0x198] sm:$0xff] }
 0x433   : > { %10346 = vst [vmem:[%s13464_s5 + $0xa48] sm:$0xff] %v3176_v54  ;;  %10348 = vst.msk [vmem:[%s13464_s5 + $0xa58] sm:$0xff] %vm1933_vm2, %v3601_v55  ;;  %12318 = vmatprep.mubr.msk.f32.mxu0 %vm336_vm1, %v4099_v51  ;;  %v4119_v51 = vld [vmem:[#allocation3 + $0x1a0] sm:$0xff] }
 0x435   : > { %v3180_v58 = vpop.f32.mrb[196].mxu0  ;;  %v3605_v59 = vpop.f32.mrb[0].mxu1 }
 0x436   : > { %10349 = vst [vmem:[%s13464_s5 + $0xa60] sm:$0xff] %v3180_v58  ;;  %10351 = vst [vmem:[%s13464_s5 + $0xa70] sm:$0xff] %v3605_v59  ;;  %v3182_v60 = vpop.f32.mrb[197].mxu0  ;;  %v3607_v61 = vpop.f32.mrb[1].mxu1  ;;  %12319 = vmatmul.mubr.msk.f32.gmra.mrb[46].mxu0 %vm336_vm1, %v4100_v56  ;;  %v4120_v56 = vld [vmem:[#allocation3 + $0x1a8] sm:$0xff] }
 0x437   : > { %10350 = vst [vmem:[%s13464_s5 + $0xa68] sm:$0xff] %v3182_v60  ;;  %10352 = vst.msk [vmem:[%s13464_s5 + $0xa78] sm:$0xff] %vm1933_vm2, %v3607_v61  ;;  %12321 = vmatprep.mubr.msk.f32.mxu0 %vm336_vm1, %v4101_v57  ;;  %v4121_v57 = vld [vmem:[#allocation3 + $0x1b0] sm:$0xff] }
 0x439   : > { %v3186_v43 = vpop.f32.mrb[198].mxu0  ;;  %v3611_v0 = vpop.f32.mrb[2].mxu1 }
 0x43a   : > { %10353 = vst [vmem:[%s13464_s5 + $0xa80] sm:$0xff] %v3186_v43  ;;  %10355 = vst [vmem:[%s13464_s5 + $0xa90] sm:$0xff] %v3611_v0  ;;  %v3188_v1 = vpop.f32.mrb[199].mxu0  ;;  %v3613_v2 = vpop.f32.mrb[3].mxu1  ;;  %12322 = vmatmul.mubr.msk.f32.gmra.mrb[48].mxu0 %vm336_vm1, %v4102_v62  ;;  %v4122_v62 = vld [vmem:[#allocation3 + $0x1b8] sm:$0xff] }
 0x43b   : > { %10354 = vst [vmem:[%s13464_s5 + $0xa88] sm:$0xff] %v3188_v1  ;;  %10356 = vst.msk [vmem:[%s13464_s5 + $0xa98] sm:$0xff] %vm1933_vm2, %v3613_v2  ;;  %12324 = vmatprep.mubr.msk.f32.mxu0 %vm336_vm1, %v4103_v63  ;;  %v4123_v63 = vld [vmem:[#allocation3 + $0x1c0] sm:$0xff] }
 0x43d   : > { %v3192_v5 = vpop.f32.mrb[200].mxu0  ;;  %v3617_v9 = vpop.f32.mrb[4].mxu1 }
 0x43e   : > { %10357 = vst [vmem:[%s13464_s5 + $0xaa0] sm:$0xff] %v3192_v5  ;;  %10359 = vst [vmem:[%s13464_s5 + $0xab0] sm:$0xff] %v3617_v9  ;;  %v3194_v10 = vpop.f32.mrb[201].mxu0  ;;  %v3619_v11 = vpop.f32.mrb[5].mxu1  ;;  %12325 = vmatmul.mubr.msk.f32.gmra.mrb[50].mxu0 %vm336_vm1, %v4104_v3  ;;  %v4124_v3 = vld [vmem:[#allocation3 + $0x1c8] sm:$0xff] }
 0x43f   : > { %10358 = vst [vmem:[%s13464_s5 + $0xaa8] sm:$0xff] %v3194_v10  ;;  %10360 = vst.msk [vmem:[%s13464_s5 + $0xab8] sm:$0xff] %vm1933_vm2, %v3619_v11  ;;  %12327 = vmatprep.mubr.msk.f32.mxu0 %vm336_vm1, %v4105_v4  ;;  %v4125_v4 = vld [vmem:[#allocation3 + $0x1d0] sm:$0xff] }
 0x441   : > { %v3198_v14 = vpop.f32.mrb[202].mxu0  ;;  %v3623_v15 = vpop.f32.mrb[6].mxu1 }
 0x442   : > { %10361 = vst [vmem:[%s13464_s5 + $0xac0] sm:$0xff] %v3198_v14  ;;  %10363 = vst [vmem:[%s13464_s5 + $0xad0] sm:$0xff] %v3623_v15  ;;  %v3200_v16 = vpop.f32.mrb[203].mxu0  ;;  %v3625_v17 = vpop.f32.mrb[7].mxu1  ;;  %12328 = vmatmul.mubr.msk.f32.gmra.mrb[52].mxu0 %vm336_vm1, %v4106_v12  ;;  %v4126_v12 = vld [vmem:[#allocation3 + $0x1d8] sm:$0x1] }
 0x443   : > { %10362 = vst [vmem:[%s13464_s5 + $0xac8] sm:$0xff] %v3200_v16  ;;  %10364 = vst.msk [vmem:[%s13464_s5 + $0xad8] sm:$0xff] %vm1933_vm2, %v3625_v17  ;;  %12330 = vmatprep.mubr.msk.f32.mxu0 %vm336_vm1, %v4107_v13 }
 0x445   : > { %v3204_v20 = vpop.f32.mrb[204].mxu0  ;;  %v3629_v21 = vpop.f32.mrb[8].mxu1 }
 0x446   : > { %10365 = vst [vmem:[%s13464_s5 + $0xae0] sm:$0xff] %v3204_v20  ;;  %10367 = vst [vmem:[%s13464_s5 + $0xaf0] sm:$0xff] %v3629_v21  ;;  %v3206_v22 = vpop.f32.mrb[205].mxu0  ;;  %v3631_v23 = vpop.f32.mrb[9].mxu1  ;;  %12331 = vmatmul.mubr.msk.f32.gmra.mrb[54].mxu0 %vm336_vm1, %v4108_v18 }
 0x447   : > { %10366 = vst [vmem:[%s13464_s5 + $0xae8] sm:$0xff] %v3206_v22  ;;  %10368 = vst.msk [vmem:[%s13464_s5 + $0xaf8] sm:$0xff] %vm1933_vm2, %v3631_v23  ;;  %12333 = vmatprep.mubr.msk.f32.mxu0 %vm336_vm1, %v4109_v19 }
 0x449   : > { %v3210_v28 = vpop.f32.mrb[206].mxu0  ;;  %v3635_v29 = vpop.f32.mrb[10].mxu1 }
 0x44a   : > { %10369 = vst [vmem:[%s13464_s5 + $0xb00] sm:$0xff] %v3210_v28  ;;  %10371 = vst [vmem:[%s13464_s5 + $0xb10] sm:$0xff] %v3635_v29  ;;  %v3212_v30 = vpop.f32.mrb[207].mxu0  ;;  %v3637_v31 = vpop.f32.mrb[11].mxu1  ;;  %12334 = vmatmul.mubr.msk.f32.gmra.mrb[56].mxu0 %vm336_vm1, %v4110_v25 }
 0x44b   : > { %10370 = vst [vmem:[%s13464_s5 + $0xb08] sm:$0xff] %v3212_v30  ;;  %10372 = vst.msk [vmem:[%s13464_s5 + $0xb18] sm:$0xff] %vm1933_vm2, %v3637_v31  ;;  %12336 = vmatprep.mubr.msk.f32.mxu0 %vm336_vm1, %v4111_v27 }
 0x44d   : > { %v3216_v35 = vpop.f32.mrb[208].mxu0  ;;  %v3641_v36 = vpop.f32.mrb[12].mxu1 }
 0x44e   : > { %10373 = vst [vmem:[%s13464_s5 + $0xb20] sm:$0xff] %v3216_v35  ;;  %10375 = vst [vmem:[%s13464_s5 + $0xb30] sm:$0xff] %v3641_v36  ;;  %v3218_v37 = vpop.f32.mrb[209].mxu0  ;;  %v3643_v38 = vpop.f32.mrb[13].mxu1  ;;  %12337 = vmatmul.mubr.msk.f32.gmra.mrb[58].mxu0 %vm336_vm1, %v4112_v33 }
 0x44f   : > { %10374 = vst [vmem:[%s13464_s5 + $0xb28] sm:$0xff] %v3218_v37  ;;  %10376 = vst.msk [vmem:[%s13464_s5 + $0xb38] sm:$0xff] %vm1933_vm2, %v3643_v38  ;;  %12339 = vmatprep.mubr.msk.f32.mxu0 %vm336_vm1, %v4113_v34 }
 0x451   : > { %v3222_v41 = vpop.f32.mrb[210].mxu0  ;;  %v3647_v6 = vpop.f32.mrb[14].mxu1 }
 0x452   : > { %10377 = vst [vmem:[%s13464_s5 + $0xb40] sm:$0xff] %v3222_v41  ;;  %10379 = vst [vmem:[%s13464_s5 + $0xb50] sm:$0xff] %v3647_v6  ;;  %v3224_v42 = vpop.f32.mrb[211].mxu0  ;;  %v3649_v44 = vpop.f32.mrb[15].mxu1  ;;  %12340 = vmatmul.mubr.msk.f32.gmra.mrb[60].mxu0 %vm336_vm1, %v4114_v39 }
 0x453   : > { %10378 = vst [vmem:[%s13464_s5 + $0xb48] sm:$0xff] %v3224_v42  ;;  %10380 = vst.msk [vmem:[%s13464_s5 + $0xb58] sm:$0xff] %vm1933_vm2, %v3649_v44  ;;  %12342 = vmatprep.mubr.msk.f32.mxu0 %vm336_vm1, %v4115_v40 }
 0x455   : > { %v3228_v7 = vpop.f32.mrb[212].mxu0  ;;  %v3653_v47 = vpop.f32.mrb[16].mxu1 }
 0x456   : > { %10381 = vst [vmem:[%s13464_s5 + $0xb60] sm:$0xff] %v3228_v7  ;;  %10383 = vst [vmem:[%s13464_s5 + $0xb70] sm:$0xff] %v3653_v47  ;;  %v3230_v48 = vpop.f32.mrb[213].mxu0  ;;  %v3655_v49 = vpop.f32.mrb[17].mxu1  ;;  %12343 = vmatmul.mubr.msk.f32.gmra.mrb[62].mxu0 %vm336_vm1, %v4116_v45 }
 0x457   : > { %10382 = vst [vmem:[%s13464_s5 + $0xb68] sm:$0xff] %v3230_v48  ;;  %10384 = vst.msk [vmem:[%s13464_s5 + $0xb78] sm:$0xff] %vm1933_vm2, %v3655_v49  ;;  %12345 = vmatprep.mubr.msk.f32.mxu0 %vm336_vm1, %v4117_v46 }
 0x459   : > { %v3234_v52 = vpop.f32.mrb[214].mxu0  ;;  %v3659_v53 = vpop.f32.mrb[18].mxu1 }
 0x45a   : > { %10385 = vst [vmem:[%s13464_s5 + $0xb80] sm:$0xff] %v3234_v52  ;;  %10387 = vst [vmem:[%s13464_s5 + $0xb90] sm:$0xff] %v3659_v53  ;;  %v3236_v54 = vpop.f32.mrb[215].mxu0  ;;  %v3661_v55 = vpop.f32.mrb[19].mxu1  ;;  %12346 = vmatmul.mubr.msk.f32.gmra.mrb[64].mxu0 %vm336_vm1, %v4118_v50 }
 0x45b   : > { %10386 = vst [vmem:[%s13464_s5 + $0xb88] sm:$0xff] %v3236_v54  ;;  %10388 = vst.msk [vmem:[%s13464_s5 + $0xb98] sm:$0xff] %vm1933_vm2, %v3661_v55  ;;  %12348 = vmatprep.mubr.msk.f32.mxu0 %vm336_vm1, %v4119_v51 }
 0x45d   : > { %v3240_v58 = vpop.f32.mrb[216].mxu0  ;;  %v3665_v59 = vpop.f32.mrb[20].mxu1 }
 0x45e   : > { %10389 = vst [vmem:[%s13464_s5 + $0xba0] sm:$0xff] %v3240_v58  ;;  %10391 = vst [vmem:[%s13464_s5 + $0xbb0] sm:$0xff] %v3665_v59  ;;  %v3242_v60 = vpop.f32.mrb[217].mxu0  ;;  %v3667_v61 = vpop.f32.mrb[21].mxu1  ;;  %12349 = vmatmul.mubr.msk.f32.gmra.mrb[66].mxu0 %vm336_vm1, %v4120_v56 }
 0x45f   : > { %10390 = vst [vmem:[%s13464_s5 + $0xba8] sm:$0xff] %v3242_v60  ;;  %10392 = vst.msk [vmem:[%s13464_s5 + $0xbb8] sm:$0xff] %vm1933_vm2, %v3667_v61  ;;  %12351 = vmatprep.mubr.msk.f32.mxu0 %vm336_vm1, %v4121_v57 }
 0x461   : > { %v3246_v43 = vpop.f32.mrb[218].mxu0  ;;  %v3671_v0 = vpop.f32.mrb[22].mxu1 }
 0x462   : > { %10393 = vst [vmem:[%s13464_s5 + $0xbc0] sm:$0xff] %v3246_v43  ;;  %10395 = vst [vmem:[%s13464_s5 + $0xbd0] sm:$0xff] %v3671_v0  ;;  %v3248_v1 = vpop.f32.mrb[219].mxu0  ;;  %v3673_v2 = vpop.f32.mrb[23].mxu1  ;;  %12352 = vmatmul.mubr.msk.f32.gmra.mrb[68].mxu0 %vm336_vm1, %v4122_v62 }
 0x463   : > { %10394 = vst [vmem:[%s13464_s5 + $0xbc8] sm:$0xff] %v3248_v1  ;;  %10396 = vst.msk [vmem:[%s13464_s5 + $0xbd8] sm:$0xff] %vm1933_vm2, %v3673_v2  ;;  %12354 = vmatprep.mubr.msk.f32.mxu0 %vm336_vm1, %v4123_v63 }
 0x465   : > { %v3252_v5 = vpop.f32.mrb[220].mxu0  ;;  %v3677_v9 = vpop.f32.mrb[24].mxu1 }
 0x466   : > { %10397 = vst [vmem:[%s13464_s5 + $0xbe0] sm:$0xff] %v3252_v5  ;;  %10399 = vst [vmem:[%s13464_s5 + $0xbf0] sm:$0xff] %v3677_v9  ;;  %v3254_v10 = vpop.f32.mrb[221].mxu0  ;;  %v3679_v11 = vpop.f32.mrb[25].mxu1  ;;  %12355 = vmatmul.mubr.msk.f32.gmra.mrb[70].mxu0 %vm336_vm1, %v4124_v3 }
 0x467   : > { %10398 = vst [vmem:[%s13464_s5 + $0xbe8] sm:$0xff] %v3254_v10  ;;  %10400 = vst.msk [vmem:[%s13464_s5 + $0xbf8] sm:$0xff] %vm1933_vm2, %v3679_v11  ;;  %12357 = vmatprep.mubr.msk.f32.mxu0 %vm336_vm1, %v4125_v4 }
 0x469   : > { %v3258_v13 = vpop.f32.mrb[222].mxu0  ;;  %v3683_v14 = vpop.f32.mrb[26].mxu1 }
 0x46a   : > { %10401 = vst [vmem:[%s13464_s5 + $0xc00] sm:$0xff] %v3258_v13  ;;  %10403 = vst [vmem:[%s13464_s5 + $0xc10] sm:$0xff] %v3683_v14  ;;  %v3260_v15 = vpop.f32.mrb[223].mxu0  ;;  %v3685_v16 = vpop.f32.mrb[27].mxu1  ;;  %12358 = vmatmul.mubr.msk.f32.gmra.mrb[72].mxu0 %vm336_vm1, %v4126_v12 }
 0x46b   : > { %10402 = vst [vmem:[%s13464_s5 + $0xc08] sm:$0xff] %v3260_v15  ;;  %10404 = vst.msk [vmem:[%s13464_s5 + $0xc18] sm:$0xff] %vm1933_vm2, %v3685_v16  ;;  %5360 = vmatprep.mubr.f32.mxu0 %v12822_v8 }
 0x46d   : > { %v3264_v17 = vpop.f32.mrb[224].mxu0  ;;  %v3689_v18 = vpop.f32.mrb[28].mxu1 }
 0x46e   : > { %10405 = vst [vmem:[%s13464_s5 + $0xc20] sm:$0xff] %v3264_v17  ;;  %10407 = vst [vmem:[%s13464_s5 + $0xc30] sm:$0xff] %v3689_v18  ;;  %v3266_v19 = vpop.f32.mrb[225].mxu0  ;;  %v3691_v20 = vpop.f32.mrb[29].mxu1 }
 0x46f   : > { %10406 = vst [vmem:[%s13464_s5 + $0xc28] sm:$0xff] %v3266_v19  ;;  %10408 = vst.msk [vmem:[%s13464_s5 + $0xc38] sm:$0xff] %vm1933_vm2, %v3691_v20 }
 0x471   : > { %v3270_v21 = vpop.f32.mrb[226].mxu0  ;;  %v3695_v22 = vpop.f32.mrb[30].mxu1 }
 0x472   : > { %10409 = vst [vmem:[%s13464_s5 + $0xc40] sm:$0xff] %v3270_v21  ;;  %10411 = vst [vmem:[%s13464_s5 + $0xc50] sm:$0xff] %v3695_v22  ;;  %v3272_v23 = vpop.f32.mrb[227].mxu0  ;;  %v3697_v24 = vpop.f32.mrb[31].mxu1 }
 0x473   : > { %10410 = vst [vmem:[%s13464_s5 + $0xc48] sm:$0xff] %v3272_v23  ;;  %10412 = vst.msk [vmem:[%s13464_s5 + $0xc58] sm:$0xff] %vm1933_vm2, %v3697_v24 }
 0x475   : > { %v3276_v25 = vpop.f32.mrb[228].mxu0  ;;  %v3701_v26 = vpop.f32.mrb[32].mxu1 }
 0x476   : > { %10413 = vst [vmem:[%s13464_s5 + $0xc60] sm:$0xff] %v3276_v25  ;;  %10415 = vst [vmem:[%s13464_s5 + $0xc70] sm:$0xff] %v3701_v26  ;;  %v3278_v27 = vpop.f32.mrb[229].mxu0  ;;  %v3703_v28 = vpop.f32.mrb[33].mxu1 }
 0x477   : > { %10414 = vst [vmem:[%s13464_s5 + $0xc68] sm:$0xff] %v3278_v27  ;;  %10416 = vst.msk [vmem:[%s13464_s5 + $0xc78] sm:$0xff] %vm1933_vm2, %v3703_v28 }
 0x479   : > { %v3282_v29 = vpop.f32.mrb[230].mxu0  ;;  %v3707_v30 = vpop.f32.mrb[34].mxu1 }
 0x47a   : > { %10417 = vst [vmem:[%s13464_s5 + $0xc80] sm:$0xff] %v3282_v29  ;;  %10419 = vst [vmem:[%s13464_s5 + $0xc90] sm:$0xff] %v3707_v30  ;;  %v3284_v31 = vpop.f32.mrb[231].mxu0  ;;  %v3709_v33 = vpop.f32.mrb[35].mxu1 }
 0x47b   : > { %10418 = vst [vmem:[%s13464_s5 + $0xc88] sm:$0xff] %v3284_v31  ;;  %10420 = vst.msk [vmem:[%s13464_s5 + $0xc98] sm:$0xff] %vm1933_vm2, %v3709_v33 }
 0x47d   : > { %v3288_v34 = vpop.f32.mrb[232].mxu0  ;;  %v3713_v35 = vpop.f32.mrb[36].mxu1 }
 0x47e   : > { %10421 = vst [vmem:[%s13464_s5 + $0xca0] sm:$0xff] %v3288_v34  ;;  %10423 = vst [vmem:[%s13464_s5 + $0xcb0] sm:$0xff] %v3713_v35  ;;  %v3290_v36 = vpop.f32.mrb[233].mxu0  ;;  %v3715_v37 = vpop.f32.mrb[37].mxu1 }
 0x47f   : > { %10422 = vst [vmem:[%s13464_s5 + $0xca8] sm:$0xff] %v3290_v36  ;;  %10424 = vst.msk [vmem:[%s13464_s5 + $0xcb8] sm:$0xff] %vm1933_vm2, %v3715_v37 }
 0x481   : > { %v3294_v38 = vpop.f32.mrb[234].mxu0  ;;  %v3719_v39 = vpop.f32.mrb[38].mxu1 }
 0x482   : > { %10425 = vst [vmem:[%s13464_s5 + $0xcc0] sm:$0xff] %v3294_v38  ;;  %10427 = vst [vmem:[%s13464_s5 + $0xcd0] sm:$0xff] %v3719_v39  ;;  %v3296_v40 = vpop.f32.mrb[235].mxu0  ;;  %v3721_v41 = vpop.f32.mrb[39].mxu1 }
 0x483   : > { %10426 = vst [vmem:[%s13464_s5 + $0xcc8] sm:$0xff] %v3296_v40  ;;  %10428 = vst.msk [vmem:[%s13464_s5 + $0xcd8] sm:$0xff] %vm1933_vm2, %v3721_v41 }
 0x485   : > { %v3300_v6 = vpop.f32.mrb[236].mxu0  ;;  %v3725_v42 = vpop.f32.mrb[40].mxu1 }
 0x486   : > { %10429 = vst [vmem:[%s13464_s5 + $0xce0] sm:$0xff] %v3300_v6  ;;  %10431 = vst [vmem:[%s13464_s5 + $0xcf0] sm:$0xff] %v3725_v42  ;;  %v3302_v44 = vpop.f32.mrb[237].mxu0  ;;  %v3727_v45 = vpop.f32.mrb[41].mxu1 }
 0x487   : > { %10430 = vst [vmem:[%s13464_s5 + $0xce8] sm:$0xff] %v3302_v44  ;;  %10432 = vst.msk [vmem:[%s13464_s5 + $0xcf8] sm:$0xff] %vm1933_vm2, %v3727_v45 }
 0x489   : > { %v3306_v46 = vpop.f32.mrb[238].mxu0  ;;  %v3731_v7 = vpop.f32.mrb[42].mxu1 }
 0x48a   : > { %10433 = vst [vmem:[%s13464_s5 + $0xd00] sm:$0xff] %v3306_v46  ;;  %10435 = vst [vmem:[%s13464_s5 + $0xd10] sm:$0xff] %v3731_v7  ;;  %v3308_v47 = vpop.f32.mrb[239].mxu0  ;;  %v3733_v48 = vpop.f32.mrb[43].mxu1 }
 0x48b   : > { %10434 = vst [vmem:[%s13464_s5 + $0xd08] sm:$0xff] %v3308_v47  ;;  %10436 = vst.msk [vmem:[%s13464_s5 + $0xd18] sm:$0xff] %vm1933_vm2, %v3733_v48 }
 0x48d   : > { %v3312_v49 = vpop.f32.mrb[240].mxu0  ;;  %v3737_v50 = vpop.f32.mrb[44].mxu1 }
 0x48e   : > { %10437 = vst [vmem:[%s13464_s5 + $0xd20] sm:$0xff] %v3312_v49  ;;  %10439 = vst [vmem:[%s13464_s5 + $0xd30] sm:$0xff] %v3737_v50  ;;  %v3314_v51 = vpop.f32.mrb[241].mxu0  ;;  %v3739_v52 = vpop.f32.mrb[45].mxu1 }
 0x48f   : > { %10438 = vst [vmem:[%s13464_s5 + $0xd28] sm:$0xff] %v3314_v51  ;;  %10440 = vst.msk [vmem:[%s13464_s5 + $0xd38] sm:$0xff] %vm1933_vm2, %v3739_v52 }
 0x491   : > { %v3318_v53 = vpop.f32.mrb[242].mxu0  ;;  %v3743_v54 = vpop.f32.mrb[46].mxu1 }
 0x492   : > { %10441 = vst [vmem:[%s13464_s5 + $0xd40] sm:$0xff] %v3318_v53  ;;  %10443 = vst [vmem:[%s13464_s5 + $0xd50] sm:$0xff] %v3743_v54  ;;  %v3320_v55 = vpop.f32.mrb[243].mxu0  ;;  %v3745_v56 = vpop.f32.mrb[47].mxu1 }
 0x493   : > { %10442 = vst [vmem:[%s13464_s5 + $0xd48] sm:$0xff] %v3320_v55  ;;  %10444 = vst.msk [vmem:[%s13464_s5 + $0xd58] sm:$0xff] %vm1933_vm2, %v3745_v56 }
 0x495   : > { %v3324_v57 = vpop.f32.mrb[244].mxu0  ;;  %v3749_v58 = vpop.f32.mrb[48].mxu1 }
 0x496   : > { %10445 = vst [vmem:[%s13464_s5 + $0xd60] sm:$0xff] %v3324_v57  ;;  %10447 = vst [vmem:[%s13464_s5 + $0xd70] sm:$0xff] %v3749_v58  ;;  %v3326_v59 = vpop.f32.mrb[245].mxu0  ;;  %v3751_v60 = vpop.f32.mrb[49].mxu1 }
 0x497   : > { %10446 = vst [vmem:[%s13464_s5 + $0xd68] sm:$0xff] %v3326_v59  ;;  %10448 = vst.msk [vmem:[%s13464_s5 + $0xd78] sm:$0xff] %vm1933_vm2, %v3751_v60 }
 0x499   : > { %v3330_v61 = vpop.f32.mrb[246].mxu0  ;;  %v3755_v62 = vpop.f32.mrb[50].mxu1 }
 0x49a   : > { %10449 = vst [vmem:[%s13464_s5 + $0xd80] sm:$0xff] %v3330_v61  ;;  %10451 = vst [vmem:[%s13464_s5 + $0xd90] sm:$0xff] %v3755_v62  ;;  %v3332_v63 = vpop.f32.mrb[247].mxu0  ;;  %v3757_v43 = vpop.f32.mrb[51].mxu1 }
 0x49b   : > { %10450 = vst [vmem:[%s13464_s5 + $0xd88] sm:$0xff] %v3332_v63  ;;  %10452 = vst.msk [vmem:[%s13464_s5 + $0xd98] sm:$0xff] %vm1933_vm2, %v3757_v43 }
 0x49d   : > { %v3336_v0 = vpop.f32.mrb[248].mxu0  ;;  %v3761_v1 = vpop.f32.mrb[52].mxu1 }
 0x49e   : > { %10453 = vst [vmem:[%s13464_s5 + $0xda0] sm:$0xff] %v3336_v0  ;;  %10455 = vst [vmem:[%s13464_s5 + $0xdb0] sm:$0xff] %v3761_v1  ;;  %v3338_v2 = vpop.f32.mrb[249].mxu0  ;;  %v3763_v3 = vpop.f32.mrb[53].mxu1 }
 0x49f   : > { %10454 = vst [vmem:[%s13464_s5 + $0xda8] sm:$0xff] %v3338_v2  ;;  %10456 = vst.msk [vmem:[%s13464_s5 + $0xdb8] sm:$0xff] %vm1933_vm2, %v3763_v3 }
 0x4a1   : > { %v3342_v4 = vpop.f32.mrb[250].mxu0  ;;  %v3767_v5 = vpop.f32.mrb[54].mxu1 }
 0x4a2   : > { %10457 = vst [vmem:[%s13464_s5 + $0xdc0] sm:$0xff] %v3342_v4  ;;  %10459 = vst [vmem:[%s13464_s5 + $0xdd0] sm:$0xff] %v3767_v5  ;;  %v3344_v9 = vpop.f32.mrb[251].mxu0  ;;  %v3769_v10 = vpop.f32.mrb[55].mxu1 }
 0x4a3   : > { %10458 = vst [vmem:[%s13464_s5 + $0xdc8] sm:$0xff] %v3344_v9  ;;  %10460 = vst.msk [vmem:[%s13464_s5 + $0xdd8] sm:$0xff] %vm1933_vm2, %v3769_v10 }
 0x4a5   : > { %v3348_v11 = vpop.f32.mrb[252].mxu0  ;;  %v3773_v12 = vpop.f32.mrb[56].mxu1 }
 0x4a6   : > { %10461 = vst [vmem:[%s13464_s5 + $0xde0] sm:$0xff] %v3348_v11  ;;  %10463 = vst [vmem:[%s13464_s5 + $0xdf0] sm:$0xff] %v3773_v12  ;;  %v3350_v13 = vpop.f32.mrb[253].mxu0  ;;  %v3775_v14 = vpop.f32.mrb[57].mxu1 }
 0x4a7   : > { %10462 = vst [vmem:[%s13464_s5 + $0xde8] sm:$0xff] %v3350_v13  ;;  %10464 = vst.msk [vmem:[%s13464_s5 + $0xdf8] sm:$0xff] %vm1933_vm2, %v3775_v14 }
 0x4a9   : > { %v3354_v15 = vpop.f32.mrb[254].mxu0  ;;  %v3779_v16 = vpop.f32.mrb[58].mxu1 }
 0x4aa   : > { %10465 = vst [vmem:[%s13464_s5 + $0xe00] sm:$0xff] %v3354_v15  ;;  %10467 = vst [vmem:[%s13464_s5 + $0xe10] sm:$0xff] %v3779_v16  ;;  %v3356_v17 = vpop.f32.mrb[255].mxu0  ;;  %v3781_v18 = vpop.f32.mrb[59].mxu1 }
 0x4ab   : > { %10466 = vst [vmem:[%s13464_s5 + $0xe08] sm:$0xff] %v3356_v17  ;;  %10468 = vst.msk [vmem:[%s13464_s5 + $0xe18] sm:$0xff] %vm1933_vm2, %v3781_v18 }
 0x4ad   : > { %v3360_v19 = vpop.f32.mrb[0].mxu0  ;;  %v3785_v20 = vpop.f32.mrb[60].mxu1 }
 0x4ae   : > { %10469 = vst [vmem:[%s13464_s5 + $0xe20] sm:$0xff] %v3360_v19  ;;  %10471 = vst [vmem:[%s13464_s5 + $0xe30] sm:$0xff] %v3785_v20  ;;  %v3362_v21 = vpop.f32.mrb[1].mxu0  ;;  %v3787_v22 = vpop.f32.mrb[61].mxu1 }
 0x4af   : > { %10470 = vst [vmem:[%s13464_s5 + $0xe28] sm:$0xff] %v3362_v21  ;;  %10472 = vst.msk [vmem:[%s13464_s5 + $0xe38] sm:$0xff] %vm1933_vm2, %v3787_v22 }
 0x4b1   : > { %v3366_v23 = vpop.f32.mrb[2].mxu0  ;;  %v3791_v24 = vpop.f32.mrb[62].mxu1 }
 0x4b2   : > { %10473 = vst [vmem:[%s13464_s5 + $0xe40] sm:$0xff] %v3366_v23  ;;  %10475 = vst [vmem:[%s13464_s5 + $0xe50] sm:$0xff] %v3791_v24  ;;  %v3368_v25 = vpop.f32.mrb[3].mxu0  ;;  %v3793_v26 = vpop.f32.mrb[63].mxu1 }
 0x4b3   : > { %10474 = vst [vmem:[%s13464_s5 + $0xe48] sm:$0xff] %v3368_v25  ;;  %10476 = vst.msk [vmem:[%s13464_s5 + $0xe58] sm:$0xff] %vm1933_vm2, %v3793_v26 }
 0x4b5   : > { %v3372_v27 = vpop.f32.mrb[4].mxu0  ;;  %v3797_v28 = vpop.f32.mrb[64].mxu1 }
 0x4b6   : > { %10477 = vst [vmem:[%s13464_s5 + $0xe60] sm:$0xff] %v3372_v27  ;;  %10479 = vst [vmem:[%s13464_s5 + $0xe70] sm:$0xff] %v3797_v28  ;;  %v3374_v29 = vpop.f32.mrb[5].mxu0  ;;  %v3799_v30 = vpop.f32.mrb[65].mxu1  ;;  %v6572_v28 = vld [vmem:[#allocation6] sm:$0xff] }
 0x4b7   : > { %10478 = vst [vmem:[%s13464_s5 + $0xe68] sm:$0xff] %v3374_v29  ;;  %10480 = vst.msk [vmem:[%s13464_s5 + $0xe78] sm:$0xff] %vm1933_vm2, %v3799_v30  ;;  %v6576_v30 = vcombine.high %v6572_v28, %v6572_v28 }
 0x4b9   : > { %v3378_v31 = vpop.f32.mrb[6].mxu0  ;;  %v3803_v33 = vpop.f32.mrb[66].mxu1  ;;  %10985 = vmatprep.subr.msk.mxu0 %vm517_vm0, %v6576_v30  ;;  %v5969_v30 = vld [vmem:[#allocation3 + $0x38] sm:$0xff] }
 0x4ba   : > { %10481 = vst [vmem:[%s13464_s5 + $0xe80] sm:$0xff] %v3378_v31  ;;  %10483 = vst [vmem:[%s13464_s5 + $0xe90] sm:$0xff] %v3803_v33  ;;  %v3380_v34 = vpop.f32.mrb[7].mxu0  ;;  %v3805_v35 = vpop.f32.mrb[67].mxu1 }
 0x4bb   : > { %10482 = vst [vmem:[%s13464_s5 + $0xe88] sm:$0xff] %v3380_v34  ;;  %10484 = vst.msk [vmem:[%s13464_s5 + $0xe98] sm:$0xff] %vm1933_vm2, %v3805_v35 }
 0x4bd   : > { %v3384_v36 = vpop.f32.mrb[8].mxu0  ;;  %v3809_v37 = vpop.f32.mrb[68].mxu1 }
 0x4be   : > { %10485 = vst [vmem:[%s13464_s5 + $0xea0] sm:$0xff] %v3384_v36  ;;  %10487 = vst [vmem:[%s13464_s5 + $0xeb0] sm:$0xff] %v3809_v37  ;;  %v3386_v38 = vpop.f32.mrb[9].mxu0  ;;  %v3811_v39 = vpop.f32.mrb[69].mxu1 }
 0x4bf   : > { %10486 = vst [vmem:[%s13464_s5 + $0xea8] sm:$0xff] %v3386_v38  ;;  %10488 = vst.msk [vmem:[%s13464_s5 + $0xeb8] sm:$0xff] %vm1933_vm2, %v3811_v39 }
 0x4c1   : > { %v3390_v40 = vpop.f32.mrb[10].mxu0  ;;  %v3815_v41 = vpop.f32.mrb[70].mxu1 }
 0x4c2   : > { %10489 = vst [vmem:[%s13464_s5 + $0xec0] sm:$0xff] %v3390_v40  ;;  %10491 = vst [vmem:[%s13464_s5 + $0xed0] sm:$0xff] %v3815_v41  ;;  %v3392_v6 = vpop.f32.mrb[11].mxu0  ;;  %v3817_v42 = vpop.f32.mrb[71].mxu1 }
 0x4c3   : > { %10490 = vst [vmem:[%s13464_s5 + $0xec8] sm:$0xff] %v3392_v6  ;;  %10492 = vst.msk [vmem:[%s13464_s5 + $0xed8] sm:$0xff] %vm1933_vm2, %v3817_v42 }
 0x4c5   : > { %v3396_v44 = vpop.f32.mrb[12].mxu0  ;;  %v3821_v45 = vpop.f32.mrb[72].mxu1 }
 0x4c6   : > { %10493 = vst [vmem:[%s13464_s5 + $0xee0] sm:$0x1] %v3396_v44  ;;  %10495 = vst [vmem:[%s13464_s5 + $0xef0] sm:$0x1] %v3821_v45  ;;  %v3398_v46 = vpop.f32.mrb[13].mxu0  ;;  %v3823_v7 = vpop.f32.mrb[73].mxu1 }
 0x4c7   : > { %10494 = vst [vmem:[%s13464_s5 + $0xee8] sm:$0x1] %v3398_v46  ;;  %10496 = vst.msk [vmem:[%s13464_s5 + $0xef8] sm:$0x1] %vm2170_vm3, %v3823_v7 }
 0x4c9   : > { %v12272_v47 = vpop.f32.mrb[14].mxu0 }
 0x4ca   : > { %v4378_v48 = vpop.f32.mrb[15].mxu0 }
 0x4cb   : > { %10561 = vmatmul.mubr.msk.f32.vlgmr.msra.gmra.mrb[74].mxu1 %vm336_vm1, %v4378_v48  ;;  %10623 = vmatmul.mubr.msk.f32.vlgmr.msra.gmra.mrb[74].mxu0 %vm336_vm1, %v4378_v48 }
 0x4cc   : > { %12361 = vmatpush3.msk.msra.mxu1 %vm517_vm0, %v14468_v32  ;;  %4941 = vmatprep.mubr.f32.mxu1 %v12822_v8 }
 0x4cd   : > { %5366 = vmatprep.mubr.f32.mxu0 %v12822_v8  ;;  %v12275_v49 = vpop.f32.mrb[16].mxu0  ;;  %10986 = vmatpush1.msk.msra.mxu0 %vm517_vm0, %v6572_v28 }
 0x4ce   : > { %v4388_v50 = vpop.f32.mrb[17].mxu0 }
 0x4cf   : > { %10562 = vmatmul.mubr.msk.f32.gmra.mrb[76].mxu1 %vm336_vm1, %v12272_v47  ;;  %10624 = vmatmul.mubr.msk.f32.gmra.mrb[76].mxu0 %vm336_vm1, %v12272_v47 }
 0x4d0   : > { %4947 = vmatprep.mubr.f32.mxu1 %v12822_v8  ;;  %5372 = vmatprep.mubr.f32.mxu0 %v12822_v8 }
 0x4d1   : > { %v12278_v51 = vpop.f32.mrb[18].mxu0 }
 0x4d2   : > { %v4398_v52 = vpop.f32.mrb[19].mxu0 }
 0x4d3   : > { %10563 = vmatmul.mubr.msk.f32.gmra.mrb[78].mxu1 %vm336_vm1, %v4388_v50  ;;  %10625 = vmatmul.mubr.msk.f32.gmra.mrb[78].mxu0 %vm336_vm1, %v4388_v50 }
 0x4d4   : > { %4953 = vmatprep.mubr.f32.mxu1 %v12822_v8  ;;  %5378 = vmatprep.mubr.f32.mxu0 %v12822_v8 }
 0x4d5   : > { %v12281_v32 = vpop.f32.mrb[20].mxu0 }
 0x4d6   : > { %v4408_v53 = vpop.f32.mrb[21].mxu0 }
 0x4d7   : > { %10564 = vmatmul.mubr.msk.f32.gmra.mrb[80].mxu1 %vm336_vm1, %v12275_v49  ;;  %10626 = vmatmul.mubr.msk.f32.gmra.mrb[80].mxu0 %vm336_vm1, %v12275_v49 }
 0x4d8   : > { %4959 = vmatprep.mubr.f32.mxu1 %v12822_v8  ;;  %5384 = vmatprep.mubr.f32.mxu0 %v12822_v8 }
 0x4d9   : > { %v12284_v54 = vpop.f32.mrb[22].mxu0 }
 0x4da   : > { %v4418_v55 = vpop.f32.mrb[23].mxu0 }
 0x4db   : > { %10565 = vmatmul.mubr.msk.f32.gmra.mrb[82].mxu1 %vm336_vm1, %v4398_v52  ;;  %10627 = vmatmul.mubr.msk.f32.gmra.mrb[82].mxu0 %vm336_vm1, %v4398_v52 }
 0x4dc   : > { %4965 = vmatprep.mubr.f32.mxu1 %v12822_v8  ;;  %5390 = vmatprep.mubr.f32.mxu0 %v12822_v8 }
 0x4dd   : > { %v12287_v56 = vpop.f32.mrb[24].mxu0 }
 0x4de   : > { %v4428_v57 = vpop.f32.mrb[25].mxu0 }
 0x4df   : > { %10566 = vmatmul.mubr.msk.f32.gmra.mrb[84].mxu1 %vm336_vm1, %v12278_v51  ;;  %10628 = vmatmul.mubr.msk.f32.gmra.mrb[84].mxu0 %vm336_vm1, %v12278_v51 }
 0x4e0   : > { %4971 = vmatprep.mubr.f32.mxu1 %v12822_v8  ;;  %5396 = vmatprep.mubr.f32.mxu0 %v12822_v8 }
 0x4e1   : > { %v12290_v58 = vpop.f32.mrb[26].mxu0 }
 0x4e2   : > { %v4438_v59 = vpop.f32.mrb[27].mxu0 }
 0x4e3   : > { %10567 = vmatmul.mubr.msk.f32.gmra.mrb[86].mxu1 %vm336_vm1, %v4408_v53  ;;  %10629 = vmatmul.mubr.msk.f32.gmra.mrb[86].mxu0 %vm336_vm1, %v4408_v53 }
 0x4e4   : > { %4977 = vmatprep.mubr.f32.mxu1 %v12822_v8  ;;  %5402 = vmatprep.mubr.f32.mxu0 %v12822_v8 }
 0x4e5   : > { %v12293_v60 = vpop.f32.mrb[28].mxu0 }
 0x4e6   : > { %v4448_v61 = vpop.f32.mrb[29].mxu0 }
 0x4e7   : > { %10568 = vmatmul.mubr.msk.f32.gmra.mrb[88].mxu1 %vm336_vm1, %v12281_v32  ;;  %10630 = vmatmul.mubr.msk.f32.gmra.mrb[88].mxu0 %vm336_vm1, %v12281_v32 }
 0x4e8   : > { %4983 = vmatprep.mubr.f32.mxu1 %v12822_v8  ;;  %5408 = vmatprep.mubr.f32.mxu0 %v12822_v8 }
 0x4e9   : > { %v12296_v62 = vpop.f32.mrb[30].mxu0 }
 0x4ea   : > { %v4458_v63 = vpop.f32.mrb[31].mxu0 }
 0x4eb   : > { %10569 = vmatmul.mubr.msk.f32.gmra.mrb[90].mxu1 %vm336_vm1, %v4418_v55  ;;  %10631 = vmatmul.mubr.msk.f32.gmra.mrb[90].mxu0 %vm336_vm1, %v4418_v55 }
 0x4ec   : > { %4989 = vmatprep.mubr.f32.mxu1 %v12822_v8  ;;  %5414 = vmatprep.mubr.f32.mxu0 %v12822_v8 }
 0x4ed   : > { %v14686_v43 = vpop.f32.mrb[32].mxu0 }
 0x4ee   : > { %v4468_v0 = vpop.f32.mrb[33].mxu0 }
 0x4ef   : > { %10570 = vmatmul.mubr.msk.f32.gmra.mrb[92].mxu1 %vm336_vm1, %v12284_v54  ;;  %10632 = vmatmul.mubr.msk.f32.gmra.mrb[92].mxu0 %vm336_vm1, %v12284_v54 }
 0x4f0   : > { %4995 = vmatprep.mubr.f32.mxu1 %v12822_v8  ;;  %5420 = vmatprep.mubr.f32.mxu0 %v12822_v8 }
 0x4f1   : > { %v14692_v1 = vpop.f32.mrb[34].mxu0 }
 0x4f2   : > { %v4478_v2 = vpop.f32.mrb[35].mxu0 }
 0x4f3   : > { %10571 = vmatmul.mubr.msk.f32.gmra.mrb[94].mxu1 %vm336_vm1, %v4428_v57  ;;  %10633 = vmatmul.mubr.msk.f32.gmra.mrb[94].mxu0 %vm336_vm1, %v4428_v57 }
 0x4f4   : > { %5001 = vmatprep.mubr.f32.mxu1 %v12822_v8  ;;  %5426 = vmatprep.mubr.f32.mxu0 %v12822_v8 }
 0x4f5   : > { %v14698_v3 = vpop.f32.mrb[36].mxu0 }
 0x4f6   : > { %v14700_v4 = vpop.f32.mrb[37].mxu0 }
 0x4f7   : > { %10572 = vmatmul.mubr.msk.f32.gmra.mrb[96].mxu1 %vm336_vm1, %v12287_v56  ;;  %10634 = vmatmul.mubr.msk.f32.gmra.mrb[96].mxu0 %vm336_vm1, %v12287_v56 }
 0x4f8   : > { %5007 = vmatprep.mubr.f32.mxu1 %v12822_v8  ;;  %5432 = vmatprep.mubr.f32.mxu0 %v12822_v8 }
 0x4f9   : > { %v14706_v5 = vpop.f32.mrb[38].mxu0 }
 0x4fa   : > { %v14708_v9 = vpop.f32.mrb[39].mxu0 }
 0x4fb   : > { %10573 = vmatmul.mubr.msk.f32.gmra.mrb[98].mxu1 %vm336_vm1, %v4438_v59  ;;  %10635 = vmatmul.mubr.msk.f32.gmra.mrb[98].mxu0 %vm336_vm1, %v4438_v59 }
 0x4fc   : > { %5013 = vmatprep.mubr.f32.mxu1 %v12822_v8  ;;  %5438 = vmatprep.mubr.f32.mxu0 %v12822_v8 }
 0x4fd   : > { %v14714_v10 = vpop.f32.mrb[40].mxu0 }
 0x4fe   : > { %v14716_v11 = vpop.f32.mrb[41].mxu0 }
 0x4ff   : > { %10574 = vmatmul.mubr.msk.f32.gmra.mrb[100].mxu1 %vm336_vm1, %v12290_v58  ;;  %10636 = vmatmul.mubr.msk.f32.gmra.mrb[100].mxu0 %vm336_vm1, %v12290_v58 }
 0x500   : > { %5019 = vmatprep.mubr.f32.mxu1 %v12822_v8  ;;  %5444 = vmatprep.mubr.f32.mxu0 %v12822_v8 }
 0x501   : > { %v14722_v12 = vpop.f32.mrb[42].mxu0 }
 0x502   : > { %v14724_v13 = vpop.f32.mrb[43].mxu0 }
 0x503   : > { %10575 = vmatmul.mubr.msk.f32.gmra.mrb[102].mxu1 %vm336_vm1, %v4448_v61  ;;  %10637 = vmatmul.mubr.msk.f32.gmra.mrb[102].mxu0 %vm336_vm1, %v4448_v61 }
 0x504   : > { %5025 = vmatprep.mubr.f32.mxu1 %v12822_v8  ;;  %5450 = vmatprep.mubr.f32.mxu0 %v12822_v8 }
 0x505   : > { %v14730_v14 = vpop.f32.mrb[44].mxu0 }
 0x506   : > { %v14732_v15 = vpop.f32.mrb[45].mxu0 }
 0x507   : > { %10576 = vmatmul.mubr.msk.f32.gmra.mrb[104].mxu1 %vm336_vm1, %v12293_v60  ;;  %10638 = vmatmul.mubr.msk.f32.gmra.mrb[104].mxu0 %vm336_vm1, %v12293_v60 }
 0x508   : > { %5031 = vmatprep.mubr.f32.mxu1 %v12822_v8  ;;  %5456 = vmatprep.mubr.f32.mxu0 %v12822_v8 }
 0x509   : > { %v14738_v16 = vpop.f32.mrb[46].mxu0 }
 0x50a   : > { %v14740_v17 = vpop.f32.mrb[47].mxu0 }
 0x50b   : > { %10577 = vmatmul.mubr.msk.f32.gmra.mrb[106].mxu1 %vm336_vm1, %v4458_v63  ;;  %10639 = vmatmul.mubr.msk.f32.gmra.mrb[106].mxu0 %vm336_vm1, %v4458_v63 }
 0x50c   : > { %5037 = vmatprep.mubr.f32.mxu1 %v12822_v8  ;;  %5462 = vmatprep.mubr.f32.mxu0 %v12822_v8 }
 0x50d   : > { %v14746_v18 = vpop.f32.mrb[48].mxu0 }
 0x50e   : > { %v14748_v19 = vpop.f32.mrb[49].mxu0 }
 0x50f   : > { %10578 = vmatmul.mubr.msk.f32.gmra.mrb[108].mxu1 %vm336_vm1, %v12296_v62  ;;  %10640 = vmatmul.mubr.msk.f32.gmra.mrb[108].mxu0 %vm336_vm1, %v12296_v62 }
 0x510   : > { %5043 = vmatprep.mubr.f32.mxu1 %v12822_v8  ;;  %5468 = vmatprep.mubr.f32.mxu0 %v12822_v8 }
 0x511   : > { %v14754_v20 = vpop.f32.mrb[50].mxu0 }
 0x512   : > { %v14756_v21 = vpop.f32.mrb[51].mxu0 }
 0x513   : > { %10579 = vmatmul.mubr.msk.f32.gmra.mrb[110].mxu1 %vm336_vm1, %v4468_v0  ;;  %10641 = vmatmul.mubr.msk.f32.gmra.mrb[110].mxu0 %vm336_vm1, %v4468_v0 }
 0x514   : > { %5049 = vmatprep.mubr.f32.mxu1 %v12822_v8  ;;  %5474 = vmatprep.mubr.f32.mxu0 %v12822_v8 }
 0x515   : > { %v14762_v22 = vpop.f32.mrb[52].mxu0 }
 0x516   : > { %v14764_v23 = vpop.f32.mrb[53].mxu0 }
 0x517   : > { %10580 = vmatmul.mubr.msk.f32.gmra.mrb[112].mxu1 %vm336_vm1, %v14686_v43  ;;  %10642 = vmatmul.mubr.msk.f32.gmra.mrb[112].mxu0 %vm336_vm1, %v14686_v43 }
 0x518   : > { %5055 = vmatprep.mubr.f32.mxu1 %v12822_v8  ;;  %5480 = vmatprep.mubr.f32.mxu0 %v12822_v8 }
 0x519   : > { %v14772_v24 = vpop.f32.mrb[54].mxu0 }
 0x51a   : > { %v14774_v25 = vpop.f32.mrb[55].mxu0 }
 0x51b   : > { %10581 = vmatmul.mubr.msk.f32.gmra.mrb[114].mxu1 %vm336_vm1, %v4478_v2  ;;  %10643 = vmatmul.mubr.msk.f32.gmra.mrb[114].mxu0 %vm336_vm1, %v4478_v2 }
 0x51c   : > { %5061 = vmatprep.mubr.f32.mxu1 %v12822_v8  ;;  %5486 = vmatprep.mubr.f32.mxu0 %v12822_v8 }
 0x51d   : > { %v14780_v26 = vpop.f32.mrb[56].mxu0 }
 0x51e   : > { %v14782_v27 = vpop.f32.mrb[57].mxu0 }
 0x51f   : > { %10582 = vmatmul.mubr.msk.f32.gmra.mrb[116].mxu1 %vm336_vm1, %v14692_v1  ;;  %10644 = vmatmul.mubr.msk.f32.gmra.mrb[116].mxu0 %vm336_vm1, %v14692_v1 }
 0x520   : > { %5067 = vmatprep.mubr.f32.mxu1 %v12822_v8  ;;  %5492 = vmatprep.mubr.f32.mxu0 %v12822_v8 }
 0x521   : > { %v14790_v29 = vpop.f32.mrb[58].mxu0 }
 0x522   : > { %v14792_v31 = vpop.f32.mrb[59].mxu0 }
 0x523   : > { %10583 = vmatmul.mubr.msk.f32.gmra.mrb[118].mxu1 %vm336_vm1, %v14700_v4  ;;  %10645 = vmatmul.mubr.msk.f32.gmra.mrb[118].mxu0 %vm336_vm1, %v14700_v4  ;;  %v5962_v4 = vld [vmem:[#allocation3] sm:$0xff] }
 0x524   : > { %5073 = vmatprep.mubr.f32.mxu1 %v12822_v8  ;;  %5498 = vmatprep.mubr.f32.mxu0 %v12822_v8 }
 0x525   : > { %v14800_v33 = vpop.f32.mrb[60].mxu0 }
 0x526   : > { %v14803_v34 = vpop.f32.mrb[61].mxu0 }
 0x527   : > { %10584 = vmatmul.mubr.msk.f32.gmra.mrb[120].mxu1 %vm336_vm1, %v14698_v3  ;;  %10646 = vmatmul.mubr.msk.f32.gmra.mrb[120].mxu0 %vm336_vm1, %v14698_v3 }
 0x528   : > { %5079 = vmatprep.mubr.f32.mxu1 %v12822_v8  ;;  %5504 = vmatprep.mubr.f32.mxu0 %v12822_v8 }
 0x529   : > { %v14812_v35 = vpop.f32.mrb[62].mxu0 }
 0x52a   : > { %v14814_v36 = vpop.f32.mrb[63].mxu0 }
 0x52b   : > { %10585 = vmatmul.mubr.msk.f32.gmra.mrb[122].mxu1 %vm336_vm1, %v14708_v9  ;;  %10647 = vmatmul.mubr.msk.f32.gmra.mrb[122].mxu0 %vm336_vm1, %v14708_v9 }
 0x52c   : > { %5085 = vmatprep.mubr.f32.mxu1 %v12822_v8  ;;  %5510 = vmatprep.mubr.f32.mxu0 %v12822_v8 }
 0x52d   : > { %v14822_v37 = vpop.f32.mrb[64].mxu0 }
 0x52e   : > { %v14824_v38 = vpop.f32.mrb[65].mxu0 }
 0x52f   : > { %10586 = vmatmul.mubr.msk.f32.gmra.mrb[124].mxu1 %vm336_vm1, %v14706_v5  ;;  %10648 = vmatmul.mubr.msk.f32.gmra.mrb[124].mxu0 %vm336_vm1, %v14706_v5 }
 0x530   : > { %5091 = vmatprep.mubr.f32.mxu1 %v12822_v8  ;;  %5516 = vmatprep.mubr.f32.mxu0 %v12822_v8 }
 0x531   : > { %v14832_v39 = vpop.f32.mrb[66].mxu0 }
 0x532   : > { %v14834_v40 = vpop.f32.mrb[67].mxu0 }
 0x533   : > { %10587 = vmatmul.mubr.msk.f32.gmra.mrb[126].mxu1 %vm336_vm1, %v14716_v11  ;;  %10649 = vmatmul.mubr.msk.f32.gmra.mrb[126].mxu0 %vm336_vm1, %v14716_v11 }
 0x534   : > { %5097 = vmatprep.mubr.f32.mxu1 %v12822_v8  ;;  %5522 = vmatprep.mubr.f32.mxu0 %v12822_v8 }
 0x535   : > { %v14842_v41 = vpop.f32.mrb[68].mxu0 }
 0x536   : > { %v14844_v6 = vpop.f32.mrb[69].mxu0 }
 0x537   : > { %10588 = vmatmul.mubr.msk.f32.gmra.mrb[128].mxu1 %vm336_vm1, %v14714_v10  ;;  %10650 = vmatmul.mubr.msk.f32.gmra.mrb[128].mxu0 %vm336_vm1, %v14714_v10 }
 0x538   : > { %5103 = vmatprep.mubr.f32.mxu1 %v12822_v8  ;;  %5528 = vmatprep.mubr.f32.mxu0 %v12822_v8 }
 0x539   : > { %v14852_v42 = vpop.f32.mrb[70].mxu0 }
 0x53a   : > { %v14854_v44 = vpop.f32.mrb[71].mxu0 }
 0x53b   : > { %10589 = vmatmul.mubr.msk.f32.gmra.mrb[130].mxu1 %vm336_vm1, %v14724_v13  ;;  %10651 = vmatmul.mubr.msk.f32.gmra.mrb[130].mxu0 %vm336_vm1, %v14724_v13  ;;  %v5964_v13 = vld [vmem:[#allocation3 + $0x10] sm:$0xff] }
 0x53c   : > { %5109 = vmatprep.mubr.f32.mxu1 %v12822_v8  ;;  %5534 = vmatprep.mubr.f32.mxu0 %v12822_v8 }
 0x53d   : > { %v14862_v45 = vpop.f32.mrb[72].mxu0 }
 0x53e   : > { %v14864_v46 = vpop.f32.mrb[73].mxu0 }
 0x53f   : > { %10590 = vmatmul.mubr.msk.f32.gmra.mrb[132].mxu1 %vm336_vm1, %v14722_v12  ;;  %10652 = vmatmul.mubr.msk.f32.gmra.mrb[132].mxu0 %vm336_vm1, %v14722_v12  ;;  %v5963_v12 = vld [vmem:[#allocation3 + $0x8] sm:$0xff] }
 0x540   : > { %5115 = vmatprep.mubr.f32.mxu1 %v12822_v8  ;;  %5540 = vmatprep.mubr.f32.mxu0 %v12822_v8 }
 0x543   : > { %10591 = vmatmul.mubr.msk.f32.gmra.mrb[134].mxu1 %vm336_vm1, %v14732_v15  ;;  %10653 = vmatmul.mubr.msk.f32.gmra.mrb[134].mxu0 %vm336_vm1, %v14732_v15 }
 0x544   : > { %5121 = vmatprep.mubr.f32.mxu1 %v12822_v8  ;;  %5546 = vmatprep.mubr.f32.mxu0 %v12822_v8 }
 0x547   : > { %10592 = vmatmul.mubr.msk.f32.gmra.mrb[136].mxu1 %vm336_vm1, %v14730_v14  ;;  %10654 = vmatmul.mubr.msk.f32.gmra.mrb[136].mxu0 %vm336_vm1, %v14730_v14 }
 0x548   : > { %5127 = vmatprep.mubr.f32.mxu1 %v12822_v8  ;;  %5552 = vmatprep.mubr.f32.mxu0 %v12822_v8 }
 0x54b   : > { %10593 = vmatmul.mubr.msk.f32.gmra.mrb[138].mxu1 %vm336_vm1, %v14740_v17  ;;  %10655 = vmatmul.mubr.msk.f32.gmra.mrb[138].mxu0 %vm336_vm1, %v14740_v17 }
 0x54c   : > { %5133 = vmatprep.mubr.f32.mxu1 %v12822_v8  ;;  %5558 = vmatprep.mubr.f32.mxu0 %v12822_v8 }
 0x54f   : > { %10594 = vmatmul.mubr.msk.f32.gmra.mrb[140].mxu1 %vm336_vm1, %v14738_v16  ;;  %10656 = vmatmul.mubr.msk.f32.gmra.mrb[140].mxu0 %vm336_vm1, %v14738_v16 }
 0x550   : > { %5139 = vmatprep.mubr.f32.mxu1 %v12822_v8  ;;  %5564 = vmatprep.mubr.f32.mxu0 %v12822_v8 }
 0x553   : > { %10595 = vmatmul.mubr.msk.f32.gmra.mrb[142].mxu1 %vm336_vm1, %v14748_v19  ;;  %10657 = vmatmul.mubr.msk.f32.gmra.mrb[142].mxu0 %vm336_vm1, %v14748_v19  ;;  %v5966_v19 = vld [vmem:[#allocation3 + $0x20] sm:$0xff] }
 0x554   : > { %5145 = vmatprep.mubr.f32.mxu1 %v12822_v8  ;;  %5570 = vmatprep.mubr.f32.mxu0 %v12822_v8 }
 0x557   : > { %10596 = vmatmul.mubr.msk.f32.gmra.mrb[144].mxu1 %vm336_vm1, %v14746_v18  ;;  %10658 = vmatmul.mubr.msk.f32.gmra.mrb[144].mxu0 %vm336_vm1, %v14746_v18  ;;  %v5965_v18 = vld [vmem:[#allocation3 + $0x18] sm:$0xff] }
 0x558   : > { %5151 = vmatprep.mubr.f32.mxu1 %v12822_v8  ;;  %5576 = vmatprep.mubr.f32.mxu0 %v12822_v8 }
 0x55b   : > { %10597 = vmatmul.mubr.msk.f32.gmra.mrb[146].mxu1 %vm336_vm1, %v14756_v21  ;;  %10659 = vmatmul.mubr.msk.f32.gmra.mrb[146].mxu0 %vm336_vm1, %v14756_v21 }
 0x55c   : > { %5157 = vmatprep.mubr.f32.mxu1 %v12822_v8  ;;  %5582 = vmatprep.mubr.f32.mxu0 %v12822_v8 }
 0x55f   : > { %10598 = vmatmul.mubr.msk.f32.gmra.mrb[148].mxu1 %vm336_vm1, %v14754_v20  ;;  %10660 = vmatmul.mubr.msk.f32.gmra.mrb[148].mxu0 %vm336_vm1, %v14754_v20 }
 0x560   : > { %5163 = vmatprep.mubr.f32.mxu1 %v12822_v8  ;;  %5588 = vmatprep.mubr.f32.mxu0 %v12822_v8 }
 0x563   : > { %10599 = vmatmul.mubr.msk.f32.gmra.mrb[150].mxu1 %vm336_vm1, %v14764_v23  ;;  %10661 = vmatmul.mubr.msk.f32.gmra.mrb[150].mxu0 %vm336_vm1, %v14764_v23 }
 0x564   : > { %5169 = vmatprep.mubr.f32.mxu1 %v12822_v8  ;;  %5594 = vmatprep.mubr.f32.mxu0 %v12822_v8 }
 0x567   : > { %10600 = vmatmul.mubr.msk.f32.gmra.mrb[152].mxu1 %vm336_vm1, %v14762_v22  ;;  %10662 = vmatmul.mubr.msk.f32.gmra.mrb[152].mxu0 %vm336_vm1, %v14762_v22 }
 0x568   : > { %5175 = vmatprep.mubr.f32.mxu1 %v12822_v8  ;;  %5600 = vmatprep.mubr.f32.mxu0 %v12822_v8 }
 0x56b   : > { %10601 = vmatmul.mubr.msk.f32.gmra.mrb[154].mxu1 %vm336_vm1, %v14774_v25  ;;  %10663 = vmatmul.mubr.msk.f32.gmra.mrb[154].mxu0 %vm336_vm1, %v14774_v25  ;;  %v5968_v25 = vld [vmem:[#allocation3 + $0x30] sm:$0xff] }
 0x56c   : > { %5181 = vmatprep.mubr.f32.mxu1 %v12822_v8  ;;  %5606 = vmatprep.mubr.f32.mxu0 %v12822_v8 }
 0x56f   : > { %10602 = vmatmul.mubr.msk.f32.gmra.mrb[156].mxu1 %vm336_vm1, %v14772_v24  ;;  %10664 = vmatmul.mubr.msk.f32.gmra.mrb[156].mxu0 %vm336_vm1, %v14772_v24  ;;  %v5967_v24 = vld [vmem:[#allocation3 + $0x28] sm:$0xff] }
 0x570   : > { %5187 = vmatprep.mubr.f32.mxu1 %v12822_v8  ;;  %5612 = vmatprep.mubr.f32.mxu0 %v12822_v8 }
 0x573   : > { %10603 = vmatmul.mubr.msk.f32.gmra.mrb[158].mxu1 %vm336_vm1, %v14782_v27  ;;  %10665 = vmatmul.mubr.msk.f32.gmra.mrb[158].mxu0 %vm336_vm1, %v14782_v27 }
 0x574   : > { %5193 = vmatprep.mubr.f32.mxu1 %v12822_v8  ;;  %5618 = vmatprep.mubr.f32.mxu0 %v12822_v8 }
 0x577   : > { %10604 = vmatmul.mubr.msk.f32.gmra.mrb[160].mxu1 %vm336_vm1, %v14780_v26  ;;  %10666 = vmatmul.mubr.msk.f32.gmra.mrb[160].mxu0 %vm336_vm1, %v14780_v26 }
 0x578   : > { %5199 = vmatprep.mubr.f32.mxu1 %v12822_v8  ;;  %5624 = vmatprep.mubr.f32.mxu0 %v12822_v8 }
 0x57b   : > { %10605 = vmatmul.mubr.msk.f32.gmra.mrb[162].mxu1 %vm336_vm1, %v14792_v31  ;;  %10667 = vmatmul.mubr.msk.f32.gmra.mrb[162].mxu0 %vm336_vm1, %v14792_v31  ;;  %v5970_v31 = vld [vmem:[#allocation3 + $0x40] sm:$0xff] }
 0x57c   : > { %5205 = vmatprep.mubr.f32.mxu1 %v12822_v8  ;;  %5630 = vmatprep.mubr.f32.mxu0 %v12822_v8 }
 0x57f   : > { %10606 = vmatmul.mubr.msk.f32.gmra.mrb[164].mxu1 %vm336_vm1, %v14790_v29  ;;  %10668 = vmatmul.mubr.msk.f32.gmra.mrb[164].mxu0 %vm336_vm1, %v14790_v29 }
 0x580   : > { %5211 = vmatprep.mubr.f32.mxu1 %v12822_v8  ;;  %5636 = vmatprep.mubr.f32.mxu0 %v12822_v8 }
 0x583   : > { %10607 = vmatmul.mubr.msk.f32.gmra.mrb[166].mxu1 %vm336_vm1, %v14803_v34  ;;  %10669 = vmatmul.mubr.msk.f32.gmra.mrb[166].mxu0 %vm336_vm1, %v14803_v34 }
 0x584   : > { %5217 = vmatprep.mubr.f32.mxu1 %v12822_v8  ;;  %5642 = vmatprep.mubr.f32.mxu0 %v12822_v8 }
 0x587   : > { %10608 = vmatmul.mubr.msk.f32.gmra.mrb[168].mxu1 %vm336_vm1, %v14800_v33  ;;  %10670 = vmatmul.mubr.msk.f32.gmra.mrb[168].mxu0 %vm336_vm1, %v14800_v33 }
 0x588   : > { %5223 = vmatprep.mubr.f32.mxu1 %v12822_v8  ;;  %5648 = vmatprep.mubr.f32.mxu0 %v12822_v8 }
 0x58b   : > { %10609 = vmatmul.mubr.msk.f32.gmra.mrb[170].mxu1 %vm336_vm1, %v14814_v36  ;;  %10671 = vmatmul.mubr.msk.f32.gmra.mrb[170].mxu0 %vm336_vm1, %v14814_v36 }
 0x58c   : > { %5229 = vmatprep.mubr.f32.mxu1 %v12822_v8  ;;  %5654 = vmatprep.mubr.f32.mxu0 %v12822_v8 }
 0x58f   : > { %10610 = vmatmul.mubr.msk.f32.gmra.mrb[172].mxu1 %vm336_vm1, %v14812_v35  ;;  %10672 = vmatmul.mubr.msk.f32.gmra.mrb[172].mxu0 %vm336_vm1, %v14812_v35 }
 0x590   : > { %5235 = vmatprep.mubr.f32.mxu1 %v12822_v8  ;;  %5660 = vmatprep.mubr.f32.mxu0 %v12822_v8 }
 0x593   : > { %10611 = vmatmul.mubr.msk.f32.gmra.mrb[174].mxu1 %vm336_vm1, %v14824_v38  ;;  %10673 = vmatmul.mubr.msk.f32.gmra.mrb[174].mxu0 %vm336_vm1, %v14824_v38  ;;  %v5972_v38 = vld [vmem:[#allocation3 + $0x50] sm:$0xff] }
 0x594   : > { %5241 = vmatprep.mubr.f32.mxu1 %v12822_v8  ;;  %5666 = vmatprep.mubr.f32.mxu0 %v12822_v8 }
 0x597   : > { %10612 = vmatmul.mubr.msk.f32.gmra.mrb[176].mxu1 %vm336_vm1, %v14822_v37  ;;  %10674 = vmatmul.mubr.msk.f32.gmra.mrb[176].mxu0 %vm336_vm1, %v14822_v37  ;;  %v5971_v37 = vld [vmem:[#allocation3 + $0x48] sm:$0xff] }
 0x598   : > { %5247 = vmatprep.mubr.f32.mxu1 %v12822_v8  ;;  %5672 = vmatprep.mubr.f32.mxu0 %v12822_v8 }
 0x59b   : > { %10613 = vmatmul.mubr.msk.f32.gmra.mrb[178].mxu1 %vm336_vm1, %v14834_v40  ;;  %10675 = vmatmul.mubr.msk.f32.gmra.mrb[178].mxu0 %vm336_vm1, %v14834_v40 }
 0x59c   : > { %5253 = vmatprep.mubr.f32.mxu1 %v12822_v8  ;;  %5678 = vmatprep.mubr.f32.mxu0 %v12822_v8 }
 0x59e   : > { %v4937_v7 = vpop.f32.mrb[74].mxu1  ;;  %v5362_v47 = vpop.f32.mrb[74].mxu0 }
 0x59f   : > { %10683 = vst [vmem:[%s13464_s5 + $0xf00] sm:$0xff] %v4937_v7  ;;  %10685 = vst [vmem:[%s13464_s5 + $0xf10] sm:$0xff] %v5362_v47  ;;  %v4939_v48 = vpop.f32.mrb[75].mxu1  ;;  %10614 = vmatmul.mubr.msk.f32.gmra.mrb[180].mxu1 %vm336_vm1, %v14832_v39  ;;  %v5364_v49 = vpop.f32.mrb[75].mxu0  ;;  %10676 = vmatmul.mubr.msk.f32.gmra.mrb[180].mxu0 %vm336_vm1, %v14832_v39 }
 0x5a0   : > { %10684 = vst [vmem:[%s13464_s5 + $0xf08] sm:$0xff] %v4939_v48  ;;  %10686 = vst.msk [vmem:[%s13464_s5 + $0xf18] sm:$0xff] %vm1933_vm2, %v5364_v49  ;;  %5259 = vmatprep.mubr.f32.mxu1 %v12822_v8  ;;  %5684 = vmatprep.mubr.f32.mxu0 %v12822_v8  ;;  %v5975_v48 = vld [vmem:[#allocation3 + $0x68] sm:$0xff]  ;;  %v5976_v49 = vld [vmem:[#allocation3 + $0x70] sm:$0xff] }
 0x5a2   : > { %v4943_v50 = vpop.f32.mrb[76].mxu1  ;;  %v5368_v51 = vpop.f32.mrb[76].mxu0 }
 0x5a3   : > { %10687 = vst [vmem:[%s13464_s5 + $0xf20] sm:$0xff] %v4943_v50  ;;  %10689 = vst [vmem:[%s13464_s5 + $0xf30] sm:$0xff] %v5368_v51  ;;  %v4945_v52 = vpop.f32.mrb[77].mxu1  ;;  %10615 = vmatmul.mubr.msk.f32.gmra.mrb[182].mxu1 %vm336_vm1, %v14844_v6  ;;  %v5370_v32 = vpop.f32.mrb[77].mxu0  ;;  %10677 = vmatmul.mubr.msk.f32.gmra.mrb[182].mxu0 %vm336_vm1, %v14844_v6 }
 0x5a4   : > { %10688 = vst [vmem:[%s13464_s5 + $0xf28] sm:$0xff] %v4945_v52  ;;  %10690 = vst.msk [vmem:[%s13464_s5 + $0xf38] sm:$0xff] %vm1933_vm2, %v5370_v32  ;;  %5265 = vmatprep.mubr.f32.mxu1 %v12822_v8  ;;  %5690 = vmatprep.mubr.f32.mxu0 %v12822_v8 }
 0x5a6   : > { %v4949_v53 = vpop.f32.mrb[78].mxu1  ;;  %v5374_v54 = vpop.f32.mrb[78].mxu0 }
 0x5a7   : > { %10691 = vst [vmem:[%s13464_s5 + $0xf40] sm:$0xff] %v4949_v53  ;;  %10693 = vst [vmem:[%s13464_s5 + $0xf50] sm:$0xff] %v5374_v54  ;;  %v4951_v55 = vpop.f32.mrb[79].mxu1  ;;  %10616 = vmatmul.mubr.msk.f32.gmra.mrb[184].mxu1 %vm336_vm1, %v14842_v41  ;;  %v5376_v56 = vpop.f32.mrb[79].mxu0  ;;  %10678 = vmatmul.mubr.msk.f32.gmra.mrb[184].mxu0 %vm336_vm1, %v14842_v41  ;;  %v5977_v53 = vld [vmem:[#allocation3 + $0x78] sm:$0xff]  ;;  %v5978_v54 = vld [vmem:[#allocation3 + $0x80] sm:$0xff] }
 0x5a8   : > { %10692 = vst [vmem:[%s13464_s5 + $0xf48] sm:$0xff] %v4951_v55  ;;  %10694 = vst.msk [vmem:[%s13464_s5 + $0xf58] sm:$0xff] %vm1933_vm2, %v5376_v56  ;;  %5271 = vmatprep.mubr.f32.mxu1 %v12822_v8  ;;  %5696 = vmatprep.mubr.f32.mxu0 %v12822_v8 }
 0x5aa   : > { %v4955_v57 = vpop.f32.mrb[80].mxu1  ;;  %v5380_v58 = vpop.f32.mrb[80].mxu0 }
 0x5ab   : > { %10695 = vst [vmem:[%s13464_s5 + $0xf60] sm:$0xff] %v4955_v57  ;;  %10697 = vst [vmem:[%s13464_s5 + $0xf70] sm:$0xff] %v5380_v58  ;;  %v4957_v59 = vpop.f32.mrb[81].mxu1  ;;  %10617 = vmatmul.mubr.msk.f32.gmra.mrb[186].mxu1 %vm336_vm1, %v14854_v44  ;;  %v5382_v60 = vpop.f32.mrb[81].mxu0  ;;  %10679 = vmatmul.mubr.msk.f32.gmra.mrb[186].mxu0 %vm336_vm1, %v14854_v44  ;;  %v5974_v44 = vld [vmem:[#allocation3 + $0x60] sm:$0xff] }
 0x5ac   : > { %10696 = vst [vmem:[%s13464_s5 + $0xf68] sm:$0xff] %v4957_v59  ;;  %10698 = vst.msk [vmem:[%s13464_s5 + $0xf78] sm:$0xff] %vm1933_vm2, %v5382_v60  ;;  %5277 = vmatprep.mubr.f32.mxu1 %v12822_v8  ;;  %5702 = vmatprep.mubr.f32.mxu0 %v12822_v8  ;;  %v5979_v59 = vld [vmem:[#allocation3 + $0x88] sm:$0xff]  ;;  %v5980_v60 = vld [vmem:[#allocation3 + $0x90] sm:$0xff] }
 0x5ae   : > { %v4961_v61 = vpop.f32.mrb[82].mxu1  ;;  %v5386_v62 = vpop.f32.mrb[82].mxu0 }
 0x5af   : > { %10699 = vst [vmem:[%s13464_s5 + $0xf80] sm:$0xff] %v4961_v61  ;;  %10701 = vst [vmem:[%s13464_s5 + $0xf90] sm:$0xff] %v5386_v62  ;;  %v4963_v63 = vpop.f32.mrb[83].mxu1  ;;  %10618 = vmatmul.mubr.msk.f32.gmra.mrb[188].mxu1 %vm336_vm1, %v14852_v42  ;;  %v5388_v43 = vpop.f32.mrb[83].mxu0  ;;  %10680 = vmatmul.mubr.msk.f32.gmra.mrb[188].mxu0 %vm336_vm1, %v14852_v42  ;;  %v5973_v42 = vld [vmem:[#allocation3 + $0x58] sm:$0xff] }
 0x5b0   : > { %10700 = vst [vmem:[%s13464_s5 + $0xf88] sm:$0xff] %v4963_v63  ;;  %10702 = vst.msk [vmem:[%s13464_s5 + $0xf98] sm:$0xff] %vm1933_vm2, %v5388_v43  ;;  %5283 = vmatprep.mubr.f32.mxu1 %v12822_v8  ;;  %5708 = vmatprep.mubr.f32.mxu0 %v12822_v8 }
 0x5b2   : > { %v4967_v0 = vpop.f32.mrb[84].mxu1  ;;  %v5392_v1 = vpop.f32.mrb[84].mxu0 }
 0x5b3   : > { %10703 = vst [vmem:[%s13464_s5 + $0xfa0] sm:$0xff] %v4967_v0  ;;  %10705 = vst [vmem:[%s13464_s5 + $0xfb0] sm:$0xff] %v5392_v1  ;;  %v4969_v2 = vpop.f32.mrb[85].mxu1  ;;  %10619 = vmatmul.mubr.msk.f32.gmra.mrb[190].mxu1 %vm336_vm1, %v14864_v46  ;;  %v5394_v3 = vpop.f32.mrb[85].mxu0  ;;  %10681 = vmatmul.mubr.msk.f32.gmra.mrb[190].mxu0 %vm336_vm1, %v14864_v46  ;;  %v5981_v0 = vld [vmem:[#allocation3 + $0x98] sm:$0xff]  ;;  %v5982_v1 = vld [vmem:[#allocation3 + $0xa0] sm:$0xff] }
 0x5b4   : > { %10704 = vst [vmem:[%s13464_s5 + $0xfa8] sm:$0xff] %v4969_v2  ;;  %10706 = vst.msk [vmem:[%s13464_s5 + $0xfb8] sm:$0xff] %vm1933_vm2, %v5394_v3  ;;  %5289 = vmatprep.mubr.f32.mxu1 %v12822_v8  ;;  %5714 = vmatprep.mubr.f32.mxu0 %v12822_v8 }
 0x5b6   : > { %v4973_v5 = vpop.f32.mrb[86].mxu1  ;;  %v5398_v9 = vpop.f32.mrb[86].mxu0 }
 0x5b7   : > { %10707 = vst [vmem:[%s13464_s5 + $0xfc0] sm:$0xff] %v4973_v5  ;;  %10709 = vst [vmem:[%s13464_s5 + $0xfd0] sm:$0xff] %v5398_v9  ;;  %v4975_v10 = vpop.f32.mrb[87].mxu1  ;;  %10620 = vmatmul.mubr.msk.f32.gmra.mrb[192].mxu1 %vm336_vm1, %v14862_v45  ;;  %v5400_v11 = vpop.f32.mrb[87].mxu0  ;;  %10682 = vmatmul.mubr.msk.f32.gmra.mrb[192].mxu0 %vm336_vm1, %v14862_v45  ;;  %v5983_v9 = vld [vmem:[#allocation3 + $0xa8] sm:$0xff] }
 0x5b8   : > { %10708 = vst [vmem:[%s13464_s5 + $0xfc8] sm:$0xff] %v4975_v10  ;;  %10710 = vst.msk [vmem:[%s13464_s5 + $0xfd8] sm:$0xff] %vm1933_vm2, %v5400_v11  ;;  %12362 = vmatprep.mubr.msk.f32.mxu1 %vm336_vm1, %v5962_v4  ;;  %6830 = vmatprep.mubr.f32.mxu0 %v12822_v8  ;;  %v5984_v10 = vld [vmem:[#allocation3 + $0xb0] sm:$0xff] }
 0x5ba   : > { %v4979_v14 = vpop.f32.mrb[88].mxu1  ;;  %v5404_v15 = vpop.f32.mrb[88].mxu0 }
 0x5bb   : > { %10711 = vst [vmem:[%s13464_s5 + $0xfe0] sm:$0xff] %v4979_v14  ;;  %10713 = vst [vmem:[%s13464_s5 + $0xff0] sm:$0xff] %v5404_v15  ;;  %v4981_v16 = vpop.f32.mrb[89].mxu1  ;;  %v5406_v17 = vpop.f32.mrb[89].mxu0  ;;  %12363 = vmatmul.mubr.msk.f32.vlgmr.msra.gmra.mrb[194].mxu1 %vm336_vm1, %v5963_v12  ;;  %v5985_v15 = vld [vmem:[#allocation3 + $0xb8] sm:$0xff] }
 0x5bc   : > { %10712 = vst [vmem:[%s13464_s5 + $0xfe8] sm:$0xff] %v4981_v16  ;;  %10714 = vst.msk [vmem:[%s13464_s5 + $0xff8] sm:$0xff] %vm1933_vm2, %v5406_v17  ;;  %12365 = vmatprep.mubr.msk.f32.mxu1 %vm336_vm1, %v5964_v13  ;;  %v5986_v16 = vld [vmem:[#allocation3 + $0xc0] sm:$0xff] }
 0x5be   : > { %v4985_v20 = vpop.f32.mrb[90].mxu1  ;;  %v5410_v21 = vpop.f32.mrb[90].mxu0 }
 0x5bf   : > { %10715 = vst [vmem:[%s13464_s5 + $0x1000] sm:$0xff] %v4985_v20  ;;  %10717 = vst [vmem:[%s13464_s5 + $0x1010] sm:$0xff] %v5410_v21  ;;  %v4987_v22 = vpop.f32.mrb[91].mxu1  ;;  %v5412_v23 = vpop.f32.mrb[91].mxu0  ;;  %12366 = vmatmul.mubr.msk.f32.gmra.mrb[196].mxu1 %vm336_vm1, %v5965_v18  ;;  %v5987_v21 = vld [vmem:[#allocation3 + $0xc8] sm:$0xff] }
 0x5c0   : > { %10716 = vst [vmem:[%s13464_s5 + $0x1008] sm:$0xff] %v4987_v22  ;;  %10718 = vst.msk [vmem:[%s13464_s5 + $0x1018] sm:$0xff] %vm1933_vm2, %v5412_v23  ;;  %12368 = vmatprep.mubr.msk.f32.mxu1 %vm336_vm1, %v5966_v19  ;;  %v5988_v22 = vld [vmem:[#allocation3 + $0xd0] sm:$0xff] }
 0x5c2   : > { %v4991_v26 = vpop.f32.mrb[92].mxu1  ;;  %v5416_v27 = vpop.f32.mrb[92].mxu0 }
 0x5c3   : > { %10719 = vst [vmem:[%s13464_s5 + $0x1020] sm:$0xff] %v4991_v26  ;;  %10721 = vst [vmem:[%s13464_s5 + $0x1030] sm:$0xff] %v5416_v27  ;;  %v4993_v28 = vpop.f32.mrb[93].mxu1  ;;  %v5418_v29 = vpop.f32.mrb[93].mxu0  ;;  %12369 = vmatmul.mubr.msk.f32.gmra.mrb[198].mxu1 %vm336_vm1, %v5967_v24  ;;  %v5989_v27 = vld [vmem:[#allocation3 + $0xd8] sm:$0xff] }
 0x5c4   : > { %10720 = vst [vmem:[%s13464_s5 + $0x1028] sm:$0xff] %v4993_v28  ;;  %10722 = vst.msk [vmem:[%s13464_s5 + $0x1038] sm:$0xff] %vm1933_vm2, %v5418_v29  ;;  %12371 = vmatprep.mubr.msk.f32.mxu1 %vm336_vm1, %v5968_v25  ;;  %v5990_v28 = vld [vmem:[#allocation3 + $0xe0] sm:$0xff] }
 0x5c6   : > { %v4997_v33 = vpop.f32.mrb[94].mxu1  ;;  %v5422_v34 = vpop.f32.mrb[94].mxu0 }
 0x5c7   : > { %10723 = vst [vmem:[%s13464_s5 + $0x1040] sm:$0xff] %v4997_v33  ;;  %10725 = vst [vmem:[%s13464_s5 + $0x1050] sm:$0xff] %v5422_v34  ;;  %v4999_v35 = vpop.f32.mrb[95].mxu1  ;;  %v5424_v36 = vpop.f32.mrb[95].mxu0  ;;  %12372 = vmatmul.mubr.msk.f32.gmra.mrb[200].mxu1 %vm336_vm1, %v5969_v30  ;;  %v5991_v34 = vld [vmem:[#allocation3 + $0xe8] sm:$0xff] }
 0x5c8   : > { %10724 = vst [vmem:[%s13464_s5 + $0x1048] sm:$0xff] %v4999_v35  ;;  %10726 = vst.msk [vmem:[%s13464_s5 + $0x1058] sm:$0xff] %vm1933_vm2, %v5424_v36  ;;  %12374 = vmatprep.mubr.msk.f32.mxu1 %vm336_vm1, %v5970_v31  ;;  %v5992_v35 = vld [vmem:[#allocation3 + $0xf0] sm:$0xff] }
 0x5ca   : > { %v5003_v39 = vpop.f32.mrb[96].mxu1  ;;  %v5428_v40 = vpop.f32.mrb[96].mxu0 }
 0x5cb   : > { %10727 = vst [vmem:[%s13464_s5 + $0x1060] sm:$0xff] %v5003_v39  ;;  %10729 = vst [vmem:[%s13464_s5 + $0x1070] sm:$0xff] %v5428_v40  ;;  %v5005_v41 = vpop.f32.mrb[97].mxu1  ;;  %v5430_v6 = vpop.f32.mrb[97].mxu0  ;;  %12375 = vmatmul.mubr.msk.f32.gmra.mrb[202].mxu1 %vm336_vm1, %v5971_v37  ;;  %v5993_v40 = vld [vmem:[#allocation3 + $0xf8] sm:$0xff] }
 0x5cc   : > { %10728 = vst [vmem:[%s13464_s5 + $0x1068] sm:$0xff] %v5005_v41  ;;  %10730 = vst.msk [vmem:[%s13464_s5 + $0x1078] sm:$0xff] %vm1933_vm2, %v5430_v6  ;;  %12377 = vmatprep.mubr.msk.f32.mxu1 %vm336_vm1, %v5972_v38  ;;  %v5994_v41 = vld [vmem:[#allocation3 + $0x100] sm:$0xff] }
 0x5ce   : > { %v5009_v45 = vpop.f32.mrb[98].mxu1  ;;  %v5434_v46 = vpop.f32.mrb[98].mxu0 }
 0x5cf   : > { %10731 = vst [vmem:[%s13464_s5 + $0x1080] sm:$0xff] %v5009_v45  ;;  %10733 = vst [vmem:[%s13464_s5 + $0x1090] sm:$0xff] %v5434_v46  ;;  %v5011_v7 = vpop.f32.mrb[99].mxu1  ;;  %v5436_v47 = vpop.f32.mrb[99].mxu0  ;;  %12378 = vmatmul.mubr.msk.f32.gmra.mrb[204].mxu1 %vm336_vm1, %v5973_v42  ;;  %v5995_v46 = vld [vmem:[#allocation3 + $0x108] sm:$0xff] }
 0x5d0   : > { %10732 = vst [vmem:[%s13464_s5 + $0x1088] sm:$0xff] %v5011_v7  ;;  %10734 = vst.msk [vmem:[%s13464_s5 + $0x1098] sm:$0xff] %vm1933_vm2, %v5436_v47  ;;  %12380 = vmatprep.mubr.msk.f32.mxu1 %vm336_vm1, %v5974_v44  ;;  %v5996_v7 = vld [vmem:[#allocation3 + $0x110] sm:$0xff] }
 0x5d2   : > { %v5015_v50 = vpop.f32.mrb[100].mxu1  ;;  %v5440_v51 = vpop.f32.mrb[100].mxu0 }
 0x5d3   : > { %10735 = vst [vmem:[%s13464_s5 + $0x10a0] sm:$0xff] %v5015_v50  ;;  %10737 = vst [vmem:[%s13464_s5 + $0x10b0] sm:$0xff] %v5440_v51  ;;  %v5017_v52 = vpop.f32.mrb[101].mxu1  ;;  %v5442_v32 = vpop.f32.mrb[101].mxu0  ;;  %12381 = vmatmul.mubr.msk.f32.gmra.mrb[206].mxu1 %vm336_vm1, %v5975_v48  ;;  %v5997_v51 = vld [vmem:[#allocation3 + $0x118] sm:$0xff] }
 0x5d4   : > { %10736 = vst [vmem:[%s13464_s5 + $0x10a8] sm:$0xff] %v5017_v52  ;;  %10738 = vst.msk [vmem:[%s13464_s5 + $0x10b8] sm:$0xff] %vm1933_vm2, %v5442_v32  ;;  %12383 = vmatprep.mubr.msk.f32.mxu1 %vm336_vm1, %v5976_v49  ;;  %v5998_v52 = vld [vmem:[#allocation3 + $0x120] sm:$0xff] }
 0x5d6   : > { %v5021_v55 = vpop.f32.mrb[102].mxu1  ;;  %v5446_v56 = vpop.f32.mrb[102].mxu0 }
 0x5d7   : > { %10739 = vst [vmem:[%s13464_s5 + $0x10c0] sm:$0xff] %v5021_v55  ;;  %10741 = vst [vmem:[%s13464_s5 + $0x10d0] sm:$0xff] %v5446_v56  ;;  %v5023_v57 = vpop.f32.mrb[103].mxu1  ;;  %v5448_v58 = vpop.f32.mrb[103].mxu0  ;;  %12384 = vmatmul.mubr.msk.f32.gmra.mrb[208].mxu1 %vm336_vm1, %v5977_v53  ;;  %v5999_v56 = vld [vmem:[#allocation3 + $0x128] sm:$0xff] }
 0x5d8   : > { %10740 = vst [vmem:[%s13464_s5 + $0x10c8] sm:$0xff] %v5023_v57  ;;  %10742 = vst.msk [vmem:[%s13464_s5 + $0x10d8] sm:$0xff] %vm1933_vm2, %v5448_v58  ;;  %12386 = vmatprep.mubr.msk.f32.mxu1 %vm336_vm1, %v5978_v54  ;;  %v6000_v57 = vld [vmem:[#allocation3 + $0x130] sm:$0xff] }
 0x5da   : > { %v5027_v61 = vpop.f32.mrb[104].mxu1  ;;  %v5452_v62 = vpop.f32.mrb[104].mxu0 }
 0x5db   : > { %10743 = vst [vmem:[%s13464_s5 + $0x10e0] sm:$0xff] %v5027_v61  ;;  %10745 = vst [vmem:[%s13464_s5 + $0x10f0] sm:$0xff] %v5452_v62  ;;  %v5029_v63 = vpop.f32.mrb[105].mxu1  ;;  %v5454_v43 = vpop.f32.mrb[105].mxu0  ;;  %12387 = vmatmul.mubr.msk.f32.gmra.mrb[210].mxu1 %vm336_vm1, %v5979_v59  ;;  %v6001_v62 = vld [vmem:[#allocation3 + $0x138] sm:$0xff] }
 0x5dc   : > { %10744 = vst [vmem:[%s13464_s5 + $0x10e8] sm:$0xff] %v5029_v63  ;;  %10746 = vst.msk [vmem:[%s13464_s5 + $0x10f8] sm:$0xff] %vm1933_vm2, %v5454_v43  ;;  %12389 = vmatprep.mubr.msk.f32.mxu1 %vm336_vm1, %v5980_v60  ;;  %v6002_v63 = vld [vmem:[#allocation3 + $0x140] sm:$0xff] }
 0x5de   : > { %v5033_v2 = vpop.f32.mrb[106].mxu1  ;;  %v5458_v3 = vpop.f32.mrb[106].mxu0 }
 0x5df   : > { %10747 = vst [vmem:[%s13464_s5 + $0x1100] sm:$0xff] %v5033_v2  ;;  %10749 = vst [vmem:[%s13464_s5 + $0x1110] sm:$0xff] %v5458_v3  ;;  %v5035_v4 = vpop.f32.mrb[107].mxu1  ;;  %v5460_v5 = vpop.f32.mrb[107].mxu0  ;;  %12390 = vmatmul.mubr.msk.f32.gmra.mrb[212].mxu1 %vm336_vm1, %v5981_v0  ;;  %v6003_v3 = vld [vmem:[#allocation3 + $0x148] sm:$0xff] }
 0x5e0   : > { %10748 = vst [vmem:[%s13464_s5 + $0x1108] sm:$0xff] %v5035_v4  ;;  %10750 = vst.msk [vmem:[%s13464_s5 + $0x1118] sm:$0xff] %vm1933_vm2, %v5460_v5  ;;  %12392 = vmatprep.mubr.msk.f32.mxu1 %vm336_vm1, %v5982_v1  ;;  %v6004_v4 = vld [vmem:[#allocation3 + $0x150] sm:$0xff] }
 0x5e2   : > { %v5039_v11 = vpop.f32.mrb[108].mxu1  ;;  %v5464_v12 = vpop.f32.mrb[108].mxu0 }
 0x5e3   : > { %10751 = vst [vmem:[%s13464_s5 + $0x1120] sm:$0xff] %v5039_v11  ;;  %10753 = vst [vmem:[%s13464_s5 + $0x1130] sm:$0xff] %v5464_v12  ;;  %v5041_v13 = vpop.f32.mrb[109].mxu1  ;;  %v5466_v14 = vpop.f32.mrb[109].mxu0  ;;  %12393 = vmatmul.mubr.msk.f32.gmra.mrb[214].mxu1 %vm336_vm1, %v5983_v9  ;;  %v6573_v12 = vld [vmem:[#allocation6 + $0x8] sm:$0xff] }
 0x5e4   : > { %10752 = vst [vmem:[%s13464_s5 + $0x1128] sm:$0xff] %v5041_v13  ;;  %10754 = vst.msk [vmem:[%s13464_s5 + $0x1138] sm:$0xff] %vm1933_vm2, %v5466_v14  ;;  %12395 = vmatprep.mubr.msk.f32.mxu1 %vm336_vm1, %v5984_v10  ;;  %v6005_v13 = vld [vmem:[#allocation3 + $0x158] sm:$0xff]  ;;  %v6577_v14 = vcombine.high %v6573_v12, %v6573_v12 }
 0x5e6   : > { %v5045_v17 = vpop.f32.mrb[110].mxu1  ;;  %v5470_v18 = vpop.f32.mrb[110].mxu0  ;;  %11047 = vmatprep.subr.msk.mxu1 %vm517_vm0, %v6577_v14 }
 0x5e7   : > { %10755 = vst [vmem:[%s13464_s5 + $0x1140] sm:$0xff] %v5045_v17  ;;  %10757 = vst [vmem:[%s13464_s5 + $0x1150] sm:$0xff] %v5470_v18  ;;  %v5047_v19 = vpop.f32.mrb[111].mxu1  ;;  %v5472_v20 = vpop.f32.mrb[111].mxu0  ;;  %12396 = vmatmul.mubr.msk.f32.gmra.mrb[216].mxu1 %vm336_vm1, %v5985_v15  ;;  %v6006_v15 = vld [vmem:[#allocation3 + $0x160] sm:$0xff] }
 0x5e8   : > { %10756 = vst [vmem:[%s13464_s5 + $0x1148] sm:$0xff] %v5047_v19  ;;  %10758 = vst.msk [vmem:[%s13464_s5 + $0x1158] sm:$0xff] %vm1933_vm2, %v5472_v20  ;;  %12398 = vmatprep.mubr.msk.f32.mxu1 %vm336_vm1, %v5986_v16  ;;  %v15239_v20 = vld [vmem:[%s12995_s10 + $0x10] sm:$0xf]  ;;  %11048 = vmatpush1.msk.msra.mxu1 %vm517_vm0, %v6573_v12 }
 0x5e9   : > { %12452 = vmatprep.subr.msk.mxu0 %vm517_vm0, %v15239_v20 }
 0x5ea   : > { %v5051_v23 = vpop.f32.mrb[112].mxu1  ;;  %v5476_v24 = vpop.f32.mrb[112].mxu0 }
 0x5eb   : > { %10759 = vst [vmem:[%s13464_s5 + $0x1160] sm:$0xff] %v5051_v23  ;;  %10761 = vst [vmem:[%s13464_s5 + $0x1170] sm:$0xff] %v5476_v24  ;;  %v5053_v25 = vpop.f32.mrb[113].mxu1  ;;  %v5478_v26 = vpop.f32.mrb[113].mxu0  ;;  %12399 = vmatmul.mubr.msk.f32.gmra.mrb[218].mxu1 %vm336_vm1, %v5987_v21  ;;  %v6007_v21 = vld [vmem:[#allocation3 + $0x168] sm:$0xff] }
 0x5ec   : > { %10760 = vst [vmem:[%s13464_s5 + $0x1168] sm:$0xff] %v5053_v25  ;;  %10762 = vst.msk [vmem:[%s13464_s5 + $0x1178] sm:$0xff] %vm1933_vm2, %v5478_v26  ;;  %12401 = vmatprep.mubr.msk.f32.mxu1 %vm336_vm1, %v5988_v22  ;;  %v6008_v22 = vld [vmem:[#allocation3 + $0x170] sm:$0xff] }
 0x5ee   : > { %v5057_v29 = vpop.f32.mrb[114].mxu1  ;;  %v5482_v30 = vpop.f32.mrb[114].mxu0 }
 0x5ef   : > { %10763 = vst [vmem:[%s13464_s5 + $0x1180] sm:$0xff] %v5057_v29  ;;  %10765 = vst [vmem:[%s13464_s5 + $0x1190] sm:$0xff] %v5482_v30  ;;  %v5059_v31 = vpop.f32.mrb[115].mxu1  ;;  %v5484_v33 = vpop.f32.mrb[115].mxu0  ;;  %12402 = vmatmul.mubr.msk.f32.gmra.mrb[220].mxu1 %vm336_vm1, %v5989_v27  ;;  %v6009_v27 = vld [vmem:[#allocation3 + $0x178] sm:$0xff] }
 0x5f0   : > { %10764 = vst [vmem:[%s13464_s5 + $0x1188] sm:$0xff] %v5059_v31  ;;  %10766 = vst.msk [vmem:[%s13464_s5 + $0x1198] sm:$0xff] %vm1933_vm2, %v5484_v33  ;;  %12404 = vmatprep.mubr.msk.f32.mxu1 %vm336_vm1, %v5990_v28  ;;  %v6010_v28 = vld [vmem:[#allocation3 + $0x180] sm:$0xff] }
 0x5f2   : > { %v5063_v36 = vpop.f32.mrb[116].mxu1  ;;  %v5488_v37 = vpop.f32.mrb[116].mxu0 }
 0x5f3   : > { %10767 = vst [vmem:[%s13464_s5 + $0x11a0] sm:$0xff] %v5063_v36  ;;  %10769 = vst [vmem:[%s13464_s5 + $0x11b0] sm:$0xff] %v5488_v37  ;;  %v5065_v38 = vpop.f32.mrb[117].mxu1  ;;  %v5490_v39 = vpop.f32.mrb[117].mxu0  ;;  %12405 = vmatmul.mubr.msk.f32.gmra.mrb[222].mxu1 %vm336_vm1, %v5991_v34  ;;  %v6011_v34 = vld [vmem:[#allocation3 + $0x188] sm:$0xff] }
 0x5f4   : > { %10768 = vst [vmem:[%s13464_s5 + $0x11a8] sm:$0xff] %v5065_v38  ;;  %10770 = vst.msk [vmem:[%s13464_s5 + $0x11b8] sm:$0xff] %vm1933_vm2, %v5490_v39  ;;  %12407 = vmatprep.mubr.msk.f32.mxu1 %vm336_vm1, %v5992_v35  ;;  %v6012_v35 = vld [vmem:[#allocation3 + $0x190] sm:$0xff] }
 0x5f6   : > { %v5069_v6 = vpop.f32.mrb[118].mxu1  ;;  %v5494_v42 = vpop.f32.mrb[118].mxu0 }
 0x5f7   : > { %10771 = vst [vmem:[%s13464_s5 + $0x11c0] sm:$0xff] %v5069_v6  ;;  %10773 = vst [vmem:[%s13464_s5 + $0x11d0] sm:$0xff] %v5494_v42  ;;  %v5071_v44 = vpop.f32.mrb[119].mxu1  ;;  %v5496_v45 = vpop.f32.mrb[119].mxu0  ;;  %12408 = vmatmul.mubr.msk.f32.gmra.mrb[224].mxu1 %vm336_vm1, %v5993_v40  ;;  %v6013_v40 = vld [vmem:[#allocation3 + $0x198] sm:$0xff] }
 0x5f8   : > { %10772 = vst [vmem:[%s13464_s5 + $0x11c8] sm:$0xff] %v5071_v44  ;;  %10774 = vst.msk [vmem:[%s13464_s5 + $0x11d8] sm:$0xff] %vm1933_vm2, %v5496_v45  ;;  %12410 = vmatprep.mubr.msk.f32.mxu1 %vm336_vm1, %v5994_v41  ;;  %v6014_v41 = vld [vmem:[#allocation3 + $0x1a0] sm:$0xff] }
 0x5fa   : > { %v5075_v47 = vpop.f32.mrb[120].mxu1  ;;  %v5500_v48 = vpop.f32.mrb[120].mxu0 }
 0x5fb   : > { %10775 = vst [vmem:[%s13464_s5 + $0x11e0] sm:$0xff] %v5075_v47  ;;  %10777 = vst [vmem:[%s13464_s5 + $0x11f0] sm:$0xff] %v5500_v48  ;;  %v5077_v49 = vpop.f32.mrb[121].mxu1  ;;  %v5502_v50 = vpop.f32.mrb[121].mxu0  ;;  %12411 = vmatmul.mubr.msk.f32.gmra.mrb[226].mxu1 %vm336_vm1, %v5995_v46  ;;  %v6015_v46 = vld [vmem:[#allocation3 + $0x1a8] sm:$0xff] }
 0x5fc   : > { %10776 = vst [vmem:[%s13464_s5 + $0x11e8] sm:$0xff] %v5077_v49  ;;  %10778 = vst.msk [vmem:[%s13464_s5 + $0x11f8] sm:$0xff] %vm1933_vm2, %v5502_v50  ;;  %12413 = vmatprep.mubr.msk.f32.mxu1 %vm336_vm1, %v5996_v7  ;;  %v6016_v7 = vld [vmem:[#allocation3 + $0x1b0] sm:$0xff] }
 0x5fe   : > { %v5081_v32 = vpop.f32.mrb[122].mxu1  ;;  %v5506_v53 = vpop.f32.mrb[122].mxu0 }
 0x5ff   : > { %10779 = vst [vmem:[%s13464_s5 + $0x1200] sm:$0xff] %v5081_v32  ;;  %10781 = vst [vmem:[%s13464_s5 + $0x1210] sm:$0xff] %v5506_v53  ;;  %v5083_v54 = vpop.f32.mrb[123].mxu1  ;;  %v5508_v55 = vpop.f32.mrb[123].mxu0  ;;  %12414 = vmatmul.mubr.msk.f32.gmra.mrb[228].mxu1 %vm336_vm1, %v5997_v51  ;;  %v6017_v51 = vld [vmem:[#allocation3 + $0x1b8] sm:$0xff] }
 0x600   : > { %10780 = vst [vmem:[%s13464_s5 + $0x1208] sm:$0xff] %v5083_v54  ;;  %10782 = vst.msk [vmem:[%s13464_s5 + $0x1218] sm:$0xff] %vm1933_vm2, %v5508_v55  ;;  %12416 = vmatprep.mubr.msk.f32.mxu1 %vm336_vm1, %v5998_v52  ;;  %v6018_v52 = vld [vmem:[#allocation3 + $0x1c0] sm:$0xff] }
 0x602   : > { %v5087_v58 = vpop.f32.mrb[124].mxu1  ;;  %v5512_v59 = vpop.f32.mrb[124].mxu0 }
 0x603   : > { %10783 = vst [vmem:[%s13464_s5 + $0x1220] sm:$0xff] %v5087_v58  ;;  %10785 = vst [vmem:[%s13464_s5 + $0x1230] sm:$0xff] %v5512_v59  ;;  %v5089_v60 = vpop.f32.mrb[125].mxu1  ;;  %v5514_v61 = vpop.f32.mrb[125].mxu0  ;;  %12417 = vmatmul.mubr.msk.f32.gmra.mrb[230].mxu1 %vm336_vm1, %v5999_v56  ;;  %v6019_v56 = vld [vmem:[#allocation3 + $0x1c8] sm:$0xff] }
 0x604   : > { %10784 = vst [vmem:[%s13464_s5 + $0x1228] sm:$0xff] %v5089_v60  ;;  %10786 = vst.msk [vmem:[%s13464_s5 + $0x1238] sm:$0xff] %vm1933_vm2, %v5514_v61  ;;  %12419 = vmatprep.mubr.msk.f32.mxu1 %vm336_vm1, %v6000_v57  ;;  %v6020_v57 = vld [vmem:[#allocation3 + $0x1d0] sm:$0xff] }
 0x606   : > { %v5093_v43 = vpop.f32.mrb[126].mxu1  ;;  %v5518_v0 = vpop.f32.mrb[126].mxu0 }
 0x607   : > { %10787 = vst [vmem:[%s13464_s5 + $0x1240] sm:$0xff] %v5093_v43  ;;  %10789 = vst [vmem:[%s13464_s5 + $0x1250] sm:$0xff] %v5518_v0  ;;  %v5095_v1 = vpop.f32.mrb[127].mxu1  ;;  %v5520_v2 = vpop.f32.mrb[127].mxu0  ;;  %12420 = vmatmul.mubr.msk.f32.gmra.mrb[232].mxu1 %vm336_vm1, %v6001_v62  ;;  %v6021_v62 = vld [vmem:[#allocation3 + $0x1d8] sm:$0x1] }
 0x608   : > { %10788 = vst [vmem:[%s13464_s5 + $0x1248] sm:$0xff] %v5095_v1  ;;  %10790 = vst.msk [vmem:[%s13464_s5 + $0x1258] sm:$0xff] %vm1933_vm2, %v5520_v2  ;;  %12422 = vmatprep.mubr.msk.f32.mxu1 %vm336_vm1, %v6002_v63 }
 0x60a   : > { %v5099_v5 = vpop.f32.mrb[128].mxu1  ;;  %v5524_v9 = vpop.f32.mrb[128].mxu0 }
 0x60b   : > { %10791 = vst [vmem:[%s13464_s5 + $0x1260] sm:$0xff] %v5099_v5  ;;  %10793 = vst [vmem:[%s13464_s5 + $0x1270] sm:$0xff] %v5524_v9  ;;  %v5101_v10 = vpop.f32.mrb[129].mxu1  ;;  %v5526_v11 = vpop.f32.mrb[129].mxu0  ;;  %12423 = vmatmul.mubr.msk.f32.gmra.mrb[234].mxu1 %vm336_vm1, %v6003_v3 }
 0x60c   : > { %10792 = vst [vmem:[%s13464_s5 + $0x1268] sm:$0xff] %v5101_v10  ;;  %10794 = vst.msk [vmem:[%s13464_s5 + $0x1278] sm:$0xff] %vm1933_vm2, %v5526_v11  ;;  %12425 = vmatprep.mubr.msk.f32.mxu1 %vm336_vm1, %v6004_v4 }
 0x60e   : > { %v5105_v16 = vpop.f32.mrb[130].mxu1  ;;  %v5530_v17 = vpop.f32.mrb[130].mxu0 }
 0x60f   : > { %10795 = vst [vmem:[%s13464_s5 + $0x1280] sm:$0xff] %v5105_v16  ;;  %10797 = vst [vmem:[%s13464_s5 + $0x1290] sm:$0xff] %v5530_v17  ;;  %v5107_v18 = vpop.f32.mrb[131].mxu1  ;;  %v5532_v19 = vpop.f32.mrb[131].mxu0  ;;  %12426 = vmatmul.mubr.msk.f32.gmra.mrb[236].mxu1 %vm336_vm1, %v6005_v13 }
 0x610   : > { %10796 = vst [vmem:[%s13464_s5 + $0x1288] sm:$0xff] %v5107_v18  ;;  %10798 = vst.msk [vmem:[%s13464_s5 + $0x1298] sm:$0xff] %vm1933_vm2, %v5532_v19  ;;  %12428 = vmatprep.mubr.msk.f32.mxu1 %vm336_vm1, %v6006_v15 }
 0x612   : > { %v5111_v23 = vpop.f32.mrb[132].mxu1  ;;  %v5536_v24 = vpop.f32.mrb[132].mxu0 }
 0x613   : > { %10799 = vst [vmem:[%s13464_s5 + $0x12a0] sm:$0xff] %v5111_v23  ;;  %10801 = vst [vmem:[%s13464_s5 + $0x12b0] sm:$0xff] %v5536_v24  ;;  %v5113_v25 = vpop.f32.mrb[133].mxu1  ;;  %v5538_v26 = vpop.f32.mrb[133].mxu0  ;;  %12429 = vmatmul.mubr.msk.f32.gmra.mrb[238].mxu1 %vm336_vm1, %v6007_v21 }
 0x614   : > { %10800 = vst [vmem:[%s13464_s5 + $0x12a8] sm:$0xff] %v5113_v25  ;;  %10802 = vst.msk [vmem:[%s13464_s5 + $0x12b8] sm:$0xff] %vm1933_vm2, %v5538_v26  ;;  %12431 = vmatprep.mubr.msk.f32.mxu1 %vm336_vm1, %v6008_v22 }
 0x616   : > { %v5117_v29 = vpop.f32.mrb[134].mxu1  ;;  %v5542_v30 = vpop.f32.mrb[134].mxu0 }
 0x617   : > { %10803 = vst [vmem:[%s13464_s5 + $0x12c0] sm:$0xff] %v5117_v29  ;;  %10805 = vst [vmem:[%s13464_s5 + $0x12d0] sm:$0xff] %v5542_v30  ;;  %v5119_v31 = vpop.f32.mrb[135].mxu1  ;;  %v5544_v33 = vpop.f32.mrb[135].mxu0  ;;  %12432 = vmatmul.mubr.msk.f32.gmra.mrb[240].mxu1 %vm336_vm1, %v6009_v27 }
 0x618   : > { %10804 = vst [vmem:[%s13464_s5 + $0x12c8] sm:$0xff] %v5119_v31  ;;  %10806 = vst.msk [vmem:[%s13464_s5 + $0x12d8] sm:$0xff] %vm1933_vm2, %v5544_v33  ;;  %12434 = vmatprep.mubr.msk.f32.mxu1 %vm336_vm1, %v6010_v28 }
 0x61a   : > { %v5123_v36 = vpop.f32.mrb[136].mxu1  ;;  %v5548_v37 = vpop.f32.mrb[136].mxu0 }
 0x61b   : > { %10807 = vst [vmem:[%s13464_s5 + $0x12e0] sm:$0xff] %v5123_v36  ;;  %10809 = vst [vmem:[%s13464_s5 + $0x12f0] sm:$0xff] %v5548_v37  ;;  %v5125_v38 = vpop.f32.mrb[137].mxu1  ;;  %v5550_v39 = vpop.f32.mrb[137].mxu0  ;;  %12435 = vmatmul.mubr.msk.f32.gmra.mrb[242].mxu1 %vm336_vm1, %v6011_v34 }
 0x61c   : > { %10808 = vst [vmem:[%s13464_s5 + $0x12e8] sm:$0xff] %v5125_v38  ;;  %10810 = vst.msk [vmem:[%s13464_s5 + $0x12f8] sm:$0xff] %vm1933_vm2, %v5550_v39  ;;  %12437 = vmatprep.mubr.msk.f32.mxu1 %vm336_vm1, %v6012_v35 }
 0x61e   : > { %v5129_v6 = vpop.f32.mrb[138].mxu1  ;;  %v5554_v42 = vpop.f32.mrb[138].mxu0 }
 0x61f   : > { %10811 = vst [vmem:[%s13464_s5 + $0x1300] sm:$0xff] %v5129_v6  ;;  %10813 = vst [vmem:[%s13464_s5 + $0x1310] sm:$0xff] %v5554_v42  ;;  %v5131_v44 = vpop.f32.mrb[139].mxu1  ;;  %v5556_v45 = vpop.f32.mrb[139].mxu0  ;;  %12438 = vmatmul.mubr.msk.f32.gmra.mrb[244].mxu1 %vm336_vm1, %v6013_v40 }
 0x620   : > { %10812 = vst [vmem:[%s13464_s5 + $0x1308] sm:$0xff] %v5131_v44  ;;  %10814 = vst.msk [vmem:[%s13464_s5 + $0x1318] sm:$0xff] %vm1933_vm2, %v5556_v45  ;;  %12440 = vmatprep.mubr.msk.f32.mxu1 %vm336_vm1, %v6014_v41 }
 0x622   : > { %v5135_v47 = vpop.f32.mrb[140].mxu1  ;;  %v5560_v48 = vpop.f32.mrb[140].mxu0 }
 0x623   : > { %10815 = vst [vmem:[%s13464_s5 + $0x1320] sm:$0xff] %v5135_v47  ;;  %10817 = vst [vmem:[%s13464_s5 + $0x1330] sm:$0xff] %v5560_v48  ;;  %v5137_v49 = vpop.f32.mrb[141].mxu1  ;;  %v5562_v50 = vpop.f32.mrb[141].mxu0  ;;  %12441 = vmatmul.mubr.msk.f32.gmra.mrb[246].mxu1 %vm336_vm1, %v6015_v46 }
 0x624   : > { %10816 = vst [vmem:[%s13464_s5 + $0x1328] sm:$0xff] %v5137_v49  ;;  %10818 = vst.msk [vmem:[%s13464_s5 + $0x1338] sm:$0xff] %vm1933_vm2, %v5562_v50  ;;  %12443 = vmatprep.mubr.msk.f32.mxu1 %vm336_vm1, %v6016_v7 }
 0x626   : > { %v5141_v32 = vpop.f32.mrb[142].mxu1  ;;  %v5566_v53 = vpop.f32.mrb[142].mxu0 }
 0x627   : > { %10819 = vst [vmem:[%s13464_s5 + $0x1340] sm:$0xff] %v5141_v32  ;;  %10821 = vst [vmem:[%s13464_s5 + $0x1350] sm:$0xff] %v5566_v53  ;;  %v5143_v54 = vpop.f32.mrb[143].mxu1  ;;  %v5568_v55 = vpop.f32.mrb[143].mxu0  ;;  %12444 = vmatmul.mubr.msk.f32.gmra.mrb[248].mxu1 %vm336_vm1, %v6017_v51 }
 0x628   : > { %10820 = vst [vmem:[%s13464_s5 + $0x1348] sm:$0xff] %v5143_v54  ;;  %10822 = vst.msk [vmem:[%s13464_s5 + $0x1358] sm:$0xff] %vm1933_vm2, %v5568_v55  ;;  %12446 = vmatprep.mubr.msk.f32.mxu1 %vm336_vm1, %v6018_v52 }
 0x62a   : > { %v5147_v58 = vpop.f32.mrb[144].mxu1  ;;  %v5572_v59 = vpop.f32.mrb[144].mxu0 }
 0x62b   : > { %10823 = vst [vmem:[%s13464_s5 + $0x1360] sm:$0xff] %v5147_v58  ;;  %10825 = vst [vmem:[%s13464_s5 + $0x1370] sm:$0xff] %v5572_v59  ;;  %v5149_v60 = vpop.f32.mrb[145].mxu1  ;;  %v5574_v61 = vpop.f32.mrb[145].mxu0  ;;  %12447 = vmatmul.mubr.msk.f32.gmra.mrb[250].mxu1 %vm336_vm1, %v6019_v56 }
 0x62c   : > { %10824 = vst [vmem:[%s13464_s5 + $0x1368] sm:$0xff] %v5149_v60  ;;  %10826 = vst.msk [vmem:[%s13464_s5 + $0x1378] sm:$0xff] %vm1933_vm2, %v5574_v61  ;;  %12449 = vmatprep.mubr.msk.f32.mxu1 %vm336_vm1, %v6020_v57 }
 0x62e   : > { %v5153_v63 = vpop.f32.mrb[146].mxu1  ;;  %v5578_v43 = vpop.f32.mrb[146].mxu0 }
 0x62f   : > { %10827 = vst [vmem:[%s13464_s5 + $0x1380] sm:$0xff] %v5153_v63  ;;  %10829 = vst [vmem:[%s13464_s5 + $0x1390] sm:$0xff] %v5578_v43  ;;  %v5155_v0 = vpop.f32.mrb[147].mxu1  ;;  %v5580_v1 = vpop.f32.mrb[147].mxu0  ;;  %12450 = vmatmul.mubr.msk.f32.gmra.mrb[252].mxu1 %vm336_vm1, %v6021_v62 }
 0x630   : > { %10828 = vst [vmem:[%s13464_s5 + $0x1388] sm:$0xff] %v5155_v0  ;;  %10830 = vst.msk [vmem:[%s13464_s5 + $0x1398] sm:$0xff] %vm1933_vm2, %v5580_v1  ;;  %7255 = vmatprep.mubr.f32.mxu1 %v12822_v8 }
 0x632   : > { %v5159_v2 = vpop.f32.mrb[148].mxu1  ;;  %v5584_v3 = vpop.f32.mrb[148].mxu0 }
 0x633   : > { %10831 = vst [vmem:[%s13464_s5 + $0x13a0] sm:$0xff] %v5159_v2  ;;  %10833 = vst [vmem:[%s13464_s5 + $0x13b0] sm:$0xff] %v5584_v3  ;;  %v5161_v4 = vpop.f32.mrb[149].mxu1  ;;  %v5586_v5 = vpop.f32.mrb[149].mxu0 }
 0x634   : > { %10832 = vst [vmem:[%s13464_s5 + $0x13a8] sm:$0xff] %v5161_v4  ;;  %10834 = vst.msk [vmem:[%s13464_s5 + $0x13b8] sm:$0xff] %vm1933_vm2, %v5586_v5 }
 0x636   : > { %v5165_v9 = vpop.f32.mrb[150].mxu1  ;;  %v5590_v10 = vpop.f32.mrb[150].mxu0 }
 0x637   : > { %10835 = vst [vmem:[%s13464_s5 + $0x13c0] sm:$0xff] %v5165_v9  ;;  %10837 = vst [vmem:[%s13464_s5 + $0x13d0] sm:$0xff] %v5590_v10  ;;  %v5167_v11 = vpop.f32.mrb[151].mxu1  ;;  %v5592_v12 = vpop.f32.mrb[151].mxu0 }
 0x638   : > { %10836 = vst [vmem:[%s13464_s5 + $0x13c8] sm:$0xff] %v5167_v11  ;;  %10838 = vst.msk [vmem:[%s13464_s5 + $0x13d8] sm:$0xff] %vm1933_vm2, %v5592_v12 }
 0x63a   : > { %v5171_v13 = vpop.f32.mrb[152].mxu1  ;;  %v5596_v14 = vpop.f32.mrb[152].mxu0 }
 0x63b   : > { %10839 = vst [vmem:[%s13464_s5 + $0x13e0] sm:$0xff] %v5171_v13  ;;  %10841 = vst [vmem:[%s13464_s5 + $0x13f0] sm:$0xff] %v5596_v14  ;;  %v5173_v15 = vpop.f32.mrb[153].mxu1  ;;  %v5598_v16 = vpop.f32.mrb[153].mxu0 }
 0x63c   : > { %10840 = vst [vmem:[%s13464_s5 + $0x13e8] sm:$0xff] %v5173_v15  ;;  %10842 = vst.msk [vmem:[%s13464_s5 + $0x13f8] sm:$0xff] %vm1933_vm2, %v5598_v16 }
 0x63e   : > { %v5177_v17 = vpop.f32.mrb[154].mxu1  ;;  %v5602_v18 = vpop.f32.mrb[154].mxu0 }
 0x63f   : > { %10843 = vst [vmem:[%s13464_s5 + $0x1400] sm:$0xff] %v5177_v17  ;;  %10845 = vst [vmem:[%s13464_s5 + $0x1410] sm:$0xff] %v5602_v18  ;;  %v5179_v19 = vpop.f32.mrb[155].mxu1  ;;  %v5604_v21 = vpop.f32.mrb[155].mxu0 }
 0x640   : > { %10844 = vst [vmem:[%s13464_s5 + $0x1408] sm:$0xff] %v5179_v19  ;;  %10846 = vst.msk [vmem:[%s13464_s5 + $0x1418] sm:$0xff] %vm1933_vm2, %v5604_v21 }
 0x642   : > { %v5183_v22 = vpop.f32.mrb[156].mxu1  ;;  %v5608_v23 = vpop.f32.mrb[156].mxu0 }
 0x643   : > { %10847 = vst [vmem:[%s13464_s5 + $0x1420] sm:$0xff] %v5183_v22  ;;  %10849 = vst [vmem:[%s13464_s5 + $0x1430] sm:$0xff] %v5608_v23  ;;  %v5185_v24 = vpop.f32.mrb[157].mxu1  ;;  %v5610_v25 = vpop.f32.mrb[157].mxu0 }
 0x644   : > { %10848 = vst [vmem:[%s13464_s5 + $0x1428] sm:$0xff] %v5185_v24  ;;  %10850 = vst.msk [vmem:[%s13464_s5 + $0x1438] sm:$0xff] %vm1933_vm2, %v5610_v25 }
 0x646   : > { %v5189_v26 = vpop.f32.mrb[158].mxu1  ;;  %v5614_v27 = vpop.f32.mrb[158].mxu0 }
 0x647   : > { %10851 = vst [vmem:[%s13464_s5 + $0x1440] sm:$0xff] %v5189_v26  ;;  %10853 = vst [vmem:[%s13464_s5 + $0x1450] sm:$0xff] %v5614_v27  ;;  %v5191_v28 = vpop.f32.mrb[159].mxu1  ;;  %v5616_v29 = vpop.f32.mrb[159].mxu0 }
 0x648   : > { %10852 = vst [vmem:[%s13464_s5 + $0x1448] sm:$0xff] %v5191_v28  ;;  %10854 = vst.msk [vmem:[%s13464_s5 + $0x1458] sm:$0xff] %vm1933_vm2, %v5616_v29 }
 0x64a   : > { %v5195_v30 = vpop.f32.mrb[160].mxu1  ;;  %v5620_v31 = vpop.f32.mrb[160].mxu0 }
 0x64b   : > { %10855 = vst [vmem:[%s13464_s5 + $0x1460] sm:$0xff] %v5195_v30  ;;  %10857 = vst [vmem:[%s13464_s5 + $0x1470] sm:$0xff] %v5620_v31  ;;  %v5197_v33 = vpop.f32.mrb[161].mxu1  ;;  %v5622_v34 = vpop.f32.mrb[161].mxu0 }
 0x64c   : > { %10856 = vst [vmem:[%s13464_s5 + $0x1468] sm:$0xff] %v5197_v33  ;;  %10858 = vst.msk [vmem:[%s13464_s5 + $0x1478] sm:$0xff] %vm1933_vm2, %v5622_v34 }
 0x64e   : > { %v5201_v35 = vpop.f32.mrb[162].mxu1  ;;  %v5626_v36 = vpop.f32.mrb[162].mxu0 }
 0x64f   : > { %10859 = vst [vmem:[%s13464_s5 + $0x1480] sm:$0xff] %v5201_v35  ;;  %10861 = vst [vmem:[%s13464_s5 + $0x1490] sm:$0xff] %v5626_v36  ;;  %v5203_v37 = vpop.f32.mrb[163].mxu1  ;;  %v5628_v38 = vpop.f32.mrb[163].mxu0 }
 0x650   : > { %10860 = vst [vmem:[%s13464_s5 + $0x1488] sm:$0xff] %v5203_v37  ;;  %10862 = vst.msk [vmem:[%s13464_s5 + $0x1498] sm:$0xff] %vm1933_vm2, %v5628_v38 }
 0x652   : > { %v5207_v39 = vpop.f32.mrb[164].mxu1  ;;  %v5632_v40 = vpop.f32.mrb[164].mxu0 }
 0x653   : > { %10863 = vst [vmem:[%s13464_s5 + $0x14a0] sm:$0xff] %v5207_v39  ;;  %10865 = vst [vmem:[%s13464_s5 + $0x14b0] sm:$0xff] %v5632_v40  ;;  %v5209_v41 = vpop.f32.mrb[165].mxu1  ;;  %v5634_v6 = vpop.f32.mrb[165].mxu0 }
 0x654   : > { %10864 = vst [vmem:[%s13464_s5 + $0x14a8] sm:$0xff] %v5209_v41  ;;  %10866 = vst.msk [vmem:[%s13464_s5 + $0x14b8] sm:$0xff] %vm1933_vm2, %v5634_v6 }
 0x656   : > { %v5213_v42 = vpop.f32.mrb[166].mxu1  ;;  %v5638_v44 = vpop.f32.mrb[166].mxu0 }
 0x657   : > { %10867 = vst [vmem:[%s13464_s5 + $0x14c0] sm:$0xff] %v5213_v42  ;;  %10869 = vst [vmem:[%s13464_s5 + $0x14d0] sm:$0xff] %v5638_v44  ;;  %v5215_v45 = vpop.f32.mrb[167].mxu1  ;;  %v5640_v46 = vpop.f32.mrb[167].mxu0 }
 0x658   : > { %10868 = vst [vmem:[%s13464_s5 + $0x14c8] sm:$0xff] %v5215_v45  ;;  %10870 = vst.msk [vmem:[%s13464_s5 + $0x14d8] sm:$0xff] %vm1933_vm2, %v5640_v46 }
 0x65a   : > { %v5219_v7 = vpop.f32.mrb[168].mxu1  ;;  %v5644_v47 = vpop.f32.mrb[168].mxu0 }
 0x65b   : > { %10871 = vst [vmem:[%s13464_s5 + $0x14e0] sm:$0xff] %v5219_v7  ;;  %10873 = vst [vmem:[%s13464_s5 + $0x14f0] sm:$0xff] %v5644_v47  ;;  %v5221_v48 = vpop.f32.mrb[169].mxu1  ;;  %v5646_v49 = vpop.f32.mrb[169].mxu0 }
 0x65c   : > { %10872 = vst [vmem:[%s13464_s5 + $0x14e8] sm:$0xff] %v5221_v48  ;;  %10874 = vst.msk [vmem:[%s13464_s5 + $0x14f8] sm:$0xff] %vm1933_vm2, %v5646_v49 }
 0x65e   : > { %v5225_v50 = vpop.f32.mrb[170].mxu1  ;;  %v5650_v51 = vpop.f32.mrb[170].mxu0 }
 0x65f   : > { %10875 = vst [vmem:[%s13464_s5 + $0x1500] sm:$0xff] %v5225_v50  ;;  %10877 = vst [vmem:[%s13464_s5 + $0x1510] sm:$0xff] %v5650_v51  ;;  %v5227_v52 = vpop.f32.mrb[171].mxu1  ;;  %v5652_v32 = vpop.f32.mrb[171].mxu0 }
 0x660   : > { %10876 = vst [vmem:[%s13464_s5 + $0x1508] sm:$0xff] %v5227_v52  ;;  %10878 = vst.msk [vmem:[%s13464_s5 + $0x1518] sm:$0xff] %vm1933_vm2, %v5652_v32 }
 0x662   : > { %v5231_v53 = vpop.f32.mrb[172].mxu1  ;;  %v5656_v54 = vpop.f32.mrb[172].mxu0 }
 0x663   : > { %10879 = vst [vmem:[%s13464_s5 + $0x1520] sm:$0xff] %v5231_v53  ;;  %10881 = vst [vmem:[%s13464_s5 + $0x1530] sm:$0xff] %v5656_v54  ;;  %v5233_v55 = vpop.f32.mrb[173].mxu1  ;;  %v5658_v56 = vpop.f32.mrb[173].mxu0 }
 0x664   : > { %10880 = vst [vmem:[%s13464_s5 + $0x1528] sm:$0xff] %v5233_v55  ;;  %10882 = vst.msk [vmem:[%s13464_s5 + $0x1538] sm:$0xff] %vm1933_vm2, %v5658_v56 }
 0x666   : > { %v5237_v57 = vpop.f32.mrb[174].mxu1  ;;  %v5662_v58 = vpop.f32.mrb[174].mxu0 }
 0x667   : > { %10883 = vst [vmem:[%s13464_s5 + $0x1540] sm:$0xff] %v5237_v57  ;;  %10885 = vst [vmem:[%s13464_s5 + $0x1550] sm:$0xff] %v5662_v58  ;;  %v5239_v59 = vpop.f32.mrb[175].mxu1  ;;  %v5664_v60 = vpop.f32.mrb[175].mxu0 }
 0x668   : > { %10884 = vst [vmem:[%s13464_s5 + $0x1548] sm:$0xff] %v5239_v59  ;;  %10886 = vst.msk [vmem:[%s13464_s5 + $0x1558] sm:$0xff] %vm1933_vm2, %v5664_v60 }
 0x66a   : > { %v5243_v61 = vpop.f32.mrb[176].mxu1  ;;  %v5668_v62 = vpop.f32.mrb[176].mxu0 }
 0x66b   : > { %10887 = vst [vmem:[%s13464_s5 + $0x1560] sm:$0xff] %v5243_v61  ;;  %10889 = vst [vmem:[%s13464_s5 + $0x1570] sm:$0xff] %v5668_v62  ;;  %v5245_v63 = vpop.f32.mrb[177].mxu1  ;;  %v5670_v43 = vpop.f32.mrb[177].mxu0 }
 0x66c   : > { %10888 = vst [vmem:[%s13464_s5 + $0x1568] sm:$0xff] %v5245_v63  ;;  %10890 = vst.msk [vmem:[%s13464_s5 + $0x1578] sm:$0xff] %vm1933_vm2, %v5670_v43 }
 0x66e   : > { %v5249_v0 = vpop.f32.mrb[178].mxu1  ;;  %v5674_v1 = vpop.f32.mrb[178].mxu0 }
 0x66f   : > { %10891 = vst [vmem:[%s13464_s5 + $0x1580] sm:$0xff] %v5249_v0  ;;  %10893 = vst [vmem:[%s13464_s5 + $0x1590] sm:$0xff] %v5674_v1  ;;  %v5251_v2 = vpop.f32.mrb[179].mxu1  ;;  %v5676_v3 = vpop.f32.mrb[179].mxu0 }
 0x670   : > { %10892 = vst [vmem:[%s13464_s5 + $0x1588] sm:$0xff] %v5251_v2  ;;  %10894 = vst.msk [vmem:[%s13464_s5 + $0x1598] sm:$0xff] %vm1933_vm2, %v5676_v3 }
 0x672   : > { %v5255_v4 = vpop.f32.mrb[180].mxu1  ;;  %v5680_v5 = vpop.f32.mrb[180].mxu0 }
 0x673   : > { %10895 = vst [vmem:[%s13464_s5 + $0x15a0] sm:$0xff] %v5255_v4  ;;  %10897 = vst [vmem:[%s13464_s5 + $0x15b0] sm:$0xff] %v5680_v5  ;;  %v5257_v9 = vpop.f32.mrb[181].mxu1  ;;  %v5682_v10 = vpop.f32.mrb[181].mxu0 }
 0x674   : > { %10896 = vst [vmem:[%s13464_s5 + $0x15a8] sm:$0xff] %v5257_v9  ;;  %10898 = vst.msk [vmem:[%s13464_s5 + $0x15b8] sm:$0xff] %vm1933_vm2, %v5682_v10 }
 0x676   : > { %v5261_v11 = vpop.f32.mrb[182].mxu1  ;;  %v5686_v12 = vpop.f32.mrb[182].mxu0 }
 0x677   : > { %10899 = vst [vmem:[%s13464_s5 + $0x15c0] sm:$0xff] %v5261_v11  ;;  %10901 = vst [vmem:[%s13464_s5 + $0x15d0] sm:$0xff] %v5686_v12  ;;  %v5263_v13 = vpop.f32.mrb[183].mxu1  ;;  %v5688_v14 = vpop.f32.mrb[183].mxu0 }
 0x678   : > { %10900 = vst [vmem:[%s13464_s5 + $0x15c8] sm:$0xff] %v5263_v13  ;;  %10902 = vst.msk [vmem:[%s13464_s5 + $0x15d8] sm:$0xff] %vm1933_vm2, %v5688_v14 }
 0x67a   : > { %v5267_v15 = vpop.f32.mrb[184].mxu1  ;;  %v5692_v16 = vpop.f32.mrb[184].mxu0 }
 0x67b   : > { %10903 = vst [vmem:[%s13464_s5 + $0x15e0] sm:$0xff] %v5267_v15  ;;  %10905 = vst [vmem:[%s13464_s5 + $0x15f0] sm:$0xff] %v5692_v16  ;;  %v5269_v17 = vpop.f32.mrb[185].mxu1  ;;  %v5694_v18 = vpop.f32.mrb[185].mxu0  ;;  %v8467_v16 = vld [vmem:[#allocation6] sm:$0xff] }
 0x67c   : > { %10904 = vst [vmem:[%s13464_s5 + $0x15e8] sm:$0xff] %v5269_v17  ;;  %10906 = vst.msk [vmem:[%s13464_s5 + $0x15f8] sm:$0xff] %vm1933_vm2, %v5694_v18  ;;  %v8471_v18 = vcombine.high %v8467_v16, %v8467_v16 }
 0x67e   : > { %v5273_v19 = vpop.f32.mrb[186].mxu1  ;;  %v5698_v21 = vpop.f32.mrb[186].mxu0  ;;  %11411 = vmatprep.subr.msk.mxu1 %vm517_vm0, %v8471_v18 }
 0x67f   : > { %10907 = vst [vmem:[%s13464_s5 + $0x1600] sm:$0xff] %v5273_v19  ;;  %10909 = vst [vmem:[%s13464_s5 + $0x1610] sm:$0xff] %v5698_v21  ;;  %v5275_v22 = vpop.f32.mrb[187].mxu1  ;;  %v5700_v23 = vpop.f32.mrb[187].mxu0 }
 0x680   : > { %10908 = vst [vmem:[%s13464_s5 + $0x1608] sm:$0xff] %v5275_v22  ;;  %10910 = vst.msk [vmem:[%s13464_s5 + $0x1618] sm:$0xff] %vm1933_vm2, %v5700_v23 }
 0x682   : > { %v5279_v24 = vpop.f32.mrb[188].mxu1  ;;  %v5704_v25 = vpop.f32.mrb[188].mxu0 }
 0x683   : > { %10911 = vst [vmem:[%s13464_s5 + $0x1620] sm:$0xff] %v5279_v24  ;;  %10913 = vst [vmem:[%s13464_s5 + $0x1630] sm:$0xff] %v5704_v25  ;;  %v5281_v26 = vpop.f32.mrb[189].mxu1  ;;  %v5706_v27 = vpop.f32.mrb[189].mxu0 }
 0x684   : > { %10912 = vst [vmem:[%s13464_s5 + $0x1628] sm:$0xff] %v5281_v26  ;;  %10914 = vst.msk [vmem:[%s13464_s5 + $0x1638] sm:$0xff] %vm1933_vm2, %v5706_v27 }
 0x686   : > { %v5285_v28 = vpop.f32.mrb[190].mxu1  ;;  %v5710_v29 = vpop.f32.mrb[190].mxu0 }
 0x687   : > { %10915 = vst [vmem:[%s13464_s5 + $0x1640] sm:$0xff] %v5285_v28  ;;  %10917 = vst [vmem:[%s13464_s5 + $0x1650] sm:$0xff] %v5710_v29  ;;  %v5287_v30 = vpop.f32.mrb[191].mxu1  ;;  %v5712_v31 = vpop.f32.mrb[191].mxu0 }
 0x688   : > { %10916 = vst [vmem:[%s13464_s5 + $0x1648] sm:$0xff] %v5287_v30  ;;  %10918 = vst.msk [vmem:[%s13464_s5 + $0x1658] sm:$0xff] %vm1933_vm2, %v5712_v31 }
 0x68a   : > { %v5291_v33 = vpop.f32.mrb[192].mxu1  ;;  %v5716_v34 = vpop.f32.mrb[192].mxu0 }
 0x68b   : > { %10919 = vst [vmem:[%s13464_s5 + $0x1660] sm:$0x1] %v5291_v33  ;;  %10921 = vst [vmem:[%s13464_s5 + $0x1670] sm:$0x1] %v5716_v34  ;;  %v5293_v35 = vpop.f32.mrb[193].mxu1  ;;  %v5718_v36 = vpop.f32.mrb[193].mxu0 }
 0x68c   : > { %10920 = vst [vmem:[%s13464_s5 + $0x1668] sm:$0x1] %v5293_v35  ;;  %10922 = vst.msk [vmem:[%s13464_s5 + $0x1678] sm:$0x1] %vm2170_vm3, %v5718_v36  ;;  %v15775_v36 = vld [vmem:[#allocation6 + $0x8] sm:$0xff] }
 0x68e   : > { %v12364_v37 = vpop.f32.mrb[194].mxu1 }
 0x68f   : > { %v6273_v38 = vpop.f32.mrb[195].mxu1 }
 0x690   : > { %10987 = vmatmul.mubr.msk.f32.vlgmr.msra.gmra.mrb[194].mxu0 %vm336_vm1, %v6273_v38  ;;  %11049 = vmatmul.mubr.msk.f32.vlgmr.msra.gmra.mrb[254].mxu1 %vm336_vm1, %v6273_v38 }
 0x691   : > { %12453 = vmatpush3.msk.msra.mxu0 %vm517_vm0, %v15239_v20  ;;  %6836 = vmatprep.mubr.f32.mxu0 %v12822_v8 }
 0x692   : > { %7261 = vmatprep.mubr.f32.mxu1 %v12822_v8  ;;  %v12367_v39 = vpop.f32.mrb[196].mxu1  ;;  %11412 = vmatpush1.msk.msra.mxu1 %vm517_vm0, %v8467_v16 }
 0x693   : > { %v6283_v40 = vpop.f32.mrb[197].mxu1 }
 0x694   : > { %10988 = vmatmul.mubr.msk.f32.gmra.mrb[196].mxu0 %vm336_vm1, %v12364_v37  ;;  %11050 = vmatmul.mubr.msk.f32.gmra.mrb[0].mxu1 %vm336_vm1, %v12364_v37  ;;  %v8472_v37 = vcombine.high %v15775_v36, %v15775_v36 }
 0x695   : > { %6842 = vmatprep.mubr.f32.mxu0 %v12822_v8  ;;  %7267 = vmatprep.mubr.f32.mxu1 %v12822_v8 }
 0x696   : > { %v12370_v41 = vpop.f32.mrb[198].mxu1  ;;  %11473 = vmatprep.subr.msk.mxu0 %vm517_vm0, %v8472_v37 }
 0x697   : > { %v6293_v6 = vpop.f32.mrb[199].mxu1 }
 0x698   : > { %10989 = vmatmul.mubr.msk.f32.gmra.mrb[198].mxu0 %vm336_vm1, %v6283_v40  ;;  %11051 = vmatmul.mubr.msk.f32.gmra.mrb[2].mxu1 %vm336_vm1, %v6283_v40 }
 0x699   : > { %6848 = vmatprep.mubr.f32.mxu0 %v12822_v8  ;;  %7273 = vmatprep.mubr.f32.mxu1 %v12822_v8 }
 0x69a   : > { %v12373_v20 = vpop.f32.mrb[200].mxu1 }
 0x69b   : > { %v6303_v42 = vpop.f32.mrb[201].mxu1 }
 0x69c   : > { %10990 = vmatmul.mubr.msk.f32.gmra.mrb[200].mxu0 %vm336_vm1, %v12367_v39  ;;  %11052 = vmatmul.mubr.msk.f32.gmra.mrb[4].mxu1 %vm336_vm1, %v12367_v39 }
 0x69d   : > { %6854 = vmatprep.mubr.f32.mxu0 %v12822_v8  ;;  %7279 = vmatprep.mubr.f32.mxu1 %v12822_v8 }
 0x69e   : > { %v12376_v44 = vpop.f32.mrb[202].mxu1 }
 0x69f   : > { %v6313_v45 = vpop.f32.mrb[203].mxu1 }
 0x6a0   : > { %10991 = vmatmul.mubr.msk.f32.gmra.mrb[202].mxu0 %vm336_vm1, %v6293_v6  ;;  %11053 = vmatmul.mubr.msk.f32.gmra.mrb[6].mxu1 %vm336_vm1, %v6293_v6 }
 0x6a1   : > { %6860 = vmatprep.mubr.f32.mxu0 %v12822_v8  ;;  %7285 = vmatprep.mubr.f32.mxu1 %v12822_v8 }
 0x6a2   : > { %v12379_v46 = vpop.f32.mrb[204].mxu1 }
 0x6a3   : > { %v6323_v7 = vpop.f32.mrb[205].mxu1 }
 0x6a4   : > { %10992 = vmatmul.mubr.msk.f32.gmra.mrb[204].mxu0 %vm336_vm1, %v12370_v41  ;;  %11054 = vmatmul.mubr.msk.f32.gmra.mrb[8].mxu1 %vm336_vm1, %v12370_v41 }
 0x6a5   : > { %6866 = vmatprep.mubr.f32.mxu0 %v12822_v8  ;;  %7291 = vmatprep.mubr.f32.mxu1 %v12822_v8 }
 0x6a6   : > { %v12382_v47 = vpop.f32.mrb[206].mxu1 }
 0x6a7   : > { %v6333_v48 = vpop.f32.mrb[207].mxu1 }
 0x6a8   : > { %10993 = vmatmul.mubr.msk.f32.gmra.mrb[206].mxu0 %vm336_vm1, %v6303_v42  ;;  %11055 = vmatmul.mubr.msk.f32.gmra.mrb[10].mxu1 %vm336_vm1, %v6303_v42 }
 0x6a9   : > { %6872 = vmatprep.mubr.f32.mxu0 %v12822_v8  ;;  %7297 = vmatprep.mubr.f32.mxu1 %v12822_v8 }
 0x6aa   : > { %v12385_v49 = vpop.f32.mrb[208].mxu1 }
 0x6ab   : > { %v6343_v50 = vpop.f32.mrb[209].mxu1 }
 0x6ac   : > { %10994 = vmatmul.mubr.msk.f32.gmra.mrb[208].mxu0 %vm336_vm1, %v12373_v20  ;;  %11056 = vmatmul.mubr.msk.f32.gmra.mrb[12].mxu1 %vm336_vm1, %v12373_v20 }
 0x6ad   : > { %6878 = vmatprep.mubr.f32.mxu0 %v12822_v8  ;;  %7303 = vmatprep.mubr.f32.mxu1 %v12822_v8 }
 0x6ae   : > { %v12388_v51 = vpop.f32.mrb[210].mxu1 }
 0x6af   : > { %v6353_v52 = vpop.f32.mrb[211].mxu1 }
 0x6b0   : > { %10995 = vmatmul.mubr.msk.f32.gmra.mrb[210].mxu0 %vm336_vm1, %v6313_v45  ;;  %11057 = vmatmul.mubr.msk.f32.gmra.mrb[14].mxu1 %vm336_vm1, %v6313_v45 }
 0x6b1   : > { %6884 = vmatprep.mubr.f32.mxu0 %v12822_v8  ;;  %7309 = vmatprep.mubr.f32.mxu1 %v12822_v8 }
 0x6b2   : > { %v15457_v32 = vpop.f32.mrb[212].mxu1 }
 0x6b3   : > { %v6363_v53 = vpop.f32.mrb[213].mxu1 }
 0x6b4   : > { %10996 = vmatmul.mubr.msk.f32.gmra.mrb[212].mxu0 %vm336_vm1, %v12376_v44  ;;  %11058 = vmatmul.mubr.msk.f32.gmra.mrb[16].mxu1 %vm336_vm1, %v12376_v44 }
 0x6b5   : > { %6890 = vmatprep.mubr.f32.mxu0 %v12822_v8  ;;  %7315 = vmatprep.mubr.f32.mxu1 %v12822_v8 }
 0x6b6   : > { %v15463_v54 = vpop.f32.mrb[214].mxu1 }
 0x6b7   : > { %v6373_v55 = vpop.f32.mrb[215].mxu1 }
 0x6b8   : > { %10997 = vmatmul.mubr.msk.f32.gmra.mrb[214].mxu0 %vm336_vm1, %v6323_v7  ;;  %11059 = vmatmul.mubr.msk.f32.gmra.mrb[18].mxu1 %vm336_vm1, %v6323_v7 }
 0x6b9   : > { %6896 = vmatprep.mubr.f32.mxu0 %v12822_v8  ;;  %7321 = vmatprep.mubr.f32.mxu1 %v12822_v8 }
 0x6ba   : > { %v15469_v56 = vpop.f32.mrb[216].mxu1 }
 0x6bb   : > { %v15471_v57 = vpop.f32.mrb[217].mxu1 }
 0x6bc   : > { %10998 = vmatmul.mubr.msk.f32.gmra.mrb[216].mxu0 %vm336_vm1, %v12379_v46  ;;  %11060 = vmatmul.mubr.msk.f32.gmra.mrb[20].mxu1 %vm336_vm1, %v12379_v46 }
 0x6bd   : > { %6902 = vmatprep.mubr.f32.mxu0 %v12822_v8  ;;  %7327 = vmatprep.mubr.f32.mxu1 %v12822_v8 }
 0x6be   : > { %v15477_v58 = vpop.f32.mrb[218].mxu1 }
 0x6bf   : > { %v15479_v59 = vpop.f32.mrb[219].mxu1 }
 0x6c0   : > { %10999 = vmatmul.mubr.msk.f32.gmra.mrb[218].mxu0 %vm336_vm1, %v6333_v48  ;;  %11061 = vmatmul.mubr.msk.f32.gmra.mrb[22].mxu1 %vm336_vm1, %v6333_v48 }
 0x6c1   : > { %6908 = vmatprep.mubr.f32.mxu0 %v12822_v8  ;;  %7333 = vmatprep.mubr.f32.mxu1 %v12822_v8 }
 0x6c2   : > { %v15485_v60 = vpop.f32.mrb[220].mxu1 }
 0x6c3   : > { %v15487_v61 = vpop.f32.mrb[221].mxu1 }
 0x6c4   : > { %11000 = vmatmul.mubr.msk.f32.gmra.mrb[220].mxu0 %vm336_vm1, %v12382_v47  ;;  %11062 = vmatmul.mubr.msk.f32.gmra.mrb[24].mxu1 %vm336_vm1, %v12382_v47 }
 0x6c5   : > { %6914 = vmatprep.mubr.f32.mxu0 %v12822_v8  ;;  %7339 = vmatprep.mubr.f32.mxu1 %v12822_v8 }
 0x6c6   : > { %v15493_v62 = vpop.f32.mrb[222].mxu1 }
 0x6c7   : > { %v15495_v63 = vpop.f32.mrb[223].mxu1 }
 0x6c8   : > { %11001 = vmatmul.mubr.msk.f32.gmra.mrb[222].mxu0 %vm336_vm1, %v6343_v50  ;;  %11063 = vmatmul.mubr.msk.f32.gmra.mrb[26].mxu1 %vm336_vm1, %v6343_v50 }
 0x6c9   : > { %6920 = vmatprep.mubr.f32.mxu0 %v12822_v8  ;;  %7345 = vmatprep.mubr.f32.mxu1 %v12822_v8 }
 0x6ca   : > { %v15501_v43 = vpop.f32.mrb[224].mxu1 }
 0x6cb   : > { %v15503_v0 = vpop.f32.mrb[225].mxu1 }
 0x6cc   : > { %11002 = vmatmul.mubr.msk.f32.gmra.mrb[224].mxu0 %vm336_vm1, %v12385_v49  ;;  %11064 = vmatmul.mubr.msk.f32.gmra.mrb[28].mxu1 %vm336_vm1, %v12385_v49 }
 0x6cd   : > { %6926 = vmatprep.mubr.f32.mxu0 %v12822_v8  ;;  %7351 = vmatprep.mubr.f32.mxu1 %v12822_v8 }
 0x6ce   : > { %v15509_v1 = vpop.f32.mrb[226].mxu1 }
 0x6cf   : > { %v15511_v2 = vpop.f32.mrb[227].mxu1 }
 0x6d0   : > { %11003 = vmatmul.mubr.msk.f32.gmra.mrb[226].mxu0 %vm336_vm1, %v6353_v52  ;;  %11065 = vmatmul.mubr.msk.f32.gmra.mrb[30].mxu1 %vm336_vm1, %v6353_v52 }
 0x6d1   : > { %6932 = vmatprep.mubr.f32.mxu0 %v12822_v8  ;;  %7357 = vmatprep.mubr.f32.mxu1 %v12822_v8 }
 0x6d2   : > { %v15517_v3 = vpop.f32.mrb[228].mxu1 }
 0x6d3   : > { %v15519_v4 = vpop.f32.mrb[229].mxu1 }
 0x6d4   : > { %11004 = vmatmul.mubr.msk.f32.gmra.mrb[228].mxu0 %vm336_vm1, %v12388_v51  ;;  %11066 = vmatmul.mubr.msk.f32.gmra.mrb[32].mxu1 %vm336_vm1, %v12388_v51 }
 0x6d5   : > { %6938 = vmatprep.mubr.f32.mxu0 %v12822_v8  ;;  %7363 = vmatprep.mubr.f32.mxu1 %v12822_v8 }
 0x6d6   : > { %v15525_v5 = vpop.f32.mrb[230].mxu1 }
 0x6d7   : > { %v15527_v9 = vpop.f32.mrb[231].mxu1 }
 0x6d8   : > { %11005 = vmatmul.mubr.msk.f32.gmra.mrb[230].mxu0 %vm336_vm1, %v6363_v53  ;;  %11067 = vmatmul.mubr.msk.f32.gmra.mrb[34].mxu1 %vm336_vm1, %v6363_v53 }
 0x6d9   : > { %6944 = vmatprep.mubr.f32.mxu0 %v12822_v8  ;;  %7369 = vmatprep.mubr.f32.mxu1 %v12822_v8 }
 0x6da   : > { %v15533_v10 = vpop.f32.mrb[232].mxu1 }
 0x6db   : > { %v15535_v11 = vpop.f32.mrb[233].mxu1 }
 0x6dc   : > { %11006 = vmatmul.mubr.msk.f32.gmra.mrb[232].mxu0 %vm336_vm1, %v15457_v32  ;;  %11068 = vmatmul.mubr.msk.f32.gmra.mrb[36].mxu1 %vm336_vm1, %v15457_v32 }
 0x6dd   : > { %6950 = vmatprep.mubr.f32.mxu0 %v12822_v8  ;;  %7375 = vmatprep.mubr.f32.mxu1 %v12822_v8 }
 0x6de   : > { %v15543_v12 = vpop.f32.mrb[234].mxu1 }
 0x6df   : > { %v15545_v13 = vpop.f32.mrb[235].mxu1 }
 0x6e0   : > { %11007 = vmatmul.mubr.msk.f32.gmra.mrb[234].mxu0 %vm336_vm1, %v6373_v55  ;;  %11069 = vmatmul.mubr.msk.f32.gmra.mrb[38].mxu1 %vm336_vm1, %v6373_v55 }
 0x6e1   : > { %6956 = vmatprep.mubr.f32.mxu0 %v12822_v8  ;;  %7381 = vmatprep.mubr.f32.mxu1 %v12822_v8 }
 0x6e2   : > { %v15551_v14 = vpop.f32.mrb[236].mxu1 }
 0x6e3   : > { %v15553_v15 = vpop.f32.mrb[237].mxu1 }
 0x6e4   : > { %11008 = vmatmul.mubr.msk.f32.gmra.mrb[236].mxu0 %vm336_vm1, %v15463_v54  ;;  %11070 = vmatmul.mubr.msk.f32.gmra.mrb[40].mxu1 %vm336_vm1, %v15463_v54 }
 0x6e5   : > { %6962 = vmatprep.mubr.f32.mxu0 %v12822_v8  ;;  %7387 = vmatprep.mubr.f32.mxu1 %v12822_v8 }
 0x6e6   : > { %v15561_v17 = vpop.f32.mrb[238].mxu1 }
 0x6e7   : > { %v15563_v19 = vpop.f32.mrb[239].mxu1 }
 0x6e8   : > { %11009 = vmatmul.mubr.msk.f32.gmra.mrb[238].mxu0 %vm336_vm1, %v15471_v57  ;;  %11071 = vmatmul.mubr.msk.f32.gmra.mrb[42].mxu1 %vm336_vm1, %v15471_v57 }
 0x6e9   : > { %6968 = vmatprep.mubr.f32.mxu0 %v12822_v8  ;;  %7393 = vmatprep.mubr.f32.mxu1 %v12822_v8 }
 0x6ea   : > { %v15571_v21 = vpop.f32.mrb[240].mxu1 }
 0x6eb   : > { %v15574_v22 = vpop.f32.mrb[241].mxu1 }
 0x6ec   : > { %11010 = vmatmul.mubr.msk.f32.gmra.mrb[240].mxu0 %vm336_vm1, %v15469_v56  ;;  %11072 = vmatmul.mubr.msk.f32.gmra.mrb[44].mxu1 %vm336_vm1, %v15469_v56 }
 0x6ed   : > { %6974 = vmatprep.mubr.f32.mxu0 %v12822_v8  ;;  %7399 = vmatprep.mubr.f32.mxu1 %v12822_v8 }
 0x6ee   : > { %v15583_v23 = vpop.f32.mrb[242].mxu1 }
 0x6ef   : > { %v15585_v24 = vpop.f32.mrb[243].mxu1 }
 0x6f0   : > { %11011 = vmatmul.mubr.msk.f32.gmra.mrb[242].mxu0 %vm336_vm1, %v15479_v59  ;;  %11073 = vmatmul.mubr.msk.f32.gmra.mrb[46].mxu1 %vm336_vm1, %v15479_v59  ;;  %v7857_v59 = vld [vmem:[#allocation3] sm:$0xff] }
 0x6f1   : > { %6980 = vmatprep.mubr.f32.mxu0 %v12822_v8  ;;  %7405 = vmatprep.mubr.f32.mxu1 %v12822_v8 }
 0x6f2   : > { %v15593_v25 = vpop.f32.mrb[244].mxu1 }
 0x6f3   : > { %v15595_v26 = vpop.f32.mrb[245].mxu1 }
 0x6f4   : > { %11012 = vmatmul.mubr.msk.f32.gmra.mrb[244].mxu0 %vm336_vm1, %v15477_v58  ;;  %11074 = vmatmul.mubr.msk.f32.gmra.mrb[48].mxu1 %vm336_vm1, %v15477_v58 }
 0x6f5   : > { %6986 = vmatprep.mubr.f32.mxu0 %v12822_v8  ;;  %7411 = vmatprep.mubr.f32.mxu1 %v12822_v8 }
 0x6f6   : > { %v15603_v27 = vpop.f32.mrb[246].mxu1 }
 0x6f7   : > { %v15605_v28 = vpop.f32.mrb[247].mxu1 }
 0x6f8   : > { %11013 = vmatmul.mubr.msk.f32.gmra.mrb[246].mxu0 %vm336_vm1, %v15487_v61  ;;  %11075 = vmatmul.mubr.msk.f32.gmra.mrb[50].mxu1 %vm336_vm1, %v15487_v61 }
 0x6f9   : > { %6992 = vmatprep.mubr.f32.mxu0 %v12822_v8  ;;  %7417 = vmatprep.mubr.f32.mxu1 %v12822_v8 }
 0x6fa   : > { %v15613_v29 = vpop.f32.mrb[248].mxu1 }
 0x6fb   : > { %v15615_v30 = vpop.f32.mrb[249].mxu1 }
 0x6fc   : > { %11014 = vmatmul.mubr.msk.f32.gmra.mrb[248].mxu0 %vm336_vm1, %v15485_v60  ;;  %11076 = vmatmul.mubr.msk.f32.gmra.mrb[52].mxu1 %vm336_vm1, %v15485_v60 }
 0x6fd   : > { %6998 = vmatprep.mubr.f32.mxu0 %v12822_v8  ;;  %7423 = vmatprep.mubr.f32.mxu1 %v12822_v8 }
 0x6fe   : > { %v15623_v31 = vpop.f32.mrb[250].mxu1 }
 0x6ff   : > { %v15625_v33 = vpop.f32.mrb[251].mxu1 }
 0x700   : > { %11015 = vmatmul.mubr.msk.f32.gmra.mrb[250].mxu0 %vm336_vm1, %v15495_v63  ;;  %11077 = vmatmul.mubr.msk.f32.gmra.mrb[54].mxu1 %vm336_vm1, %v15495_v63 }
 0x701   : > { %7004 = vmatprep.mubr.f32.mxu0 %v12822_v8  ;;  %7429 = vmatprep.mubr.f32.mxu1 %v12822_v8 }
 0x702   : > { %v15633_v34 = vpop.f32.mrb[252].mxu1 }
 0x703   : > { %v15635_v35 = vpop.f32.mrb[253].mxu1 }
 0x704   : > { %11016 = vmatmul.mubr.msk.f32.gmra.mrb[252].mxu0 %vm336_vm1, %v15493_v62  ;;  %11078 = vmatmul.mubr.msk.f32.gmra.mrb[56].mxu1 %vm336_vm1, %v15493_v62 }
 0x705   : > { %7010 = vmatprep.mubr.f32.mxu0 %v12822_v8  ;;  %7435 = vmatprep.mubr.f32.mxu1 %v12822_v8 }
 0x708   : > { %11017 = vmatmul.mubr.msk.f32.gmra.mrb[254].mxu0 %vm336_vm1, %v15503_v0  ;;  %11079 = vmatmul.mubr.msk.f32.gmra.mrb[58].mxu1 %vm336_vm1, %v15503_v0  ;;  %v7859_v0 = vld [vmem:[#allocation3 + $0x10] sm:$0xff] }
 0x709   : > { %7016 = vmatprep.mubr.f32.mxu0 %v12822_v8  ;;  %7441 = vmatprep.mubr.f32.mxu1 %v12822_v8 }
 0x70c   : > { %11018 = vmatmul.mubr.msk.f32.gmra.mrb[0].mxu0 %vm336_vm1, %v15501_v43  ;;  %11080 = vmatmul.mubr.msk.f32.gmra.mrb[60].mxu1 %vm336_vm1, %v15501_v43  ;;  %v7858_v43 = vld [vmem:[#allocation3 + $0x8] sm:$0xff] }
 0x70d   : > { %7022 = vmatprep.mubr.f32.mxu0 %v12822_v8  ;;  %7447 = vmatprep.mubr.f32.mxu1 %v12822_v8 }
 0x710   : > { %11019 = vmatmul.mubr.msk.f32.gmra.mrb[2].mxu0 %vm336_vm1, %v15511_v2  ;;  %11081 = vmatmul.mubr.msk.f32.gmra.mrb[62].mxu1 %vm336_vm1, %v15511_v2 }
 0x711   : > { %7028 = vmatprep.mubr.f32.mxu0 %v12822_v8  ;;  %7453 = vmatprep.mubr.f32.mxu1 %v12822_v8 }
 0x714   : > { %11020 = vmatmul.mubr.msk.f32.gmra.mrb[4].mxu0 %vm336_vm1, %v15509_v1  ;;  %11082 = vmatmul.mubr.msk.f32.gmra.mrb[64].mxu1 %vm336_vm1, %v15509_v1 }
 0x715   : > { %7034 = vmatprep.mubr.f32.mxu0 %v12822_v8  ;;  %7459 = vmatprep.mubr.f32.mxu1 %v12822_v8 }
 0x718   : > { %11021 = vmatmul.mubr.msk.f32.gmra.mrb[6].mxu0 %vm336_vm1, %v15519_v4  ;;  %11083 = vmatmul.mubr.msk.f32.gmra.mrb[66].mxu1 %vm336_vm1, %v15519_v4 }
 0x719   : > { %7040 = vmatprep.mubr.f32.mxu0 %v12822_v8  ;;  %7465 = vmatprep.mubr.f32.mxu1 %v12822_v8 }
 0x71c   : > { %11022 = vmatmul.mubr.msk.f32.gmra.mrb[8].mxu0 %vm336_vm1, %v15517_v3  ;;  %11084 = vmatmul.mubr.msk.f32.gmra.mrb[68].mxu1 %vm336_vm1, %v15517_v3 }
 0x71d   : > { %7046 = vmatprep.mubr.f32.mxu0 %v12822_v8  ;;  %7471 = vmatprep.mubr.f32.mxu1 %v12822_v8 }
 0x720   : > { %11023 = vmatmul.mubr.msk.f32.gmra.mrb[10].mxu0 %vm336_vm1, %v15527_v9  ;;  %11085 = vmatmul.mubr.msk.f32.gmra.mrb[70].mxu1 %vm336_vm1, %v15527_v9  ;;  %v7861_v9 = vld [vmem:[#allocation3 + $0x20] sm:$0xff] }
 0x721   : > { %7052 = vmatprep.mubr.f32.mxu0 %v12822_v8  ;;  %7477 = vmatprep.mubr.f32.mxu1 %v12822_v8 }
 0x724   : > { %11024 = vmatmul.mubr.msk.f32.gmra.mrb[12].mxu0 %vm336_vm1, %v15525_v5  ;;  %11086 = vmatmul.mubr.msk.f32.gmra.mrb[72].mxu1 %vm336_vm1, %v15525_v5  ;;  %v7860_v5 = vld [vmem:[#allocation3 + $0x18] sm:$0xff] }
 0x725   : > { %7058 = vmatprep.mubr.f32.mxu0 %v12822_v8  ;;  %7483 = vmatprep.mubr.f32.mxu1 %v12822_v8 }
 0x728   : > { %11025 = vmatmul.mubr.msk.f32.gmra.mrb[14].mxu0 %vm336_vm1, %v15535_v11  ;;  %11087 = vmatmul.mubr.msk.f32.gmra.mrb[74].mxu1 %vm336_vm1, %v15535_v11 }
 0x729   : > { %7064 = vmatprep.mubr.f32.mxu0 %v12822_v8  ;;  %7489 = vmatprep.mubr.f32.mxu1 %v12822_v8 }
 0x72c   : > { %11026 = vmatmul.mubr.msk.f32.gmra.mrb[16].mxu0 %vm336_vm1, %v15533_v10  ;;  %11088 = vmatmul.mubr.msk.f32.gmra.mrb[76].mxu1 %vm336_vm1, %v15533_v10 }
 0x72d   : > { %7070 = vmatprep.mubr.f32.mxu0 %v12822_v8  ;;  %7495 = vmatprep.mubr.f32.mxu1 %v12822_v8 }
 0x730   : > { %11027 = vmatmul.mubr.msk.f32.gmra.mrb[18].mxu0 %vm336_vm1, %v15545_v13  ;;  %11089 = vmatmul.mubr.msk.f32.gmra.mrb[78].mxu1 %vm336_vm1, %v15545_v13 }
 0x731   : > { %7076 = vmatprep.mubr.f32.mxu0 %v12822_v8  ;;  %7501 = vmatprep.mubr.f32.mxu1 %v12822_v8 }
 0x734   : > { %11028 = vmatmul.mubr.msk.f32.gmra.mrb[20].mxu0 %vm336_vm1, %v15543_v12  ;;  %11090 = vmatmul.mubr.msk.f32.gmra.mrb[80].mxu1 %vm336_vm1, %v15543_v12 }
 0x735   : > { %7082 = vmatprep.mubr.f32.mxu0 %v12822_v8  ;;  %7507 = vmatprep.mubr.f32.mxu1 %v12822_v8 }
 0x738   : > { %11029 = vmatmul.mubr.msk.f32.gmra.mrb[22].mxu0 %vm336_vm1, %v15553_v15  ;;  %11091 = vmatmul.mubr.msk.f32.gmra.mrb[82].mxu1 %vm336_vm1, %v15553_v15  ;;  %v7863_v15 = vld [vmem:[#allocation3 + $0x30] sm:$0xff] }
 0x739   : > { %7088 = vmatprep.mubr.f32.mxu0 %v12822_v8  ;;  %7513 = vmatprep.mubr.f32.mxu1 %v12822_v8 }
 0x73c   : > { %11030 = vmatmul.mubr.msk.f32.gmra.mrb[24].mxu0 %vm336_vm1, %v15551_v14  ;;  %11092 = vmatmul.mubr.msk.f32.gmra.mrb[84].mxu1 %vm336_vm1, %v15551_v14  ;;  %v7862_v14 = vld [vmem:[#allocation3 + $0x28] sm:$0xff] }
 0x73d   : > { %7094 = vmatprep.mubr.f32.mxu0 %v12822_v8  ;;  %7519 = vmatprep.mubr.f32.mxu1 %v12822_v8 }
 0x740   : > { %11031 = vmatmul.mubr.msk.f32.gmra.mrb[26].mxu0 %vm336_vm1, %v15563_v19  ;;  %11093 = vmatmul.mubr.msk.f32.gmra.mrb[86].mxu1 %vm336_vm1, %v15563_v19 }
 0x741   : > { %7100 = vmatprep.mubr.f32.mxu0 %v12822_v8  ;;  %7525 = vmatprep.mubr.f32.mxu1 %v12822_v8 }
 0x744   : > { %11032 = vmatmul.mubr.msk.f32.gmra.mrb[28].mxu0 %vm336_vm1, %v15561_v17  ;;  %11094 = vmatmul.mubr.msk.f32.gmra.mrb[88].mxu1 %vm336_vm1, %v15561_v17 }
 0x745   : > { %7106 = vmatprep.mubr.f32.mxu0 %v12822_v8  ;;  %7531 = vmatprep.mubr.f32.mxu1 %v12822_v8 }
 0x748   : > { %11033 = vmatmul.mubr.msk.f32.gmra.mrb[30].mxu0 %vm336_vm1, %v15574_v22  ;;  %11095 = vmatmul.mubr.msk.f32.gmra.mrb[90].mxu1 %vm336_vm1, %v15574_v22  ;;  %v7865_v22 = vld [vmem:[#allocation3 + $0x40] sm:$0xff] }
 0x749   : > { %7112 = vmatprep.mubr.f32.mxu0 %v12822_v8  ;;  %7537 = vmatprep.mubr.f32.mxu1 %v12822_v8 }
 0x74c   : > { %11034 = vmatmul.mubr.msk.f32.gmra.mrb[32].mxu0 %vm336_vm1, %v15571_v21  ;;  %11096 = vmatmul.mubr.msk.f32.gmra.mrb[92].mxu1 %vm336_vm1, %v15571_v21  ;;  %v7864_v21 = vld [vmem:[#allocation3 + $0x38] sm:$0xff] }
 0x74d   : > { %7118 = vmatprep.mubr.f32.mxu0 %v12822_v8  ;;  %7543 = vmatprep.mubr.f32.mxu1 %v12822_v8 }
 0x750   : > { %11035 = vmatmul.mubr.msk.f32.gmra.mrb[34].mxu0 %vm336_vm1, %v15585_v24  ;;  %11097 = vmatmul.mubr.msk.f32.gmra.mrb[94].mxu1 %vm336_vm1, %v15585_v24 }
 0x751   : > { %7124 = vmatprep.mubr.f32.mxu0 %v12822_v8  ;;  %7549 = vmatprep.mubr.f32.mxu1 %v12822_v8 }
 0x754   : > { %11036 = vmatmul.mubr.msk.f32.gmra.mrb[36].mxu0 %vm336_vm1, %v15583_v23  ;;  %11098 = vmatmul.mubr.msk.f32.gmra.mrb[96].mxu1 %vm336_vm1, %v15583_v23 }
 0x755   : > { %7130 = vmatprep.mubr.f32.mxu0 %v12822_v8  ;;  %7555 = vmatprep.mubr.f32.mxu1 %v12822_v8 }
 0x758   : > { %11037 = vmatmul.mubr.msk.f32.gmra.mrb[38].mxu0 %vm336_vm1, %v15595_v26  ;;  %11099 = vmatmul.mubr.msk.f32.gmra.mrb[98].mxu1 %vm336_vm1, %v15595_v26 }
 0x759   : > { %7136 = vmatprep.mubr.f32.mxu0 %v12822_v8  ;;  %7561 = vmatprep.mubr.f32.mxu1 %v12822_v8 }
 0x75c   : > { %11038 = vmatmul.mubr.msk.f32.gmra.mrb[40].mxu0 %vm336_vm1, %v15593_v25  ;;  %11100 = vmatmul.mubr.msk.f32.gmra.mrb[100].mxu1 %vm336_vm1, %v15593_v25 }
 0x75d   : > { %7142 = vmatprep.mubr.f32.mxu0 %v12822_v8  ;;  %7567 = vmatprep.mubr.f32.mxu1 %v12822_v8 }
 0x760   : > { %11039 = vmatmul.mubr.msk.f32.gmra.mrb[42].mxu0 %vm336_vm1, %v15605_v28  ;;  %11101 = vmatmul.mubr.msk.f32.gmra.mrb[102].mxu1 %vm336_vm1, %v15605_v28  ;;  %v7867_v28 = vld [vmem:[#allocation3 + $0x50] sm:$0xff] }
 0x761   : > { %7148 = vmatprep.mubr.f32.mxu0 %v12822_v8  ;;  %7573 = vmatprep.mubr.f32.mxu1 %v12822_v8 }
 0x763   : > { %v6832_v38 = vpop.f32.mrb[194].mxu0  ;;  %v7257_v39 = vpop.f32.mrb[254].mxu1 }
 0x764   : > { %11109 = vst [vmem:[%s13464_s5 + $0x1680] sm:$0xff] %v6832_v38  ;;  %11111 = vst [vmem:[%s13464_s5 + $0x1690] sm:$0xff] %v7257_v39  ;;  %v6834_v40 = vpop.f32.mrb[195].mxu0  ;;  %11040 = vmatmul.mubr.msk.f32.gmra.mrb[44].mxu0 %vm336_vm1, %v15603_v27  ;;  %v7259_v41 = vpop.f32.mrb[255].mxu1  ;;  %11102 = vmatmul.mubr.msk.f32.gmra.mrb[104].mxu1 %vm336_vm1, %v15603_v27  ;;  %v7866_v27 = vld [vmem:[#allocation3 + $0x48] sm:$0xff] }
 0x765   : > { %11110 = vst [vmem:[%s13464_s5 + $0x1688] sm:$0xff] %v6834_v40  ;;  %11112 = vst.msk [vmem:[%s13464_s5 + $0x1698] sm:$0xff] %vm1933_vm2, %v7259_v41  ;;  %7154 = vmatprep.mubr.f32.mxu0 %v12822_v8  ;;  %7579 = vmatprep.mubr.f32.mxu1 %v12822_v8  ;;  %v7870_v40 = vld [vmem:[#allocation3 + $0x68] sm:$0xff]  ;;  %v7871_v41 = vld [vmem:[#allocation3 + $0x70] sm:$0xff] }
 0x767   : > { %v6838_v6 = vpop.f32.mrb[196].mxu0  ;;  %v7263_v20 = vpop.f32.mrb[0].mxu1 }
 0x768   : > { %11113 = vst [vmem:[%s13464_s5 + $0x16a0] sm:$0xff] %v6838_v6  ;;  %11115 = vst [vmem:[%s13464_s5 + $0x16b0] sm:$0xff] %v7263_v20  ;;  %v6840_v42 = vpop.f32.mrb[197].mxu0  ;;  %11041 = vmatmul.mubr.msk.f32.gmra.mrb[46].mxu0 %vm336_vm1, %v15615_v30  ;;  %v7265_v44 = vpop.f32.mrb[1].mxu1  ;;  %11103 = vmatmul.mubr.msk.f32.gmra.mrb[106].mxu1 %vm336_vm1, %v15615_v30 }
 0x769   : > { %11114 = vst [vmem:[%s13464_s5 + $0x16a8] sm:$0xff] %v6840_v42  ;;  %11116 = vst.msk [vmem:[%s13464_s5 + $0x16b8] sm:$0xff] %vm1933_vm2, %v7265_v44  ;;  %7160 = vmatprep.mubr.f32.mxu0 %v12822_v8  ;;  %7585 = vmatprep.mubr.f32.mxu1 %v12822_v8 }
 0x76b   : > { %v6844_v45 = vpop.f32.mrb[198].mxu0  ;;  %v7269_v46 = vpop.f32.mrb[2].mxu1 }
 0x76c   : > { %11117 = vst [vmem:[%s13464_s5 + $0x16c0] sm:$0xff] %v6844_v45  ;;  %11119 = vst [vmem:[%s13464_s5 + $0x16d0] sm:$0xff] %v7269_v46  ;;  %v6846_v7 = vpop.f32.mrb[199].mxu0  ;;  %11042 = vmatmul.mubr.msk.f32.gmra.mrb[48].mxu0 %vm336_vm1, %v15613_v29  ;;  %v7271_v47 = vpop.f32.mrb[3].mxu1  ;;  %11104 = vmatmul.mubr.msk.f32.gmra.mrb[108].mxu1 %vm336_vm1, %v15613_v29  ;;  %v7872_v45 = vld [vmem:[#allocation3 + $0x78] sm:$0xff]  ;;  %v7873_v46 = vld [vmem:[#allocation3 + $0x80] sm:$0xff] }
 0x76d   : > { %11118 = vst [vmem:[%s13464_s5 + $0x16c8] sm:$0xff] %v6846_v7  ;;  %11120 = vst.msk [vmem:[%s13464_s5 + $0x16d8] sm:$0xff] %vm1933_vm2, %v7271_v47  ;;  %7166 = vmatprep.mubr.f32.mxu0 %v12822_v8  ;;  %7591 = vmatprep.mubr.f32.mxu1 %v12822_v8 }
 0x76f   : > { %v6850_v48 = vpop.f32.mrb[200].mxu0  ;;  %v7275_v49 = vpop.f32.mrb[4].mxu1 }
 0x770   : > { %11121 = vst [vmem:[%s13464_s5 + $0x16e0] sm:$0xff] %v6850_v48  ;;  %11123 = vst [vmem:[%s13464_s5 + $0x16f0] sm:$0xff] %v7275_v49  ;;  %v6852_v50 = vpop.f32.mrb[201].mxu0  ;;  %11043 = vmatmul.mubr.msk.f32.gmra.mrb[50].mxu0 %vm336_vm1, %v15625_v33  ;;  %v7277_v51 = vpop.f32.mrb[5].mxu1  ;;  %11105 = vmatmul.mubr.msk.f32.gmra.mrb[110].mxu1 %vm336_vm1, %v15625_v33 }
 0x771   : > { %11122 = vst [vmem:[%s13464_s5 + $0x16e8] sm:$0xff] %v6852_v50  ;;  %11124 = vst.msk [vmem:[%s13464_s5 + $0x16f8] sm:$0xff] %vm1933_vm2, %v7277_v51  ;;  %7172 = vmatprep.mubr.f32.mxu0 %v12822_v8  ;;  %7597 = vmatprep.mubr.f32.mxu1 %v12822_v8  ;;  %v7874_v50 = vld [vmem:[#allocation3 + $0x88] sm:$0xff]  ;;  %v7875_v51 = vld [vmem:[#allocation3 + $0x90] sm:$0xff] }
 0x773   : > { %v6856_v52 = vpop.f32.mrb[202].mxu0  ;;  %v7281_v32 = vpop.f32.mrb[6].mxu1 }
 0x774   : > { %11125 = vst [vmem:[%s13464_s5 + $0x1700] sm:$0xff] %v6856_v52  ;;  %11127 = vst [vmem:[%s13464_s5 + $0x1710] sm:$0xff] %v7281_v32  ;;  %v6858_v53 = vpop.f32.mrb[203].mxu0  ;;  %11044 = vmatmul.mubr.msk.f32.gmra.mrb[52].mxu0 %vm336_vm1, %v15623_v31  ;;  %v7283_v54 = vpop.f32.mrb[7].mxu1  ;;  %11106 = vmatmul.mubr.msk.f32.gmra.mrb[112].mxu1 %vm336_vm1, %v15623_v31 }
 0x775   : > { %11126 = vst [vmem:[%s13464_s5 + $0x1708] sm:$0xff] %v6858_v53  ;;  %11128 = vst.msk [vmem:[%s13464_s5 + $0x1718] sm:$0xff] %vm1933_vm2, %v7283_v54  ;;  %7178 = vmatprep.mubr.f32.mxu0 %v12822_v8  ;;  %7603 = vmatprep.mubr.f32.mxu1 %v12822_v8 }
 0x777   : > { %v6862_v55 = vpop.f32.mrb[204].mxu0  ;;  %v7287_v56 = vpop.f32.mrb[8].mxu1 }
 0x778   : > { %11129 = vst [vmem:[%s13464_s5 + $0x1720] sm:$0xff] %v6862_v55  ;;  %11131 = vst [vmem:[%s13464_s5 + $0x1730] sm:$0xff] %v7287_v56  ;;  %v6864_v57 = vpop.f32.mrb[205].mxu0  ;;  %11045 = vmatmul.mubr.msk.f32.gmra.mrb[54].mxu0 %vm336_vm1, %v15635_v35  ;;  %v7289_v58 = vpop.f32.mrb[9].mxu1  ;;  %11107 = vmatmul.mubr.msk.f32.gmra.mrb[114].mxu1 %vm336_vm1, %v15635_v35  ;;  %v7869_v35 = vld [vmem:[#allocation3 + $0x60] sm:$0xff]  ;;  %v7876_v55 = vld [vmem:[#allocation3 + $0x98] sm:$0xff] }
 0x779   : > { %11130 = vst [vmem:[%s13464_s5 + $0x1728] sm:$0xff] %v6864_v57  ;;  %11132 = vst.msk [vmem:[%s13464_s5 + $0x1738] sm:$0xff] %vm1933_vm2, %v7289_v58  ;;  %7184 = vmatprep.mubr.f32.mxu0 %v12822_v8  ;;  %7609 = vmatprep.mubr.f32.mxu1 %v12822_v8  ;;  %v7877_v56 = vld [vmem:[#allocation3 + $0xa0] sm:$0xff] }
 0x77b   : > { %v6868_v60 = vpop.f32.mrb[206].mxu0  ;;  %v7293_v61 = vpop.f32.mrb[10].mxu1 }
 0x77c   : > { %11133 = vst [vmem:[%s13464_s5 + $0x1740] sm:$0xff] %v6868_v60  ;;  %11135 = vst [vmem:[%s13464_s5 + $0x1750] sm:$0xff] %v7293_v61  ;;  %v6870_v62 = vpop.f32.mrb[207].mxu0  ;;  %11046 = vmatmul.mubr.msk.f32.gmra.mrb[56].mxu0 %vm336_vm1, %v15633_v34  ;;  %v7295_v63 = vpop.f32.mrb[11].mxu1  ;;  %11108 = vmatmul.mubr.msk.f32.gmra.mrb[116].mxu1 %vm336_vm1, %v15633_v34  ;;  %v7868_v34 = vld [vmem:[#allocation3 + $0x58] sm:$0xff]  ;;  %v7878_v61 = vld [vmem:[#allocation3 + $0xa8] sm:$0xff] }
 0x77d   : > { %11134 = vst [vmem:[%s13464_s5 + $0x1748] sm:$0xff] %v6870_v62  ;;  %11136 = vst.msk [vmem:[%s13464_s5 + $0x1758] sm:$0xff] %vm1933_vm2, %v7295_v63  ;;  %12454 = vmatprep.mubr.msk.f32.mxu0 %vm336_vm1, %v7857_v59  ;;  %8725 = vmatprep.mubr.f32.mxu1 %v12822_v8  ;;  %v7879_v62 = vld [vmem:[#allocation3 + $0xb0] sm:$0xff] }
 0x77f   : > { %v6874_v1 = vpop.f32.mrb[208].mxu0  ;;  %v7299_v2 = vpop.f32.mrb[12].mxu1 }
 0x780   : > { %11137 = vst [vmem:[%s13464_s5 + $0x1760] sm:$0xff] %v6874_v1  ;;  %11139 = vst [vmem:[%s13464_s5 + $0x1770] sm:$0xff] %v7299_v2  ;;  %v6876_v3 = vpop.f32.mrb[209].mxu0  ;;  %v7301_v4 = vpop.f32.mrb[13].mxu1  ;;  %12455 = vmatmul.mubr.msk.f32.vlgmr.msra.gmra.mrb[58].mxu0 %vm336_vm1, %v7858_v43  ;;  %v7880_v2 = vld [vmem:[#allocation3 + $0xb8] sm:$0xff] }
 0x781   : > { %11138 = vst [vmem:[%s13464_s5 + $0x1768] sm:$0xff] %v6876_v3  ;;  %11140 = vst.msk [vmem:[%s13464_s5 + $0x1778] sm:$0xff] %vm1933_vm2, %v7301_v4  ;;  %12457 = vmatprep.mubr.msk.f32.mxu0 %vm336_vm1, %v7859_v0  ;;  %11474 = vmatpush1.msk.msra.mxu0 %vm517_vm0, %v15775_v36  ;;  %v7881_v3 = vld [vmem:[#allocation3 + $0xc0] sm:$0xff] }
 0x783   : > { %v6880_v10 = vpop.f32.mrb[210].mxu0  ;;  %v7305_v11 = vpop.f32.mrb[14].mxu1 }
 0x784   : > { %11141 = vst [vmem:[%s13464_s5 + $0x1780] sm:$0xff] %v6880_v10  ;;  %11143 = vst [vmem:[%s13464_s5 + $0x1790] sm:$0xff] %v7305_v11  ;;  %v6882_v12 = vpop.f32.mrb[211].mxu0  ;;  %v7307_v13 = vpop.f32.mrb[15].mxu1  ;;  %12458 = vmatmul.mubr.msk.f32.gmra.mrb[60].mxu0 %vm336_vm1, %v7860_v5  ;;  %v7882_v11 = vld [vmem:[#allocation3 + $0xc8] sm:$0xff] }
 0x785   : > { %11142 = vst [vmem:[%s13464_s5 + $0x1788] sm:$0xff] %v6882_v12  ;;  %11144 = vst.msk [vmem:[%s13464_s5 + $0x1798] sm:$0xff] %vm1933_vm2, %v7307_v13  ;;  %12460 = vmatprep.mubr.msk.f32.mxu0 %vm336_vm1, %v7861_v9  ;;  %v7883_v12 = vld [vmem:[#allocation3 + $0xd0] sm:$0xff] }
 0x787   : > { %v6886_v16 = vpop.f32.mrb[212].mxu0  ;;  %v7311_v17 = vpop.f32.mrb[16].mxu1 }
 0x788   : > { %11145 = vst [vmem:[%s13464_s5 + $0x17a0] sm:$0xff] %v6886_v16  ;;  %11147 = vst [vmem:[%s13464_s5 + $0x17b0] sm:$0xff] %v7311_v17  ;;  %v6888_v18 = vpop.f32.mrb[213].mxu0  ;;  %v7313_v19 = vpop.f32.mrb[17].mxu1  ;;  %12461 = vmatmul.mubr.msk.f32.gmra.mrb[62].mxu0 %vm336_vm1, %v7862_v14  ;;  %v7884_v17 = vld [vmem:[#allocation3 + $0xd8] sm:$0xff] }
 0x789   : > { %11146 = vst [vmem:[%s13464_s5 + $0x17a8] sm:$0xff] %v6888_v18  ;;  %11148 = vst.msk [vmem:[%s13464_s5 + $0x17b8] sm:$0xff] %vm1933_vm2, %v7313_v19  ;;  %12463 = vmatprep.mubr.msk.f32.mxu0 %vm336_vm1, %v7863_v15  ;;  %v7885_v18 = vld [vmem:[#allocation3 + $0xe0] sm:$0xff] }
 0x78b   : > { %v6892_v23 = vpop.f32.mrb[214].mxu0  ;;  %v7317_v24 = vpop.f32.mrb[18].mxu1 }
 0x78c   : > { %11149 = vst [vmem:[%s13464_s5 + $0x17c0] sm:$0xff] %v6892_v23  ;;  %11151 = vst [vmem:[%s13464_s5 + $0x17d0] sm:$0xff] %v7317_v24  ;;  %v6894_v25 = vpop.f32.mrb[215].mxu0  ;;  %v7319_v26 = vpop.f32.mrb[19].mxu1  ;;  %12464 = vmatmul.mubr.msk.f32.gmra.mrb[64].mxu0 %vm336_vm1, %v7864_v21  ;;  %v7886_v24 = vld [vmem:[#allocation3 + $0xe8] sm:$0xff] }
 0x78d   : > { %11150 = vst [vmem:[%s13464_s5 + $0x17c8] sm:$0xff] %v6894_v25  ;;  %11152 = vst.msk [vmem:[%s13464_s5 + $0x17d8] sm:$0xff] %vm1933_vm2, %v7319_v26  ;;  %12466 = vmatprep.mubr.msk.f32.mxu0 %vm336_vm1, %v7865_v22  ;;  %v7887_v25 = vld [vmem:[#allocation3 + $0xf0] sm:$0xff] }
 0x78f   : > { %v6898_v29 = vpop.f32.mrb[216].mxu0  ;;  %v7323_v30 = vpop.f32.mrb[20].mxu1 }
 0x790   : > { %11153 = vst [vmem:[%s13464_s5 + $0x17e0] sm:$0xff] %v6898_v29  ;;  %11155 = vst [vmem:[%s13464_s5 + $0x17f0] sm:$0xff] %v7323_v30  ;;  %v6900_v31 = vpop.f32.mrb[217].mxu0  ;;  %v7325_v33 = vpop.f32.mrb[21].mxu1  ;;  %12467 = vmatmul.mubr.msk.f32.gmra.mrb[66].mxu0 %vm336_vm1, %v7866_v27  ;;  %v7888_v30 = vld [vmem:[#allocation3 + $0xf8] sm:$0xff] }
 0x791   : > { %11154 = vst [vmem:[%s13464_s5 + $0x17e8] sm:$0xff] %v6900_v31  ;;  %11156 = vst.msk [vmem:[%s13464_s5 + $0x17f8] sm:$0xff] %vm1933_vm2, %v7325_v33  ;;  %12469 = vmatprep.mubr.msk.f32.mxu0 %vm336_vm1, %v7867_v28  ;;  %v7889_v31 = vld [vmem:[#allocation3 + $0x100] sm:$0xff] }
 0x793   : > { %v6904_v36 = vpop.f32.mrb[218].mxu0  ;;  %v7329_v37 = vpop.f32.mrb[22].mxu1 }
 0x794   : > { %11157 = vst [vmem:[%s13464_s5 + $0x1800] sm:$0xff] %v6904_v36  ;;  %11159 = vst [vmem:[%s13464_s5 + $0x1810] sm:$0xff] %v7329_v37  ;;  %v6906_v38 = vpop.f32.mrb[219].mxu0  ;;  %v7331_v39 = vpop.f32.mrb[23].mxu1  ;;  %12470 = vmatmul.mubr.msk.f32.gmra.mrb[68].mxu0 %vm336_vm1, %v7868_v34  ;;  %v7890_v37 = vld [vmem:[#allocation3 + $0x108] sm:$0xff] }
 0x795   : > { %11158 = vst [vmem:[%s13464_s5 + $0x1808] sm:$0xff] %v6906_v38  ;;  %11160 = vst.msk [vmem:[%s13464_s5 + $0x1818] sm:$0xff] %vm1933_vm2, %v7331_v39  ;;  %12472 = vmatprep.mubr.msk.f32.mxu0 %vm336_vm1, %v7869_v35  ;;  %v7891_v38 = vld [vmem:[#allocation3 + $0x110] sm:$0xff] }
 0x797   : > { %v6910_v6 = vpop.f32.mrb[220].mxu0  ;;  %v7335_v20 = vpop.f32.mrb[24].mxu1 }
 0x798   : > { %11161 = vst [vmem:[%s13464_s5 + $0x1820] sm:$0xff] %v6910_v6  ;;  %11163 = vst [vmem:[%s13464_s5 + $0x1830] sm:$0xff] %v7335_v20  ;;  %v6912_v42 = vpop.f32.mrb[221].mxu0  ;;  %v7337_v44 = vpop.f32.mrb[25].mxu1  ;;  %12473 = vmatmul.mubr.msk.f32.gmra.mrb[70].mxu0 %vm336_vm1, %v7870_v40  ;;  %v7892_v20 = vld [vmem:[#allocation3 + $0x118] sm:$0xff] }
 0x799   : > { %11162 = vst [vmem:[%s13464_s5 + $0x1828] sm:$0xff] %v6912_v42  ;;  %11164 = vst.msk [vmem:[%s13464_s5 + $0x1838] sm:$0xff] %vm1933_vm2, %v7337_v44  ;;  %12475 = vmatprep.mubr.msk.f32.mxu0 %vm336_vm1, %v7871_v41  ;;  %v7893_v42 = vld [vmem:[#allocation3 + $0x120] sm:$0xff] }
 0x79b   : > { %v6916_v7 = vpop.f32.mrb[222].mxu0  ;;  %v7341_v47 = vpop.f32.mrb[26].mxu1 }
 0x79c   : > { %11165 = vst [vmem:[%s13464_s5 + $0x1840] sm:$0xff] %v6916_v7  ;;  %11167 = vst [vmem:[%s13464_s5 + $0x1850] sm:$0xff] %v7341_v47  ;;  %v6918_v48 = vpop.f32.mrb[223].mxu0  ;;  %v7343_v49 = vpop.f32.mrb[27].mxu1  ;;  %12476 = vmatmul.mubr.msk.f32.gmra.mrb[72].mxu0 %vm336_vm1, %v7872_v45  ;;  %v7894_v47 = vld [vmem:[#allocation3 + $0x128] sm:$0xff] }
 0x79d   : > { %11166 = vst [vmem:[%s13464_s5 + $0x1848] sm:$0xff] %v6918_v48  ;;  %11168 = vst.msk [vmem:[%s13464_s5 + $0x1858] sm:$0xff] %vm1933_vm2, %v7343_v49  ;;  %12478 = vmatprep.mubr.msk.f32.mxu0 %vm336_vm1, %v7873_v46  ;;  %v7895_v48 = vld [vmem:[#allocation3 + $0x130] sm:$0xff] }
 0x79f   : > { %v6922_v52 = vpop.f32.mrb[224].mxu0  ;;  %v7347_v32 = vpop.f32.mrb[28].mxu1 }
 0x7a0   : > { %11169 = vst [vmem:[%s13464_s5 + $0x1860] sm:$0xff] %v6922_v52  ;;  %11171 = vst [vmem:[%s13464_s5 + $0x1870] sm:$0xff] %v7347_v32  ;;  %v6924_v53 = vpop.f32.mrb[225].mxu0  ;;  %v7349_v54 = vpop.f32.mrb[29].mxu1  ;;  %12479 = vmatmul.mubr.msk.f32.gmra.mrb[74].mxu0 %vm336_vm1, %v7874_v50  ;;  %v7896_v32 = vld [vmem:[#allocation3 + $0x138] sm:$0xff] }
 0x7a1   : > { %11170 = vst [vmem:[%s13464_s5 + $0x1868] sm:$0xff] %v6924_v53  ;;  %11172 = vst.msk [vmem:[%s13464_s5 + $0x1878] sm:$0xff] %vm1933_vm2, %v7349_v54  ;;  %12481 = vmatprep.mubr.msk.f32.mxu0 %vm336_vm1, %v7875_v51  ;;  %v7897_v53 = vld [vmem:[#allocation3 + $0x140] sm:$0xff] }
 0x7a3   : > { %v6928_v57 = vpop.f32.mrb[226].mxu0  ;;  %v7353_v58 = vpop.f32.mrb[30].mxu1 }
 0x7a4   : > { %11173 = vst [vmem:[%s13464_s5 + $0x1880] sm:$0xff] %v6928_v57  ;;  %11175 = vst [vmem:[%s13464_s5 + $0x1890] sm:$0xff] %v7353_v58  ;;  %v6930_v59 = vpop.f32.mrb[227].mxu0  ;;  %v7355_v60 = vpop.f32.mrb[31].mxu1  ;;  %12482 = vmatmul.mubr.msk.f32.gmra.mrb[76].mxu0 %vm336_vm1, %v7876_v55  ;;  %v7898_v58 = vld [vmem:[#allocation3 + $0x148] sm:$0xff] }
 0x7a5   : > { %11174 = vst [vmem:[%s13464_s5 + $0x1888] sm:$0xff] %v6930_v59  ;;  %11176 = vst.msk [vmem:[%s13464_s5 + $0x1898] sm:$0xff] %vm1933_vm2, %v7355_v60  ;;  %12484 = vmatprep.mubr.msk.f32.mxu0 %vm336_vm1, %v7877_v56  ;;  %v7899_v59 = vld [vmem:[#allocation3 + $0x150] sm:$0xff] }
 0x7a7   : > { %v6934_v63 = vpop.f32.mrb[228].mxu0  ;;  %v7359_v43 = vpop.f32.mrb[32].mxu1 }
 0x7a8   : > { %11177 = vst [vmem:[%s13464_s5 + $0x18a0] sm:$0xff] %v6934_v63  ;;  %11179 = vst [vmem:[%s13464_s5 + $0x18b0] sm:$0xff] %v7359_v43  ;;  %v6936_v0 = vpop.f32.mrb[229].mxu0  ;;  %v7361_v1 = vpop.f32.mrb[33].mxu1  ;;  %12485 = vmatmul.mubr.msk.f32.gmra.mrb[78].mxu0 %vm336_vm1, %v7878_v61  ;;  %v7900_v43 = vld [vmem:[#allocation3 + $0x158] sm:$0xff] }
 0x7a9   : > { %11178 = vst [vmem:[%s13464_s5 + $0x18a8] sm:$0xff] %v6936_v0  ;;  %11180 = vst.msk [vmem:[%s13464_s5 + $0x18b8] sm:$0xff] %vm1933_vm2, %v7361_v1  ;;  %12487 = vmatprep.mubr.msk.f32.mxu0 %vm336_vm1, %v7879_v62  ;;  %v7901_v0 = vld [vmem:[#allocation3 + $0x160] sm:$0xff] }
 0x7ab   : > { %v6940_v4 = vpop.f32.mrb[230].mxu0  ;;  %v7365_v5 = vpop.f32.mrb[34].mxu1 }
 0x7ac   : > { %11181 = vst [vmem:[%s13464_s5 + $0x18c0] sm:$0xff] %v6940_v4  ;;  %11183 = vst [vmem:[%s13464_s5 + $0x18d0] sm:$0xff] %v7365_v5  ;;  %v6942_v9 = vpop.f32.mrb[231].mxu0  ;;  %v7367_v10 = vpop.f32.mrb[35].mxu1  ;;  %12488 = vmatmul.mubr.msk.f32.gmra.mrb[80].mxu0 %vm336_vm1, %v7880_v2  ;;  %v7902_v5 = vld [vmem:[#allocation3 + $0x168] sm:$0xff] }
 0x7ad   : > { %11182 = vst [vmem:[%s13464_s5 + $0x18c8] sm:$0xff] %v6942_v9  ;;  %11184 = vst.msk [vmem:[%s13464_s5 + $0x18d8] sm:$0xff] %vm1933_vm2, %v7367_v10  ;;  %12490 = vmatprep.mubr.msk.f32.mxu0 %vm336_vm1, %v7881_v3  ;;  %v7903_v9 = vld [vmem:[#allocation3 + $0x170] sm:$0xff] }
 0x7af   : > { %v6946_v13 = vpop.f32.mrb[232].mxu0  ;;  %v7371_v14 = vpop.f32.mrb[36].mxu1 }
 0x7b0   : > { %11185 = vst [vmem:[%s13464_s5 + $0x18e0] sm:$0xff] %v6946_v13  ;;  %11187 = vst [vmem:[%s13464_s5 + $0x18f0] sm:$0xff] %v7371_v14  ;;  %v6948_v15 = vpop.f32.mrb[233].mxu0  ;;  %v7373_v16 = vpop.f32.mrb[37].mxu1  ;;  %12491 = vmatmul.mubr.msk.f32.gmra.mrb[82].mxu0 %vm336_vm1, %v7882_v11  ;;  %v7904_v14 = vld [vmem:[#allocation3 + $0x178] sm:$0xff] }
 0x7b1   : > { %11186 = vst [vmem:[%s13464_s5 + $0x18e8] sm:$0xff] %v6948_v15  ;;  %11188 = vst.msk [vmem:[%s13464_s5 + $0x18f8] sm:$0xff] %vm1933_vm2, %v7373_v16  ;;  %12493 = vmatprep.mubr.msk.f32.mxu0 %vm336_vm1, %v7883_v12  ;;  %v7905_v15 = vld [vmem:[#allocation3 + $0x180] sm:$0xff] }
 0x7b3   : > { %v6952_v19 = vpop.f32.mrb[234].mxu0  ;;  %v7377_v21 = vpop.f32.mrb[38].mxu1 }
 0x7b4   : > { %11189 = vst [vmem:[%s13464_s5 + $0x1900] sm:$0xff] %v6952_v19  ;;  %11191 = vst [vmem:[%s13464_s5 + $0x1910] sm:$0xff] %v7377_v21  ;;  %v6954_v22 = vpop.f32.mrb[235].mxu0  ;;  %v7379_v23 = vpop.f32.mrb[39].mxu1  ;;  %12494 = vmatmul.mubr.msk.f32.gmra.mrb[84].mxu0 %vm336_vm1, %v7884_v17  ;;  %v7906_v21 = vld [vmem:[#allocation3 + $0x188] sm:$0xff] }
 0x7b5   : > { %11190 = vst [vmem:[%s13464_s5 + $0x1908] sm:$0xff] %v6954_v22  ;;  %11192 = vst.msk [vmem:[%s13464_s5 + $0x1918] sm:$0xff] %vm1933_vm2, %v7379_v23  ;;  %12496 = vmatprep.mubr.msk.f32.mxu0 %vm336_vm1, %v7885_v18  ;;  %v7907_v22 = vld [vmem:[#allocation3 + $0x190] sm:$0xff] }
 0x7b7   : > { %v6958_v26 = vpop.f32.mrb[236].mxu0  ;;  %v7383_v27 = vpop.f32.mrb[40].mxu1 }
 0x7b8   : > { %11193 = vst [vmem:[%s13464_s5 + $0x1920] sm:$0xff] %v6958_v26  ;;  %11195 = vst [vmem:[%s13464_s5 + $0x1930] sm:$0xff] %v7383_v27  ;;  %v6960_v28 = vpop.f32.mrb[237].mxu0  ;;  %v7385_v29 = vpop.f32.mrb[41].mxu1  ;;  %12497 = vmatmul.mubr.msk.f32.gmra.mrb[86].mxu0 %vm336_vm1, %v7886_v24  ;;  %v7908_v27 = vld [vmem:[#allocation3 + $0x198] sm:$0xff] }
 0x7b9   : > { %11194 = vst [vmem:[%s13464_s5 + $0x1928] sm:$0xff] %v6960_v28  ;;  %11196 = vst.msk [vmem:[%s13464_s5 + $0x1938] sm:$0xff] %vm1933_vm2, %v7385_v29  ;;  %12499 = vmatprep.mubr.msk.f32.mxu0 %vm336_vm1, %v7887_v25  ;;  %v7909_v28 = vld [vmem:[#allocation3 + $0x1a0] sm:$0xff] }
 0x7bb   : > { %v6964_v33 = vpop.f32.mrb[238].mxu0  ;;  %v7389_v34 = vpop.f32.mrb[42].mxu1 }
 0x7bc   : > { %11197 = vst [vmem:[%s13464_s5 + $0x1940] sm:$0xff] %v6964_v33  ;;  %11199 = vst [vmem:[%s13464_s5 + $0x1950] sm:$0xff] %v7389_v34  ;;  %v6966_v35 = vpop.f32.mrb[239].mxu0  ;;  %v7391_v36 = vpop.f32.mrb[43].mxu1  ;;  %12500 = vmatmul.mubr.msk.f32.gmra.mrb[88].mxu0 %vm336_vm1, %v7888_v30  ;;  %v7910_v34 = vld [vmem:[#allocation3 + $0x1a8] sm:$0xff] }
 0x7bd   : > { %11198 = vst [vmem:[%s13464_s5 + $0x1948] sm:$0xff] %v6966_v35  ;;  %11200 = vst.msk [vmem:[%s13464_s5 + $0x1958] sm:$0xff] %vm1933_vm2, %v7391_v36  ;;  %12502 = vmatprep.mubr.msk.f32.mxu0 %vm336_vm1, %v7889_v31  ;;  %v7911_v35 = vld [vmem:[#allocation3 + $0x1b0] sm:$0xff] }
 0x7bf   : > { %v6970_v39 = vpop.f32.mrb[240].mxu0  ;;  %v7395_v40 = vpop.f32.mrb[44].mxu1 }
 0x7c0   : > { %11201 = vst [vmem:[%s13464_s5 + $0x1960] sm:$0xff] %v6970_v39  ;;  %11203 = vst [vmem:[%s13464_s5 + $0x1970] sm:$0xff] %v7395_v40  ;;  %v6972_v41 = vpop.f32.mrb[241].mxu0  ;;  %v7397_v6 = vpop.f32.mrb[45].mxu1  ;;  %12503 = vmatmul.mubr.msk.f32.gmra.mrb[90].mxu0 %vm336_vm1, %v7890_v37  ;;  %v7912_v40 = vld [vmem:[#allocation3 + $0x1b8] sm:$0xff] }
 0x7c1   : > { %11202 = vst [vmem:[%s13464_s5 + $0x1968] sm:$0xff] %v6972_v41  ;;  %11204 = vst.msk [vmem:[%s13464_s5 + $0x1978] sm:$0xff] %vm1933_vm2, %v7397_v6  ;;  %12505 = vmatprep.mubr.msk.f32.mxu0 %vm336_vm1, %v7891_v38  ;;  %v7913_v41 = vld [vmem:[#allocation3 + $0x1c0] sm:$0xff] }
 0x7c3   : > { %v6976_v44 = vpop.f32.mrb[242].mxu0  ;;  %v7401_v45 = vpop.f32.mrb[46].mxu1 }
 0x7c4   : > { %11205 = vst [vmem:[%s13464_s5 + $0x1980] sm:$0xff] %v6976_v44  ;;  %11207 = vst [vmem:[%s13464_s5 + $0x1990] sm:$0xff] %v7401_v45  ;;  %v6978_v46 = vpop.f32.mrb[243].mxu0  ;;  %v7403_v7 = vpop.f32.mrb[47].mxu1  ;;  %12506 = vmatmul.mubr.msk.f32.gmra.mrb[92].mxu0 %vm336_vm1, %v7892_v20  ;;  %v7914_v45 = vld [vmem:[#allocation3 + $0x1c8] sm:$0xff] }
 0x7c5   : > { %11206 = vst [vmem:[%s13464_s5 + $0x1988] sm:$0xff] %v6978_v46  ;;  %11208 = vst.msk [vmem:[%s13464_s5 + $0x1998] sm:$0xff] %vm1933_vm2, %v7403_v7  ;;  %12508 = vmatprep.mubr.msk.f32.mxu0 %vm336_vm1, %v7893_v42  ;;  %v7915_v46 = vld [vmem:[#allocation3 + $0x1d0] sm:$0xff] }
 0x7c7   : > { %v6982_v49 = vpop.f32.mrb[244].mxu0  ;;  %v7407_v50 = vpop.f32.mrb[48].mxu1 }
 0x7c8   : > { %11209 = vst [vmem:[%s13464_s5 + $0x19a0] sm:$0xff] %v6982_v49  ;;  %11211 = vst [vmem:[%s13464_s5 + $0x19b0] sm:$0xff] %v7407_v50  ;;  %v6984_v51 = vpop.f32.mrb[245].mxu0  ;;  %v7409_v52 = vpop.f32.mrb[49].mxu1  ;;  %12509 = vmatmul.mubr.msk.f32.gmra.mrb[94].mxu0 %vm336_vm1, %v7894_v47  ;;  %v7916_v50 = vld [vmem:[#allocation3 + $0x1d8] sm:$0x1] }
 0x7c9   : > { %11210 = vst [vmem:[%s13464_s5 + $0x19a8] sm:$0xff] %v6984_v51  ;;  %11212 = vst.msk [vmem:[%s13464_s5 + $0x19b8] sm:$0xff] %vm1933_vm2, %v7409_v52  ;;  %12511 = vmatprep.mubr.msk.f32.mxu0 %vm336_vm1, %v7895_v48 }
 0x7cb   : > { %v6988_v54 = vpop.f32.mrb[246].mxu0  ;;  %v7413_v55 = vpop.f32.mrb[50].mxu1 }
 0x7cc   : > { %11213 = vst [vmem:[%s13464_s5 + $0x19c0] sm:$0xff] %v6988_v54  ;;  %11215 = vst [vmem:[%s13464_s5 + $0x19d0] sm:$0xff] %v7413_v55  ;;  %v6990_v56 = vpop.f32.mrb[247].mxu0  ;;  %v7415_v57 = vpop.f32.mrb[51].mxu1  ;;  %12512 = vmatmul.mubr.msk.f32.gmra.mrb[96].mxu0 %vm336_vm1, %v7896_v32 }
 0x7cd   : > { %11214 = vst [vmem:[%s13464_s5 + $0x19c8] sm:$0xff] %v6990_v56  ;;  %11216 = vst.msk [vmem:[%s13464_s5 + $0x19d8] sm:$0xff] %vm1933_vm2, %v7415_v57  ;;  %12514 = vmatprep.mubr.msk.f32.mxu0 %vm336_vm1, %v7897_v53 }
 0x7cf   : > { %v6994_v60 = vpop.f32.mrb[248].mxu0  ;;  %v7419_v61 = vpop.f32.mrb[52].mxu1 }
 0x7d0   : > { %11217 = vst [vmem:[%s13464_s5 + $0x19e0] sm:$0xff] %v6994_v60  ;;  %11219 = vst [vmem:[%s13464_s5 + $0x19f0] sm:$0xff] %v7419_v61  ;;  %v6996_v62 = vpop.f32.mrb[249].mxu0  ;;  %v7421_v63 = vpop.f32.mrb[53].mxu1  ;;  %12515 = vmatmul.mubr.msk.f32.gmra.mrb[98].mxu0 %vm336_vm1, %v7898_v58 }
 0x7d1   : > { %11218 = vst [vmem:[%s13464_s5 + $0x19e8] sm:$0xff] %v6996_v62  ;;  %11220 = vst.msk [vmem:[%s13464_s5 + $0x19f8] sm:$0xff] %vm1933_vm2, %v7421_v63  ;;  %12517 = vmatprep.mubr.msk.f32.mxu0 %vm336_vm1, %v7899_v59 }
 0x7d3   : > { %v7000_v1 = vpop.f32.mrb[250].mxu0  ;;  %v7425_v2 = vpop.f32.mrb[54].mxu1 }
 0x7d4   : > { %11221 = vst [vmem:[%s13464_s5 + $0x1a00] sm:$0xff] %v7000_v1  ;;  %11223 = vst [vmem:[%s13464_s5 + $0x1a10] sm:$0xff] %v7425_v2  ;;  %v7002_v3 = vpop.f32.mrb[251].mxu0  ;;  %v7427_v4 = vpop.f32.mrb[55].mxu1  ;;  %12518 = vmatmul.mubr.msk.f32.gmra.mrb[100].mxu0 %vm336_vm1, %v7900_v43 }
 0x7d5   : > { %11222 = vst [vmem:[%s13464_s5 + $0x1a08] sm:$0xff] %v7002_v3  ;;  %11224 = vst.msk [vmem:[%s13464_s5 + $0x1a18] sm:$0xff] %vm1933_vm2, %v7427_v4  ;;  %12520 = vmatprep.mubr.msk.f32.mxu0 %vm336_vm1, %v7901_v0 }
 0x7d7   : > { %v7006_v10 = vpop.f32.mrb[252].mxu0  ;;  %v7431_v11 = vpop.f32.mrb[56].mxu1 }
 0x7d8   : > { %11225 = vst [vmem:[%s13464_s5 + $0x1a20] sm:$0xff] %v7006_v10  ;;  %11227 = vst [vmem:[%s13464_s5 + $0x1a30] sm:$0xff] %v7431_v11  ;;  %v7008_v12 = vpop.f32.mrb[253].mxu0  ;;  %v7433_v13 = vpop.f32.mrb[57].mxu1  ;;  %12521 = vmatmul.mubr.msk.f32.gmra.mrb[102].mxu0 %vm336_vm1, %v7902_v5 }
 0x7d9   : > { %11226 = vst [vmem:[%s13464_s5 + $0x1a28] sm:$0xff] %v7008_v12  ;;  %11228 = vst.msk [vmem:[%s13464_s5 + $0x1a38] sm:$0xff] %vm1933_vm2, %v7433_v13  ;;  %12523 = vmatprep.mubr.msk.f32.mxu0 %vm336_vm1, %v7903_v9 }
 0x7db   : > { %v7012_v16 = vpop.f32.mrb[254].mxu0  ;;  %v7437_v17 = vpop.f32.mrb[58].mxu1 }
 0x7dc   : > { %11229 = vst [vmem:[%s13464_s5 + $0x1a40] sm:$0xff] %v7012_v16  ;;  %11231 = vst [vmem:[%s13464_s5 + $0x1a50] sm:$0xff] %v7437_v17  ;;  %v7014_v18 = vpop.f32.mrb[255].mxu0  ;;  %v7439_v19 = vpop.f32.mrb[59].mxu1  ;;  %12524 = vmatmul.mubr.msk.f32.gmra.mrb[104].mxu0 %vm336_vm1, %v7904_v14 }
 0x7dd   : > { %11230 = vst [vmem:[%s13464_s5 + $0x1a48] sm:$0xff] %v7014_v18  ;;  %11232 = vst.msk [vmem:[%s13464_s5 + $0x1a58] sm:$0xff] %vm1933_vm2, %v7439_v19  ;;  %12526 = vmatprep.mubr.msk.f32.mxu0 %vm336_vm1, %v7905_v15 }
 0x7df   : > { %v7018_v23 = vpop.f32.mrb[0].mxu0  ;;  %v7443_v24 = vpop.f32.mrb[60].mxu1 }
 0x7e0   : > { %11233 = vst [vmem:[%s13464_s5 + $0x1a60] sm:$0xff] %v7018_v23  ;;  %11235 = vst [vmem:[%s13464_s5 + $0x1a70] sm:$0xff] %v7443_v24  ;;  %v7020_v25 = vpop.f32.mrb[1].mxu0  ;;  %v7445_v26 = vpop.f32.mrb[61].mxu1  ;;  %12527 = vmatmul.mubr.msk.f32.gmra.mrb[106].mxu0 %vm336_vm1, %v7906_v21 }
 0x7e1   : > { %11234 = vst [vmem:[%s13464_s5 + $0x1a68] sm:$0xff] %v7020_v25  ;;  %11236 = vst.msk [vmem:[%s13464_s5 + $0x1a78] sm:$0xff] %vm1933_vm2, %v7445_v26  ;;  %12529 = vmatprep.mubr.msk.f32.mxu0 %vm336_vm1, %v7907_v22 }
 0x7e3   : > { %v7024_v29 = vpop.f32.mrb[2].mxu0  ;;  %v7449_v30 = vpop.f32.mrb[62].mxu1 }
 0x7e4   : > { %11237 = vst [vmem:[%s13464_s5 + $0x1a80] sm:$0xff] %v7024_v29  ;;  %11239 = vst [vmem:[%s13464_s5 + $0x1a90] sm:$0xff] %v7449_v30  ;;  %v7026_v31 = vpop.f32.mrb[3].mxu0  ;;  %v7451_v33 = vpop.f32.mrb[63].mxu1  ;;  %12530 = vmatmul.mubr.msk.f32.gmra.mrb[108].mxu0 %vm336_vm1, %v7908_v27 }
 0x7e5   : > { %11238 = vst [vmem:[%s13464_s5 + $0x1a88] sm:$0xff] %v7026_v31  ;;  %11240 = vst.msk [vmem:[%s13464_s5 + $0x1a98] sm:$0xff] %vm1933_vm2, %v7451_v33  ;;  %12532 = vmatprep.mubr.msk.f32.mxu0 %vm336_vm1, %v7909_v28 }
 0x7e7   : > { %v7030_v36 = vpop.f32.mrb[4].mxu0  ;;  %v7455_v37 = vpop.f32.mrb[64].mxu1 }
 0x7e8   : > { %11241 = vst [vmem:[%s13464_s5 + $0x1aa0] sm:$0xff] %v7030_v36  ;;  %11243 = vst [vmem:[%s13464_s5 + $0x1ab0] sm:$0xff] %v7455_v37  ;;  %v7032_v38 = vpop.f32.mrb[5].mxu0  ;;  %v7457_v39 = vpop.f32.mrb[65].mxu1  ;;  %12533 = vmatmul.mubr.msk.f32.gmra.mrb[110].mxu0 %vm336_vm1, %v7910_v34 }
 0x7e9   : > { %11242 = vst [vmem:[%s13464_s5 + $0x1aa8] sm:$0xff] %v7032_v38  ;;  %11244 = vst.msk [vmem:[%s13464_s5 + $0x1ab8] sm:$0xff] %vm1933_vm2, %v7457_v39  ;;  %12535 = vmatprep.mubr.msk.f32.mxu0 %vm336_vm1, %v7911_v35 }
 0x7eb   : > { %v7036_v6 = vpop.f32.mrb[6].mxu0  ;;  %v7461_v20 = vpop.f32.mrb[66].mxu1 }
 0x7ec   : > { %11245 = vst [vmem:[%s13464_s5 + $0x1ac0] sm:$0xff] %v7036_v6  ;;  %11247 = vst [vmem:[%s13464_s5 + $0x1ad0] sm:$0xff] %v7461_v20  ;;  %v7038_v42 = vpop.f32.mrb[7].mxu0  ;;  %v7463_v44 = vpop.f32.mrb[67].mxu1  ;;  %12536 = vmatmul.mubr.msk.f32.gmra.mrb[112].mxu0 %vm336_vm1, %v7912_v40 }
 0x7ed   : > { %11246 = vst [vmem:[%s13464_s5 + $0x1ac8] sm:$0xff] %v7038_v42  ;;  %11248 = vst.msk [vmem:[%s13464_s5 + $0x1ad8] sm:$0xff] %vm1933_vm2, %v7463_v44  ;;  %12538 = vmatprep.mubr.msk.f32.mxu0 %vm336_vm1, %v7913_v41 }
 0x7ef   : > { %v7042_v7 = vpop.f32.mrb[8].mxu0  ;;  %v7467_v47 = vpop.f32.mrb[68].mxu1 }
 0x7f0   : > { %11249 = vst [vmem:[%s13464_s5 + $0x1ae0] sm:$0xff] %v7042_v7  ;;  %11251 = vst [vmem:[%s13464_s5 + $0x1af0] sm:$0xff] %v7467_v47  ;;  %v7044_v48 = vpop.f32.mrb[9].mxu0  ;;  %v7469_v49 = vpop.f32.mrb[69].mxu1  ;;  %12539 = vmatmul.mubr.msk.f32.gmra.mrb[114].mxu0 %vm336_vm1, %v7914_v45 }
 0x7f1   : > { %11250 = vst [vmem:[%s13464_s5 + $0x1ae8] sm:$0xff] %v7044_v48  ;;  %11252 = vst.msk [vmem:[%s13464_s5 + $0x1af8] sm:$0xff] %vm1933_vm2, %v7469_v49  ;;  %12541 = vmatprep.mubr.msk.f32.mxu0 %vm336_vm1, %v7915_v46 }
 0x7f3   : > { %v7048_v51 = vpop.f32.mrb[10].mxu0  ;;  %v7473_v52 = vpop.f32.mrb[70].mxu1 }
 0x7f4   : > { %11253 = vst [vmem:[%s13464_s5 + $0x1b00] sm:$0xff] %v7048_v51  ;;  %11255 = vst [vmem:[%s13464_s5 + $0x1b10] sm:$0xff] %v7473_v52  ;;  %v7050_v32 = vpop.f32.mrb[11].mxu0  ;;  %v7475_v53 = vpop.f32.mrb[71].mxu1  ;;  %12542 = vmatmul.mubr.msk.f32.gmra.mrb[116].mxu0 %vm336_vm1, %v7916_v50 }
 0x7f5   : > { %11254 = vst [vmem:[%s13464_s5 + $0x1b08] sm:$0xff] %v7050_v32  ;;  %11256 = vst.msk [vmem:[%s13464_s5 + $0x1b18] sm:$0xff] %vm1933_vm2, %v7475_v53  ;;  %9150 = vmatprep.mubr.f32.mxu0 %v12822_v8 }
 0x7f7   : > { %v7054_v54 = vpop.f32.mrb[12].mxu0  ;;  %v7479_v55 = vpop.f32.mrb[72].mxu1 }
 0x7f8   : > { %11257 = vst [vmem:[%s13464_s5 + $0x1b20] sm:$0xff] %v7054_v54  ;;  %11259 = vst [vmem:[%s13464_s5 + $0x1b30] sm:$0xff] %v7479_v55  ;;  %v7056_v56 = vpop.f32.mrb[13].mxu0  ;;  %v7481_v57 = vpop.f32.mrb[73].mxu1 }
 0x7f9   : > { %11258 = vst [vmem:[%s13464_s5 + $0x1b28] sm:$0xff] %v7056_v56  ;;  %11260 = vst.msk [vmem:[%s13464_s5 + $0x1b38] sm:$0xff] %vm1933_vm2, %v7481_v57 }
 0x7fb   : > { %v7060_v58 = vpop.f32.mrb[14].mxu0  ;;  %v7485_v59 = vpop.f32.mrb[74].mxu1 }
 0x7fc   : > { %11261 = vst [vmem:[%s13464_s5 + $0x1b40] sm:$0xff] %v7060_v58  ;;  %11263 = vst [vmem:[%s13464_s5 + $0x1b50] sm:$0xff] %v7485_v59  ;;  %v7062_v60 = vpop.f32.mrb[15].mxu0  ;;  %v7487_v61 = vpop.f32.mrb[75].mxu1 }
 0x7fd   : > { %11262 = vst [vmem:[%s13464_s5 + $0x1b48] sm:$0xff] %v7062_v60  ;;  %11264 = vst.msk [vmem:[%s13464_s5 + $0x1b58] sm:$0xff] %vm1933_vm2, %v7487_v61 }
 0x7ff   : > { %v7066_v62 = vpop.f32.mrb[16].mxu0  ;;  %v7491_v63 = vpop.f32.mrb[76].mxu1 }
 0x800   : > { %11265 = vst [vmem:[%s13464_s5 + $0x1b60] sm:$0xff] %v7066_v62  ;;  %11267 = vst [vmem:[%s13464_s5 + $0x1b70] sm:$0xff] %v7491_v63  ;;  %v7068_v43 = vpop.f32.mrb[17].mxu0  ;;  %v7493_v0 = vpop.f32.mrb[77].mxu1 }
 0x801   : > { %11266 = vst [vmem:[%s13464_s5 + $0x1b68] sm:$0xff] %v7068_v43  ;;  %11268 = vst.msk [vmem:[%s13464_s5 + $0x1b78] sm:$0xff] %vm1933_vm2, %v7493_v0 }
 0x803   : > { %v7072_v1 = vpop.f32.mrb[18].mxu0  ;;  %v7497_v2 = vpop.f32.mrb[78].mxu1 }
 0x804   : > { %11269 = vst [vmem:[%s13464_s5 + $0x1b80] sm:$0xff] %v7072_v1  ;;  %11271 = vst [vmem:[%s13464_s5 + $0x1b90] sm:$0xff] %v7497_v2  ;;  %v7074_v3 = vpop.f32.mrb[19].mxu0  ;;  %v7499_v4 = vpop.f32.mrb[79].mxu1 }
 0x805   : > { %11270 = vst [vmem:[%s13464_s5 + $0x1b88] sm:$0xff] %v7074_v3  ;;  %11272 = vst.msk [vmem:[%s13464_s5 + $0x1b98] sm:$0xff] %vm1933_vm2, %v7499_v4 }
 0x807   : > { %v7078_v5 = vpop.f32.mrb[20].mxu0  ;;  %v7503_v9 = vpop.f32.mrb[80].mxu1 }
 0x808   : > { %11273 = vst [vmem:[%s13464_s5 + $0x1ba0] sm:$0xff] %v7078_v5  ;;  %11275 = vst [vmem:[%s13464_s5 + $0x1bb0] sm:$0xff] %v7503_v9  ;;  %v7080_v10 = vpop.f32.mrb[21].mxu0  ;;  %v7505_v11 = vpop.f32.mrb[81].mxu1 }
 0x809   : > { %11274 = vst [vmem:[%s13464_s5 + $0x1ba8] sm:$0xff] %v7080_v10  ;;  %11276 = vst.msk [vmem:[%s13464_s5 + $0x1bb8] sm:$0xff] %vm1933_vm2, %v7505_v11 }
 0x80b   : > { %v7084_v12 = vpop.f32.mrb[22].mxu0  ;;  %v7509_v13 = vpop.f32.mrb[82].mxu1 }
 0x80c   : > { %11277 = vst [vmem:[%s13464_s5 + $0x1bc0] sm:$0xff] %v7084_v12  ;;  %11279 = vst [vmem:[%s13464_s5 + $0x1bd0] sm:$0xff] %v7509_v13  ;;  %v7086_v14 = vpop.f32.mrb[23].mxu0  ;;  %v7511_v15 = vpop.f32.mrb[83].mxu1 }
 0x80d   : > { %11278 = vst [vmem:[%s13464_s5 + $0x1bc8] sm:$0xff] %v7086_v14  ;;  %11280 = vst.msk [vmem:[%s13464_s5 + $0x1bd8] sm:$0xff] %vm1933_vm2, %v7511_v15 }
 0x80f   : > { %v7090_v16 = vpop.f32.mrb[24].mxu0  ;;  %v7515_v17 = vpop.f32.mrb[84].mxu1 }
 0x810   : > { %11281 = vst [vmem:[%s13464_s5 + $0x1be0] sm:$0xff] %v7090_v16  ;;  %11283 = vst [vmem:[%s13464_s5 + $0x1bf0] sm:$0xff] %v7515_v17  ;;  %v7092_v18 = vpop.f32.mrb[25].mxu0  ;;  %v7517_v19 = vpop.f32.mrb[85].mxu1 }
 0x811   : > { %11282 = vst [vmem:[%s13464_s5 + $0x1be8] sm:$0xff] %v7092_v18  ;;  %11284 = vst.msk [vmem:[%s13464_s5 + $0x1bf8] sm:$0xff] %vm1933_vm2, %v7517_v19 }
 0x813   : > { %v7096_v21 = vpop.f32.mrb[26].mxu0  ;;  %v7521_v22 = vpop.f32.mrb[86].mxu1 }
 0x814   : > { %11285 = vst [vmem:[%s13464_s5 + $0x1c00] sm:$0xff] %v7096_v21  ;;  %11287 = vst [vmem:[%s13464_s5 + $0x1c10] sm:$0xff] %v7521_v22  ;;  %v7098_v23 = vpop.f32.mrb[27].mxu0  ;;  %v7523_v24 = vpop.f32.mrb[87].mxu1 }
 0x815   : > { %11286 = vst [vmem:[%s13464_s5 + $0x1c08] sm:$0xff] %v7098_v23  ;;  %11288 = vst.msk [vmem:[%s13464_s5 + $0x1c18] sm:$0xff] %vm1933_vm2, %v7523_v24 }
 0x817   : > { %v7102_v25 = vpop.f32.mrb[28].mxu0  ;;  %v7527_v26 = vpop.f32.mrb[88].mxu1 }
 0x818   : > { %11289 = vst [vmem:[%s13464_s5 + $0x1c20] sm:$0xff] %v7102_v25  ;;  %11291 = vst [vmem:[%s13464_s5 + $0x1c30] sm:$0xff] %v7527_v26  ;;  %v7104_v27 = vpop.f32.mrb[29].mxu0  ;;  %v7529_v28 = vpop.f32.mrb[89].mxu1 }
 0x819   : > { %11290 = vst [vmem:[%s13464_s5 + $0x1c28] sm:$0xff] %v7104_v27  ;;  %11292 = vst.msk [vmem:[%s13464_s5 + $0x1c38] sm:$0xff] %vm1933_vm2, %v7529_v28 }
 0x81b   : > { %v7108_v29 = vpop.f32.mrb[30].mxu0  ;;  %v7533_v30 = vpop.f32.mrb[90].mxu1 }
 0x81c   : > { %11293 = vst [vmem:[%s13464_s5 + $0x1c40] sm:$0xff] %v7108_v29  ;;  %11295 = vst [vmem:[%s13464_s5 + $0x1c50] sm:$0xff] %v7533_v30  ;;  %v7110_v31 = vpop.f32.mrb[31].mxu0  ;;  %v7535_v33 = vpop.f32.mrb[91].mxu1 }
 0x81d   : > { %11294 = vst [vmem:[%s13464_s5 + $0x1c48] sm:$0xff] %v7110_v31  ;;  %11296 = vst.msk [vmem:[%s13464_s5 + $0x1c58] sm:$0xff] %vm1933_vm2, %v7535_v33 }
 0x81f   : > { %v7114_v34 = vpop.f32.mrb[32].mxu0  ;;  %v7539_v35 = vpop.f32.mrb[92].mxu1 }
 0x820   : > { %11297 = vst [vmem:[%s13464_s5 + $0x1c60] sm:$0xff] %v7114_v34  ;;  %11299 = vst [vmem:[%s13464_s5 + $0x1c70] sm:$0xff] %v7539_v35  ;;  %v7116_v36 = vpop.f32.mrb[33].mxu0  ;;  %v7541_v37 = vpop.f32.mrb[93].mxu1 }
 0x821   : > { %11298 = vst [vmem:[%s13464_s5 + $0x1c68] sm:$0xff] %v7116_v36  ;;  %11300 = vst.msk [vmem:[%s13464_s5 + $0x1c78] sm:$0xff] %vm1933_vm2, %v7541_v37 }
 0x823   : > { %v7120_v38 = vpop.f32.mrb[34].mxu0  ;;  %v7545_v39 = vpop.f32.mrb[94].mxu1 }
 0x824   : > { %11301 = vst [vmem:[%s13464_s5 + $0x1c80] sm:$0xff] %v7120_v38  ;;  %11303 = vst [vmem:[%s13464_s5 + $0x1c90] sm:$0xff] %v7545_v39  ;;  %v7122_v40 = vpop.f32.mrb[35].mxu0  ;;  %v7547_v41 = vpop.f32.mrb[95].mxu1 }
 0x825   : > { %11302 = vst [vmem:[%s13464_s5 + $0x1c88] sm:$0xff] %v7122_v40  ;;  %11304 = vst.msk [vmem:[%s13464_s5 + $0x1c98] sm:$0xff] %vm1933_vm2, %v7547_v41 }
 0x827   : > { %v7126_v6 = vpop.f32.mrb[36].mxu0  ;;  %v7551_v20 = vpop.f32.mrb[96].mxu1 }
 0x828   : > { %11305 = vst [vmem:[%s13464_s5 + $0x1ca0] sm:$0xff] %v7126_v6  ;;  %11307 = vst [vmem:[%s13464_s5 + $0x1cb0] sm:$0xff] %v7551_v20  ;;  %v7128_v42 = vpop.f32.mrb[37].mxu0  ;;  %v7553_v44 = vpop.f32.mrb[97].mxu1 }
 0x829   : > { %11306 = vst [vmem:[%s13464_s5 + $0x1ca8] sm:$0xff] %v7128_v42  ;;  %11308 = vst.msk [vmem:[%s13464_s5 + $0x1cb8] sm:$0xff] %vm1933_vm2, %v7553_v44 }
 0x82b   : > { %v7132_v45 = vpop.f32.mrb[38].mxu0  ;;  %v7557_v46 = vpop.f32.mrb[98].mxu1 }
 0x82c   : > { %11309 = vst [vmem:[%s13464_s5 + $0x1cc0] sm:$0xff] %v7132_v45  ;;  %11311 = vst [vmem:[%s13464_s5 + $0x1cd0] sm:$0xff] %v7557_v46  ;;  %v7134_v7 = vpop.f32.mrb[39].mxu0  ;;  %v7559_v47 = vpop.f32.mrb[99].mxu1 }
 0x82d   : > { %11310 = vst [vmem:[%s13464_s5 + $0x1cc8] sm:$0xff] %v7134_v7  ;;  %11312 = vst.msk [vmem:[%s13464_s5 + $0x1cd8] sm:$0xff] %vm1933_vm2, %v7559_v47 }
 0x82f   : > { %v7138_v48 = vpop.f32.mrb[40].mxu0  ;;  %v7563_v49 = vpop.f32.mrb[100].mxu1 }
 0x830   : > { %11313 = vst [vmem:[%s13464_s5 + $0x1ce0] sm:$0xff] %v7138_v48  ;;  %11315 = vst [vmem:[%s13464_s5 + $0x1cf0] sm:$0xff] %v7563_v49  ;;  %v7140_v50 = vpop.f32.mrb[41].mxu0  ;;  %v7565_v51 = vpop.f32.mrb[101].mxu1 }
 0x831   : > { %11314 = vst [vmem:[%s13464_s5 + $0x1ce8] sm:$0xff] %v7140_v50  ;;  %11316 = vst.msk [vmem:[%s13464_s5 + $0x1cf8] sm:$0xff] %vm1933_vm2, %v7565_v51 }
 0x833   : > { %v7144_v52 = vpop.f32.mrb[42].mxu0  ;;  %v7569_v32 = vpop.f32.mrb[102].mxu1 }
 0x834   : > { %11317 = vst [vmem:[%s13464_s5 + $0x1d00] sm:$0xff] %v7144_v52  ;;  %11319 = vst [vmem:[%s13464_s5 + $0x1d10] sm:$0xff] %v7569_v32  ;;  %v7146_v53 = vpop.f32.mrb[43].mxu0  ;;  %v7571_v54 = vpop.f32.mrb[103].mxu1 }
 0x835   : > { %11318 = vst [vmem:[%s13464_s5 + $0x1d08] sm:$0xff] %v7146_v53  ;;  %11320 = vst.msk [vmem:[%s13464_s5 + $0x1d18] sm:$0xff] %vm1933_vm2, %v7571_v54 }
 0x837   : > { %v7150_v55 = vpop.f32.mrb[44].mxu0  ;;  %v7575_v56 = vpop.f32.mrb[104].mxu1 }
 0x838   : > { %11321 = vst [vmem:[%s13464_s5 + $0x1d20] sm:$0xff] %v7150_v55  ;;  %11323 = vst [vmem:[%s13464_s5 + $0x1d30] sm:$0xff] %v7575_v56  ;;  %v7152_v57 = vpop.f32.mrb[45].mxu0  ;;  %v7577_v58 = vpop.f32.mrb[105].mxu1 }
 0x839   : > { %11322 = vst [vmem:[%s13464_s5 + $0x1d28] sm:$0xff] %v7152_v57  ;;  %11324 = vst.msk [vmem:[%s13464_s5 + $0x1d38] sm:$0xff] %vm1933_vm2, %v7577_v58 }
 0x83b   : > { %v7156_v59 = vpop.f32.mrb[46].mxu0  ;;  %v7581_v60 = vpop.f32.mrb[106].mxu1 }
 0x83c   : > { %11325 = vst [vmem:[%s13464_s5 + $0x1d40] sm:$0xff] %v7156_v59  ;;  %11327 = vst [vmem:[%s13464_s5 + $0x1d50] sm:$0xff] %v7581_v60  ;;  %v7158_v61 = vpop.f32.mrb[47].mxu0  ;;  %v7583_v62 = vpop.f32.mrb[107].mxu1 }
 0x83d   : > { %11326 = vst [vmem:[%s13464_s5 + $0x1d48] sm:$0xff] %v7158_v61  ;;  %11328 = vst.msk [vmem:[%s13464_s5 + $0x1d58] sm:$0xff] %vm1933_vm2, %v7583_v62 }
 0x83f   : > { %v7162_v63 = vpop.f32.mrb[48].mxu0  ;;  %v7587_v43 = vpop.f32.mrb[108].mxu1 }
 0x840   : > { %11329 = vst [vmem:[%s13464_s5 + $0x1d60] sm:$0xff] %v7162_v63  ;;  %11331 = vst [vmem:[%s13464_s5 + $0x1d70] sm:$0xff] %v7587_v43  ;;  %v7164_v0 = vpop.f32.mrb[49].mxu0  ;;  %v7589_v1 = vpop.f32.mrb[109].mxu1 }
 0x841   : > { %11330 = vst [vmem:[%s13464_s5 + $0x1d68] sm:$0xff] %v7164_v0  ;;  %11332 = vst.msk [vmem:[%s13464_s5 + $0x1d78] sm:$0xff] %vm1933_vm2, %v7589_v1 }
 0x843   : > { %v7168_v2 = vpop.f32.mrb[50].mxu0  ;;  %v7593_v3 = vpop.f32.mrb[110].mxu1 }
 0x844   : > { %11333 = vst [vmem:[%s13464_s5 + $0x1d80] sm:$0xff] %v7168_v2  ;;  %11335 = vst [vmem:[%s13464_s5 + $0x1d90] sm:$0xff] %v7593_v3  ;;  %v7170_v4 = vpop.f32.mrb[51].mxu0  ;;  %v7595_v5 = vpop.f32.mrb[111].mxu1 }
 0x845   : > { %11334 = vst [vmem:[%s13464_s5 + $0x1d88] sm:$0xff] %v7170_v4  ;;  %11336 = vst.msk [vmem:[%s13464_s5 + $0x1d98] sm:$0xff] %vm1933_vm2, %v7595_v5 }
 0x847   : > { %v7174_v9 = vpop.f32.mrb[52].mxu0  ;;  %v7599_v10 = vpop.f32.mrb[112].mxu1 }
 0x848   : > { %11337 = vst [vmem:[%s13464_s5 + $0x1da0] sm:$0xff] %v7174_v9  ;;  %11339 = vst [vmem:[%s13464_s5 + $0x1db0] sm:$0xff] %v7599_v10  ;;  %v7176_v11 = vpop.f32.mrb[53].mxu0  ;;  %v7601_v12 = vpop.f32.mrb[113].mxu1 }
 0x849   : > { %11338 = vst [vmem:[%s13464_s5 + $0x1da8] sm:$0xff] %v7176_v11  ;;  %11340 = vst.msk [vmem:[%s13464_s5 + $0x1db8] sm:$0xff] %vm1933_vm2, %v7601_v12 }
 0x84b   : > { %v7180_v13 = vpop.f32.mrb[54].mxu0  ;;  %v7605_v14 = vpop.f32.mrb[114].mxu1 }
 0x84c   : > { %11341 = vst [vmem:[%s13464_s5 + $0x1dc0] sm:$0xff] %v7180_v13  ;;  %11343 = vst [vmem:[%s13464_s5 + $0x1dd0] sm:$0xff] %v7605_v14  ;;  %v7182_v15 = vpop.f32.mrb[55].mxu0  ;;  %v7607_v16 = vpop.f32.mrb[115].mxu1 }
 0x84d   : > { %11342 = vst [vmem:[%s13464_s5 + $0x1dc8] sm:$0xff] %v7182_v15  ;;  %11344 = vst.msk [vmem:[%s13464_s5 + $0x1dd8] sm:$0xff] %vm1933_vm2, %v7607_v16 }
 0x84f   : > { %v7186_v17 = vpop.f32.mrb[56].mxu0  ;;  %v7611_v18 = vpop.f32.mrb[116].mxu1 }
 0x850   : > { %11345 = vst [vmem:[%s13464_s5 + $0x1de0] sm:$0x1] %v7186_v17  ;;  %11347 = vst [vmem:[%s13464_s5 + $0x1df0] sm:$0x1] %v7611_v18  ;;  %v7188_v19 = vpop.f32.mrb[57].mxu0  ;;  %v7613_v21 = vpop.f32.mrb[117].mxu1 }
 0x851   : > { %11346 = vst [vmem:[%s13464_s5 + $0x1de8] sm:$0x1] %v7188_v19  ;;  %11348 = vst.msk [vmem:[%s13464_s5 + $0x1df8] sm:$0x1] %vm2170_vm3, %v7613_v21 }
 0x853   : > { %v12456_v22 = vpop.f32.mrb[58].mxu0 }
 0x854   : > { %v8168_v23 = vpop.f32.mrb[59].mxu0 }
 0x855   : > { %11413 = vmatmul.mubr.msk.f32.vlgmr.msra.gmra.mrb[118].mxu1 %vm336_vm1, %v8168_v23  ;;  %11475 = vmatmul.mubr.msk.f32.vlgmr.msra.gmra.mrb[118].mxu0 %vm336_vm1, %v8168_v23 }
 0x856   : > { %8731 = vmatprep.mubr.f32.mxu1 %v12822_v8  ;;  %9156 = vmatprep.mubr.f32.mxu0 %v12822_v8 }
 0x857   : > { %v12459_v24 = vpop.f32.mrb[60].mxu0 }
 0x858   : > { %v8178_v25 = vpop.f32.mrb[61].mxu0 }
 0x859   : > { %11414 = vmatmul.mubr.msk.f32.gmra.mrb[120].mxu1 %vm336_vm1, %v12456_v22  ;;  %11476 = vmatmul.mubr.msk.f32.gmra.mrb[120].mxu0 %vm336_vm1, %v12456_v22 }
 0x85a   : > { %8737 = vmatprep.mubr.f32.mxu1 %v12822_v8  ;;  %9162 = vmatprep.mubr.f32.mxu0 %v12822_v8 }
 0x85b   : > { %v12462_v26 = vpop.f32.mrb[62].mxu0 }
 0x85c   : > { %v8188_v27 = vpop.f32.mrb[63].mxu0 }
 0x85d   : > { %11415 = vmatmul.mubr.msk.f32.gmra.mrb[122].mxu1 %vm336_vm1, %v8178_v25  ;;  %11477 = vmatmul.mubr.msk.f32.gmra.mrb[122].mxu0 %vm336_vm1, %v8178_v25 }
 0x85e   : > { %8743 = vmatprep.mubr.f32.mxu1 %v12822_v8  ;;  %9168 = vmatprep.mubr.f32.mxu0 %v12822_v8 }
 0x85f   : > { %v12465_v28 = vpop.f32.mrb[64].mxu0 }
 0x860   : > { %v8198_v29 = vpop.f32.mrb[65].mxu0 }
 0x861   : > { %11416 = vmatmul.mubr.msk.f32.gmra.mrb[124].mxu1 %vm336_vm1, %v12459_v24  ;;  %11478 = vmatmul.mubr.msk.f32.gmra.mrb[124].mxu0 %vm336_vm1, %v12459_v24 }
 0x862   : > { %8749 = vmatprep.mubr.f32.mxu1 %v12822_v8  ;;  %9174 = vmatprep.mubr.f32.mxu0 %v12822_v8 }
 0x863   : > { %v12468_v30 = vpop.f32.mrb[66].mxu0 }
 0x864   : > { %v8208_v31 = vpop.f32.mrb[67].mxu0 }
 0x865   : > { %11417 = vmatmul.mubr.msk.f32.gmra.mrb[126].mxu1 %vm336_vm1, %v8188_v27  ;;  %11479 = vmatmul.mubr.msk.f32.gmra.mrb[126].mxu0 %vm336_vm1, %v8188_v27 }
 0x866   : > { %8755 = vmatprep.mubr.f32.mxu1 %v12822_v8  ;;  %9180 = vmatprep.mubr.f32.mxu0 %v12822_v8 }
 0x867   : > { %v12471_v33 = vpop.f32.mrb[68].mxu0 }
 0x868   : > { %v8218_v34 = vpop.f32.mrb[69].mxu0 }
 0x869   : > { %11418 = vmatmul.mubr.msk.f32.gmra.mrb[128].mxu1 %vm336_vm1, %v12462_v26  ;;  %11480 = vmatmul.mubr.msk.f32.gmra.mrb[128].mxu0 %vm336_vm1, %v12462_v26 }
 0x86a   : > { %8761 = vmatprep.mubr.f32.mxu1 %v12822_v8  ;;  %9186 = vmatprep.mubr.f32.mxu0 %v12822_v8 }
 0x86b   : > { %v12474_v35 = vpop.f32.mrb[70].mxu0 }
 0x86c   : > { %v8228_v36 = vpop.f32.mrb[71].mxu0 }
 0x86d   : > { %11419 = vmatmul.mubr.msk.f32.gmra.mrb[130].mxu1 %vm336_vm1, %v8198_v29  ;;  %11481 = vmatmul.mubr.msk.f32.gmra.mrb[130].mxu0 %vm336_vm1, %v8198_v29 }
 0x86e   : > { %8767 = vmatprep.mubr.f32.mxu1 %v12822_v8  ;;  %9192 = vmatprep.mubr.f32.mxu0 %v12822_v8 }
 0x86f   : > { %v12477_v37 = vpop.f32.mrb[72].mxu0 }
 0x870   : > { %v8238_v38 = vpop.f32.mrb[73].mxu0 }
 0x871   : > { %11420 = vmatmul.mubr.msk.f32.gmra.mrb[132].mxu1 %vm336_vm1, %v12465_v28  ;;  %11482 = vmatmul.mubr.msk.f32.gmra.mrb[132].mxu0 %vm336_vm1, %v12465_v28 }
 0x872   : > { %8773 = vmatprep.mubr.f32.mxu1 %v12822_v8  ;;  %9198 = vmatprep.mubr.f32.mxu0 %v12822_v8 }
 0x873   : > { %v12480_v39 = vpop.f32.mrb[74].mxu0 }
 0x874   : > { %v8248_v40 = vpop.f32.mrb[75].mxu0 }
 0x875   : > { %11421 = vmatmul.mubr.msk.f32.gmra.mrb[134].mxu1 %vm336_vm1, %v8208_v31  ;;  %11483 = vmatmul.mubr.msk.f32.gmra.mrb[134].mxu0 %vm336_vm1, %v8208_v31 }
 0x876   : > { %8779 = vmatprep.mubr.f32.mxu1 %v12822_v8  ;;  %9204 = vmatprep.mubr.f32.mxu0 %v12822_v8 }
 0x877   : > { %v16226_v41 = vpop.f32.mrb[76].mxu0 }
 0x878   : > { %v8258_v6 = vpop.f32.mrb[77].mxu0 }
 0x879   : > { %11422 = vmatmul.mubr.msk.f32.gmra.mrb[136].mxu1 %vm336_vm1, %v12468_v30  ;;  %11484 = vmatmul.mubr.msk.f32.gmra.mrb[136].mxu0 %vm336_vm1, %v12468_v30 }
 0x87a   : > { %8785 = vmatprep.mubr.f32.mxu1 %v12822_v8  ;;  %9210 = vmatprep.mubr.f32.mxu0 %v12822_v8 }
 0x87b   : > { %v16232_v20 = vpop.f32.mrb[78].mxu0 }
 0x87c   : > { %v8268_v42 = vpop.f32.mrb[79].mxu0 }
 0x87d   : > { %11423 = vmatmul.mubr.msk.f32.gmra.mrb[138].mxu1 %vm336_vm1, %v8218_v34  ;;  %11485 = vmatmul.mubr.msk.f32.gmra.mrb[138].mxu0 %vm336_vm1, %v8218_v34 }
 0x87e   : > { %8791 = vmatprep.mubr.f32.mxu1 %v12822_v8  ;;  %9216 = vmatprep.mubr.f32.mxu0 %v12822_v8 }
 0x87f   : > { %v16238_v44 = vpop.f32.mrb[80].mxu0 }
 0x880   : > { %v16240_v45 = vpop.f32.mrb[81].mxu0 }
 0x881   : > { %11424 = vmatmul.mubr.msk.f32.gmra.mrb[140].mxu1 %vm336_vm1, %v12471_v33  ;;  %11486 = vmatmul.mubr.msk.f32.gmra.mrb[140].mxu0 %vm336_vm1, %v12471_v33 }
 0x882   : > { %8797 = vmatprep.mubr.f32.mxu1 %v12822_v8  ;;  %9222 = vmatprep.mubr.f32.mxu0 %v12822_v8 }
 0x883   : > { %v16246_v46 = vpop.f32.mrb[82].mxu0 }
 0x884   : > { %v16248_v7 = vpop.f32.mrb[83].mxu0 }
 0x885   : > { %11425 = vmatmul.mubr.msk.f32.gmra.mrb[142].mxu1 %vm336_vm1, %v8228_v36  ;;  %11487 = vmatmul.mubr.msk.f32.gmra.mrb[142].mxu0 %vm336_vm1, %v8228_v36 }
 0x886   : > { %8803 = vmatprep.mubr.f32.mxu1 %v12822_v8  ;;  %9228 = vmatprep.mubr.f32.mxu0 %v12822_v8 }
 0x887   : > { %v16254_v47 = vpop.f32.mrb[84].mxu0 }
 0x888   : > { %v16256_v48 = vpop.f32.mrb[85].mxu0 }
 0x889   : > { %11426 = vmatmul.mubr.msk.f32.gmra.mrb[144].mxu1 %vm336_vm1, %v12474_v35  ;;  %11488 = vmatmul.mubr.msk.f32.gmra.mrb[144].mxu0 %vm336_vm1, %v12474_v35 }
 0x88a   : > { %8809 = vmatprep.mubr.f32.mxu1 %v12822_v8  ;;  %9234 = vmatprep.mubr.f32.mxu0 %v12822_v8 }
 0x88b   : > { %v16262_v49 = vpop.f32.mrb[86].mxu0 }
 0x88c   : > { %v16264_v50 = vpop.f32.mrb[87].mxu0 }
 0x88d   : > { %11427 = vmatmul.mubr.msk.f32.gmra.mrb[146].mxu1 %vm336_vm1, %v8238_v38  ;;  %11489 = vmatmul.mubr.msk.f32.gmra.mrb[146].mxu0 %vm336_vm1, %v8238_v38 }
 0x88e   : > { %8815 = vmatprep.mubr.f32.mxu1 %v12822_v8  ;;  %9240 = vmatprep.mubr.f32.mxu0 %v12822_v8 }
 0x88f   : > { %v16270_v51 = vpop.f32.mrb[88].mxu0 }
 0x890   : > { %v16272_v52 = vpop.f32.mrb[89].mxu0 }
 0x891   : > { %11428 = vmatmul.mubr.msk.f32.gmra.mrb[148].mxu1 %vm336_vm1, %v12477_v37  ;;  %11490 = vmatmul.mubr.msk.f32.gmra.mrb[148].mxu0 %vm336_vm1, %v12477_v37 }
 0x892   : > { %8821 = vmatprep.mubr.f32.mxu1 %v12822_v8  ;;  %9246 = vmatprep.mubr.f32.mxu0 %v12822_v8 }
 0x893   : > { %v16278_v32 = vpop.f32.mrb[90].mxu0 }
 0x894   : > { %v16280_v53 = vpop.f32.mrb[91].mxu0 }
 0x895   : > { %11429 = vmatmul.mubr.msk.f32.gmra.mrb[150].mxu1 %vm336_vm1, %v8248_v40  ;;  %11491 = vmatmul.mubr.msk.f32.gmra.mrb[150].mxu0 %vm336_vm1, %v8248_v40 }
 0x896   : > { %8827 = vmatprep.mubr.f32.mxu1 %v12822_v8  ;;  %9252 = vmatprep.mubr.f32.mxu0 %v12822_v8 }
 0x897   : > { %v16286_v54 = vpop.f32.mrb[92].mxu0 }
 0x898   : > { %v16288_v55 = vpop.f32.mrb[93].mxu0 }
 0x899   : > { %11430 = vmatmul.mubr.msk.f32.gmra.mrb[152].mxu1 %vm336_vm1, %v12480_v39  ;;  %11492 = vmatmul.mubr.msk.f32.gmra.mrb[152].mxu0 %vm336_vm1, %v12480_v39 }
 0x89a   : > { %8833 = vmatprep.mubr.f32.mxu1 %v12822_v8  ;;  %9258 = vmatprep.mubr.f32.mxu0 %v12822_v8 }
 0x89b   : > { %v16294_v56 = vpop.f32.mrb[94].mxu0 }
 0x89c   : > { %v16296_v57 = vpop.f32.mrb[95].mxu0 }
 0x89d   : > { %11431 = vmatmul.mubr.msk.f32.gmra.mrb[154].mxu1 %vm336_vm1, %v8258_v6  ;;  %11493 = vmatmul.mubr.msk.f32.gmra.mrb[154].mxu0 %vm336_vm1, %v8258_v6 }
 0x89e   : > { %8839 = vmatprep.mubr.f32.mxu1 %v12822_v8  ;;  %9264 = vmatprep.mubr.f32.mxu0 %v12822_v8 }
 0x89f   : > { %v16302_v58 = vpop.f32.mrb[96].mxu0 }
 0x8a0   : > { %v16304_v59 = vpop.f32.mrb[97].mxu0 }
 0x8a1   : > { %11432 = vmatmul.mubr.msk.f32.gmra.mrb[156].mxu1 %vm336_vm1, %v16226_v41  ;;  %11494 = vmatmul.mubr.msk.f32.gmra.mrb[156].mxu0 %vm336_vm1, %v16226_v41 }
 0x8a2   : > { %8845 = vmatprep.mubr.f32.mxu1 %v12822_v8  ;;  %9270 = vmatprep.mubr.f32.mxu0 %v12822_v8 }
 0x8a3   : > { %v16312_v60 = vpop.f32.mrb[98].mxu0 }
 0x8a4   : > { %v16314_v61 = vpop.f32.mrb[99].mxu0 }
 0x8a5   : > { %11433 = vmatmul.mubr.msk.f32.gmra.mrb[158].mxu1 %vm336_vm1, %v8268_v42  ;;  %11495 = vmatmul.mubr.msk.f32.gmra.mrb[158].mxu0 %vm336_vm1, %v8268_v42 }
 0x8a6   : > { %8851 = vmatprep.mubr.f32.mxu1 %v12822_v8  ;;  %9276 = vmatprep.mubr.f32.mxu0 %v12822_v8 }
 0x8a7   : > { %v16320_v62 = vpop.f32.mrb[100].mxu0 }
 0x8a8   : > { %v16322_v63 = vpop.f32.mrb[101].mxu0 }
 0x8a9   : > { %11434 = vmatmul.mubr.msk.f32.gmra.mrb[160].mxu1 %vm336_vm1, %v16232_v20  ;;  %11496 = vmatmul.mubr.msk.f32.gmra.mrb[160].mxu0 %vm336_vm1, %v16232_v20 }
 0x8aa   : > { %8857 = vmatprep.mubr.f32.mxu1 %v12822_v8  ;;  %9282 = vmatprep.mubr.f32.mxu0 %v12822_v8 }
 0x8ab   : > { %v16330_v43 = vpop.f32.mrb[102].mxu0 }
 0x8ac   : > { %v16332_v0 = vpop.f32.mrb[103].mxu0 }
 0x8ad   : > { %11435 = vmatmul.mubr.msk.f32.gmra.mrb[162].mxu1 %vm336_vm1, %v16240_v45  ;;  %11497 = vmatmul.mubr.msk.f32.gmra.mrb[162].mxu0 %vm336_vm1, %v16240_v45 }
 0x8ae   : > { %8863 = vmatprep.mubr.f32.mxu1 %v12822_v8  ;;  %9288 = vmatprep.mubr.f32.mxu0 %v12822_v8 }
 0x8af   : > { %v16340_v1 = vpop.f32.mrb[104].mxu0 }
 0x8b0   : > { %v16342_v2 = vpop.f32.mrb[105].mxu0 }
 0x8b1   : > { %11436 = vmatmul.mubr.msk.f32.gmra.mrb[164].mxu1 %vm336_vm1, %v16238_v44  ;;  %11498 = vmatmul.mubr.msk.f32.gmra.mrb[164].mxu0 %vm336_vm1, %v16238_v44 }
 0x8b2   : > { %8869 = vmatprep.mubr.f32.mxu1 %v12822_v8  ;;  %9294 = vmatprep.mubr.f32.mxu0 %v12822_v8 }
 0x8b3   : > { %v16350_v3 = vpop.f32.mrb[106].mxu0 }
 0x8b4   : > { %v16352_v4 = vpop.f32.mrb[107].mxu0 }
 0x8b5   : > { %11437 = vmatmul.mubr.msk.f32.gmra.mrb[166].mxu1 %vm336_vm1, %v16248_v7  ;;  %11499 = vmatmul.mubr.msk.f32.gmra.mrb[166].mxu0 %vm336_vm1, %v16248_v7 }
 0x8b6   : > { %8875 = vmatprep.mubr.f32.mxu1 %v12822_v8  ;;  %9300 = vmatprep.mubr.f32.mxu0 %v12822_v8 }
 0x8b7   : > { %v16360_v5 = vpop.f32.mrb[108].mxu0 }
 0x8b8   : > { %v16362_v9 = vpop.f32.mrb[109].mxu0 }
 0x8b9   : > { %11438 = vmatmul.mubr.msk.f32.gmra.mrb[168].mxu1 %vm336_vm1, %v16246_v46  ;;  %11500 = vmatmul.mubr.msk.f32.gmra.mrb[168].mxu0 %vm336_vm1, %v16246_v46 }
 0x8ba   : > { %8881 = vmatprep.mubr.f32.mxu1 %v12822_v8  ;;  %9306 = vmatprep.mubr.f32.mxu0 %v12822_v8 }
 0x8bb   : > { %v16370_v10 = vpop.f32.mrb[110].mxu0 }
 0x8bc   : > { %v16372_v11 = vpop.f32.mrb[111].mxu0 }
 0x8bd   : > { %11439 = vmatmul.mubr.msk.f32.gmra.mrb[170].mxu1 %vm336_vm1, %v16256_v48  ;;  %11501 = vmatmul.mubr.msk.f32.gmra.mrb[170].mxu0 %vm336_vm1, %v16256_v48 }
 0x8be   : > { %8887 = vmatprep.mubr.f32.mxu1 %v12822_v8  ;;  %9312 = vmatprep.mubr.f32.mxu0 %v12822_v8 }
 0x8bf   : > { %v16380_v12 = vpop.f32.mrb[112].mxu0 }
 0x8c0   : > { %v16382_v13 = vpop.f32.mrb[113].mxu0 }
 0x8c1   : > { %11440 = vmatmul.mubr.msk.f32.gmra.mrb[172].mxu1 %vm336_vm1, %v16254_v47  ;;  %11502 = vmatmul.mubr.msk.f32.gmra.mrb[172].mxu0 %vm336_vm1, %v16254_v47 }
 0x8c2   : > { %8893 = vmatprep.mubr.f32.mxu1 %v12822_v8  ;;  %9318 = vmatprep.mubr.f32.mxu0 %v12822_v8 }
 0x8c3   : > { %v16390_v14 = vpop.f32.mrb[114].mxu0 }
 0x8c4   : > { %v16392_v15 = vpop.f32.mrb[115].mxu0 }
 0x8c5   : > { %11441 = vmatmul.mubr.msk.f32.gmra.mrb[174].mxu1 %vm336_vm1, %v16264_v50  ;;  %11503 = vmatmul.mubr.msk.f32.gmra.mrb[174].mxu0 %vm336_vm1, %v16264_v50 }
 0x8c6   : > { %8899 = vmatprep.mubr.f32.mxu1 %v12822_v8  ;;  %9324 = vmatprep.mubr.f32.mxu0 %v12822_v8 }
 0x8c7   : > { %v16400_v16 = vpop.f32.mrb[116].mxu0 }
 0x8c8   : > { %v16402_v17 = vpop.f32.mrb[117].mxu0 }
 0x8c9   : > { %11442 = vmatmul.mubr.msk.f32.gmra.mrb[176].mxu1 %vm336_vm1, %v16262_v49  ;;  %11504 = vmatmul.mubr.msk.f32.gmra.mrb[176].mxu0 %vm336_vm1, %v16262_v49 }
 0x8ca   : > { %8905 = vmatprep.mubr.f32.mxu1 %v12822_v8  ;;  %9330 = vmatprep.mubr.f32.mxu0 %v12822_v8 }
 0x8cd   : > { %11443 = vmatmul.mubr.msk.f32.gmra.mrb[178].mxu1 %vm336_vm1, %v16272_v52  ;;  %11505 = vmatmul.mubr.msk.f32.gmra.mrb[178].mxu0 %vm336_vm1, %v16272_v52 }
 0x8ce   : > { %8911 = vmatprep.mubr.f32.mxu1 %v12822_v8  ;;  %9336 = vmatprep.mubr.f32.mxu0 %v12822_v8 }
 0x8d1   : > { %11444 = vmatmul.mubr.msk.f32.gmra.mrb[180].mxu1 %vm336_vm1, %v16270_v51  ;;  %11506 = vmatmul.mubr.msk.f32.gmra.mrb[180].mxu0 %vm336_vm1, %v16270_v51 }
 0x8d2   : > { %8917 = vmatprep.mubr.f32.mxu1 %v12822_v8  ;;  %9342 = vmatprep.mubr.f32.mxu0 %v12822_v8 }
 0x8d5   : > { %11445 = vmatmul.mubr.msk.f32.gmra.mrb[182].mxu1 %vm336_vm1, %v16280_v53  ;;  %11507 = vmatmul.mubr.msk.f32.gmra.mrb[182].mxu0 %vm336_vm1, %v16280_v53 }
 0x8d6   : > { %8923 = vmatprep.mubr.f32.mxu1 %v12822_v8  ;;  %9348 = vmatprep.mubr.f32.mxu0 %v12822_v8 }
 0x8d9   : > { %11446 = vmatmul.mubr.msk.f32.gmra.mrb[184].mxu1 %vm336_vm1, %v16278_v32  ;;  %11508 = vmatmul.mubr.msk.f32.gmra.mrb[184].mxu0 %vm336_vm1, %v16278_v32 }
 0x8da   : > { %8929 = vmatprep.mubr.f32.mxu1 %v12822_v8  ;;  %9354 = vmatprep.mubr.f32.mxu0 %v12822_v8 }
 0x8dd   : > { %11447 = vmatmul.mubr.msk.f32.gmra.mrb[186].mxu1 %vm336_vm1, %v16288_v55  ;;  %11509 = vmatmul.mubr.msk.f32.gmra.mrb[186].mxu0 %vm336_vm1, %v16288_v55 }
 0x8de   : > { %8935 = vmatprep.mubr.f32.mxu1 %v12822_v8  ;;  %9360 = vmatprep.mubr.f32.mxu0 %v12822_v8 }
 0x8e1   : > { %11448 = vmatmul.mubr.msk.f32.gmra.mrb[188].mxu1 %vm336_vm1, %v16286_v54  ;;  %11510 = vmatmul.mubr.msk.f32.gmra.mrb[188].mxu0 %vm336_vm1, %v16286_v54 }
 0x8e2   : > { %8941 = vmatprep.mubr.f32.mxu1 %v12822_v8  ;;  %9366 = vmatprep.mubr.f32.mxu0 %v12822_v8 }
 0x8e5   : > { %11449 = vmatmul.mubr.msk.f32.gmra.mrb[190].mxu1 %vm336_vm1, %v16296_v57  ;;  %11511 = vmatmul.mubr.msk.f32.gmra.mrb[190].mxu0 %vm336_vm1, %v16296_v57 }
 0x8e6   : > { %8947 = vmatprep.mubr.f32.mxu1 %v12822_v8  ;;  %9372 = vmatprep.mubr.f32.mxu0 %v12822_v8 }
 0x8e9   : > { %11450 = vmatmul.mubr.msk.f32.gmra.mrb[192].mxu1 %vm336_vm1, %v16294_v56  ;;  %11512 = vmatmul.mubr.msk.f32.gmra.mrb[192].mxu0 %vm336_vm1, %v16294_v56 }
 0x8ea   : > { %8953 = vmatprep.mubr.f32.mxu1 %v12822_v8  ;;  %9378 = vmatprep.mubr.f32.mxu0 %v12822_v8 }
 0x8ed   : > { %11451 = vmatmul.mubr.msk.f32.gmra.mrb[194].mxu1 %vm336_vm1, %v16304_v59  ;;  %11513 = vmatmul.mubr.msk.f32.gmra.mrb[194].mxu0 %vm336_vm1, %v16304_v59 }
 0x8ee   : > { %8959 = vmatprep.mubr.f32.mxu1 %v12822_v8  ;;  %9384 = vmatprep.mubr.f32.mxu0 %v12822_v8 }
 0x8f1   : > { %11452 = vmatmul.mubr.msk.f32.gmra.mrb[196].mxu1 %vm336_vm1, %v16302_v58  ;;  %11514 = vmatmul.mubr.msk.f32.gmra.mrb[196].mxu0 %vm336_vm1, %v16302_v58 }
 0x8f2   : > { %8965 = vmatprep.mubr.f32.mxu1 %v12822_v8  ;;  %9390 = vmatprep.mubr.f32.mxu0 %v12822_v8 }
 0x8f5   : > { %11453 = vmatmul.mubr.msk.f32.gmra.mrb[198].mxu1 %vm336_vm1, %v16314_v61  ;;  %11515 = vmatmul.mubr.msk.f32.gmra.mrb[198].mxu0 %vm336_vm1, %v16314_v61 }
 0x8f6   : > { %8971 = vmatprep.mubr.f32.mxu1 %v12822_v8  ;;  %9396 = vmatprep.mubr.f32.mxu0 %v12822_v8 }
 0x8f9   : > { %11454 = vmatmul.mubr.msk.f32.gmra.mrb[200].mxu1 %vm336_vm1, %v16312_v60  ;;  %11516 = vmatmul.mubr.msk.f32.gmra.mrb[200].mxu0 %vm336_vm1, %v16312_v60 }
 0x8fa   : > { %8977 = vmatprep.mubr.f32.mxu1 %v12822_v8  ;;  %9402 = vmatprep.mubr.f32.mxu0 %v12822_v8 }
 0x8fd   : > { %11455 = vmatmul.mubr.msk.f32.gmra.mrb[202].mxu1 %vm336_vm1, %v16322_v63  ;;  %11517 = vmatmul.mubr.msk.f32.gmra.mrb[202].mxu0 %vm336_vm1, %v16322_v63 }
 0x8fe   : > { %8983 = vmatprep.mubr.f32.mxu1 %v12822_v8  ;;  %9408 = vmatprep.mubr.f32.mxu0 %v12822_v8 }
 0x901   : > { %11456 = vmatmul.mubr.msk.f32.gmra.mrb[204].mxu1 %vm336_vm1, %v16320_v62  ;;  %11518 = vmatmul.mubr.msk.f32.gmra.mrb[204].mxu0 %vm336_vm1, %v16320_v62 }
 0x902   : > { %8989 = vmatprep.mubr.f32.mxu1 %v12822_v8  ;;  %9414 = vmatprep.mubr.f32.mxu0 %v12822_v8 }
 0x905   : > { %11457 = vmatmul.mubr.msk.f32.gmra.mrb[206].mxu1 %vm336_vm1, %v16332_v0  ;;  %11519 = vmatmul.mubr.msk.f32.gmra.mrb[206].mxu0 %vm336_vm1, %v16332_v0 }
 0x906   : > { %8995 = vmatprep.mubr.f32.mxu1 %v12822_v8  ;;  %9420 = vmatprep.mubr.f32.mxu0 %v12822_v8 }
 0x909   : > { %11458 = vmatmul.mubr.msk.f32.gmra.mrb[208].mxu1 %vm336_vm1, %v16330_v43  ;;  %11520 = vmatmul.mubr.msk.f32.gmra.mrb[208].mxu0 %vm336_vm1, %v16330_v43 }
 0x90a   : > { %9001 = vmatprep.mubr.f32.mxu1 %v12822_v8  ;;  %9426 = vmatprep.mubr.f32.mxu0 %v12822_v8 }
 0x90d   : > { %11459 = vmatmul.mubr.msk.f32.gmra.mrb[210].mxu1 %vm336_vm1, %v16342_v2  ;;  %11521 = vmatmul.mubr.msk.f32.gmra.mrb[210].mxu0 %vm336_vm1, %v16342_v2 }
 0x90e   : > { %9007 = vmatprep.mubr.f32.mxu1 %v12822_v8  ;;  %9432 = vmatprep.mubr.f32.mxu0 %v12822_v8 }
 0x911   : > { %11460 = vmatmul.mubr.msk.f32.gmra.mrb[212].mxu1 %vm336_vm1, %v16340_v1  ;;  %11522 = vmatmul.mubr.msk.f32.gmra.mrb[212].mxu0 %vm336_vm1, %v16340_v1 }
 0x912   : > { %9013 = vmatprep.mubr.f32.mxu1 %v12822_v8  ;;  %9438 = vmatprep.mubr.f32.mxu0 %v12822_v8 }
 0x915   : > { %11461 = vmatmul.mubr.msk.f32.gmra.mrb[214].mxu1 %vm336_vm1, %v16352_v4  ;;  %11523 = vmatmul.mubr.msk.f32.gmra.mrb[214].mxu0 %vm336_vm1, %v16352_v4 }
 0x916   : > { %9019 = vmatprep.mubr.f32.mxu1 %v12822_v8  ;;  %9444 = vmatprep.mubr.f32.mxu0 %v12822_v8 }
 0x919   : > { %11462 = vmatmul.mubr.msk.f32.gmra.mrb[216].mxu1 %vm336_vm1, %v16350_v3  ;;  %11524 = vmatmul.mubr.msk.f32.gmra.mrb[216].mxu0 %vm336_vm1, %v16350_v3 }
 0x91a   : > { %9025 = vmatprep.mubr.f32.mxu1 %v12822_v8  ;;  %9450 = vmatprep.mubr.f32.mxu0 %v12822_v8 }
 0x91d   : > { %11463 = vmatmul.mubr.msk.f32.gmra.mrb[218].mxu1 %vm336_vm1, %v16362_v9  ;;  %11525 = vmatmul.mubr.msk.f32.gmra.mrb[218].mxu0 %vm336_vm1, %v16362_v9 }
 0x91e   : > { %9031 = vmatprep.mubr.f32.mxu1 %v12822_v8  ;;  %9456 = vmatprep.mubr.f32.mxu0 %v12822_v8 }
 0x921   : > { %11464 = vmatmul.mubr.msk.f32.gmra.mrb[220].mxu1 %vm336_vm1, %v16360_v5  ;;  %11526 = vmatmul.mubr.msk.f32.gmra.mrb[220].mxu0 %vm336_vm1, %v16360_v5 }
 0x922   : > { %9037 = vmatprep.mubr.f32.mxu1 %v12822_v8  ;;  %9462 = vmatprep.mubr.f32.mxu0 %v12822_v8 }
 0x925   : > { %11465 = vmatmul.mubr.msk.f32.gmra.mrb[222].mxu1 %vm336_vm1, %v16372_v11  ;;  %11527 = vmatmul.mubr.msk.f32.gmra.mrb[222].mxu0 %vm336_vm1, %v16372_v11 }
 0x926   : > { %9043 = vmatprep.mubr.f32.mxu1 %v12822_v8  ;;  %9468 = vmatprep.mubr.f32.mxu0 %v12822_v8 }
 0x928   : > { %v8727_v18 = vpop.f32.mrb[118].mxu1  ;;  %v9152_v19 = vpop.f32.mrb[118].mxu0 }
 0x929   : > { %11535 = vst [vmem:[%s13464_s5 + $0x1e00] sm:$0xff] %v8727_v18  ;;  %11537 = vst [vmem:[%s13464_s5 + $0x1e10] sm:$0xff] %v9152_v19  ;;  %v8729_v21 = vpop.f32.mrb[119].mxu1  ;;  %11466 = vmatmul.mubr.msk.f32.gmra.mrb[224].mxu1 %vm336_vm1, %v16370_v10  ;;  %v9154_v22 = vpop.f32.mrb[119].mxu0  ;;  %11528 = vmatmul.mubr.msk.f32.gmra.mrb[224].mxu0 %vm336_vm1, %v16370_v10 }
 0x92a   : > { %11536 = vst [vmem:[%s13464_s5 + $0x1e08] sm:$0xff] %v8729_v21  ;;  %11538 = vst.msk [vmem:[%s13464_s5 + $0x1e18] sm:$0xff] %vm1933_vm2, %v9154_v22  ;;  %9049 = vmatprep.mubr.f32.mxu1 %v12822_v8  ;;  %9474 = vmatprep.mubr.f32.mxu0 %v12822_v8 }
 0x92c   : > { %v8733_v23 = vpop.f32.mrb[120].mxu1  ;;  %v9158_v24 = vpop.f32.mrb[120].mxu0 }
 0x92d   : > { %11539 = vst [vmem:[%s13464_s5 + $0x1e20] sm:$0xff] %v8733_v23  ;;  %11541 = vst [vmem:[%s13464_s5 + $0x1e30] sm:$0xff] %v9158_v24  ;;  %v8735_v25 = vpop.f32.mrb[121].mxu1  ;;  %11467 = vmatmul.mubr.msk.f32.gmra.mrb[226].mxu1 %vm336_vm1, %v16382_v13  ;;  %v9160_v26 = vpop.f32.mrb[121].mxu0  ;;  %11529 = vmatmul.mubr.msk.f32.gmra.mrb[226].mxu0 %vm336_vm1, %v16382_v13 }
 0x92e   : > { %11540 = vst [vmem:[%s13464_s5 + $0x1e28] sm:$0xff] %v8735_v25  ;;  %11542 = vst.msk [vmem:[%s13464_s5 + $0x1e38] sm:$0xff] %vm1933_vm2, %v9160_v26  ;;  %9055 = vmatprep.mubr.f32.mxu1 %v12822_v8  ;;  %9480 = vmatprep.mubr.f32.mxu0 %v12822_v8 }
 0x930   : > { %v8739_v27 = vpop.f32.mrb[122].mxu1  ;;  %v9164_v28 = vpop.f32.mrb[122].mxu0 }
 0x931   : > { %11543 = vst [vmem:[%s13464_s5 + $0x1e40] sm:$0xff] %v8739_v27  ;;  %11545 = vst [vmem:[%s13464_s5 + $0x1e50] sm:$0xff] %v9164_v28  ;;  %v8741_v29 = vpop.f32.mrb[123].mxu1  ;;  %11468 = vmatmul.mubr.msk.f32.gmra.mrb[228].mxu1 %vm336_vm1, %v16380_v12  ;;  %v9166_v30 = vpop.f32.mrb[123].mxu0  ;;  %11530 = vmatmul.mubr.msk.f32.gmra.mrb[228].mxu0 %vm336_vm1, %v16380_v12 }
 0x932   : > { %11544 = vst [vmem:[%s13464_s5 + $0x1e48] sm:$0xff] %v8741_v29  ;;  %11546 = vst.msk [vmem:[%s13464_s5 + $0x1e58] sm:$0xff] %vm1933_vm2, %v9166_v30  ;;  %9061 = vmatprep.mubr.f32.mxu1 %v12822_v8  ;;  %9486 = vmatprep.mubr.f32.mxu0 %v12822_v8 }
 0x934   : > { %v8745_v31 = vpop.f32.mrb[124].mxu1  ;;  %v9170_v33 = vpop.f32.mrb[124].mxu0 }
 0x935   : > { %11547 = vst [vmem:[%s13464_s5 + $0x1e60] sm:$0xff] %v8745_v31  ;;  %11549 = vst [vmem:[%s13464_s5 + $0x1e70] sm:$0xff] %v9170_v33  ;;  %v8747_v34 = vpop.f32.mrb[125].mxu1  ;;  %11469 = vmatmul.mubr.msk.f32.gmra.mrb[230].mxu1 %vm336_vm1, %v16392_v15  ;;  %v9172_v35 = vpop.f32.mrb[125].mxu0  ;;  %11531 = vmatmul.mubr.msk.f32.gmra.mrb[230].mxu0 %vm336_vm1, %v16392_v15 }
 0x936   : > { %11548 = vst [vmem:[%s13464_s5 + $0x1e68] sm:$0xff] %v8747_v34  ;;  %11550 = vst.msk [vmem:[%s13464_s5 + $0x1e78] sm:$0xff] %vm1933_vm2, %v9172_v35  ;;  %9067 = vmatprep.mubr.f32.mxu1 %v12822_v8  ;;  %9492 = vmatprep.mubr.f32.mxu0 %v12822_v8 }
 0x938   : > { %v8751_v36 = vpop.f32.mrb[126].mxu1  ;;  %v9176_v37 = vpop.f32.mrb[126].mxu0 }
 0x939   : > { %11551 = vst [vmem:[%s13464_s5 + $0x1e80] sm:$0xff] %v8751_v36  ;;  %11553 = vst [vmem:[%s13464_s5 + $0x1e90] sm:$0xff] %v9176_v37  ;;  %v8753_v38 = vpop.f32.mrb[127].mxu1  ;;  %11470 = vmatmul.mubr.msk.f32.gmra.mrb[232].mxu1 %vm336_vm1, %v16390_v14  ;;  %v9178_v39 = vpop.f32.mrb[127].mxu0  ;;  %11532 = vmatmul.mubr.msk.f32.gmra.mrb[232].mxu0 %vm336_vm1, %v16390_v14 }
 0x93a   : > { %11552 = vst [vmem:[%s13464_s5 + $0x1e88] sm:$0xff] %v8753_v38  ;;  %11554 = vst.msk [vmem:[%s13464_s5 + $0x1e98] sm:$0xff] %vm1933_vm2, %v9178_v39  ;;  %9073 = vmatprep.mubr.f32.mxu1 %v12822_v8  ;;  %9498 = vmatprep.mubr.f32.mxu0 %v12822_v8 }
 0x93c   : > { %v8757_v40 = vpop.f32.mrb[128].mxu1  ;;  %v9182_v41 = vpop.f32.mrb[128].mxu0 }
 0x93d   : > { %11555 = vst [vmem:[%s13464_s5 + $0x1ea0] sm:$0xff] %v8757_v40  ;;  %11557 = vst [vmem:[%s13464_s5 + $0x1eb0] sm:$0xff] %v9182_v41  ;;  %v8759_v6 = vpop.f32.mrb[129].mxu1  ;;  %11471 = vmatmul.mubr.msk.f32.gmra.mrb[234].mxu1 %vm336_vm1, %v16402_v17  ;;  %v9184_v20 = vpop.f32.mrb[129].mxu0  ;;  %11533 = vmatmul.mubr.msk.f32.gmra.mrb[234].mxu0 %vm336_vm1, %v16402_v17 }
 0x93e   : > { %11556 = vst [vmem:[%s13464_s5 + $0x1ea8] sm:$0xff] %v8759_v6  ;;  %11558 = vst.msk [vmem:[%s13464_s5 + $0x1eb8] sm:$0xff] %vm1933_vm2, %v9184_v20  ;;  %9079 = vmatprep.mubr.f32.mxu1 %v12822_v8  ;;  %9504 = vmatprep.mubr.f32.mxu0 %v12822_v8 }
 0x940   : > { %v8763_v42 = vpop.f32.mrb[130].mxu1  ;;  %v9188_v44 = vpop.f32.mrb[130].mxu0 }
 0x941   : > { %11559 = vst [vmem:[%s13464_s5 + $0x1ec0] sm:$0xff] %v8763_v42  ;;  %11561 = vst [vmem:[%s13464_s5 + $0x1ed0] sm:$0xff] %v9188_v44  ;;  %v8765_v45 = vpop.f32.mrb[131].mxu1  ;;  %11472 = vmatmul.mubr.msk.f32.gmra.mrb[236].mxu1 %vm336_vm1, %v16400_v16  ;;  %v9190_v46 = vpop.f32.mrb[131].mxu0  ;;  %11534 = vmatmul.mubr.msk.f32.gmra.mrb[236].mxu0 %vm336_vm1, %v16400_v16 }
 0x942   : > { %11560 = vst [vmem:[%s13464_s5 + $0x1ec8] sm:$0xff] %v8765_v45  ;;  %11562 = vst.msk [vmem:[%s13464_s5 + $0x1ed8] sm:$0xff] %vm1933_vm2, %v9190_v46 }
 0x944   : > { %v8769_v8 = vpop.f32.mrb[132].mxu1  ;;  %v9194_v7 = vpop.f32.mrb[132].mxu0 }
 0x945   : > { %11563 = vst [vmem:[%s13464_s5 + $0x1ee0] sm:$0xff] %v8769_v8  ;;  %11565 = vst [vmem:[%s13464_s5 + $0x1ef0] sm:$0xff] %v9194_v7  ;;  %v8771_v47 = vpop.f32.mrb[133].mxu1  ;;  %v9196_v48 = vpop.f32.mrb[133].mxu0 }
 0x946   : > { %11564 = vst [vmem:[%s13464_s5 + $0x1ee8] sm:$0xff] %v8771_v47  ;;  %11566 = vst.msk [vmem:[%s13464_s5 + $0x1ef8] sm:$0xff] %vm1933_vm2, %v9196_v48 }
 0x948   : > { %v8775_v49 = vpop.f32.mrb[134].mxu1  ;;  %v9200_v50 = vpop.f32.mrb[134].mxu0 }
 0x949   : > { %11567 = vst [vmem:[%s13464_s5 + $0x1f00] sm:$0xff] %v8775_v49  ;;  %11569 = vst [vmem:[%s13464_s5 + $0x1f10] sm:$0xff] %v9200_v50  ;;  %v8777_v51 = vpop.f32.mrb[135].mxu1  ;;  %v9202_v52 = vpop.f32.mrb[135].mxu0 }
 0x94a   : > { %11568 = vst [vmem:[%s13464_s5 + $0x1f08] sm:$0xff] %v8777_v51  ;;  %11570 = vst.msk [vmem:[%s13464_s5 + $0x1f18] sm:$0xff] %vm1933_vm2, %v9202_v52 }
 0x94c   : > { %v8781_v32 = vpop.f32.mrb[136].mxu1  ;;  %v9206_v53 = vpop.f32.mrb[136].mxu0 }
 0x94d   : > { %11571 = vst [vmem:[%s13464_s5 + $0x1f20] sm:$0xff] %v8781_v32  ;;  %11573 = vst [vmem:[%s13464_s5 + $0x1f30] sm:$0xff] %v9206_v53  ;;  %v8783_v54 = vpop.f32.mrb[137].mxu1  ;;  %v9208_v55 = vpop.f32.mrb[137].mxu0 }
 0x94e   : > { %11572 = vst [vmem:[%s13464_s5 + $0x1f28] sm:$0xff] %v8783_v54  ;;  %11574 = vst.msk [vmem:[%s13464_s5 + $0x1f38] sm:$0xff] %vm1933_vm2, %v9208_v55 }
 0x950   : > { %v8787_v56 = vpop.f32.mrb[138].mxu1  ;;  %v9212_v57 = vpop.f32.mrb[138].mxu0 }
 0x951   : > { %11575 = vst [vmem:[%s13464_s5 + $0x1f40] sm:$0xff] %v8787_v56  ;;  %11577 = vst [vmem:[%s13464_s5 + $0x1f50] sm:$0xff] %v9212_v57  ;;  %v8789_v58 = vpop.f32.mrb[139].mxu1  ;;  %v9214_v59 = vpop.f32.mrb[139].mxu0 }
 0x952   : > { %11576 = vst [vmem:[%s13464_s5 + $0x1f48] sm:$0xff] %v8789_v58  ;;  %11578 = vst.msk [vmem:[%s13464_s5 + $0x1f58] sm:$0xff] %vm1933_vm2, %v9214_v59 }
 0x954   : > { %v8793_v60 = vpop.f32.mrb[140].mxu1  ;;  %v9218_v61 = vpop.f32.mrb[140].mxu0 }
 0x955   : > { %11579 = vst [vmem:[%s13464_s5 + $0x1f60] sm:$0xff] %v8793_v60  ;;  %11581 = vst [vmem:[%s13464_s5 + $0x1f70] sm:$0xff] %v9218_v61  ;;  %v8795_v62 = vpop.f32.mrb[141].mxu1  ;;  %v9220_v63 = vpop.f32.mrb[141].mxu0 }
 0x956   : > { %11580 = vst [vmem:[%s13464_s5 + $0x1f68] sm:$0xff] %v8795_v62  ;;  %11582 = vst.msk [vmem:[%s13464_s5 + $0x1f78] sm:$0xff] %vm1933_vm2, %v9220_v63 }
 0x958   : > { %v8799_v43 = vpop.f32.mrb[142].mxu1  ;;  %v9224_v0 = vpop.f32.mrb[142].mxu0 }
 0x959   : > { %11583 = vst [vmem:[%s13464_s5 + $0x1f80] sm:$0xff] %v8799_v43  ;;  %11585 = vst [vmem:[%s13464_s5 + $0x1f90] sm:$0xff] %v9224_v0  ;;  %v8801_v1 = vpop.f32.mrb[143].mxu1  ;;  %v9226_v2 = vpop.f32.mrb[143].mxu0 }
 0x95a   : > { %11584 = vst [vmem:[%s13464_s5 + $0x1f88] sm:$0xff] %v8801_v1  ;;  %11586 = vst.msk [vmem:[%s13464_s5 + $0x1f98] sm:$0xff] %vm1933_vm2, %v9226_v2 }
 0x95c   : > { %v8805_v3 = vpop.f32.mrb[144].mxu1  ;;  %v9230_v4 = vpop.f32.mrb[144].mxu0 }
 0x95d   : > { %11587 = vst [vmem:[%s13464_s5 + $0x1fa0] sm:$0xff] %v8805_v3  ;;  %11589 = vst [vmem:[%s13464_s5 + $0x1fb0] sm:$0xff] %v9230_v4  ;;  %v8807_v5 = vpop.f32.mrb[145].mxu1  ;;  %v9232_v9 = vpop.f32.mrb[145].mxu0 }
 0x95e   : > { %11588 = vst [vmem:[%s13464_s5 + $0x1fa8] sm:$0xff] %v8807_v5  ;;  %11590 = vst.msk [vmem:[%s13464_s5 + $0x1fb8] sm:$0xff] %vm1933_vm2, %v9232_v9 }
 0x960   : > { %v8811_v10 = vpop.f32.mrb[146].mxu1  ;;  %v9236_v11 = vpop.f32.mrb[146].mxu0 }
 0x961   : > { %11591 = vst [vmem:[%s13464_s5 + $0x1fc0] sm:$0xff] %v8811_v10  ;;  %11593 = vst [vmem:[%s13464_s5 + $0x1fd0] sm:$0xff] %v9236_v11  ;;  %v8813_v12 = vpop.f32.mrb[147].mxu1  ;;  %v9238_v13 = vpop.f32.mrb[147].mxu0 }
 0x962   : > { %11592 = vst [vmem:[%s13464_s5 + $0x1fc8] sm:$0xff] %v8813_v12  ;;  %11594 = vst.msk [vmem:[%s13464_s5 + $0x1fd8] sm:$0xff] %vm1933_vm2, %v9238_v13 }
 0x964   : > { %v8817_v14 = vpop.f32.mrb[148].mxu1  ;;  %v9242_v15 = vpop.f32.mrb[148].mxu0 }
 0x965   : > { %11595 = vst [vmem:[%s13464_s5 + $0x1fe0] sm:$0xff] %v8817_v14  ;;  %11597 = vst [vmem:[%s13464_s5 + $0x1ff0] sm:$0xff] %v9242_v15  ;;  %v8819_v16 = vpop.f32.mrb[149].mxu1  ;;  %v9244_v17 = vpop.f32.mrb[149].mxu0 }
 0x966   : > { %11596 = vst [vmem:[%s13464_s5 + $0x1fe8] sm:$0xff] %v8819_v16  ;;  %11598 = vst.msk [vmem:[%s13464_s5 + $0x1ff8] sm:$0xff] %vm1933_vm2, %v9244_v17 }
 0x968   : > { %v8823_v18 = vpop.f32.mrb[150].mxu1  ;;  %v9248_v19 = vpop.f32.mrb[150].mxu0 }
 0x969   : > { %11599 = vst [vmem:[%s13464_s5 + $0x2000] sm:$0xff] %v8823_v18  ;;  %11601 = vst [vmem:[%s13464_s5 + $0x2010] sm:$0xff] %v9248_v19  ;;  %v8825_v21 = vpop.f32.mrb[151].mxu1  ;;  %v9250_v22 = vpop.f32.mrb[151].mxu0 }
 0x96a   : > { %11600 = vst [vmem:[%s13464_s5 + $0x2008] sm:$0xff] %v8825_v21  ;;  %11602 = vst.msk [vmem:[%s13464_s5 + $0x2018] sm:$0xff] %vm1933_vm2, %v9250_v22 }
 0x96c   : > { %v8829_v23 = vpop.f32.mrb[152].mxu1  ;;  %v9254_v24 = vpop.f32.mrb[152].mxu0 }
 0x96d   : > { %11603 = vst [vmem:[%s13464_s5 + $0x2020] sm:$0xff] %v8829_v23  ;;  %11605 = vst [vmem:[%s13464_s5 + $0x2030] sm:$0xff] %v9254_v24  ;;  %v8831_v25 = vpop.f32.mrb[153].mxu1  ;;  %v9256_v26 = vpop.f32.mrb[153].mxu0 }
 0x96e   : > { %11604 = vst [vmem:[%s13464_s5 + $0x2028] sm:$0xff] %v8831_v25  ;;  %11606 = vst.msk [vmem:[%s13464_s5 + $0x2038] sm:$0xff] %vm1933_vm2, %v9256_v26 }
 0x970   : > { %v8835_v27 = vpop.f32.mrb[154].mxu1  ;;  %v9260_v28 = vpop.f32.mrb[154].mxu0 }
 0x971   : > { %11607 = vst [vmem:[%s13464_s5 + $0x2040] sm:$0xff] %v8835_v27  ;;  %11609 = vst [vmem:[%s13464_s5 + $0x2050] sm:$0xff] %v9260_v28  ;;  %v8837_v29 = vpop.f32.mrb[155].mxu1  ;;  %v9262_v30 = vpop.f32.mrb[155].mxu0 }
 0x972   : > { %11608 = vst [vmem:[%s13464_s5 + $0x2048] sm:$0xff] %v8837_v29  ;;  %11610 = vst.msk [vmem:[%s13464_s5 + $0x2058] sm:$0xff] %vm1933_vm2, %v9262_v30 }
 0x974   : > { %v8841_v31 = vpop.f32.mrb[156].mxu1  ;;  %v9266_v33 = vpop.f32.mrb[156].mxu0 }
 0x975   : > { %11611 = vst [vmem:[%s13464_s5 + $0x2060] sm:$0xff] %v8841_v31  ;;  %11613 = vst [vmem:[%s13464_s5 + $0x2070] sm:$0xff] %v9266_v33  ;;  %v8843_v34 = vpop.f32.mrb[157].mxu1  ;;  %v9268_v35 = vpop.f32.mrb[157].mxu0 }
 0x976   : > { %11612 = vst [vmem:[%s13464_s5 + $0x2068] sm:$0xff] %v8843_v34  ;;  %11614 = vst.msk [vmem:[%s13464_s5 + $0x2078] sm:$0xff] %vm1933_vm2, %v9268_v35 }
 0x978   : > { %v8847_v36 = vpop.f32.mrb[158].mxu1  ;;  %v9272_v37 = vpop.f32.mrb[158].mxu0 }
 0x979   : > { %11615 = vst [vmem:[%s13464_s5 + $0x2080] sm:$0xff] %v8847_v36  ;;  %11617 = vst [vmem:[%s13464_s5 + $0x2090] sm:$0xff] %v9272_v37  ;;  %v8849_v38 = vpop.f32.mrb[159].mxu1  ;;  %v9274_v39 = vpop.f32.mrb[159].mxu0 }
 0x97a   : > { %11616 = vst [vmem:[%s13464_s5 + $0x2088] sm:$0xff] %v8849_v38  ;;  %11618 = vst.msk [vmem:[%s13464_s5 + $0x2098] sm:$0xff] %vm1933_vm2, %v9274_v39 }
 0x97c   : > { %v8853_v40 = vpop.f32.mrb[160].mxu1  ;;  %v9278_v41 = vpop.f32.mrb[160].mxu0 }
 0x97d   : > { %11619 = vst [vmem:[%s13464_s5 + $0x20a0] sm:$0xff] %v8853_v40  ;;  %11621 = vst [vmem:[%s13464_s5 + $0x20b0] sm:$0xff] %v9278_v41  ;;  %v8855_v6 = vpop.f32.mrb[161].mxu1  ;;  %v9280_v20 = vpop.f32.mrb[161].mxu0 }
 0x97e   : > { %11620 = vst [vmem:[%s13464_s5 + $0x20a8] sm:$0xff] %v8855_v6  ;;  %11622 = vst.msk [vmem:[%s13464_s5 + $0x20b8] sm:$0xff] %vm1933_vm2, %v9280_v20 }
 0x980   : > { %v8859_v42 = vpop.f32.mrb[162].mxu1  ;;  %v9284_v44 = vpop.f32.mrb[162].mxu0 }
 0x981   : > { %11623 = vst [vmem:[%s13464_s5 + $0x20c0] sm:$0xff] %v8859_v42  ;;  %11625 = vst [vmem:[%s13464_s5 + $0x20d0] sm:$0xff] %v9284_v44  ;;  %v8861_v45 = vpop.f32.mrb[163].mxu1  ;;  %v9286_v46 = vpop.f32.mrb[163].mxu0 }
 0x982   : > { %11624 = vst [vmem:[%s13464_s5 + $0x20c8] sm:$0xff] %v8861_v45  ;;  %11626 = vst.msk [vmem:[%s13464_s5 + $0x20d8] sm:$0xff] %vm1933_vm2, %v9286_v46 }
 0x984   : > { %v8865_v8 = vpop.f32.mrb[164].mxu1  ;;  %v9290_v7 = vpop.f32.mrb[164].mxu0 }
 0x985   : > { %11627 = vst [vmem:[%s13464_s5 + $0x20e0] sm:$0xff] %v8865_v8  ;;  %11629 = vst [vmem:[%s13464_s5 + $0x20f0] sm:$0xff] %v9290_v7  ;;  %v8867_v47 = vpop.f32.mrb[165].mxu1  ;;  %v9292_v48 = vpop.f32.mrb[165].mxu0 }
 0x986   : > { %11628 = vst [vmem:[%s13464_s5 + $0x20e8] sm:$0xff] %v8867_v47  ;;  %11630 = vst.msk [vmem:[%s13464_s5 + $0x20f8] sm:$0xff] %vm1933_vm2, %v9292_v48 }
 0x988   : > { %v8871_v49 = vpop.f32.mrb[166].mxu1  ;;  %v9296_v50 = vpop.f32.mrb[166].mxu0 }
 0x989   : > { %11631 = vst [vmem:[%s13464_s5 + $0x2100] sm:$0xff] %v8871_v49  ;;  %11633 = vst [vmem:[%s13464_s5 + $0x2110] sm:$0xff] %v9296_v50  ;;  %v8873_v51 = vpop.f32.mrb[167].mxu1  ;;  %v9298_v52 = vpop.f32.mrb[167].mxu0 }
 0x98a   : > { %11632 = vst [vmem:[%s13464_s5 + $0x2108] sm:$0xff] %v8873_v51  ;;  %11634 = vst.msk [vmem:[%s13464_s5 + $0x2118] sm:$0xff] %vm1933_vm2, %v9298_v52 }
 0x98c   : > { %v8877_v32 = vpop.f32.mrb[168].mxu1  ;;  %v9302_v53 = vpop.f32.mrb[168].mxu0 }
 0x98d   : > { %11635 = vst [vmem:[%s13464_s5 + $0x2120] sm:$0xff] %v8877_v32  ;;  %11637 = vst [vmem:[%s13464_s5 + $0x2130] sm:$0xff] %v9302_v53  ;;  %v8879_v54 = vpop.f32.mrb[169].mxu1  ;;  %v9304_v55 = vpop.f32.mrb[169].mxu0 }
 0x98e   : > { %11636 = vst [vmem:[%s13464_s5 + $0x2128] sm:$0xff] %v8879_v54  ;;  %11638 = vst.msk [vmem:[%s13464_s5 + $0x2138] sm:$0xff] %vm1933_vm2, %v9304_v55 }
 0x990   : > { %v8883_v56 = vpop.f32.mrb[170].mxu1  ;;  %v9308_v57 = vpop.f32.mrb[170].mxu0 }
 0x991   : > { %11639 = vst [vmem:[%s13464_s5 + $0x2140] sm:$0xff] %v8883_v56  ;;  %11641 = vst [vmem:[%s13464_s5 + $0x2150] sm:$0xff] %v9308_v57  ;;  %v8885_v58 = vpop.f32.mrb[171].mxu1  ;;  %v9310_v59 = vpop.f32.mrb[171].mxu0 }
 0x992   : > { %11640 = vst [vmem:[%s13464_s5 + $0x2148] sm:$0xff] %v8885_v58  ;;  %11642 = vst.msk [vmem:[%s13464_s5 + $0x2158] sm:$0xff] %vm1933_vm2, %v9310_v59 }
 0x994   : > { %v8889_v60 = vpop.f32.mrb[172].mxu1  ;;  %v9314_v61 = vpop.f32.mrb[172].mxu0 }
 0x995   : > { %11643 = vst [vmem:[%s13464_s5 + $0x2160] sm:$0xff] %v8889_v60  ;;  %11645 = vst [vmem:[%s13464_s5 + $0x2170] sm:$0xff] %v9314_v61  ;;  %v8891_v62 = vpop.f32.mrb[173].mxu1  ;;  %v9316_v63 = vpop.f32.mrb[173].mxu0 }
 0x996   : > { %11644 = vst [vmem:[%s13464_s5 + $0x2168] sm:$0xff] %v8891_v62  ;;  %11646 = vst.msk [vmem:[%s13464_s5 + $0x2178] sm:$0xff] %vm1933_vm2, %v9316_v63 }
 0x998   : > { %v8895_v43 = vpop.f32.mrb[174].mxu1  ;;  %v9320_v0 = vpop.f32.mrb[174].mxu0 }
 0x999   : > { %11647 = vst [vmem:[%s13464_s5 + $0x2180] sm:$0xff] %v8895_v43  ;;  %11649 = vst [vmem:[%s13464_s5 + $0x2190] sm:$0xff] %v9320_v0  ;;  %v8897_v1 = vpop.f32.mrb[175].mxu1  ;;  %v9322_v2 = vpop.f32.mrb[175].mxu0 }
 0x99a   : > { %11648 = vst [vmem:[%s13464_s5 + $0x2188] sm:$0xff] %v8897_v1  ;;  %11650 = vst.msk [vmem:[%s13464_s5 + $0x2198] sm:$0xff] %vm1933_vm2, %v9322_v2 }
 0x99c   : > { %v8901_v3 = vpop.f32.mrb[176].mxu1  ;;  %v9326_v4 = vpop.f32.mrb[176].mxu0 }
 0x99d   : > { %11651 = vst [vmem:[%s13464_s5 + $0x21a0] sm:$0xff] %v8901_v3  ;;  %11653 = vst [vmem:[%s13464_s5 + $0x21b0] sm:$0xff] %v9326_v4  ;;  %v8903_v5 = vpop.f32.mrb[177].mxu1  ;;  %v9328_v9 = vpop.f32.mrb[177].mxu0 }
 0x99e   : > { %11652 = vst [vmem:[%s13464_s5 + $0x21a8] sm:$0xff] %v8903_v5  ;;  %11654 = vst.msk [vmem:[%s13464_s5 + $0x21b8] sm:$0xff] %vm1933_vm2, %v9328_v9 }
 0x9a0   : > { %v8907_v10 = vpop.f32.mrb[178].mxu1  ;;  %v9332_v11 = vpop.f32.mrb[178].mxu0 }
 0x9a1   : > { %11655 = vst [vmem:[%s13464_s5 + $0x21c0] sm:$0xff] %v8907_v10  ;;  %11657 = vst [vmem:[%s13464_s5 + $0x21d0] sm:$0xff] %v9332_v11  ;;  %v8909_v12 = vpop.f32.mrb[179].mxu1  ;;  %v9334_v13 = vpop.f32.mrb[179].mxu0 }
 0x9a2   : > { %11656 = vst [vmem:[%s13464_s5 + $0x21c8] sm:$0xff] %v8909_v12  ;;  %11658 = vst.msk [vmem:[%s13464_s5 + $0x21d8] sm:$0xff] %vm1933_vm2, %v9334_v13 }
 0x9a4   : > { %v8913_v14 = vpop.f32.mrb[180].mxu1  ;;  %v9338_v15 = vpop.f32.mrb[180].mxu0 }
 0x9a5   : > { %11659 = vst [vmem:[%s13464_s5 + $0x21e0] sm:$0xff] %v8913_v14  ;;  %11661 = vst [vmem:[%s13464_s5 + $0x21f0] sm:$0xff] %v9338_v15  ;;  %v8915_v16 = vpop.f32.mrb[181].mxu1  ;;  %v9340_v17 = vpop.f32.mrb[181].mxu0 }
 0x9a6   : > { %11660 = vst [vmem:[%s13464_s5 + $0x21e8] sm:$0xff] %v8915_v16  ;;  %11662 = vst.msk [vmem:[%s13464_s5 + $0x21f8] sm:$0xff] %vm1933_vm2, %v9340_v17 }
 0x9a8   : > { %v8919_v18 = vpop.f32.mrb[182].mxu1  ;;  %v9344_v19 = vpop.f32.mrb[182].mxu0 }
 0x9a9   : > { %11663 = vst [vmem:[%s13464_s5 + $0x2200] sm:$0xff] %v8919_v18  ;;  %11665 = vst [vmem:[%s13464_s5 + $0x2210] sm:$0xff] %v9344_v19  ;;  %v8921_v21 = vpop.f32.mrb[183].mxu1  ;;  %v9346_v22 = vpop.f32.mrb[183].mxu0 }
 0x9aa   : > { %11664 = vst [vmem:[%s13464_s5 + $0x2208] sm:$0xff] %v8921_v21  ;;  %11666 = vst.msk [vmem:[%s13464_s5 + $0x2218] sm:$0xff] %vm1933_vm2, %v9346_v22 }
 0x9ac   : > { %v8925_v23 = vpop.f32.mrb[184].mxu1  ;;  %v9350_v24 = vpop.f32.mrb[184].mxu0 }
 0x9ad   : > { %11667 = vst [vmem:[%s13464_s5 + $0x2220] sm:$0xff] %v8925_v23  ;;  %11669 = vst [vmem:[%s13464_s5 + $0x2230] sm:$0xff] %v9350_v24  ;;  %v8927_v25 = vpop.f32.mrb[185].mxu1  ;;  %v9352_v26 = vpop.f32.mrb[185].mxu0 }
 0x9ae   : > { %11668 = vst [vmem:[%s13464_s5 + $0x2228] sm:$0xff] %v8927_v25  ;;  %11670 = vst.msk [vmem:[%s13464_s5 + $0x2238] sm:$0xff] %vm1933_vm2, %v9352_v26 }
 0x9b0   : > { %v8931_v27 = vpop.f32.mrb[186].mxu1  ;;  %v9356_v28 = vpop.f32.mrb[186].mxu0 }
 0x9b1   : > { %11671 = vst [vmem:[%s13464_s5 + $0x2240] sm:$0xff] %v8931_v27  ;;  %11673 = vst [vmem:[%s13464_s5 + $0x2250] sm:$0xff] %v9356_v28  ;;  %v8933_v29 = vpop.f32.mrb[187].mxu1  ;;  %v9358_v30 = vpop.f32.mrb[187].mxu0 }
 0x9b2   : > { %11672 = vst [vmem:[%s13464_s5 + $0x2248] sm:$0xff] %v8933_v29  ;;  %11674 = vst.msk [vmem:[%s13464_s5 + $0x2258] sm:$0xff] %vm1933_vm2, %v9358_v30 }
 0x9b4   : > { %v8937_v31 = vpop.f32.mrb[188].mxu1  ;;  %v9362_v33 = vpop.f32.mrb[188].mxu0 }
 0x9b5   : > { %11675 = vst [vmem:[%s13464_s5 + $0x2260] sm:$0xff] %v8937_v31  ;;  %11677 = vst [vmem:[%s13464_s5 + $0x2270] sm:$0xff] %v9362_v33  ;;  %v8939_v34 = vpop.f32.mrb[189].mxu1  ;;  %v9364_v35 = vpop.f32.mrb[189].mxu0 }
 0x9b6   : > { %11676 = vst [vmem:[%s13464_s5 + $0x2268] sm:$0xff] %v8939_v34  ;;  %11678 = vst.msk [vmem:[%s13464_s5 + $0x2278] sm:$0xff] %vm1933_vm2, %v9364_v35 }
 0x9b8   : > { %v8943_v36 = vpop.f32.mrb[190].mxu1  ;;  %v9368_v37 = vpop.f32.mrb[190].mxu0 }
 0x9b9   : > { %11679 = vst [vmem:[%s13464_s5 + $0x2280] sm:$0xff] %v8943_v36  ;;  %11681 = vst [vmem:[%s13464_s5 + $0x2290] sm:$0xff] %v9368_v37  ;;  %v8945_v38 = vpop.f32.mrb[191].mxu1  ;;  %v9370_v39 = vpop.f32.mrb[191].mxu0 }
 0x9ba   : > { %11680 = vst [vmem:[%s13464_s5 + $0x2288] sm:$0xff] %v8945_v38  ;;  %11682 = vst.msk [vmem:[%s13464_s5 + $0x2298] sm:$0xff] %vm1933_vm2, %v9370_v39 }
 0x9bc   : > { %v8949_v40 = vpop.f32.mrb[192].mxu1  ;;  %v9374_v41 = vpop.f32.mrb[192].mxu0 }
 0x9bd   : > { %11683 = vst [vmem:[%s13464_s5 + $0x22a0] sm:$0xff] %v8949_v40  ;;  %11685 = vst [vmem:[%s13464_s5 + $0x22b0] sm:$0xff] %v9374_v41  ;;  %v8951_v6 = vpop.f32.mrb[193].mxu1  ;;  %v9376_v20 = vpop.f32.mrb[193].mxu0 }
 0x9be   : > { %11684 = vst [vmem:[%s13464_s5 + $0x22a8] sm:$0xff] %v8951_v6  ;;  %11686 = vst.msk [vmem:[%s13464_s5 + $0x22b8] sm:$0xff] %vm1933_vm2, %v9376_v20 }
 0x9c0   : > { %v8955_v42 = vpop.f32.mrb[194].mxu1  ;;  %v9380_v44 = vpop.f32.mrb[194].mxu0 }
 0x9c1   : > { %11687 = vst [vmem:[%s13464_s5 + $0x22c0] sm:$0xff] %v8955_v42  ;;  %11689 = vst [vmem:[%s13464_s5 + $0x22d0] sm:$0xff] %v9380_v44  ;;  %v8957_v45 = vpop.f32.mrb[195].mxu1  ;;  %v9382_v46 = vpop.f32.mrb[195].mxu0 }
 0x9c2   : > { %11688 = vst [vmem:[%s13464_s5 + $0x22c8] sm:$0xff] %v8957_v45  ;;  %11690 = vst.msk [vmem:[%s13464_s5 + $0x22d8] sm:$0xff] %vm1933_vm2, %v9382_v46 }
 0x9c4   : > { %v8961_v8 = vpop.f32.mrb[196].mxu1  ;;  %v9386_v7 = vpop.f32.mrb[196].mxu0 }
 0x9c5   : > { %11691 = vst [vmem:[%s13464_s5 + $0x22e0] sm:$0xff] %v8961_v8  ;;  %11693 = vst [vmem:[%s13464_s5 + $0x22f0] sm:$0xff] %v9386_v7  ;;  %v8963_v47 = vpop.f32.mrb[197].mxu1  ;;  %v9388_v48 = vpop.f32.mrb[197].mxu0 }
 0x9c6   : > { %11692 = vst [vmem:[%s13464_s5 + $0x22e8] sm:$0xff] %v8963_v47  ;;  %11694 = vst.msk [vmem:[%s13464_s5 + $0x22f8] sm:$0xff] %vm1933_vm2, %v9388_v48 }
 0x9c8   : > { %v8967_v49 = vpop.f32.mrb[198].mxu1  ;;  %v9392_v50 = vpop.f32.mrb[198].mxu0 }
 0x9c9   : > { %11695 = vst [vmem:[%s13464_s5 + $0x2300] sm:$0xff] %v8967_v49  ;;  %11697 = vst [vmem:[%s13464_s5 + $0x2310] sm:$0xff] %v9392_v50  ;;  %v8969_v51 = vpop.f32.mrb[199].mxu1  ;;  %v9394_v52 = vpop.f32.mrb[199].mxu0 }
 0x9ca   : > { %11696 = vst [vmem:[%s13464_s5 + $0x2308] sm:$0xff] %v8969_v51  ;;  %11698 = vst.msk [vmem:[%s13464_s5 + $0x2318] sm:$0xff] %vm1933_vm2, %v9394_v52 }
 0x9cc   : > { %v8973_v32 = vpop.f32.mrb[200].mxu1  ;;  %v9398_v53 = vpop.f32.mrb[200].mxu0 }
 0x9cd   : > { %11699 = vst [vmem:[%s13464_s5 + $0x2320] sm:$0xff] %v8973_v32  ;;  %11701 = vst [vmem:[%s13464_s5 + $0x2330] sm:$0xff] %v9398_v53  ;;  %v8975_v54 = vpop.f32.mrb[201].mxu1  ;;  %v9400_v55 = vpop.f32.mrb[201].mxu0 }
 0x9ce   : > { %11700 = vst [vmem:[%s13464_s5 + $0x2328] sm:$0xff] %v8975_v54  ;;  %11702 = vst.msk [vmem:[%s13464_s5 + $0x2338] sm:$0xff] %vm1933_vm2, %v9400_v55 }
 0x9d0   : > { %v8979_v56 = vpop.f32.mrb[202].mxu1  ;;  %v9404_v57 = vpop.f32.mrb[202].mxu0 }
 0x9d1   : > { %11703 = vst [vmem:[%s13464_s5 + $0x2340] sm:$0xff] %v8979_v56  ;;  %11705 = vst [vmem:[%s13464_s5 + $0x2350] sm:$0xff] %v9404_v57  ;;  %v8981_v58 = vpop.f32.mrb[203].mxu1  ;;  %v9406_v59 = vpop.f32.mrb[203].mxu0 }
 0x9d2   : > { %11704 = vst [vmem:[%s13464_s5 + $0x2348] sm:$0xff] %v8981_v58  ;;  %11706 = vst.msk [vmem:[%s13464_s5 + $0x2358] sm:$0xff] %vm1933_vm2, %v9406_v59 }
 0x9d4   : > { %v8985_v60 = vpop.f32.mrb[204].mxu1  ;;  %v9410_v61 = vpop.f32.mrb[204].mxu0 }
 0x9d5   : > { %11707 = vst [vmem:[%s13464_s5 + $0x2360] sm:$0xff] %v8985_v60  ;;  %11709 = vst [vmem:[%s13464_s5 + $0x2370] sm:$0xff] %v9410_v61  ;;  %v8987_v62 = vpop.f32.mrb[205].mxu1  ;;  %v9412_v63 = vpop.f32.mrb[205].mxu0 }
 0x9d6   : > { %11708 = vst [vmem:[%s13464_s5 + $0x2368] sm:$0xff] %v8987_v62  ;;  %11710 = vst.msk [vmem:[%s13464_s5 + $0x2378] sm:$0xff] %vm1933_vm2, %v9412_v63 }
 0x9d8   : > { %v8991_v43 = vpop.f32.mrb[206].mxu1  ;;  %v9416_v0 = vpop.f32.mrb[206].mxu0 }
 0x9d9   : > { %11711 = vst [vmem:[%s13464_s5 + $0x2380] sm:$0xff] %v8991_v43  ;;  %11713 = vst [vmem:[%s13464_s5 + $0x2390] sm:$0xff] %v9416_v0  ;;  %v8993_v1 = vpop.f32.mrb[207].mxu1  ;;  %v9418_v2 = vpop.f32.mrb[207].mxu0 }
 0x9da   : > { %11712 = vst [vmem:[%s13464_s5 + $0x2388] sm:$0xff] %v8993_v1  ;;  %11714 = vst.msk [vmem:[%s13464_s5 + $0x2398] sm:$0xff] %vm1933_vm2, %v9418_v2 }
 0x9dc   : > { %v8997_v3 = vpop.f32.mrb[208].mxu1  ;;  %v9422_v4 = vpop.f32.mrb[208].mxu0 }
 0x9dd   : > { %11715 = vst [vmem:[%s13464_s5 + $0x23a0] sm:$0xff] %v8997_v3  ;;  %11717 = vst [vmem:[%s13464_s5 + $0x23b0] sm:$0xff] %v9422_v4  ;;  %v8999_v5 = vpop.f32.mrb[209].mxu1  ;;  %v9424_v9 = vpop.f32.mrb[209].mxu0 }
 0x9de   : > { %11716 = vst [vmem:[%s13464_s5 + $0x23a8] sm:$0xff] %v8999_v5  ;;  %11718 = vst.msk [vmem:[%s13464_s5 + $0x23b8] sm:$0xff] %vm1933_vm2, %v9424_v9 }
 0x9e0   : > { %v9003_v10 = vpop.f32.mrb[210].mxu1  ;;  %v9428_v11 = vpop.f32.mrb[210].mxu0 }
 0x9e1   : > { %11719 = vst [vmem:[%s13464_s5 + $0x23c0] sm:$0xff] %v9003_v10  ;;  %11721 = vst [vmem:[%s13464_s5 + $0x23d0] sm:$0xff] %v9428_v11  ;;  %v9005_v12 = vpop.f32.mrb[211].mxu1  ;;  %v9430_v13 = vpop.f32.mrb[211].mxu0 }
 0x9e2   : > { %11720 = vst [vmem:[%s13464_s5 + $0x23c8] sm:$0xff] %v9005_v12  ;;  %11722 = vst.msk [vmem:[%s13464_s5 + $0x23d8] sm:$0xff] %vm1933_vm2, %v9430_v13 }
 0x9e4   : > { %v9009_v14 = vpop.f32.mrb[212].mxu1  ;;  %v9434_v15 = vpop.f32.mrb[212].mxu0 }
 0x9e5   : > { %11723 = vst [vmem:[%s13464_s5 + $0x23e0] sm:$0xff] %v9009_v14  ;;  %11725 = vst [vmem:[%s13464_s5 + $0x23f0] sm:$0xff] %v9434_v15  ;;  %v9011_v16 = vpop.f32.mrb[213].mxu1  ;;  %v9436_v17 = vpop.f32.mrb[213].mxu0 }
 0x9e6   : > { %11724 = vst [vmem:[%s13464_s5 + $0x23e8] sm:$0xff] %v9011_v16  ;;  %11726 = vst.msk [vmem:[%s13464_s5 + $0x23f8] sm:$0xff] %vm1933_vm2, %v9436_v17 }
 0x9e8   : > { %v9015_v18 = vpop.f32.mrb[214].mxu1  ;;  %v9440_v19 = vpop.f32.mrb[214].mxu0 }
 0x9e9   : > { %11727 = vst [vmem:[%s13464_s5 + $0x2400] sm:$0xff] %v9015_v18  ;;  %11729 = vst [vmem:[%s13464_s5 + $0x2410] sm:$0xff] %v9440_v19  ;;  %v9017_v21 = vpop.f32.mrb[215].mxu1  ;;  %v9442_v22 = vpop.f32.mrb[215].mxu0 }
 0x9ea   : > { %11728 = vst [vmem:[%s13464_s5 + $0x2408] sm:$0xff] %v9017_v21  ;;  %11730 = vst.msk [vmem:[%s13464_s5 + $0x2418] sm:$0xff] %vm1933_vm2, %v9442_v22 }
 0x9ec   : > { %v9021_v23 = vpop.f32.mrb[216].mxu1  ;;  %v9446_v24 = vpop.f32.mrb[216].mxu0 }
 0x9ed   : > { %11731 = vst [vmem:[%s13464_s5 + $0x2420] sm:$0xff] %v9021_v23  ;;  %11733 = vst [vmem:[%s13464_s5 + $0x2430] sm:$0xff] %v9446_v24  ;;  %v9023_v25 = vpop.f32.mrb[217].mxu1  ;;  %v9448_v26 = vpop.f32.mrb[217].mxu0 }
 0x9ee   : > { %11732 = vst [vmem:[%s13464_s5 + $0x2428] sm:$0xff] %v9023_v25  ;;  %11734 = vst.msk [vmem:[%s13464_s5 + $0x2438] sm:$0xff] %vm1933_vm2, %v9448_v26 }
 0x9f0   : > { %v9027_v27 = vpop.f32.mrb[218].mxu1  ;;  %v9452_v28 = vpop.f32.mrb[218].mxu0 }
 0x9f1   : > { %11735 = vst [vmem:[%s13464_s5 + $0x2440] sm:$0xff] %v9027_v27  ;;  %11737 = vst [vmem:[%s13464_s5 + $0x2450] sm:$0xff] %v9452_v28  ;;  %v9029_v29 = vpop.f32.mrb[219].mxu1  ;;  %v9454_v30 = vpop.f32.mrb[219].mxu0 }
 0x9f2   : > { %11736 = vst [vmem:[%s13464_s5 + $0x2448] sm:$0xff] %v9029_v29  ;;  %11738 = vst.msk [vmem:[%s13464_s5 + $0x2458] sm:$0xff] %vm1933_vm2, %v9454_v30 }
 0x9f4   : > { %v9033_v31 = vpop.f32.mrb[220].mxu1  ;;  %v9458_v33 = vpop.f32.mrb[220].mxu0 }
 0x9f5   : > { %11739 = vst [vmem:[%s13464_s5 + $0x2460] sm:$0xff] %v9033_v31  ;;  %11741 = vst [vmem:[%s13464_s5 + $0x2470] sm:$0xff] %v9458_v33  ;;  %v9035_v34 = vpop.f32.mrb[221].mxu1  ;;  %v9460_v35 = vpop.f32.mrb[221].mxu0 }
 0x9f6   : > { %11740 = vst [vmem:[%s13464_s5 + $0x2468] sm:$0xff] %v9035_v34  ;;  %11742 = vst.msk [vmem:[%s13464_s5 + $0x2478] sm:$0xff] %vm1933_vm2, %v9460_v35 }
 0x9f8   : > { %v9039_v36 = vpop.f32.mrb[222].mxu1  ;;  %v9464_v37 = vpop.f32.mrb[222].mxu0 }
 0x9f9   : > { %11743 = vst [vmem:[%s13464_s5 + $0x2480] sm:$0xff] %v9039_v36  ;;  %11745 = vst [vmem:[%s13464_s5 + $0x2490] sm:$0xff] %v9464_v37  ;;  %v9041_v38 = vpop.f32.mrb[223].mxu1  ;;  %v9466_v39 = vpop.f32.mrb[223].mxu0 }
 0x9fa   : > { %11744 = vst [vmem:[%s13464_s5 + $0x2488] sm:$0xff] %v9041_v38  ;;  %11746 = vst.msk [vmem:[%s13464_s5 + $0x2498] sm:$0xff] %vm1933_vm2, %v9466_v39 }
 0x9fc   : > { %v9045_v40 = vpop.f32.mrb[224].mxu1  ;;  %v9470_v41 = vpop.f32.mrb[224].mxu0 }
 0x9fd   : > { %11747 = vst [vmem:[%s13464_s5 + $0x24a0] sm:$0xff] %v9045_v40  ;;  %11749 = vst [vmem:[%s13464_s5 + $0x24b0] sm:$0xff] %v9470_v41  ;;  %v9047_v6 = vpop.f32.mrb[225].mxu1  ;;  %v9472_v20 = vpop.f32.mrb[225].mxu0 }
 0x9fe   : > { %11748 = vst [vmem:[%s13464_s5 + $0x24a8] sm:$0xff] %v9047_v6  ;;  %11750 = vst.msk [vmem:[%s13464_s5 + $0x24b8] sm:$0xff] %vm1933_vm2, %v9472_v20 }
 0xa00   : > { %v9051_v42 = vpop.f32.mrb[226].mxu1  ;;  %v9476_v44 = vpop.f32.mrb[226].mxu0 }
 0xa01   : > { %11751 = vst [vmem:[%s13464_s5 + $0x24c0] sm:$0xff] %v9051_v42  ;;  %11753 = vst [vmem:[%s13464_s5 + $0x24d0] sm:$0xff] %v9476_v44  ;;  %v9053_v45 = vpop.f32.mrb[227].mxu1  ;;  %v9478_v46 = vpop.f32.mrb[227].mxu0 }
 0xa02   : > { %11752 = vst [vmem:[%s13464_s5 + $0x24c8] sm:$0xff] %v9053_v45  ;;  %11754 = vst.msk [vmem:[%s13464_s5 + $0x24d8] sm:$0xff] %vm1933_vm2, %v9478_v46 }
 0xa04   : > { %v9057_v8 = vpop.f32.mrb[228].mxu1  ;;  %v9482_v7 = vpop.f32.mrb[228].mxu0 }
 0xa05   : > { %11755 = vst [vmem:[%s13464_s5 + $0x24e0] sm:$0xff] %v9057_v8  ;;  %11757 = vst [vmem:[%s13464_s5 + $0x24f0] sm:$0xff] %v9482_v7  ;;  %v9059_v47 = vpop.f32.mrb[229].mxu1  ;;  %v9484_v48 = vpop.f32.mrb[229].mxu0 }
 0xa06   : > { %11756 = vst [vmem:[%s13464_s5 + $0x24e8] sm:$0xff] %v9059_v47  ;;  %11758 = vst.msk [vmem:[%s13464_s5 + $0x24f8] sm:$0xff] %vm1933_vm2, %v9484_v48 }
 0xa08   : > { %v9063_v49 = vpop.f32.mrb[230].mxu1  ;;  %v9488_v50 = vpop.f32.mrb[230].mxu0 }
 0xa09   : > { %11759 = vst [vmem:[%s13464_s5 + $0x2500] sm:$0xff] %v9063_v49  ;;  %11761 = vst [vmem:[%s13464_s5 + $0x2510] sm:$0xff] %v9488_v50  ;;  %v9065_v51 = vpop.f32.mrb[231].mxu1  ;;  %v9490_v52 = vpop.f32.mrb[231].mxu0 }
 0xa0a   : > { %11760 = vst [vmem:[%s13464_s5 + $0x2508] sm:$0xff] %v9065_v51  ;;  %11762 = vst.msk [vmem:[%s13464_s5 + $0x2518] sm:$0xff] %vm1933_vm2, %v9490_v52 }
 0xa0c   : > { %v9069_v32 = vpop.f32.mrb[232].mxu1  ;;  %v9494_v53 = vpop.f32.mrb[232].mxu0 }
 0xa0d   : > { %11763 = vst [vmem:[%s13464_s5 + $0x2520] sm:$0xff] %v9069_v32  ;;  %11765 = vst [vmem:[%s13464_s5 + $0x2530] sm:$0xff] %v9494_v53  ;;  %v9071_v54 = vpop.f32.mrb[233].mxu1  ;;  %v9496_v55 = vpop.f32.mrb[233].mxu0 }
 0xa0e   : > { %11764 = vst [vmem:[%s13464_s5 + $0x2528] sm:$0xff] %v9071_v54  ;;  %11766 = vst.msk [vmem:[%s13464_s5 + $0x2538] sm:$0xff] %vm1933_vm2, %v9496_v55 }
 0xa10   : > { %v9075_v56 = vpop.f32.mrb[234].mxu1  ;;  %v9500_v57 = vpop.f32.mrb[234].mxu0 }
 0xa11   : > { %11767 = vst [vmem:[%s13464_s5 + $0x2540] sm:$0xff] %v9075_v56  ;;  %11769 = vst [vmem:[%s13464_s5 + $0x2550] sm:$0xff] %v9500_v57  ;;  %v9077_v58 = vpop.f32.mrb[235].mxu1  ;;  %v9502_v59 = vpop.f32.mrb[235].mxu0 }
 0xa12   : > { %11768 = vst [vmem:[%s13464_s5 + $0x2548] sm:$0xff] %v9077_v58  ;;  %11770 = vst.msk [vmem:[%s13464_s5 + $0x2558] sm:$0xff] %vm1933_vm2, %v9502_v59 }
 0xa14   : > { %v9081_v60 = vpop.f32.mrb[236].mxu1  ;;  %v9506_v61 = vpop.f32.mrb[236].mxu0 }
 0xa15   : > { %11771 = vst [vmem:[%s13464_s5 + $0x2560] sm:$0x1] %v9081_v60  ;;  %11773 = vst [vmem:[%s13464_s5 + $0x2570] sm:$0x1] %v9506_v61  ;;  %v9083_v62 = vpop.f32.mrb[237].mxu1  ;;  %v9508_v63 = vpop.f32.mrb[237].mxu0 }
 0xa16   : > { %11772 = vst [vmem:[%s13464_s5 + $0x2568] sm:$0x1] %v9083_v62  ;;  %11774 = vst.msk [vmem:[%s13464_s5 + $0x2578] sm:$0x1] %vm2170_vm3, %v9508_v63 }
 0xa17   : > { %12727 = shalt.err (!%p12724_p11)
}
 0xa18   : > { %s12728_s11 = scalar_lea.hbm %s16889_s21, 153600  ;;  %s12732_s4 = scalar_lea.hbm %s16953_s3, 1228800 }
 0xa19   : > { %p12729_p12 = scmp.ne.s32.totalorder %s16889_s21, %s12728_s11  ;;  %p12733_p3 = scmp.lt.u32.totalorder %s16889_s21, %s16953_s3 }
 0xa1a   : > { %p12734_p2 = scmp.lt.u32.totalorder %s12732_s4, %s12728_s11  ;;  %p12736_p9 = scmp.lt.u32.totalorder %s12728_s11, %s16889_s21 }
 0xa1b   : > { %p12730_p1 = pnand %p12729_p12, %p16972_p13 }
 0xa1c   : > { %p12735_p5 = por %p12734_p2, %p12733_p3 }
 0xa1d   : > { %p12731_p8 = pneg %p12730_p1 }
 0xa1e   : > { %p12737_p0 = por %p12736_p9, %p12735_p5 }
 0xa20   : > { %p12738_p4 = pnand %p12737_p0, %p12731_p8 }
 0xa22   : > { %12741 = shalt.err (!%p12738_p4)
}
 0xa23   : > { %s12824_s22 = smov 512   ;;  %s12825_s16 = smov 32  }
 0xa24   : > { %12559 = dma.vmem_to_hbm [thread:$0]  (%p16972_p13), %s16891_s23, 153600, %s16889_s21, %s9753_s25, %s12824_s22, %s12824_s22, %s12825_s16  }
 0xa25 PF: > { %p12577_p6 = scmp.ge.s32.totalorder %s12816_s19, 2  ;;  %s9784_s15 = sand.u32 1, %s12788_s12  }
 0xa26   : > { %p16973_p7 = scmp.ne.s32.totalorder %s16964_s28, 0  ;;  %s9785_s6 = scalar_lea.sflag [#allocation5], %s9784_s15 }
 0xa28   : > { %p12569_p10 = pnand %p12577_p6, %p16973_p7 }
 0xa2a   : > { %12783 = dma.done.wait (!%p12569_p10), %s9785_s6, 153600  }
 0xa2b   : > { %12785 = vsyncadd (!%p12569_p10), %s9785_s6, 4294813696  ;;  %s18_s19 = sadd.s32 1, %s12816_s19   ;;  %s16974_s20 = sld [smem:[#allocation14_spill]] }
 0xa2c   : > { %p15_p11 = scmp.ge.s32.totalorder %s18_s19, 10   ;;  %s16975_s27 = sld [smem:[#allocation12_spill]] }
 0xa2d   : > { %s16976_s26 = sld [smem:[#allocation13_spill]]  ;;  %s16977_s12 = smov %s12792_s13 }
 0xa2e   : > { %s16978_s13 = smov %s12796_s14  ;;  %s16980_s15 = smov %s12808_s17 }
 0xa2f   : > { %s16981_s16 = smov %s12812_s18  ;;  %17 = sbr.rel (!%p15_p11) target bundleno = 7 (0x7), region = 130 }
 0xa31   : > { %s16979_s14 = smov %s16974_s20 }
 0xa32   : > { %s16982_s17 = smov %s16975_s27 }
 0xa33   : > { %s16983_s18 = smov %s16976_s26 }
 0xa36   :  { %9790 = vsyncpa [#allocation4], 1 }
 0xa37   :  { %9792 = vsyncpa [#allocation4 + $0x1], 1 }
 0xa38   :  { %9793 = vsyncpa [#allocation7], 1 }
 0xa39   :  { %9794 = vsyncpa [#allocation5], 1 }
 0xa3a   :  { %9796 = vsyncpa [#allocation5 + $0x1], 1 }

</bundles_post_ra>
